<compile_context>
chip_gen: v7x
topology: tpu7x:2x2x1
jax: 0.10.0
libtpu: 0.0.40
codegen_flags: <defaults>
</compile_context>

<pallas_src>
import math

import jax
import jax.numpy as jnp
from jax.experimental import pallas as pl
from jax.experimental.pallas import tpu as pltpu

# ---- model hyper-parameters (small, consistent with the module) ----
D_MODEL = 64
HEADS = 8
D_K = D_MODEL // HEADS
P_K = 5                      # positional_number
N_LAYERS = 3
SEQ = 16
BATCH = 2
NTOK = BATCH * SEQ           # packed tokens (batch folded into the rows) = 32
LANES = HEADS * NTOK         # dense attention lane width = 256
REL_W = 64                   # padded width of the relative-position section (>= P_K*HEADS)
FUSE_W = 4 * D_MODEL + REL_W  # fused projection width  = 320
EPS = 1e-6
SQRT_2_OVER_PI = math.sqrt(2.0 / math.pi)
NEG_BIG = -9e9


def _layer_norm(x, gamma, beta):
    mean = jnp.mean(x, axis=-1, keepdims=True)
    var = jnp.mean((x - mean) ** 2, axis=-1, keepdims=True)
    return (x - mean) * jax.lax.rsqrt(var + EPS) * gamma + beta


def _gelu_tanh(x):
    # matches the custom GELU in the PyTorch module
    return 0.5 * x * (1.0 + jnp.tanh(SQRT_2_OVER_PI * (x + 0.044715 * x * x * x)))


# ------------------------------- the kernel ---------------------------------

def fused_kernel(
    # per-call data
    x_ref, onehot_ref, maskb_ref,
    # static tables
    seg_ref, segT_ref, seg5_ref, blk2_ref,
    # stacked per-layer parameters (leading layer axis, static index l)
    ln1_g_ref, ln1_b_ref, wfused_ref, bfused_ref, wv2_ref, bv2_ref, wo_ref, bo_ref,
    ln2_g_ref, ln2_b_ref, w1_ref, b1_ref, w2_ref, b2_ref,
    # outputs
    xout_ref, attn_ref,
):
    x = x_ref[...]                      # (NTOK, D)
    onehot = onehot_ref[...]            # (NTOK, P_K*LANES)
    maskb = maskb_ref[...]              # (NTOK, LANES) additive key/cross-batch mask
    seg = seg_ref[...]                  # (H, LANES)
    segT = segT_ref[...]                # (LANES, H)
    seg5 = seg5_ref[...]                # (REL_W, P_K*LANES)
    blk2 = blk2_ref[...]                # (LANES, 2*D)   block-diag head selector for K|V

    for l in range(N_LAYERS):           # static unroll of the 3 layers
        # ---------------- MultiHeadAttention ----------------
        x_ln = _layer_norm(x, ln1_g_ref[l], ln1_b_ref[l])

        # fused Q | K | V-hidden | Gate | Rel projection: one (32,64)x(64,320) matmul.
        # Q columns are pre-scaled by 1/sqrt(d_k); Rel columns are wq_scaled @ relative_k^T.
        fused = jnp.dot(x_ln, wfused_ref[l],
                        preferred_element_type=jnp.float32) + bfused_ref[l]
        q = fused[:, 0 * D_MODEL:1 * D_MODEL]
        k = fused[:, 1 * D_MODEL:2 * D_MODEL]
        v_hid = jnp.maximum(fused[:, 2 * D_MODEL:3 * D_MODEL], 0.0)
        gate = jax.nn.sigmoid(fused[:, 3 * D_MODEL:4 * D_MODEL])
        attn2 = fused[:, 4 * D_MODEL:4 * D_MODEL + REL_W]     # (NTOK, 64), cols>=40 are zero

        v = jnp.dot(v_hid, wv2_ref[l],
                    preferred_element_type=jnp.float32) + bv2_ref[l]

        # block-diagonal K and V built in one 128-lane-wide tile+mask pass
        kv = jnp.concatenate([k, v], axis=1)                  # (NTOK, 2*D)
        kv_bd = jnp.concatenate([kv] * HEADS, axis=0) * blk2  # (LANES, 2*D)
        k_bd = kv_bd[:, :D_MODEL]                             # (LANES, D)
        v_bd = kv_bd[:, D_MODEL:]                             # (LANES, D)

        # content scores: (NTOK, LANES), lane j = head*NTOK + key  (q already scaled)
        scores = jnp.einsum('qe,je->qj', q, k_bd,
                            preferred_element_type=jnp.float32)

        # relative positional bias: one matmul spreads the 40 per-(p,head) values to
        # all 5*256 lanes, then one lane-dense one-hot select + 5-way sum.
        dense5 = jnp.dot(attn2, seg5,
                         preferred_element_type=jnp.float32)  # (NTOK, P_K*LANES)
        sel = dense5 * onehot
        a = scores + maskb                                     # mask folded in, scale pre-folded
        for p in range(P_K):
            a = a + sel[:, p * LANES:(p + 1) * LANES]

        # softmax per (row, head-segment); the row-global shift is constant within
        # every segment so it is exact
        a = a - jnp.max(a, axis=-1, keepdims=True)
        ea = jnp.exp(a)
        denom = jnp.dot(ea, segT, preferred_element_type=jnp.float32)   # (NTOK, H)
        denom = jnp.maximum(denom, 1e-30)
        probs = ea * jnp.dot(1.0 / denom, seg,
                             preferred_element_type=jnp.float32)
        attn_ref[l] = probs             # lane-dense (NTOK, H*NTOK) store per layer

        # attn @ V (block-diagonal V) lands directly in concatenated-heads layout
        out = jnp.dot(probs, v_bd, preferred_element_type=jnp.float32)  # (NTOK, D)
        m = jnp.dot(out * gate, wo_ref[l],
                    preferred_element_type=jnp.float32) + bo_ref[l]
        # TODO(synk): dropout layers are identity (eval mode).

        # ---------------- FeedForward / residual: x = x + pff(x + m) --------------
        h_in = x + m
        h_ln = _layer_norm(h_in, ln2_g_ref[l], ln2_b_ref[l])
        ff = _gelu_tanh(jnp.dot(h_ln, w1_ref[l],
                                preferred_element_type=jnp.float32) + b1_ref[l])
        ff = jnp.dot(ff, w2_ref[l], preferred_element_type=jnp.float32) + b2_ref[l]
        x = x + ff

    xout_ref[...] = x


# ----------------------------- one-time packing ------------------------------

def _make_wrelT(relk):
    """relk (P_K, D_K) -> (D, P_K*H): wrelT[e, p*H+h] = relk[p, e%D_K] * [e//D_K == h]."""
    e = jnp.arange(D_MODEL)
    col = jnp.arange(P_K * HEADS)
    p_idx = col // HEADS
    h_idx = col % HEADS
    vals = relk[p_idx[None, :], (e % D_K)[:, None]]                       # (D, 40)
    sel = ((e // D_K)[:, None] == h_idx[None, :]).astype(relk.dtype)
    return vals * sel


def _static_tables():
    lane = jnp.arange(LANES)
    head_of_lane = lane // NTOK
    heads = jnp.arange(HEADS)
    # head-segment map and its transpose (for softmax denom / broadcast matmuls)
    seg = (heads[:, None] == head_of_lane[None, :]).astype(jnp.float32)   # (H, LANES)
    segT = jnp.transpose(seg)                                             # (LANES, H)
    # block-diagonal head selector for the concatenated K|V construction
    c = jnp.arange(2 * D_MODEL)
    blk2 = (((c % D_MODEL) // D_K)[None, :] ==
            head_of_lane[:, None]).astype(jnp.float32)                    # (LANES, 2*D)
    # spreading table for the merged relative-position bias matmul
    row5 = jnp.arange(REL_W)
    col5 = jnp.arange(P_K * LANES)
    seg5 = (((row5 // HEADS)[:, None] == (col5 // LANES)[None, :]) &
            ((row5 % HEADS)[:, None] == ((col5 % LANES) // NTOK)[None, :]) &
            (row5[:, None] < P_K * HEADS)).astype(jnp.float32)            # (REL_W, P_K*LANES)
    return dict(seg=seg, segT=segT, blk2=blk2, seg5=seg5)


def prepare_weights(params_list):
    """Pack and stack all per-layer parameters ONCE (hoisted out of the per-call path)."""
    scale = 1.0 / math.sqrt(D_K)
    zeros_b = jnp.zeros((1, D_MODEL), jnp.float32)
    zeros_r = jnp.zeros((1, REL_W), jnp.float32)

    def fused_w(p):
        wq_s = p["wq"] * scale                                   # fold 1/sqrt(d_k) into Q
        rel_cols = jnp.pad(wq_s @ _make_wrelT(p["relk"]),
                           ((0, 0), (0, REL_W - P_K * HEADS)))   # (D, REL_W)
        return jnp.concatenate([wq_s, p["wk"], p["wv1"], p["wg"], rel_cols], axis=1)

    def fused_b(p):
        return jnp.concatenate([zeros_b, zeros_b, p["bv1"], p["bg"], zeros_r], axis=1)

    def stack(f):
        return jnp.stack([f(p) for p in params_list], axis=0)

    packed = dict(
        ln1_g=stack(lambda p: p["ln1_g"]), ln1_b=stack(lambda p: p["ln1_b"]),
        wfused=stack(fused_w), bfused=stack(fused_b),
        wv2=stack(lambda p: p["wv2"]), bv2=stack(lambda p: p["bv2"]),
        wo=stack(lambda p: p["wo"]), bo=stack(lambda p: p["bo"]),
        ln2_g=stack(lambda p: p["ln2_g"]), ln2_b=stack(lambda p: p["ln2_b"]),
        w1=stack(lambda p: p["w1"]), b1=stack(lambda p: p["b1"]),
        w2=stack(lambda p: p["w2"]), b2=stack(lambda p: p["b2"]),
    )
    packed.update(_static_tables())
    return packed


# ------------------------- per-call (rpm/mask) tables -------------------------

def _pack_attention_tables(rpm, mask):
    oh = jax.nn.one_hot(rpm, P_K, dtype=jnp.float32)             # (B, S, S, P)
    tok = jnp.arange(NTOK)
    bq, sq = tok // SEQ, tok % SEQ
    same_batch = bq[:, None] == bq[None, :]                      # (N, N)

    # packed block-diagonal relative-position one-hot, lane layout p*LANES + h*NTOK + j
    oh_qj = oh[bq[:, None], sq[:, None], sq[None, :], :]         # (N, N, P)
    oh_qj = oh_qj * same_batch[..., None]
    oh_pj = jnp.transpose(oh_qj, (0, 2, 1))                      # (N, P, N)
    onehot_lane = jnp.tile(oh_pj[:, :, None, :],
                           (1, 1, HEADS, 1)).reshape(NTOK, P_K * LANES)

    # additive mask: key-validity + cross-batch block mask (packed sequence)
    key_ok = (mask.reshape(NTOK) > 0)[None, :]
    allow = jnp.logical_and(same_batch, key_ok)
    maskb = jnp.where(allow, 0.0, NEG_BIG).astype(jnp.float32)
    maskb_lane = jnp.tile(maskb, (1, HEADS))                     # (N, LANES)
    return onehot_lane, maskb_lane


# ------------------------------- forward pass --------------------------------

_TABLE_NAMES = ["seg", "segT", "seg5", "blk2"]
_WEIGHT_NAMES = ["ln1_g", "ln1_b", "wfused", "bfused", "wv2", "bv2", "wo", "bo",
                 "ln2_g", "ln2_b", "w1", "b1", "w2", "b2"]


@jax.jit
def _forward(x, rpm, mask, packed):
    B, S, D = x.shape
    assert (B, S, D) == (BATCH, SEQ, D_MODEL)

    onehot_lane, maskb_lane = _pack_attention_tables(rpm, mask)

    args = (x.reshape(NTOK, D_MODEL), onehot_lane, maskb_lane) \
        + tuple(packed[n] for n in _TABLE_NAMES) \
        + tuple(packed[n] for n in _WEIGHT_NAMES)

    vmem = pl.BlockSpec(memory_space=pltpu.MemorySpace.VMEM)
    x_out_flat, attn_dense = pl.pallas_call(
        fused_kernel,
        out_shape=(
            jax.ShapeDtypeStruct((NTOK, D_MODEL), jnp.float32),
            jax.ShapeDtypeStruct((N_LAYERS, NTOK, LANES), jnp.float32),
        ),
        in_specs=[vmem] * len(args),
        out_specs=(vmem, vmem),
    )(*args)

    x_out = x_out_flat.reshape(B, S, D)

    # unpack the lane-dense attention maps back to (L, B, H, S, S)
    a = attn_dense.reshape(N_LAYERS, BATCH, SEQ, HEADS, BATCH, SEQ)
    a = jnp.diagonal(a, axis1=1, axis2=4)            # (L, S, H, S, B)
    a = jnp.moveaxis(a, -1, 1)                       # (L, B, S, H, S)
    att = jnp.transpose(a, (0, 1, 3, 2, 4))          # (L, B, H, S, S)
    return x_out, att


def global_reactivity_attention(x, rpm, mask, packed):
    """x: (B, S, D) float32, rpm: (B, S, S) int32 in [0, P_K), mask: (B, S)."""
    x_out, att = _forward(x, rpm, mask, packed)
    att_scores = {n: att[n] for n in range(N_LAYERS)}
    return x_out, att_scores


# ------------------------------- parameters ---------------------------------

def _xavier(key, shape):
    fan_in, fan_out = shape[0], shape[1]
    bound = math.sqrt(6.0 / (fan_in + fan_out))
    return jax.random.uniform(key, shape, jnp.float32, -bound, bound)


def init_params(key):
    params_list = []
    for n in range(N_LAYERS):
        ks = jax.random.split(jax.random.fold_in(key, n), 12)
        b_bound = 1.0 / math.sqrt(D_MODEL)
        p = {
            # attention layer-norm
            "ln1_g": jnp.ones((1, D_MODEL), jnp.float32),
            "ln1_b": jnp.zeros((1, D_MODEL), jnp.float32),
            # projections (stored as (in, out) == W^T); q/k linears have bias=False
            "wq": _xavier(ks[0], (D_MODEL, D_MODEL)),
            "wk": _xavier(ks[1], (D_MODEL, D_MODEL)),
            "wv1": _xavier(ks[2], (D_MODEL, D_MODEL)),
            "bv1": jax.random.uniform(ks[3], (1, D_MODEL), jnp.float32, -b_bound, b_bound),
            "wv2": _xavier(ks[4], (D_MODEL, D_MODEL)),
            "bv2": jax.random.uniform(ks[5], (1, D_MODEL), jnp.float32, -b_bound, b_bound),
            # gating: weight = 0, bias = 1 (per reset_parameters)
            "wg": jnp.zeros((D_MODEL, D_MODEL), jnp.float32),
            "bg": jnp.ones((1, D_MODEL), jnp.float32),
            "wo": _xavier(ks[6], (D_MODEL, D_MODEL)),
            "bo": jax.random.uniform(ks[7], (1, D_MODEL), jnp.float32, -b_bound, b_bound),
            # relative positional keys
            "relk": _xavier(ks[8], (P_K, D_K)),
            # feed-forward
            "ln2_g": jnp.ones((1, D_MODEL), jnp.float32),
            "ln2_b": jnp.zeros((1, D_MODEL), jnp.float32),
            "w1": _xavier(ks[9], (D_MODEL, 2 * D_MODEL)),
            "b1": jax.random.uniform(ks[10], (1, 2 * D_MODEL), jnp.float32, -b_bound, b_bound),
            "w2": _xavier(ks[11], (2 * D_MODEL, D_MODEL)),
            "b2": jnp.zeros((1, D_MODEL), jnp.float32),
        }
        params_list.append(p)
    return params_list


if __name__ == "__main__":
    key = jax.random.PRNGKey(0)
    kx, krpm, kparam = jax.random.split(key, 3)

    x = jax.random.normal(kx, (BATCH, SEQ, D_MODEL), jnp.float32)
    rpm = jax.random.randint(krpm, (BATCH, SEQ, SEQ), 0, P_K, jnp.int32)
    mask = jnp.ones((BATCH, SEQ), jnp.int32).at[1, SEQ - 3:].set(0)

    params_list = init_params(kparam)
    packed = prepare_weights(params_list)          # hoisted: packed exactly once

    x_out, att_scores = global_reactivity_attention(x, rpm, mask, packed)
    x_out = jax.block_until_ready(x_out)
    for n in range(N_LAYERS):
        jax.block_until_ready(att_scores[n])

    assert x_out.shape == (BATCH, SEQ, D_MODEL)
    assert att_scores[0].shape == (BATCH, HEADS, SEQ, SEQ)
    assert bool(jnp.all(jnp.isfinite(x_out)))
    assert bool(jnp.all(jnp.isfinite(att_scores[0])))
    print("KERNEL_OK")
</pallas_src>

<mosaic_0001>
module attributes {stable_mosaic.version = 11 : i64} {
  func.func @fused_kernel(%arg0: memref<32x64xf32, #tpu.memory_space<vmem>>, %arg1: memref<32x1280xf32, #tpu.memory_space<vmem>>, %arg2: memref<32x256xf32, #tpu.memory_space<vmem>>, %arg3: memref<8x256xf32, #tpu.memory_space<vmem>>, %arg4: memref<256x8xf32, #tpu.memory_space<vmem>>, %arg5: memref<64x1280xf32, #tpu.memory_space<vmem>>, %arg6: memref<256x128xf32, #tpu.memory_space<vmem>>, %arg7: memref<3x1x64xf32, #tpu.memory_space<vmem>>, %arg8: memref<3x1x64xf32, #tpu.memory_space<vmem>>, %arg9: memref<3x64x320xf32, #tpu.memory_space<vmem>>, %arg10: memref<3x1x320xf32, #tpu.memory_space<vmem>>, %arg11: memref<3x64x64xf32, #tpu.memory_space<vmem>>, %arg12: memref<3x1x64xf32, #tpu.memory_space<vmem>>, %arg13: memref<3x64x64xf32, #tpu.memory_space<vmem>>, %arg14: memref<3x1x64xf32, #tpu.memory_space<vmem>>, %arg15: memref<3x1x64xf32, #tpu.memory_space<vmem>>, %arg16: memref<3x1x64xf32, #tpu.memory_space<vmem>>, %arg17: memref<3x64x128xf32, #tpu.memory_space<vmem>>, %arg18: memref<3x1x128xf32, #tpu.memory_space<vmem>>, %arg19: memref<3x128x64xf32, #tpu.memory_space<vmem>>, %arg20: memref<3x1x64xf32, #tpu.memory_space<vmem>>, %arg21: memref<32x64xf32, #tpu.memory_space<vmem>>, %arg22: memref<3x32x256xf32, #tpu.memory_space<vmem>>) attributes {dimension_semantics = [], scalar_prefetch = 0 : i64, scratch_operands = 0 : i64, tpu.core_type = #tpu.core_type<tc>} {
    %c0 = arith.constant 0 : index
    %c0_0 = arith.constant 0 : index
    %0 = vector.load %arg0[%c0, %c0_0] : memref<32x64xf32, #tpu.memory_space<vmem>>, vector<32x64xf32>
    %c0_1 = arith.constant 0 : index
    %c0_2 = arith.constant 0 : index
    %1 = vector.load %arg1[%c0_1, %c0_2] : memref<32x1280xf32, #tpu.memory_space<vmem>>, vector<32x1280xf32>
    %c0_3 = arith.constant 0 : index
    %c0_4 = arith.constant 0 : index
    %2 = vector.load %arg2[%c0_3, %c0_4] : memref<32x256xf32, #tpu.memory_space<vmem>>, vector<32x256xf32>
    %c0_5 = arith.constant 0 : index
    %c0_6 = arith.constant 0 : index
    %3 = vector.load %arg3[%c0_5, %c0_6] : memref<8x256xf32, #tpu.memory_space<vmem>>, vector<8x256xf32>
    %c0_7 = arith.constant 0 : index
    %c0_8 = arith.constant 0 : index
    %4 = vector.load %arg4[%c0_7, %c0_8] : memref<256x8xf32, #tpu.memory_space<vmem>>, vector<256x8xf32>
    %c0_9 = arith.constant 0 : index
    %c0_10 = arith.constant 0 : index
    %5 = vector.load %arg5[%c0_9, %c0_10] : memref<64x1280xf32, #tpu.memory_space<vmem>>, vector<64x1280xf32>
    %c0_11 = arith.constant 0 : index
    %c0_12 = arith.constant 0 : index
    %6 = vector.load %arg6[%c0_11, %c0_12] : memref<256x128xf32, #tpu.memory_space<vmem>>, vector<256x128xf32>
    %c0_13 = arith.constant 0 : index
    %c0_14 = arith.constant 0 : index
    %c0_15 = arith.constant 0 : index
    %7 = vector.load %arg7[%c0_13, %c0_14, %c0_15] : memref<3x1x64xf32, #tpu.memory_space<vmem>>, vector<1x1x64xf32>
    %8 = vector.shape_cast %7 : vector<1x1x64xf32> to vector<1x64xf32>
    %c0_16 = arith.constant 0 : index
    %c0_17 = arith.constant 0 : index
    %c0_18 = arith.constant 0 : index
    %9 = vector.load %arg8[%c0_16, %c0_17, %c0_18] : memref<3x1x64xf32, #tpu.memory_space<vmem>>, vector<1x1x64xf32>
    %10 = vector.shape_cast %9 : vector<1x1x64xf32> to vector<1x64xf32>
    %cst = arith.constant dense<0.000000e+00> : vector<32xf32>
    %11 = vector.multi_reduction <add>, %0, %cst [1] : vector<32x64xf32> to vector<32xf32>
    %12 = vector.shape_cast %11 : vector<32xf32> to vector<32x1xf32>
    %cst_19 = arith.constant 6.400000e+01 : f32
    %13 = vector.broadcast %cst_19 : f32 to vector<32x1xf32>
    %14 = arith.divf %12, %13 : vector<32x1xf32>
    %15 = vector.broadcast %14 : vector<32x1xf32> to vector<32x64xf32>
    %16 = arith.subf %0, %15 : vector<32x64xf32>
    %17 = arith.mulf %16, %16 : vector<32x64xf32>
    %cst_20 = arith.constant dense<0.000000e+00> : vector<32xf32>
    %18 = vector.multi_reduction <add>, %17, %cst_20 [1] : vector<32x64xf32> to vector<32xf32>
    %19 = vector.shape_cast %18 : vector<32xf32> to vector<32x1xf32>
    %cst_21 = arith.constant 6.400000e+01 : f32
    %20 = vector.broadcast %cst_21 : f32 to vector<32x1xf32>
    %21 = arith.divf %19, %20 : vector<32x1xf32>
    %22 = vector.broadcast %14 : vector<32x1xf32> to vector<32x64xf32>
    %23 = arith.subf %0, %22 : vector<32x64xf32>
    %cst_22 = arith.constant 9.99999997E-7 : f32
    %24 = vector.broadcast %cst_22 : f32 to vector<32x1xf32>
    %25 = arith.addf %21, %24 : vector<32x1xf32>
    %26 = math.rsqrt %25 : vector<32x1xf32>
    %27 = vector.broadcast %26 : vector<32x1xf32> to vector<32x64xf32>
    %28 = arith.mulf %23, %27 : vector<32x64xf32>
    %29 = vector.broadcast %8 : vector<1x64xf32> to vector<32x64xf32>
    %30 = arith.mulf %28, %29 : vector<32x64xf32>
    %31 = vector.broadcast %10 : vector<1x64xf32> to vector<32x64xf32>
    %32 = arith.addf %30, %31 : vector<32x64xf32>
    %c0_23 = arith.constant 0 : index
    %c0_24 = arith.constant 0 : index
    %c0_25 = arith.constant 0 : index
    %33 = vector.load %arg9[%c0_23, %c0_24, %c0_25] : memref<3x64x320xf32, #tpu.memory_space<vmem>>, vector<1x64x320xf32>
    %34 = vector.shape_cast %33 : vector<1x64x320xf32> to vector<64x320xf32>
    %cst_26 = arith.constant dense<0.000000e+00> : vector<32x320xf32>
    %35 = tpu.matmul %32, %34, %cst_26 {dimension_numbers = #tpu.dot_dimension_numbers<[1], [0], [0], [1], [0, 0, 1, 1], [], []>} : vector<32x64xf32>, vector<64x320xf32>, vector<32x320xf32> -> vector<32x320xf32>
    %c0_27 = arith.constant 0 : index
    %c0_28 = arith.constant 0 : index
    %c0_29 = arith.constant 0 : index
    %36 = vector.load %arg10[%c0_27, %c0_28, %c0_29] : memref<3x1x320xf32, #tpu.memory_space<vmem>>, vector<1x1x320xf32>
    %37 = vector.shape_cast %36 : vector<1x1x320xf32> to vector<1x320xf32>
    %38 = vector.broadcast %37 : vector<1x320xf32> to vector<32x320xf32>
    %39 = arith.addf %35, %38 : vector<32x320xf32>
    %40 = vector.extract_strided_slice %39 {offsets = [0, 0], sizes = [32, 64], strides = [1, 1]} : vector<32x320xf32> to vector<32x64xf32>
    %41 = vector.extract_strided_slice %39 {offsets = [0, 64], sizes = [32, 64], strides = [1, 1]} : vector<32x320xf32> to vector<32x64xf32>
    %42 = vector.extract_strided_slice %39 {offsets = [0, 128], sizes = [32, 64], strides = [1, 1]} : vector<32x320xf32> to vector<32x64xf32>
    %cst_30 = arith.constant 0.000000e+00 : f32
    %43 = vector.broadcast %cst_30 : f32 to vector<32x64xf32>
    %44 = arith.maximumf %42, %43 : vector<32x64xf32>
    %45 = vector.extract_strided_slice %39 {offsets = [0, 192], sizes = [32, 64], strides = [1, 1]} : vector<32x320xf32> to vector<32x64xf32>
    %46 = arith.negf %45 : vector<32x64xf32>
    %47 = math.exp %46 : vector<32x64xf32>
    %cst_31 = arith.constant 1.000000e+00 : f32
    %48 = vector.broadcast %cst_31 : f32 to vector<32x64xf32>
    %49 = arith.addf %48, %47 : vector<32x64xf32>
    %50 = arith.divf %48, %49 : vector<32x64xf32>
    %51 = vector.extract_strided_slice %39 {offsets = [0, 256], sizes = [32, 64], strides = [1, 1]} : vector<32x320xf32> to vector<32x64xf32>
    %c0_32 = arith.constant 0 : index
    %c0_33 = arith.constant 0 : index
    %c0_34 = arith.constant 0 : index
    %52 = vector.load %arg11[%c0_32, %c0_33, %c0_34] : memref<3x64x64xf32, #tpu.memory_space<vmem>>, vector<1x64x64xf32>
    %53 = vector.shape_cast %52 : vector<1x64x64xf32> to vector<64x64xf32>
    %cst_35 = arith.constant dense<0.000000e+00> : vector<32x64xf32>
    %54 = tpu.matmul %44, %53, %cst_35 {dimension_numbers = #tpu.dot_dimension_numbers<[1], [0], [0], [1], [0, 0, 1, 1], [], []>} : vector<32x64xf32>, vector<64x64xf32>, vector<32x64xf32> -> vector<32x64xf32>
    %c0_36 = arith.constant 0 : index
    %c0_37 = arith.constant 0 : index
    %c0_38 = arith.constant 0 : index
    %55 = vector.load %arg12[%c0_36, %c0_37, %c0_38] : memref<3x1x64xf32, #tpu.memory_space<vmem>>, vector<1x1x64xf32>
    %56 = vector.shape_cast %55 : vector<1x1x64xf32> to vector<1x64xf32>
    %57 = vector.broadcast %56 : vector<1x64xf32> to vector<32x64xf32>
    %58 = arith.addf %54, %57 : vector<32x64xf32>
    %59 = tpu.concatenate %41, %58 in 1 : vector<32x64xf32>, vector<32x64xf32> -> vector<32x128xf32>
    %60 = tpu.concatenate %59, %59, %59, %59, %59, %59, %59, %59 in 0 : vector<32x128xf32>, vector<32x128xf32>, vector<32x128xf32>, vector<32x128xf32>, vector<32x128xf32>, vector<32x128xf32>, vector<32x128xf32>, vector<32x128xf32> -> vector<256x128xf32>
    %61 = arith.mulf %60, %6 : vector<256x128xf32>
    %62 = vector.extract_strided_slice %61 {offsets = [0, 0], sizes = [256, 64], strides = [1, 1]} : vector<256x128xf32> to vector<256x64xf32>
    %63 = vector.extract_strided_slice %61 {offsets = [0, 64], sizes = [256, 64], strides = [1, 1]} : vector<256x128xf32> to vector<256x64xf32>
    "tpu.trace_start"() <{level = 10 : i32, message = "qe,je->qj"}> : () -> ()
    %cst_39 = arith.constant dense<0.000000e+00> : vector<32x256xf32>
    %64 = tpu.matmul %40, %62, %cst_39 {dimension_numbers = #tpu.dot_dimension_numbers<[1], [1], [0], [0], [0, 0, 1, 0], [], []>} : vector<32x64xf32>, vector<256x64xf32>, vector<32x256xf32> -> vector<32x256xf32>
    "tpu.trace_stop"() : () -> ()
    %cst_40 = arith.constant dense<0.000000e+00> : vector<32x1280xf32>
    %65 = tpu.matmul %51, %5, %cst_40 {dimension_numbers = #tpu.dot_dimension_numbers<[1], [0], [0], [1], [0, 0, 1, 1], [], []>} : vector<32x64xf32>, vector<64x1280xf32>, vector<32x1280xf32> -> vector<32x1280xf32>
    %66 = arith.mulf %65, %1 : vector<32x1280xf32>
    %67 = arith.addf %64, %2 : vector<32x256xf32>
    %68 = vector.extract_strided_slice %66 {offsets = [0, 0], sizes = [32, 256], strides = [1, 1]} : vector<32x1280xf32> to vector<32x256xf32>
    %69 = arith.addf %67, %68 : vector<32x256xf32>
    %70 = vector.extract_strided_slice %66 {offsets = [0, 256], sizes = [32, 256], strides = [1, 1]} : vector<32x1280xf32> to vector<32x256xf32>
    %71 = arith.addf %69, %70 : vector<32x256xf32>
    %72 = vector.extract_strided_slice %66 {offsets = [0, 512], sizes = [32, 256], strides = [1, 1]} : vector<32x1280xf32> to vector<32x256xf32>
    %73 = arith.addf %71, %72 : vector<32x256xf32>
    %74 = vector.extract_strided_slice %66 {offsets = [0, 768], sizes = [32, 256], strides = [1, 1]} : vector<32x1280xf32> to vector<32x256xf32>
    %75 = arith.addf %73, %74 : vector<32x256xf32>
    %76 = vector.extract_strided_slice %66 {offsets = [0, 1024], sizes = [32, 256], strides = [1, 1]} : vector<32x1280xf32> to vector<32x256xf32>
    %77 = arith.addf %75, %76 : vector<32x256xf32>
    %cst_41 = arith.constant dense<0xFF800000> : vector<32xf32>
    %78 = vector.multi_reduction <maximumf>, %77, %cst_41 [1] : vector<32x256xf32> to vector<32xf32>
    %79 = vector.shape_cast %78 : vector<32xf32> to vector<32x1xf32>
    %80 = vector.broadcast %79 : vector<32x1xf32> to vector<32x256xf32>
    %81 = arith.subf %77, %80 : vector<32x256xf32>
    %82 = math.exp %81 : vector<32x256xf32>
    %cst_42 = arith.constant dense<0.000000e+00> : vector<32x8xf32>
    %83 = tpu.matmul %82, %4, %cst_42 {dimension_numbers = #tpu.dot_dimension_numbers<[1], [0], [0], [1], [0, 0, 1, 1], [], []>} : vector<32x256xf32>, vector<256x8xf32>, vector<32x8xf32> -> vector<32x8xf32>
    %cst_43 = arith.constant 1.000000e-30 : f32
    %84 = vector.broadcast %cst_43 : f32 to vector<32x8xf32>
    %85 = arith.maximumf %83, %84 : vector<32x8xf32>
    %cst_44 = arith.constant 1.000000e+00 : f32
    %86 = vector.broadcast %cst_44 : f32 to vector<32x8xf32>
    %87 = arith.divf %86, %85 : vector<32x8xf32>
    %cst_45 = arith.constant dense<0.000000e+00> : vector<32x256xf32>
    %88 = tpu.matmul %87, %3, %cst_45 {dimension_numbers = #tpu.dot_dimension_numbers<[1], [0], [0], [1], [0, 0, 1, 1], [], []>} : vector<32x8xf32>, vector<8x256xf32>, vector<32x256xf32> -> vector<32x256xf32>
    %89 = arith.mulf %82, %88 : vector<32x256xf32>
    %c0_46 = arith.constant 0 : index
    %c0_47 = arith.constant 0 : index
    %c0_48 = arith.constant 0 : index
    %90 = vector.load %arg22[%c0_46, %c0_47, %c0_48] : memref<3x32x256xf32, #tpu.memory_space<vmem>>, vector<1x32x256xf32>
    %91 = vector.shape_cast %90 : vector<1x32x256xf32> to vector<32x256xf32>
    %92 = vector.shape_cast %89 : vector<32x256xf32> to vector<1x32x256xf32>
    tpu.vector_store %arg22[%c0_46, %c0_47, %c0_48], %92 {strides = array<i32>} : memref<3x32x256xf32, #tpu.memory_space<vmem>>, vector<1x32x256xf32>,
    %cst_49 = arith.constant dense<0.000000e+00> : vector<32x64xf32>
    %93 = tpu.matmul %89, %63, %cst_49 {dimension_numbers = #tpu.dot_dimension_numbers<[1], [0], [0], [1], [0, 0, 1, 1], [], []>} : vector<32x256xf32>, vector<256x64xf32>, vector<32x64xf32> -> vector<32x64xf32>
    %94 = arith.mulf %93, %50 : vector<32x64xf32>
    %c0_50 = arith.constant 0 : index
    %c0_51 = arith.constant 0 : index
    %c0_52 = arith.constant 0 : index
    %95 = vector.load %arg13[%c0_50, %c0_51, %c0_52] : memref<3x64x64xf32, #tpu.memory_space<vmem>>, vector<1x64x64xf32>
    %96 = vector.shape_cast %95 : vector<1x64x64xf32> to vector<64x64xf32>
    %cst_53 = arith.constant dense<0.000000e+00> : vector<32x64xf32>
    %97 = tpu.matmul %94, %96, %cst_53 {dimension_numbers = #tpu.dot_dimension_numbers<[1], [0], [0], [1], [0, 0, 1, 1], [], []>} : vector<32x64xf32>, vector<64x64xf32>, vector<32x64xf32> -> vector<32x64xf32>
    %c0_54 = arith.constant 0 : index
    %c0_55 = arith.constant 0 : index
    %c0_56 = arith.constant 0 : index
    %98 = vector.load %arg14[%c0_54, %c0_55, %c0_56] : memref<3x1x64xf32, #tpu.memory_space<vmem>>, vector<1x1x64xf32>
    %99 = vector.shape_cast %98 : vector<1x1x64xf32> to vector<1x64xf32>
    %100 = vector.broadcast %99 : vector<1x64xf32> to vector<32x64xf32>
    %101 = arith.addf %97, %100 : vector<32x64xf32>
    %102 = arith.addf %0, %101 : vector<32x64xf32>
    %c0_57 = arith.constant 0 : index
    %c0_58 = arith.constant 0 : index
    %c0_59 = arith.constant 0 : index
    %103 = vector.load %arg15[%c0_57, %c0_58, %c0_59] : memref<3x1x64xf32, #tpu.memory_space<vmem>>, vector<1x1x64xf32>
    %104 = vector.shape_cast %103 : vector<1x1x64xf32> to vector<1x64xf32>
    %c0_60 = arith.constant 0 : index
    %c0_61 = arith.constant 0 : index
    %c0_62 = arith.constant 0 : index
    %105 = vector.load %arg16[%c0_60, %c0_61, %c0_62] : memref<3x1x64xf32, #tpu.memory_space<vmem>>, vector<1x1x64xf32>
    %106 = vector.shape_cast %105 : vector<1x1x64xf32> to vector<1x64xf32>
    %cst_63 = arith.constant dense<0.000000e+00> : vector<32xf32>
    %107 = vector.multi_reduction <add>, %102, %cst_63 [1] : vector<32x64xf32> to vector<32xf32>
    %108 = vector.shape_cast %107 : vector<32xf32> to vector<32x1xf32>
    %cst_64 = arith.constant 6.400000e+01 : f32
    %109 = vector.broadcast %cst_64 : f32 to vector<32x1xf32>
    %110 = arith.divf %108, %109 : vector<32x1xf32>
    %111 = vector.broadcast %110 : vector<32x1xf32> to vector<32x64xf32>
    %112 = arith.subf %102, %111 : vector<32x64xf32>
    %113 = arith.mulf %112, %112 : vector<32x64xf32>
    %cst_65 = arith.constant dense<0.000000e+00> : vector<32xf32>
    %114 = vector.multi_reduction <add>, %113, %cst_65 [1] : vector<32x64xf32> to vector<32xf32>
    %115 = vector.shape_cast %114 : vector<32xf32> to vector<32x1xf32>
    %cst_66 = arith.constant 6.400000e+01 : f32
    %116 = vector.broadcast %cst_66 : f32 to vector<32x1xf32>
    %117 = arith.divf %115, %116 : vector<32x1xf32>
    %118 = vector.broadcast %110 : vector<32x1xf32> to vector<32x64xf32>
    %119 = arith.subf %102, %118 : vector<32x64xf32>
    %cst_67 = arith.constant 9.99999997E-7 : f32
    %120 = vector.broadcast %cst_67 : f32 to vector<32x1xf32>
    %121 = arith.addf %117, %120 : vector<32x1xf32>
    %122 = math.rsqrt %121 : vector<32x1xf32>
    %123 = vector.broadcast %122 : vector<32x1xf32> to vector<32x64xf32>
    %124 = arith.mulf %119, %123 : vector<32x64xf32>
    %125 = vector.broadcast %104 : vector<1x64xf32> to vector<32x64xf32>
    %126 = arith.mulf %124, %125 : vector<32x64xf32>
    %127 = vector.broadcast %106 : vector<1x64xf32> to vector<32x64xf32>
    %128 = arith.addf %126, %127 : vector<32x64xf32>
    %c0_68 = arith.constant 0 : index
    %c0_69 = arith.constant 0 : index
    %c0_70 = arith.constant 0 : index
    %129 = vector.load %arg17[%c0_68, %c0_69, %c0_70] : memref<3x64x128xf32, #tpu.memory_space<vmem>>, vector<1x64x128xf32>
    %130 = vector.shape_cast %129 : vector<1x64x128xf32> to vector<64x128xf32>
    %cst_71 = arith.constant dense<0.000000e+00> : vector<32x128xf32>
    %131 = tpu.matmul %128, %130, %cst_71 {dimension_numbers = #tpu.dot_dimension_numbers<[1], [0], [0], [1], [0, 0, 1, 1], [], []>} : vector<32x64xf32>, vector<64x128xf32>, vector<32x128xf32> -> vector<32x128xf32>
    %c0_72 = arith.constant 0 : index
    %c0_73 = arith.constant 0 : index
    %c0_74 = arith.constant 0 : index
    %132 = vector.load %arg18[%c0_72, %c0_73, %c0_74] : memref<3x1x128xf32, #tpu.memory_space<vmem>>, vector<1x1x128xf32>
    %133 = vector.shape_cast %132 : vector<1x1x128xf32> to vector<1x128xf32>
    %134 = vector.broadcast %133 : vector<1x128xf32> to vector<32x128xf32>
    %135 = arith.addf %131, %134 : vector<32x128xf32>
    %cst_75 = arith.constant 5.000000e-01 : f32
    %136 = vector.broadcast %cst_75 : f32 to vector<32x128xf32>
    %137 = arith.mulf %136, %135 : vector<32x128xf32>
    %cst_76 = arith.constant 4.471500e-02 : f32
    %138 = vector.broadcast %cst_76 : f32 to vector<32x128xf32>
    %139 = arith.mulf %138, %135 : vector<32x128xf32>
    %140 = arith.mulf %139, %135 : vector<32x128xf32>
    %141 = arith.mulf %140, %135 : vector<32x128xf32>
    %142 = arith.addf %135, %141 : vector<32x128xf32>
    %cst_77 = arith.constant 0.797884583 : f32
    %143 = vector.broadcast %cst_77 : f32 to vector<32x128xf32>
    %144 = arith.mulf %143, %142 : vector<32x128xf32>
    %145 = math.tanh %144 : vector<32x128xf32>
    %cst_78 = arith.constant 1.000000e+00 : f32
    %146 = vector.broadcast %cst_78 : f32 to vector<32x128xf32>
    %147 = arith.addf %146, %145 : vector<32x128xf32>
    %148 = arith.mulf %137, %147 : vector<32x128xf32>
    %c0_79 = arith.constant 0 : index
    %c0_80 = arith.constant 0 : index
    %c0_81 = arith.constant 0 : index
    %149 = vector.load %arg19[%c0_79, %c0_80, %c0_81] : memref<3x128x64xf32, #tpu.memory_space<vmem>>, vector<1x128x64xf32>
    %150 = vector.shape_cast %149 : vector<1x128x64xf32> to vector<128x64xf32>
    %cst_82 = arith.constant dense<0.000000e+00> : vector<32x64xf32>
    %151 = tpu.matmul %148, %150, %cst_82 {dimension_numbers = #tpu.dot_dimension_numbers<[1], [0], [0], [1], [0, 0, 1, 1], [], []>} : vector<32x128xf32>, vector<128x64xf32>, vector<32x64xf32> -> vector<32x64xf32>
    %c0_83 = arith.constant 0 : index
    %c0_84 = arith.constant 0 : index
    %c0_85 = arith.constant 0 : index
    %152 = vector.load %arg20[%c0_83, %c0_84, %c0_85] : memref<3x1x64xf32, #tpu.memory_space<vmem>>, vector<1x1x64xf32>
    %153 = vector.shape_cast %152 : vector<1x1x64xf32> to vector<1x64xf32>
    %154 = vector.broadcast %153 : vector<1x64xf32> to vector<32x64xf32>
    %155 = arith.addf %151, %154 : vector<32x64xf32>
    %156 = arith.addf %0, %155 : vector<32x64xf32>
    %c1 = arith.constant 1 : index
    %c0_86 = arith.constant 0 : index
    %c0_87 = arith.constant 0 : index
    %157 = vector.load %arg7[%c1, %c0_86, %c0_87] : memref<3x1x64xf32, #tpu.memory_space<vmem>>, vector<1x1x64xf32>
    %158 = vector.shape_cast %157 : vector<1x1x64xf32> to vector<1x64xf32>
    %c1_88 = arith.constant 1 : index
    %c0_89 = arith.constant 0 : index
    %c0_90 = arith.constant 0 : index
    %159 = vector.load %arg8[%c1_88, %c0_89, %c0_90] : memref<3x1x64xf32, #tpu.memory_space<vmem>>, vector<1x1x64xf32>
    %160 = vector.shape_cast %159 : vector<1x1x64xf32> to vector<1x64xf32>
    %cst_91 = arith.constant dense<0.000000e+00> : vector<32xf32>
    %161 = vector.multi_reduction <add>, %156, %cst_91 [1] : vector<32x64xf32> to vector<32xf32>
    %162 = vector.shape_cast %161 : vector<32xf32> to vector<32x1xf32>
    %cst_92 = arith.constant 6.400000e+01 : f32
    %163 = vector.broadcast %cst_92 : f32 to vector<32x1xf32>
    %164 = arith.divf %162, %163 : vector<32x1xf32>
    %165 = vector.broadcast %164 : vector<32x1xf32> to vector<32x64xf32>
    %166 = arith.subf %156, %165 : vector<32x64xf32>
    %167 = arith.mulf %166, %166 : vector<32x64xf32>
    %cst_93 = arith.constant dense<0.000000e+00> : vector<32xf32>
    %168 = vector.multi_reduction <add>, %167, %cst_93 [1] : vector<32x64xf32> to vector<32xf32>
    %169 = vector.shape_cast %168 : vector<32xf32> to vector<32x1xf32>
    %cst_94 = arith.constant 6.400000e+01 : f32
    %170 = vector.broadcast %cst_94 : f32 to vector<32x1xf32>
    %171 = arith.divf %169, %170 : vector<32x1xf32>
    %172 = vector.broadcast %164 : vector<32x1xf32> to vector<32x64xf32>
    %173 = arith.subf %156, %172 : vector<32x64xf32>
    %cst_95 = arith.constant 9.99999997E-7 : f32
    %174 = vector.broadcast %cst_95 : f32 to vector<32x1xf32>
    %175 = arith.addf %171, %174 : vector<32x1xf32>
    %176 = math.rsqrt %175 : vector<32x1xf32>
    %177 = vector.broadcast %176 : vector<32x1xf32> to vector<32x64xf32>
    %178 = arith.mulf %173, %177 : vector<32x64xf32>
    %179 = vector.broadcast %158 : vector<1x64xf32> to vector<32x64xf32>
    %180 = arith.mulf %178, %179 : vector<32x64xf32>
    %181 = vector.broadcast %160 : vector<1x64xf32> to vector<32x64xf32>
    %182 = arith.addf %180, %181 : vector<32x64xf32>
    %c1_96 = arith.constant 1 : index
    %c0_97 = arith.constant 0 : index
    %c0_98 = arith.constant 0 : index
    %183 = vector.load %arg9[%c1_96, %c0_97, %c0_98] : memref<3x64x320xf32, #tpu.memory_space<vmem>>, vector<1x64x320xf32>
    %184 = vector.shape_cast %183 : vector<1x64x320xf32> to vector<64x320xf32>
    %cst_99 = arith.constant dense<0.000000e+00> : vector<32x320xf32>
    %185 = tpu.matmul %182, %184, %cst_99 {dimension_numbers = #tpu.dot_dimension_numbers<[1], [0], [0], [1], [0, 0, 1, 1], [], []>} : vector<32x64xf32>, vector<64x320xf32>, vector<32x320xf32> -> vector<32x320xf32>
    %c1_100 = arith.constant 1 : index
    %c0_101 = arith.constant 0 : index
    %c0_102 = arith.constant 0 : index
    %186 = vector.load %arg10[%c1_100, %c0_101, %c0_102] : memref<3x1x320xf32, #tpu.memory_space<vmem>>, vector<1x1x320xf32>
    %187 = vector.shape_cast %186 : vector<1x1x320xf32> to vector<1x320xf32>
    %188 = vector.broadcast %187 : vector<1x320xf32> to vector<32x320xf32>
    %189 = arith.addf %185, %188 : vector<32x320xf32>
    %190 = vector.extract_strided_slice %189 {offsets = [0, 0], sizes = [32, 64], strides = [1, 1]} : vector<32x320xf32> to vector<32x64xf32>
    %191 = vector.extract_strided_slice %189 {offsets = [0, 64], sizes = [32, 64], strides = [1, 1]} : vector<32x320xf32> to vector<32x64xf32>
    %192 = vector.extract_strided_slice %189 {offsets = [0, 128], sizes = [32, 64], strides = [1, 1]} : vector<32x320xf32> to vector<32x64xf32>
    %cst_103 = arith.constant 0.000000e+00 : f32
    %193 = vector.broadcast %cst_103 : f32 to vector<32x64xf32>
    %194 = arith.maximumf %192, %193 : vector<32x64xf32>
    %195 = vector.extract_strided_slice %189 {offsets = [0, 192], sizes = [32, 64], strides = [1, 1]} : vector<32x320xf32> to vector<32x64xf32>
    %196 = arith.negf %195 : vector<32x64xf32>
    %197 = math.exp %196 : vector<32x64xf32>
    %cst_104 = arith.constant 1.000000e+00 : f32
    %198 = vector.broadcast %cst_104 : f32 to vector<32x64xf32>
    %199 = arith.addf %198, %197 : vector<32x64xf32>
    %200 = arith.divf %198, %199 : vector<32x64xf32>
    %201 = vector.extract_strided_slice %189 {offsets = [0, 256], sizes = [32, 64], strides = [1, 1]} : vector<32x320xf32> to vector<32x64xf32>
    %c1_105 = arith.constant 1 : index
    %c0_106 = arith.constant 0 : index
    %c0_107 = arith.constant 0 : index
    %202 = vector.load %arg11[%c1_105, %c0_106, %c0_107] : memref<3x64x64xf32, #tpu.memory_space<vmem>>, vector<1x64x64xf32>
    %203 = vector.shape_cast %202 : vector<1x64x64xf32> to vector<64x64xf32>
    %cst_108 = arith.constant dense<0.000000e+00> : vector<32x64xf32>
    %204 = tpu.matmul %194, %203, %cst_108 {dimension_numbers = #tpu.dot_dimension_numbers<[1], [0], [0], [1], [0, 0, 1, 1], [], []>} : vector<32x64xf32>, vector<64x64xf32>, vector<32x64xf32> -> vector<32x64xf32>
    %c1_109 = arith.constant 1 : index
    %c0_110 = arith.constant 0 : index
    %c0_111 = arith.constant 0 : index
    %205 = vector.load %arg12[%c1_109, %c0_110, %c0_111] : memref<3x1x64xf32, #tpu.memory_space<vmem>>, vector<1x1x64xf32>
    %206 = vector.shape_cast %205 : vector<1x1x64xf32> to vector<1x64xf32>
    %207 = vector.broadcast %206 : vector<1x64xf32> to vector<32x64xf32>
    %208 = arith.addf %204, %207 : vector<32x64xf32>
    %209 = tpu.concatenate %191, %208 in 1 : vector<32x64xf32>, vector<32x64xf32> -> vector<32x128xf32>
    %210 = tpu.concatenate %209, %209, %209, %209, %209, %209, %209, %209 in 0 : vector<32x128xf32>, vector<32x128xf32>, vector<32x128xf32>, vector<32x128xf32>, vector<32x128xf32>, vector<32x128xf32>, vector<32x128xf32>, vector<32x128xf32> -> vector<256x128xf32>
    %211 = arith.mulf %210, %6 : vector<256x128xf32>
    %212 = vector.extract_strided_slice %211 {offsets = [0, 0], sizes = [256, 64], strides = [1, 1]} : vector<256x128xf32> to vector<256x64xf32>
    %213 = vector.extract_strided_slice %211 {offsets = [0, 64], sizes = [256, 64], strides = [1, 1]} : vector<256x128xf32> to vector<256x64xf32>
    "tpu.trace_start"() <{level = 10 : i32, message = "qe,je->qj"}> : () -> ()
    %cst_112 = arith.constant dense<0.000000e+00> : vector<32x256xf32>
    %214 = tpu.matmul %190, %212, %cst_112 {dimension_numbers = #tpu.dot_dimension_numbers<[1], [1], [0], [0], [0, 0, 1, 0], [], []>} : vector<32x64xf32>, vector<256x64xf32>, vector<32x256xf32> -> vector<32x256xf32>
    "tpu.trace_stop"() : () -> ()
    %cst_113 = arith.constant dense<0.000000e+00> : vector<32x1280xf32>
    %215 = tpu.matmul %201, %5, %cst_113 {dimension_numbers = #tpu.dot_dimension_numbers<[1], [0], [0], [1], [0, 0, 1, 1], [], []>} : vector<32x64xf32>, vector<64x1280xf32>, vector<32x1280xf32> -> vector<32x1280xf32>
    %216 = arith.mulf %215, %1 : vector<32x1280xf32>
    %217 = arith.addf %214, %2 : vector<32x256xf32>
    %218 = vector.extract_strided_slice %216 {offsets = [0, 0], sizes = [32, 256], strides = [1, 1]} : vector<32x1280xf32> to vector<32x256xf32>
    %219 = arith.addf %217, %218 : vector<32x256xf32>
    %220 = vector.extract_strided_slice %216 {offsets = [0, 256], sizes = [32, 256], strides = [1, 1]} : vector<32x1280xf32> to vector<32x256xf32>
    %221 = arith.addf %219, %220 : vector<32x256xf32>
    %222 = vector.extract_strided_slice %216 {offsets = [0, 512], sizes = [32, 256], strides = [1, 1]} : vector<32x1280xf32> to vector<32x256xf32>
    %223 = arith.addf %221, %222 : vector<32x256xf32>
    %224 = vector.extract_strided_slice %216 {offsets = [0, 768], sizes = [32, 256], strides = [1, 1]} : vector<32x1280xf32> to vector<32x256xf32>
    %225 = arith.addf %223, %224 : vector<32x256xf32>
    %226 = vector.extract_strided_slice %216 {offsets = [0, 1024], sizes = [32, 256], strides = [1, 1]} : vector<32x1280xf32> to vector<32x256xf32>
    %227 = arith.addf %225, %226 : vector<32x256xf32>
    %cst_114 = arith.constant dense<0xFF800000> : vector<32xf32>
    %228 = vector.multi_reduction <maximumf>, %227, %cst_114 [1] : vector<32x256xf32> to vector<32xf32>
    %229 = vector.shape_cast %228 : vector<32xf32> to vector<32x1xf32>
    %230 = vector.broadcast %229 : vector<32x1xf32> to vector<32x256xf32>
    %231 = arith.subf %227, %230 : vector<32x256xf32>
    %232 = math.exp %231 : vector<32x256xf32>
    %cst_115 = arith.constant dense<0.000000e+00> : vector<32x8xf32>
    %233 = tpu.matmul %232, %4, %cst_115 {dimension_numbers = #tpu.dot_dimension_numbers<[1], [0], [0], [1], [0, 0, 1, 1], [], []>} : vector<32x256xf32>, vector<256x8xf32>, vector<32x8xf32> -> vector<32x8xf32>
    %cst_116 = arith.constant 1.000000e-30 : f32
    %234 = vector.broadcast %cst_116 : f32 to vector<32x8xf32>
    %235 = arith.maximumf %233, %234 : vector<32x8xf32>
    %cst_117 = arith.constant 1.000000e+00 : f32
    %236 = vector.broadcast %cst_117 : f32 to vector<32x8xf32>
    %237 = arith.divf %236, %235 : vector<32x8xf32>
    %cst_118 = arith.constant dense<0.000000e+00> : vector<32x256xf32>
    %238 = tpu.matmul %237, %3, %cst_118 {dimension_numbers = #tpu.dot_dimension_numbers<[1], [0], [0], [1], [0, 0, 1, 1], [], []>} : vector<32x8xf32>, vector<8x256xf32>, vector<32x256xf32> -> vector<32x256xf32>
    %239 = arith.mulf %232, %238 : vector<32x256xf32>
    %c1_119 = arith.constant 1 : index
    %c0_120 = arith.constant 0 : index
    %c0_121 = arith.constant 0 : index
    %240 = vector.load %arg22[%c1_119, %c0_120, %c0_121] : memref<3x32x256xf32, #tpu.memory_space<vmem>>, vector<1x32x256xf32>
    %241 = vector.shape_cast %240 : vector<1x32x256xf32> to vector<32x256xf32>
    %242 = vector.shape_cast %239 : vector<32x256xf32> to vector<1x32x256xf32>
    tpu.vector_store %arg22[%c1_119, %c0_120, %c0_121], %242 {strides = array<i32>} : memref<3x32x256xf32, #tpu.memory_space<vmem>>, vector<1x32x256xf32>,
    %cst_122 = arith.constant dense<0.000000e+00> : vector<32x64xf32>
    %243 = tpu.matmul %239, %213, %cst_122 {dimension_numbers = #tpu.dot_dimension_numbers<[1], [0], [0], [1], [0, 0, 1, 1], [], []>} : vector<32x256xf32>, vector<256x64xf32>, vector<32x64xf32> -> vector<32x64xf32>
    %244 = arith.mulf %243, %200 : vector<32x64xf32>
    %c1_123 = arith.constant 1 : index
    %c0_124 = arith.constant 0 : index
    %c0_125 = arith.constant 0 : index
    %245 = vector.load %arg13[%c1_123, %c0_124, %c0_125] : memref<3x64x64xf32, #tpu.memory_space<vmem>>, vector<1x64x64xf32>
    %246 = vector.shape_cast %245 : vector<1x64x64xf32> to vector<64x64xf32>
    %cst_126 = arith.constant dense<0.000000e+00> : vector<32x64xf32>
    %247 = tpu.matmul %244, %246, %cst_126 {dimension_numbers = #tpu.dot_dimension_numbers<[1], [0], [0], [1], [0, 0, 1, 1], [], []>} : vector<32x64xf32>, vector<64x64xf32>, vector<32x64xf32> -> vector<32x64xf32>
    %c1_127 = arith.constant 1 : index
    %c0_128 = arith.constant 0 : index
    %c0_129 = arith.constant 0 : index
    %248 = vector.load %arg14[%c1_127, %c0_128, %c0_129] : memref<3x1x64xf32, #tpu.memory_space<vmem>>, vector<1x1x64xf32>
    %249 = vector.shape_cast %248 : vector<1x1x64xf32> to vector<1x64xf32>
    %250 = vector.broadcast %249 : vector<1x64xf32> to vector<32x64xf32>
    %251 = arith.addf %247, %250 : vector<32x64xf32>
    %252 = arith.addf %156, %251 : vector<32x64xf32>
    %c1_130 = arith.constant 1 : index
    %c0_131 = arith.constant 0 : index
    %c0_132 = arith.constant 0 : index
    %253 = vector.load %arg15[%c1_130, %c0_131, %c0_132] : memref<3x1x64xf32, #tpu.memory_space<vmem>>, vector<1x1x64xf32>
    %254 = vector.shape_cast %253 : vector<1x1x64xf32> to vector<1x64xf32>
    %c1_133 = arith.constant 1 : index
    %c0_134 = arith.constant 0 : index
    %c0_135 = arith.constant 0 : index
    %255 = vector.load %arg16[%c1_133, %c0_134, %c0_135] : memref<3x1x64xf32, #tpu.memory_space<vmem>>, vector<1x1x64xf32>
    %256 = vector.shape_cast %255 : vector<1x1x64xf32> to vector<1x64xf32>
    %cst_136 = arith.constant dense<0.000000e+00> : vector<32xf32>
    %257 = vector.multi_reduction <add>, %252, %cst_136 [1] : vector<32x64xf32> to vector<32xf32>
    %258 = vector.shape_cast %257 : vector<32xf32> to vector<32x1xf32>
    %cst_137 = arith.constant 6.400000e+01 : f32
    %259 = vector.broadcast %cst_137 : f32 to vector<32x1xf32>
    %260 = arith.divf %258, %259 : vector<32x1xf32>
    %261 = vector.broadcast %260 : vector<32x1xf32> to vector<32x64xf32>
    %262 = arith.subf %252, %261 : vector<32x64xf32>
    %263 = arith.mulf %262, %262 : vector<32x64xf32>
    %cst_138 = arith.constant dense<0.000000e+00> : vector<32xf32>
    %264 = vector.multi_reduction <add>, %263, %cst_138 [1] : vector<32x64xf32> to vector<32xf32>
    %265 = vector.shape_cast %264 : vector<32xf32> to vector<32x1xf32>
    %cst_139 = arith.constant 6.400000e+01 : f32
    %266 = vector.broadcast %cst_139 : f32 to vector<32x1xf32>
    %267 = arith.divf %265, %266 : vector<32x1xf32>
    %268 = vector.broadcast %260 : vector<32x1xf32> to vector<32x64xf32>
    %269 = arith.subf %252, %268 : vector<32x64xf32>
    %cst_140 = arith.constant 9.99999997E-7 : f32
    %270 = vector.broadcast %cst_140 : f32 to vector<32x1xf32>
    %271 = arith.addf %267, %270 : vector<32x1xf32>
    %272 = math.rsqrt %271 : vector<32x1xf32>
    %273 = vector.broadcast %272 : vector<32x1xf32> to vector<32x64xf32>
    %274 = arith.mulf %269, %273 : vector<32x64xf32>
    %275 = vector.broadcast %254 : vector<1x64xf32> to vector<32x64xf32>
    %276 = arith.mulf %274, %275 : vector<32x64xf32>
    %277 = vector.broadcast %256 : vector<1x64xf32> to vector<32x64xf32>
    %278 = arith.addf %276, %277 : vector<32x64xf32>
    %c1_141 = arith.constant 1 : index
    %c0_142 = arith.constant 0 : index
    %c0_143 = arith.constant 0 : index
    %279 = vector.load %arg17[%c1_141, %c0_142, %c0_143] : memref<3x64x128xf32, #tpu.memory_space<vmem>>, vector<1x64x128xf32>
    %280 = vector.shape_cast %279 : vector<1x64x128xf32> to vector<64x128xf32>
    %cst_144 = arith.constant dense<0.000000e+00> : vector<32x128xf32>
    %281 = tpu.matmul %278, %280, %cst_144 {dimension_numbers = #tpu.dot_dimension_numbers<[1], [0], [0], [1], [0, 0, 1, 1], [], []>} : vector<32x64xf32>, vector<64x128xf32>, vector<32x128xf32> -> vector<32x128xf32>
    %c1_145 = arith.constant 1 : index
    %c0_146 = arith.constant 0 : index
    %c0_147 = arith.constant 0 : index
    %282 = vector.load %arg18[%c1_145, %c0_146, %c0_147] : memref<3x1x128xf32, #tpu.memory_space<vmem>>, vector<1x1x128xf32>
    %283 = vector.shape_cast %282 : vector<1x1x128xf32> to vector<1x128xf32>
    %284 = vector.broadcast %283 : vector<1x128xf32> to vector<32x128xf32>
    %285 = arith.addf %281, %284 : vector<32x128xf32>
    %cst_148 = arith.constant 5.000000e-01 : f32
    %286 = vector.broadcast %cst_148 : f32 to vector<32x128xf32>
    %287 = arith.mulf %286, %285 : vector<32x128xf32>
    %cst_149 = arith.constant 4.471500e-02 : f32
    %288 = vector.broadcast %cst_149 : f32 to vector<32x128xf32>
    %289 = arith.mulf %288, %285 : vector<32x128xf32>
    %290 = arith.mulf %289, %285 : vector<32x128xf32>
    %291 = arith.mulf %290, %285 : vector<32x128xf32>
    %292 = arith.addf %285, %291 : vector<32x128xf32>
    %cst_150 = arith.constant 0.797884583 : f32
    %293 = vector.broadcast %cst_150 : f32 to vector<32x128xf32>
    %294 = arith.mulf %293, %292 : vector<32x128xf32>
    %295 = math.tanh %294 : vector<32x128xf32>
    %cst_151 = arith.constant 1.000000e+00 : f32
    %296 = vector.broadcast %cst_151 : f32 to vector<32x128xf32>
    %297 = arith.addf %296, %295 : vector<32x128xf32>
    %298 = arith.mulf %287, %297 : vector<32x128xf32>
    %c1_152 = arith.constant 1 : index
    %c0_153 = arith.constant 0 : index
    %c0_154 = arith.constant 0 : index
    %299 = vector.load %arg19[%c1_152, %c0_153, %c0_154] : memref<3x128x64xf32, #tpu.memory_space<vmem>>, vector<1x128x64xf32>
    %300 = vector.shape_cast %299 : vector<1x128x64xf32> to vector<128x64xf32>
    %cst_155 = arith.constant dense<0.000000e+00> : vector<32x64xf32>
    %301 = tpu.matmul %298, %300, %cst_155 {dimension_numbers = #tpu.dot_dimension_numbers<[1], [0], [0], [1], [0, 0, 1, 1], [], []>} : vector<32x128xf32>, vector<128x64xf32>, vector<32x64xf32> -> vector<32x64xf32>
    %c1_156 = arith.constant 1 : index
    %c0_157 = arith.constant 0 : index
    %c0_158 = arith.constant 0 : index
    %302 = vector.load %arg20[%c1_156, %c0_157, %c0_158] : memref<3x1x64xf32, #tpu.memory_space<vmem>>, vector<1x1x64xf32>
    %303 = vector.shape_cast %302 : vector<1x1x64xf32> to vector<1x64xf32>
    %304 = vector.broadcast %303 : vector<1x64xf32> to vector<32x64xf32>
    %305 = arith.addf %301, %304 : vector<32x64xf32>
    %306 = arith.addf %156, %305 : vector<32x64xf32>
    %c2 = arith.constant 2 : index
    %c0_159 = arith.constant 0 : index
    %c0_160 = arith.constant 0 : index
    %307 = vector.load %arg7[%c2, %c0_159, %c0_160] : memref<3x1x64xf32, #tpu.memory_space<vmem>>, vector<1x1x64xf32>
    %308 = vector.shape_cast %307 : vector<1x1x64xf32> to vector<1x64xf32>
    %c2_161 = arith.constant 2 : index
    %c0_162 = arith.constant 0 : index
    %c0_163 = arith.constant 0 : index
    %309 = vector.load %arg8[%c2_161, %c0_162, %c0_163] : memref<3x1x64xf32, #tpu.memory_space<vmem>>, vector<1x1x64xf32>
    %310 = vector.shape_cast %309 : vector<1x1x64xf32> to vector<1x64xf32>
    %cst_164 = arith.constant dense<0.000000e+00> : vector<32xf32>
    %311 = vector.multi_reduction <add>, %306, %cst_164 [1] : vector<32x64xf32> to vector<32xf32>
    %312 = vector.shape_cast %311 : vector<32xf32> to vector<32x1xf32>
    %cst_165 = arith.constant 6.400000e+01 : f32
    %313 = vector.broadcast %cst_165 : f32 to vector<32x1xf32>
    %314 = arith.divf %312, %313 : vector<32x1xf32>
    %315 = vector.broadcast %314 : vector<32x1xf32> to vector<32x64xf32>
    %316 = arith.subf %306, %315 : vector<32x64xf32>
    %317 = arith.mulf %316, %316 : vector<32x64xf32>
    %cst_166 = arith.constant dense<0.000000e+00> : vector<32xf32>
    %318 = vector.multi_reduction <add>, %317, %cst_166 [1] : vector<32x64xf32> to vector<32xf32>
    %319 = vector.shape_cast %318 : vector<32xf32> to vector<32x1xf32>
    %cst_167 = arith.constant 6.400000e+01 : f32
    %320 = vector.broadcast %cst_167 : f32 to vector<32x1xf32>
    %321 = arith.divf %319, %320 : vector<32x1xf32>
    %322 = vector.broadcast %314 : vector<32x1xf32> to vector<32x64xf32>
    %323 = arith.subf %306, %322 : vector<32x64xf32>
    %cst_168 = arith.constant 9.99999997E-7 : f32
    %324 = vector.broadcast %cst_168 : f32 to vector<32x1xf32>
    %325 = arith.addf %321, %324 : vector<32x1xf32>
    %326 = math.rsqrt %325 : vector<32x1xf32>
    %327 = vector.broadcast %326 : vector<32x1xf32> to vector<32x64xf32>
    %328 = arith.mulf %323, %327 : vector<32x64xf32>
    %329 = vector.broadcast %308 : vector<1x64xf32> to vector<32x64xf32>
    %330 = arith.mulf %328, %329 : vector<32x64xf32>
    %331 = vector.broadcast %310 : vector<1x64xf32> to vector<32x64xf32>
    %332 = arith.addf %330, %331 : vector<32x64xf32>
    %c2_169 = arith.constant 2 : index
    %c0_170 = arith.constant 0 : index
    %c0_171 = arith.constant 0 : index
    %333 = vector.load %arg9[%c2_169, %c0_170, %c0_171] : memref<3x64x320xf32, #tpu.memory_space<vmem>>, vector<1x64x320xf32>
    %334 = vector.shape_cast %333 : vector<1x64x320xf32> to vector<64x320xf32>
    %cst_172 = arith.constant dense<0.000000e+00> : vector<32x320xf32>
    %335 = tpu.matmul %332, %334, %cst_172 {dimension_numbers = #tpu.dot_dimension_numbers<[1], [0], [0], [1], [0, 0, 1, 1], [], []>} : vector<32x64xf32>, vector<64x320xf32>, vector<32x320xf32> -> vector<32x320xf32>
    %c2_173 = arith.constant 2 : index
    %c0_174 = arith.constant 0 : index
    %c0_175 = arith.constant 0 : index
    %336 = vector.load %arg10[%c2_173, %c0_174, %c0_175] : memref<3x1x320xf32, #tpu.memory_space<vmem>>, vector<1x1x320xf32>
    %337 = vector.shape_cast %336 : vector<1x1x320xf32> to vector<1x320xf32>
    %338 = vector.broadcast %337 : vector<1x320xf32> to vector<32x320xf32>
    %339 = arith.addf %335, %338 : vector<32x320xf32>
    %340 = vector.extract_strided_slice %339 {offsets = [0, 0], sizes = [32, 64], strides = [1, 1]} : vector<32x320xf32> to vector<32x64xf32>
    %341 = vector.extract_strided_slice %339 {offsets = [0, 64], sizes = [32, 64], strides = [1, 1]} : vector<32x320xf32> to vector<32x64xf32>
    %342 = vector.extract_strided_slice %339 {offsets = [0, 128], sizes = [32, 64], strides = [1, 1]} : vector<32x320xf32> to vector<32x64xf32>
    %cst_176 = arith.constant 0.000000e+00 : f32
    %343 = vector.broadcast %cst_176 : f32 to vector<32x64xf32>
    %344 = arith.maximumf %342, %343 : vector<32x64xf32>
    %345 = vector.extract_strided_slice %339 {offsets = [0, 192], sizes = [32, 64], strides = [1, 1]} : vector<32x320xf32> to vector<32x64xf32>
    %346 = arith.negf %345 : vector<32x64xf32>
    %347 = math.exp %346 : vector<32x64xf32>
    %cst_177 = arith.constant 1.000000e+00 : f32
    %348 = vector.broadcast %cst_177 : f32 to vector<32x64xf32>
    %349 = arith.addf %348, %347 : vector<32x64xf32>
    %350 = arith.divf %348, %349 : vector<32x64xf32>
    %351 = vector.extract_strided_slice %339 {offsets = [0, 256], sizes = [32, 64], strides = [1, 1]} : vector<32x320xf32> to vector<32x64xf32>
    %c2_178 = arith.constant 2 : index
    %c0_179 = arith.constant 0 : index
    %c0_180 = arith.constant 0 : index
    %352 = vector.load %arg11[%c2_178, %c0_179, %c0_180] : memref<3x64x64xf32, #tpu.memory_space<vmem>>, vector<1x64x64xf32>
    %353 = vector.shape_cast %352 : vector<1x64x64xf32> to vector<64x64xf32>
    %cst_181 = arith.constant dense<0.000000e+00> : vector<32x64xf32>
    %354 = tpu.matmul %344, %353, %cst_181 {dimension_numbers = #tpu.dot_dimension_numbers<[1], [0], [0], [1], [0, 0, 1, 1], [], []>} : vector<32x64xf32>, vector<64x64xf32>, vector<32x64xf32> -> vector<32x64xf32>
    %c2_182 = arith.constant 2 : index
    %c0_183 = arith.constant 0 : index
    %c0_184 = arith.constant 0 : index
    %355 = vector.load %arg12[%c2_182, %c0_183, %c0_184] : memref<3x1x64xf32, #tpu.memory_space<vmem>>, vector<1x1x64xf32>
    %356 = vector.shape_cast %355 : vector<1x1x64xf32> to vector<1x64xf32>
    %357 = vector.broadcast %356 : vector<1x64xf32> to vector<32x64xf32>
    %358 = arith.addf %354, %357 : vector<32x64xf32>
    %359 = tpu.concatenate %341, %358 in 1 : vector<32x64xf32>, vector<32x64xf32> -> vector<32x128xf32>
    %360 = tpu.concatenate %359, %359, %359, %359, %359, %359, %359, %359 in 0 : vector<32x128xf32>, vector<32x128xf32>, vector<32x128xf32>, vector<32x128xf32>, vector<32x128xf32>, vector<32x128xf32>, vector<32x128xf32>, vector<32x128xf32> -> vector<256x128xf32>
    %361 = arith.mulf %360, %6 : vector<256x128xf32>
    %362 = vector.extract_strided_slice %361 {offsets = [0, 0], sizes = [256, 64], strides = [1, 1]} : vector<256x128xf32> to vector<256x64xf32>
    %363 = vector.extract_strided_slice %361 {offsets = [0, 64], sizes = [256, 64], strides = [1, 1]} : vector<256x128xf32> to vector<256x64xf32>
    "tpu.trace_start"() <{level = 10 : i32, message = "qe,je->qj"}> : () -> ()
    %cst_185 = arith.constant dense<0.000000e+00> : vector<32x256xf32>
    %364 = tpu.matmul %340, %362, %cst_185 {dimension_numbers = #tpu.dot_dimension_numbers<[1], [1], [0], [0], [0, 0, 1, 0], [], []>} : vector<32x64xf32>, vector<256x64xf32>, vector<32x256xf32> -> vector<32x256xf32>
    "tpu.trace_stop"() : () -> ()
    %cst_186 = arith.constant dense<0.000000e+00> : vector<32x1280xf32>
    %365 = tpu.matmul %351, %5, %cst_186 {dimension_numbers = #tpu.dot_dimension_numbers<[1], [0], [0], [1], [0, 0, 1, 1], [], []>} : vector<32x64xf32>, vector<64x1280xf32>, vector<32x1280xf32> -> vector<32x1280xf32>
    %366 = arith.mulf %365, %1 : vector<32x1280xf32>
    %367 = arith.addf %364, %2 : vector<32x256xf32>
    %368 = vector.extract_strided_slice %366 {offsets = [0, 0], sizes = [32, 256], strides = [1, 1]} : vector<32x1280xf32> to vector<32x256xf32>
    %369 = arith.addf %367, %368 : vector<32x256xf32>
    %370 = vector.extract_strided_slice %366 {offsets = [0, 256], sizes = [32, 256], strides = [1, 1]} : vector<32x1280xf32> to vector<32x256xf32>
    %371 = arith.addf %369, %370 : vector<32x256xf32>
    %372 = vector.extract_strided_slice %366 {offsets = [0, 512], sizes = [32, 256], strides = [1, 1]} : vector<32x1280xf32> to vector<32x256xf32>
    %373 = arith.addf %371, %372 : vector<32x256xf32>
    %374 = vector.extract_strided_slice %366 {offsets = [0, 768], sizes = [32, 256], strides = [1, 1]} : vector<32x1280xf32> to vector<32x256xf32>
    %375 = arith.addf %373, %374 : vector<32x256xf32>
    %376 = vector.extract_strided_slice %366 {offsets = [0, 1024], sizes = [32, 256], strides = [1, 1]} : vector<32x1280xf32> to vector<32x256xf32>
    %377 = arith.addf %375, %376 : vector<32x256xf32>
    %cst_187 = arith.constant dense<0xFF800000> : vector<32xf32>
    %378 = vector.multi_reduction <maximumf>, %377, %cst_187 [1] : vector<32x256xf32> to vector<32xf32>
    %379 = vector.shape_cast %378 : vector<32xf32> to vector<32x1xf32>
    %380 = vector.broadcast %379 : vector<32x1xf32> to vector<32x256xf32>
    %381 = arith.subf %377, %380 : vector<32x256xf32>
    %382 = math.exp %381 : vector<32x256xf32>
    %cst_188 = arith.constant dense<0.000000e+00> : vector<32x8xf32>
    %383 = tpu.matmul %382, %4, %cst_188 {dimension_numbers = #tpu.dot_dimension_numbers<[1], [0], [0], [1], [0, 0, 1, 1], [], []>} : vector<32x256xf32>, vector<256x8xf32>, vector<32x8xf32> -> vector<32x8xf32>
    %cst_189 = arith.constant 1.000000e-30 : f32
    %384 = vector.broadcast %cst_189 : f32 to vector<32x8xf32>
    %385 = arith.maximumf %383, %384 : vector<32x8xf32>
    %cst_190 = arith.constant 1.000000e+00 : f32
    %386 = vector.broadcast %cst_190 : f32 to vector<32x8xf32>
    %387 = arith.divf %386, %385 : vector<32x8xf32>
    %cst_191 = arith.constant dense<0.000000e+00> : vector<32x256xf32>
    %388 = tpu.matmul %387, %3, %cst_191 {dimension_numbers = #tpu.dot_dimension_numbers<[1], [0], [0], [1], [0, 0, 1, 1], [], []>} : vector<32x8xf32>, vector<8x256xf32>, vector<32x256xf32> -> vector<32x256xf32>
    %389 = arith.mulf %382, %388 : vector<32x256xf32>
    %c2_192 = arith.constant 2 : index
    %c0_193 = arith.constant 0 : index
    %c0_194 = arith.constant 0 : index
    %390 = vector.load %arg22[%c2_192, %c0_193, %c0_194] : memref<3x32x256xf32, #tpu.memory_space<vmem>>, vector<1x32x256xf32>
    %391 = vector.shape_cast %390 : vector<1x32x256xf32> to vector<32x256xf32>
    %392 = vector.shape_cast %389 : vector<32x256xf32> to vector<1x32x256xf32>
    tpu.vector_store %arg22[%c2_192, %c0_193, %c0_194], %392 {strides = array<i32>} : memref<3x32x256xf32, #tpu.memory_space<vmem>>, vector<1x32x256xf32>,
    %cst_195 = arith.constant dense<0.000000e+00> : vector<32x64xf32>
    %393 = tpu.matmul %389, %363, %cst_195 {dimension_numbers = #tpu.dot_dimension_numbers<[1], [0], [0], [1], [0, 0, 1, 1], [], []>} : vector<32x256xf32>, vector<256x64xf32>, vector<32x64xf32> -> vector<32x64xf32>
    %394 = arith.mulf %393, %350 : vector<32x64xf32>
    %c2_196 = arith.constant 2 : index
    %c0_197 = arith.constant 0 : index
    %c0_198 = arith.constant 0 : index
    %395 = vector.load %arg13[%c2_196, %c0_197, %c0_198] : memref<3x64x64xf32, #tpu.memory_space<vmem>>, vector<1x64x64xf32>
    %396 = vector.shape_cast %395 : vector<1x64x64xf32> to vector<64x64xf32>
    %cst_199 = arith.constant dense<0.000000e+00> : vector<32x64xf32>
    %397 = tpu.matmul %394, %396, %cst_199 {dimension_numbers = #tpu.dot_dimension_numbers<[1], [0], [0], [1], [0, 0, 1, 1], [], []>} : vector<32x64xf32>, vector<64x64xf32>, vector<32x64xf32> -> vector<32x64xf32>
    %c2_200 = arith.constant 2 : index
    %c0_201 = arith.constant 0 : index
    %c0_202 = arith.constant 0 : index
    %398 = vector.load %arg14[%c2_200, %c0_201, %c0_202] : memref<3x1x64xf32, #tpu.memory_space<vmem>>, vector<1x1x64xf32>
    %399 = vector.shape_cast %398 : vector<1x1x64xf32> to vector<1x64xf32>
    %400 = vector.broadcast %399 : vector<1x64xf32> to vector<32x64xf32>
    %401 = arith.addf %397, %400 : vector<32x64xf32>
    %402 = arith.addf %306, %401 : vector<32x64xf32>
    %c2_203 = arith.constant 2 : index
    %c0_204 = arith.constant 0 : index
    %c0_205 = arith.constant 0 : index
    %403 = vector.load %arg15[%c2_203, %c0_204, %c0_205] : memref<3x1x64xf32, #tpu.memory_space<vmem>>, vector<1x1x64xf32>
    %404 = vector.shape_cast %403 : vector<1x1x64xf32> to vector<1x64xf32>
    %c2_206 = arith.constant 2 : index
    %c0_207 = arith.constant 0 : index
    %c0_208 = arith.constant 0 : index
    %405 = vector.load %arg16[%c2_206, %c0_207, %c0_208] : memref<3x1x64xf32, #tpu.memory_space<vmem>>, vector<1x1x64xf32>
    %406 = vector.shape_cast %405 : vector<1x1x64xf32> to vector<1x64xf32>
    %cst_209 = arith.constant dense<0.000000e+00> : vector<32xf32>
    %407 = vector.multi_reduction <add>, %402, %cst_209 [1] : vector<32x64xf32> to vector<32xf32>
    %408 = vector.shape_cast %407 : vector<32xf32> to vector<32x1xf32>
    %cst_210 = arith.constant 6.400000e+01 : f32
    %409 = vector.broadcast %cst_210 : f32 to vector<32x1xf32>
    %410 = arith.divf %408, %409 : vector<32x1xf32>
    %411 = vector.broadcast %410 : vector<32x1xf32> to vector<32x64xf32>
    %412 = arith.subf %402, %411 : vector<32x64xf32>
    %413 = arith.mulf %412, %412 : vector<32x64xf32>
    %cst_211 = arith.constant dense<0.000000e+00> : vector<32xf32>
    %414 = vector.multi_reduction <add>, %413, %cst_211 [1] : vector<32x64xf32> to vector<32xf32>
    %415 = vector.shape_cast %414 : vector<32xf32> to vector<32x1xf32>
    %cst_212 = arith.constant 6.400000e+01 : f32
    %416 = vector.broadcast %cst_212 : f32 to vector<32x1xf32>
    %417 = arith.divf %415, %416 : vector<32x1xf32>
    %418 = vector.broadcast %410 : vector<32x1xf32> to vector<32x64xf32>
    %419 = arith.subf %402, %418 : vector<32x64xf32>
    %cst_213 = arith.constant 9.99999997E-7 : f32
    %420 = vector.broadcast %cst_213 : f32 to vector<32x1xf32>
    %421 = arith.addf %417, %420 : vector<32x1xf32>
    %422 = math.rsqrt %421 : vector<32x1xf32>
    %423 = vector.broadcast %422 : vector<32x1xf32> to vector<32x64xf32>
    %424 = arith.mulf %419, %423 : vector<32x64xf32>
    %425 = vector.broadcast %404 : vector<1x64xf32> to vector<32x64xf32>
    %426 = arith.mulf %424, %425 : vector<32x64xf32>
    %427 = vector.broadcast %406 : vector<1x64xf32> to vector<32x64xf32>
    %428 = arith.addf %426, %427 : vector<32x64xf32>
    %c2_214 = arith.constant 2 : index
    %c0_215 = arith.constant 0 : index
    %c0_216 = arith.constant 0 : index
    %429 = vector.load %arg17[%c2_214, %c0_215, %c0_216] : memref<3x64x128xf32, #tpu.memory_space<vmem>>, vector<1x64x128xf32>
    %430 = vector.shape_cast %429 : vector<1x64x128xf32> to vector<64x128xf32>
    %cst_217 = arith.constant dense<0.000000e+00> : vector<32x128xf32>
    %431 = tpu.matmul %428, %430, %cst_217 {dimension_numbers = #tpu.dot_dimension_numbers<[1], [0], [0], [1], [0, 0, 1, 1], [], []>} : vector<32x64xf32>, vector<64x128xf32>, vector<32x128xf32> -> vector<32x128xf32>
    %c2_218 = arith.constant 2 : index
    %c0_219 = arith.constant 0 : index
    %c0_220 = arith.constant 0 : index
    %432 = vector.load %arg18[%c2_218, %c0_219, %c0_220] : memref<3x1x128xf32, #tpu.memory_space<vmem>>, vector<1x1x128xf32>
    %433 = vector.shape_cast %432 : vector<1x1x128xf32> to vector<1x128xf32>
    %434 = vector.broadcast %433 : vector<1x128xf32> to vector<32x128xf32>
    %435 = arith.addf %431, %434 : vector<32x128xf32>
    %cst_221 = arith.constant 5.000000e-01 : f32
    %436 = vector.broadcast %cst_221 : f32 to vector<32x128xf32>
    %437 = arith.mulf %436, %435 : vector<32x128xf32>
    %cst_222 = arith.constant 4.471500e-02 : f32
    %438 = vector.broadcast %cst_222 : f32 to vector<32x128xf32>
    %439 = arith.mulf %438, %435 : vector<32x128xf32>
    %440 = arith.mulf %439, %435 : vector<32x128xf32>
    %441 = arith.mulf %440, %435 : vector<32x128xf32>
    %442 = arith.addf %435, %441 : vector<32x128xf32>
    %cst_223 = arith.constant 0.797884583 : f32
    %443 = vector.broadcast %cst_223 : f32 to vector<32x128xf32>
    %444 = arith.mulf %443, %442 : vector<32x128xf32>
    %445 = math.tanh %444 : vector<32x128xf32>
    %cst_224 = arith.constant 1.000000e+00 : f32
    %446 = vector.broadcast %cst_224 : f32 to vector<32x128xf32>
    %447 = arith.addf %446, %445 : vector<32x128xf32>
    %448 = arith.mulf %437, %447 : vector<32x128xf32>
    %c2_225 = arith.constant 2 : index
    %c0_226 = arith.constant 0 : index
    %c0_227 = arith.constant 0 : index
    %449 = vector.load %arg19[%c2_225, %c0_226, %c0_227] : memref<3x128x64xf32, #tpu.memory_space<vmem>>, vector<1x128x64xf32>
    %450 = vector.shape_cast %449 : vector<1x128x64xf32> to vector<128x64xf32>
    %cst_228 = arith.constant dense<0.000000e+00> : vector<32x64xf32>
    %451 = tpu.matmul %448, %450, %cst_228 {dimension_numbers = #tpu.dot_dimension_numbers<[1], [0], [0], [1], [0, 0, 1, 1], [], []>} : vector<32x128xf32>, vector<128x64xf32>, vector<32x64xf32> -> vector<32x64xf32>
    %c2_229 = arith.constant 2 : index
    %c0_230 = arith.constant 0 : index
    %c0_231 = arith.constant 0 : index
    %452 = vector.load %arg20[%c2_229, %c0_230, %c0_231] : memref<3x1x64xf32, #tpu.memory_space<vmem>>, vector<1x1x64xf32>
    %453 = vector.shape_cast %452 : vector<1x1x64xf32> to vector<1x64xf32>
    %454 = vector.broadcast %453 : vector<1x64xf32> to vector<32x64xf32>
    %455 = arith.addf %451, %454 : vector<32x64xf32>
    %456 = arith.addf %306, %455 : vector<32x64xf32>
    %c0_232 = arith.constant 0 : index
    %c0_233 = arith.constant 0 : index
    %457 = vector.load %arg21[%c0_232, %c0_233] : memref<32x64xf32, #tpu.memory_space<vmem>>, vector<32x64xf32>
    tpu.vector_store %arg21[%c0_232, %c0_233], %456 {strides = array<i32>} : memref<32x64xf32, #tpu.memory_space<vmem>>, vector<32x64xf32>,
    return
  }
}

</mosaic_0001>

<bundles_post_ra>
// kernel: tile.12
= control target key start
LH: loop header
LB: loop body
LE: loop exit
PB: predicated region body
PF: predicated region fallthrough
CT: control target
= control target key end

     0   :  { %vm315_vm0 = vcmask 1047556   ;;  %s2121_s14 = smov 96   ;;  %s2122_s13 = smov 64   ;;  %vm3_vm1 = vcmask 261120   ;;  %vm319_vm2 = vcmask 1048320   ;;  %vm758_vm3 = vcmask 785920   ;;  %s4078_s0 = inlined_call_operand.vmem [shape: f32[32,5,8,1,1,32], index: 0, kind: input, shape index: {}]   ;;  %s4079_s1 = inlined_call_operand.vmem [shape: f32[32,1280], index: 1, kind: output, shape index: {}]  }
   0x1   :  { %v1766_v0 = vld [vmem:[%s4078_s0 + $0x23] ss:$40 sm:$0xf]   ;;  %v1793_v30 = vld [vmem:[%s4078_s0 + $0x17] ss:$40 sm:$0xf]  }
   0x2   :  { %v1767_v1 = vld [vmem:[%s4078_s0 + $0x23] ss:$40 sm:$0xf0]   ;;  %v1794_v31 = vld [vmem:[%s4078_s0 + $0x17] ss:$40 sm:$0xf0]  }
   0x3   :  { %v337_v2 = vsel %vm315_vm0, %v1767_v1, %v1766_v0  ;;  %v1761_v3 = vld [vmem:[%s4078_s0 + $0x3] ss:$40 sm:$0xf]   ;;  %v1790_v32 = vld [vmem:[%s4078_s0 + $0x7] ss:$40 sm:$0xf]   ;;  %v436_v34 = vsel %vm315_vm0, %v1794_v31, %v1793_v30 }
   0x4   :  { %v1762_v4 = vld [vmem:[%s4078_s0 + $0x3] ss:$40 sm:$0xf0]   ;;  %338 = vrot.lane.b32.xlu1 %v337_v2, %s2121_s14  ;;  %v1791_v33 = vld [vmem:[%s4078_s0 + $0x7] ss:$40 sm:$0xf0]  }
   0x5   :  { %v316_v5 = vsel %vm315_vm0, %v1762_v4, %v1761_v3  ;;  %v1769_v6 = vld [vmem:[%s4078_s0 + $0x14b] ss:$40 sm:$0xf]   ;;  %v425_v35 = vsel %vm315_vm0, %v1791_v33, %v1790_v32  ;;  %v1799_v36 = vld [vmem:[%s4078_s0 + $0x14f] ss:$40 sm:$0xf]  }
   0x6   :  { %v1770_v7 = vld [vmem:[%s4078_s0 + $0x14b] ss:$40 sm:$0xf0]   ;;  %317 = vrot.lane.b32.xlu0 %v316_v5, %s2121_s14  ;;  %v1800_v37 = vld [vmem:[%s4078_s0 + $0x14f] ss:$40 sm:$0xf0]  }
   0x7   :  { %v348_v8 = vsel %vm315_vm0, %v1770_v7, %v1769_v6  ;;  %v1763_v9 = vld [vmem:[%s4078_s0 + $0x13] ss:$40 sm:$0xf]   ;;  %v1796_v38 = vld [vmem:[%s4078_s0 + $0x27] ss:$40 sm:$0xf]   ;;  %v458_v40 = vsel %vm315_vm0, %v1800_v37, %v1799_v36 }
   0x8   :  { %v1764_v10 = vld [vmem:[%s4078_s0 + $0x13] ss:$40 sm:$0xf0]   ;;  %349 = vrot.lane.b32.xlu1 %v348_v8, %s2121_s14  ;;  %v1797_v39 = vld [vmem:[%s4078_s0 + $0x27] ss:$40 sm:$0xf0]  }
   0x9   :  { %v326_v11 = vsel %vm315_vm0, %v1764_v10, %v1763_v9  ;;  %v1775_v12 = vld [vmem:[%s4078_s0 + $0x283] ss:$40 sm:$0xf]   ;;  %v447_v41 = vsel %vm315_vm0, %v1797_v39, %v1796_v38  ;;  %v1805_v42 = vld [vmem:[%s4078_s0 + $0x287] ss:$40 sm:$0xf]  }
   0xa   :  { %v1776_v13 = vld [vmem:[%s4078_s0 + $0x283] ss:$40 sm:$0xf0]   ;;  %327 = vrot.lane.b32.xlu0 %v326_v11, %s2121_s14  ;;  %v1806_v43 = vld [vmem:[%s4078_s0 + $0x287] ss:$40 sm:$0xf0]  }
   0xb   :  { %v1772_v14 = vld [vmem:[%s4078_s0 + $0x15b] ss:$40 sm:$0xf]   ;;  %v370_v16 = vsel %vm315_vm0, %v1776_v13, %v1775_v12  ;;  %v1802_v44 = vld [vmem:[%s4078_s0 + $0x15f] ss:$40 sm:$0xf]   ;;  %v480_v46 = vsel %vm315_vm0, %v1806_v43, %v1805_v42 }
   0xc   :  { %v1773_v15 = vld [vmem:[%s4078_s0 + $0x15b] ss:$40 sm:$0xf0]   ;;  %371 = vrot.lane.b32.xlu1 %v370_v16, %s2121_s14  ;;  %v1803_v45 = vld [vmem:[%s4078_s0 + $0x15f] ss:$40 sm:$0xf0]  }
   0xd   :  { %v359_v17 = vsel %vm315_vm0, %v1773_v15, %v1772_v14  ;;  %v1781_v18 = vld [vmem:[%s4078_s0 + $0x2a3] ss:$40 sm:$0xf]   ;;  %v469_v47 = vsel %vm315_vm0, %v1803_v45, %v1802_v44  ;;  %v1811_v48 = vld [vmem:[%s4078_s0 + $0x2a7] ss:$40 sm:$0xf]  }
   0xe   :  { %v1782_v19 = vld [vmem:[%s4078_s0 + $0x2a3] ss:$40 sm:$0xf0]   ;;  %360 = vrot.lane.b32.xlu0 %v359_v17, %s2121_s14  ;;  %v1812_v49 = vld [vmem:[%s4078_s0 + $0x2a7] ss:$40 sm:$0xf0]  }
   0xf   :  { %v1778_v20 = vld [vmem:[%s4078_s0 + $0x293] ss:$40 sm:$0xf]   ;;  %v392_v22 = vsel %vm315_vm0, %v1782_v19, %v1781_v18  ;;  %v1808_v50 = vld [vmem:[%s4078_s0 + $0x297] ss:$40 sm:$0xf]   ;;  %v502_v52 = vsel %vm315_vm0, %v1812_v49, %v1811_v48 }
  0x10   :  { %v1779_v21 = vld [vmem:[%s4078_s0 + $0x293] ss:$40 sm:$0xf0]   ;;  %393 = vrot.lane.b32.xlu1 %v392_v22, %s2121_s14  ;;  %v1809_v51 = vld [vmem:[%s4078_s0 + $0x297] ss:$40 sm:$0xf0]  }
  0x11   :  { %v381_v23 = vsel %vm315_vm0, %v1779_v21, %v1778_v20  ;;  %v1787_v24 = vld [vmem:[%s4078_s0 + $0x3db] ss:$40 sm:$0xf]   ;;  %v491_v53 = vsel %vm315_vm0, %v1809_v51, %v1808_v50  ;;  %v1817_v54 = vld [vmem:[%s4078_s0 + $0x3df] ss:$40 sm:$0xf]  }
  0x12   :  { %v1788_v25 = vld [vmem:[%s4078_s0 + $0x3db] ss:$40 sm:$0xf0]   ;;  %382 = vrot.lane.b32.xlu0 %v381_v23, %s2121_s14  ;;  %v1818_v55 = vld [vmem:[%s4078_s0 + $0x3df] ss:$40 sm:$0xf0]  }
  0x13   :  { %v1784_v26 = vld [vmem:[%s4078_s0 + $0x3cb] ss:$40 sm:$0xf]   ;;  %v414_v28 = vsel %vm315_vm0, %v1788_v25, %v1787_v24  ;;  %v1814_v56 = vld [vmem:[%s4078_s0 + $0x3cf] ss:$40 sm:$0xf]   ;;  %v524_v58 = vsel %vm315_vm0, %v1818_v55, %v1817_v54 }
  0x14   :  { %v1785_v27 = vld [vmem:[%s4078_s0 + $0x3cb] ss:$40 sm:$0xf0]   ;;  %415 = vrot.lane.b32.xlu1 %v414_v28, %s2121_s14  ;;  %v1815_v57 = vld [vmem:[%s4078_s0 + $0x3cf] ss:$40 sm:$0xf0]  }
  0x15   :  { %v403_v29 = vsel %vm315_vm0, %v1785_v27, %v1784_v26  ;;  %v513_v59 = vsel %vm315_vm0, %v1815_v57, %v1814_v56  ;;  %v1823_v60 = vld [vmem:[%s4078_s0 + $0x1b] ss:$40 sm:$0xf]   ;;  %v1853_v26 = vld [vmem:[%s4078_s0 + $0x1f] ss:$40 sm:$0xf]  }
  0x16   :  { %404 = vrot.lane.b32.xlu0 %v403_v29, %s2121_s14  ;;  %v1824_v61 = vld [vmem:[%s4078_s0 + $0x1b] ss:$40 sm:$0xf0]   ;;  %v1854_v27 = vld [vmem:[%s4078_s0 + $0x1f] ss:$40 sm:$0xf0]  }
  0x17   :  { %v1820_v62 = vld [vmem:[%s4078_s0 + $0xb] ss:$40 sm:$0xf]   ;;  %v546_v0 = vsel %vm315_vm0, %v1824_v61, %v1823_v60  ;;  %v1850_v28 = vld [vmem:[%s4078_s0 + $0xf] ss:$40 sm:$0xf]   ;;  %v656_v30 = vsel %vm315_vm0, %v1854_v27, %v1853_v26 }
  0x18   :  { %437 = vrot.lane.b32.xlu1 %v436_v34, %s2121_s14  ;;  %v1821_v63 = vld [vmem:[%s4078_s0 + $0xb] ss:$40 sm:$0xf0]   ;;  %v1851_v29 = vld [vmem:[%s4078_s0 + $0xf] ss:$40 sm:$0xf0]  }
  0x19   :  { %v535_v1 = vsel %vm315_vm0, %v1821_v63, %v1820_v62  ;;  %v1829_v2 = vld [vmem:[%s4078_s0 + $0x153] ss:$40 sm:$0xf]   ;;  %v645_v31 = vsel %vm315_vm0, %v1851_v29, %v1850_v28  ;;  %v1859_v32 = vld [vmem:[%s4078_s0 + $0x157] ss:$40 sm:$0xf]  }
  0x1a   :  { %426 = vrot.lane.b32.xlu0 %v425_v35, %s2121_s14  ;;  %v1830_v3 = vld [vmem:[%s4078_s0 + $0x153] ss:$40 sm:$0xf0]   ;;  %v1860_v33 = vld [vmem:[%s4078_s0 + $0x157] ss:$40 sm:$0xf0]  }
  0x1b   :  { %v1826_v4 = vld [vmem:[%s4078_s0 + $0x143] ss:$40 sm:$0xf]   ;;  %v568_v6 = vsel %vm315_vm0, %v1830_v3, %v1829_v2  ;;  %v1856_v34 = vld [vmem:[%s4078_s0 + $0x147] ss:$40 sm:$0xf]   ;;  %v678_v36 = vsel %vm315_vm0, %v1860_v33, %v1859_v32 }
  0x1c   :  { %459 = vrot.lane.b32.xlu1 %v458_v40, %s2121_s14  ;;  %v1827_v5 = vld [vmem:[%s4078_s0 + $0x143] ss:$40 sm:$0xf0]   ;;  %v1857_v35 = vld [vmem:[%s4078_s0 + $0x147] ss:$40 sm:$0xf0]  }
  0x1d   :  { %v557_v7 = vsel %vm315_vm0, %v1827_v5, %v1826_v4  ;;  %v1835_v8 = vld [vmem:[%s4078_s0 + $0x28b] ss:$40 sm:$0xf]   ;;  %v667_v37 = vsel %vm315_vm0, %v1857_v35, %v1856_v34  ;;  %v1865_v38 = vld [vmem:[%s4078_s0 + $0x28f] ss:$40 sm:$0xf]  }
  0x1e   :  { %448 = vrot.lane.b32.xlu0 %v447_v41, %s2121_s14  ;;  %v1836_v9 = vld [vmem:[%s4078_s0 + $0x28b] ss:$40 sm:$0xf0]   ;;  %v1866_v39 = vld [vmem:[%s4078_s0 + $0x28f] ss:$40 sm:$0xf0]  }
  0x1f   :  { %v1832_v10 = vld [vmem:[%s4078_s0 + $0x163] ss:$40 sm:$0xf]   ;;  %v590_v12 = vsel %vm315_vm0, %v1836_v9, %v1835_v8  ;;  %v1862_v40 = vld [vmem:[%s4078_s0 + $0x167] ss:$40 sm:$0xf]   ;;  %v700_v42 = vsel %vm315_vm0, %v1866_v39, %v1865_v38 }
  0x20   :  { %481 = vrot.lane.b32.xlu1 %v480_v46, %s2121_s14  ;;  %v1833_v11 = vld [vmem:[%s4078_s0 + $0x163] ss:$40 sm:$0xf0]   ;;  %v1863_v41 = vld [vmem:[%s4078_s0 + $0x167] ss:$40 sm:$0xf0]  }
  0x21   :  { %v579_v13 = vsel %vm315_vm0, %v1833_v11, %v1832_v10  ;;  %v1841_v14 = vld [vmem:[%s4078_s0 + $0x3c3] ss:$40 sm:$0xf]   ;;  %v689_v43 = vsel %vm315_vm0, %v1863_v41, %v1862_v40  ;;  %v1871_v44 = vld [vmem:[%s4078_s0 + $0x3c7] ss:$40 sm:$0xf]  }
  0x22   :  { %470 = vrot.lane.b32.xlu0 %v469_v47, %s2121_s14  ;;  %v1842_v15 = vld [vmem:[%s4078_s0 + $0x3c3] ss:$40 sm:$0xf0]   ;;  %v1872_v45 = vld [vmem:[%s4078_s0 + $0x3c7] ss:$40 sm:$0xf0]  }
  0x23   :  { %v1838_v16 = vld [vmem:[%s4078_s0 + $0x29b] ss:$40 sm:$0xf]   ;;  %v612_v18 = vsel %vm315_vm0, %v1842_v15, %v1841_v14  ;;  %v1868_v46 = vld [vmem:[%s4078_s0 + $0x29f] ss:$40 sm:$0xf]   ;;  %v722_v48 = vsel %vm315_vm0, %v1872_v45, %v1871_v44 }
  0x24   :  { %503 = vrot.lane.b32.xlu1 %v502_v52, %s2121_s14  ;;  %v1839_v17 = vld [vmem:[%s4078_s0 + $0x29b] ss:$40 sm:$0xf0]   ;;  %v1869_v47 = vld [vmem:[%s4078_s0 + $0x29f] ss:$40 sm:$0xf0]  }
  0x25   :  { %v601_v19 = vsel %vm315_vm0, %v1839_v17, %v1838_v16  ;;  %v1847_v20 = vld [vmem:[%s4078_s0 + $0x3e3] ss:$40 sm:$0xf]   ;;  %v711_v49 = vsel %vm315_vm0, %v1869_v47, %v1868_v46  ;;  %v1877_v50 = vld [vmem:[%s4078_s0 + $0x3e7] ss:$40 sm:$0xf]  }
  0x26   :  { %492 = vrot.lane.b32.xlu0 %v491_v53, %s2121_s14  ;;  %v1848_v21 = vld [vmem:[%s4078_s0 + $0x3e3] ss:$40 sm:$0xf0]   ;;  %v1878_v51 = vld [vmem:[%s4078_s0 + $0x3e7] ss:$40 sm:$0xf0]  }
  0x27   :  { %v1844_v22 = vld [vmem:[%s4078_s0 + $0x3d3] ss:$40 sm:$0xf]   ;;  %v634_v24 = vsel %vm315_vm0, %v1848_v21, %v1847_v20  ;;  %v1874_v52 = vld [vmem:[%s4078_s0 + $0x3d7] ss:$40 sm:$0xf]   ;;  %v744_v54 = vsel %vm315_vm0, %v1878_v51, %v1877_v50 }
  0x28   :  { %525 = vrot.lane.b32.xlu1 %v524_v58, %s2121_s14  ;;  %v1845_v23 = vld [vmem:[%s4078_s0 + $0x3d3] ss:$40 sm:$0xf0]   ;;  %v1875_v53 = vld [vmem:[%s4078_s0 + $0x3d7] ss:$40 sm:$0xf0]  }
  0x29   :  { %v623_v25 = vsel %vm315_vm0, %v1845_v23, %v1844_v22  ;;  %v733_v55 = vsel %vm315_vm0, %v1875_v53, %v1874_v52  ;;  %v1882_v56 = vld [vmem:[%s4078_s0 + $0x12] ss:$40 sm:$0xf]   ;;  %v1912_v22 = vld [vmem:[%s4078_s0 + $0x16] ss:$40 sm:$0xf]  }
  0x2a   :  { %514 = vrot.lane.b32.xlu0 %v513_v59, %s2121_s14  ;;  %v1883_v57 = vld [vmem:[%s4078_s0 + $0x12] ss:$40 sm:$0xf0]   ;;  %v1913_v23 = vld [vmem:[%s4078_s0 + $0x16] ss:$40 sm:$0xf0]  }
  0x2b   :  { %v1880_v58 = vld [vmem:[%s4078_s0 + $0x2] ss:$40 sm:$0xf]   ;;  %v765_v60 = vsel %vm315_vm0, %v1883_v57, %v1882_v56  ;;  %v1918_v26 = vld [vmem:[%s4078_s0 + $0x14e] ss:$40 sm:$0xf]   ;;  %v875_v29 = vsel %vm315_vm0, %v1913_v23, %v1912_v22 }
  0x2c   :  { %547 = vrot.lane.b32.xlu1 %v546_v0, %s2121_s14  ;;  %v1881_v59 = vld [vmem:[%s4078_s0 + $0x2] ss:$40 sm:$0xf0]   ;;  %v1919_v27 = vld [vmem:[%s4078_s0 + $0x14e] ss:$40 sm:$0xf0]  }
  0x2d   :  { %v755_v61 = vsel %vm315_vm0, %v1881_v59, %v1880_v58  ;;  %v1888_v62 = vld [vmem:[%s4078_s0 + $0x14a] ss:$40 sm:$0xf]   ;;  %v2_v28 = vld [vmem:[%s4078_s0] ss:$4 sm:$0xff]   ;;  %v897_v44 = vsel %vm315_vm0, %v1919_v27, %v1918_v26  ;;  %s2123_s16 = smov 32  }
  0x2e   :  { %536 = vrot.lane.b32.xlu0 %v535_v1, %s2121_s14  ;;  %v1889_v63 = vld [vmem:[%s4078_s0 + $0x14a] ss:$40 sm:$0xf0]   ;;  %5 = vst.msk [vmem:[%s4079_s1] ss:$8 sm:$0xf0] %vm3_vm1, %v2_v28  }
  0x2f   :  { %v1885_v0 = vld [vmem:[%s4078_s0 + $0x22] ss:$40 sm:$0xf]   ;;  %v787_v2 = vsel %vm315_vm0, %v1889_v63, %v1888_v62  ;;  %v1628_v32 = vld [vmem:[%s4078_s0 + $0x20] ss:$4 sm:$0xff]   ;;  %vm1197_vm4 = vcmask 523520  }
  0x30   :  { %569 = vrot.lane.b32.xlu1 %v568_v6, %s2121_s14  ;;  %v1886_v1 = vld [vmem:[%s4078_s0 + $0x22] ss:$40 sm:$0xf0]   ;;  %v1635_v33 = vld [vmem:[%s4078_s0 + $0x60] ss:$4 sm:$0xff]  }
  0x31   :  { %v776_v3 = vsel %vm315_vm0, %v1886_v1, %v1885_v0  ;;  %v1894_v4 = vld [vmem:[%s4078_s0 + $0x282] ss:$40 sm:$0xf]   ;;  %v1639_v34 = vld [vmem:[%s4078_s0 + $0x80] ss:$4 sm:$0xff]  }
  0x32   :  { %558 = vrot.lane.b32.xlu0 %v557_v7, %s2121_s14  ;;  %v1895_v5 = vld [vmem:[%s4078_s0 + $0x282] ss:$40 sm:$0xf0]   ;;  %4 = vst.msk [vmem:[%s4079_s1] ss:$8 sm:$0xf] %vm3_vm1, %v2_v28  }
  0x33   :  { %v1891_v6 = vld [vmem:[%s4078_s0 + $0x15a] ss:$40 sm:$0xf]   ;;  %v809_v8 = vsel %vm315_vm0, %v1895_v5, %v1894_v4  ;;  %1631 = vst.msk [vmem:[%s4079_s1 - $0xf] ss:$8 sm:$0xc0] %vm3_vm1, %v1628_v32  }
  0x34   :  { %591 = vrot.lane.b32.xlu1 %v590_v12, %s2121_s14  ;;  %v1892_v7 = vld [vmem:[%s4078_s0 + $0x15a] ss:$40 sm:$0xf0]   ;;  %1636 = vst.msk [vmem:[%s4079_s1 + $0x22] ss:$8 sm:$0xf] %vm3_vm1, %v1635_v33  }
  0x35   :  { %v798_v9 = vsel %vm315_vm0, %v1892_v7, %v1891_v6  ;;  %v1900_v10 = vld [vmem:[%s4078_s0 + $0x2a2] ss:$40 sm:$0xf]   ;;  %1640 = vst.msk [vmem:[%s4079_s1 + $0x13] ss:$8 sm:$0xf] %vm3_vm1, %v1639_v34  }
  0x36   :  { %580 = vrot.lane.b32.xlu0 %v579_v13, %s2121_s14  ;;  %v1901_v11 = vld [vmem:[%s4078_s0 + $0x2a2] ss:$40 sm:$0xf0]   ;;  %v1652_v38 = vld [vmem:[%s4078_s0 + $0x100] ss:$4 sm:$0xff]  }
  0x37   :  { %v1897_v12 = vld [vmem:[%s4078_s0 + $0x292] ss:$40 sm:$0xf]   ;;  %v831_v14 = vsel %vm315_vm0, %v1901_v11, %v1900_v10  ;;  %1629 = vst.msk [vmem:[%s4079_s1 + $0x40] ss:$8 sm:$0x3] %vm3_vm1, %v1628_v32  }
  0x38   :  { %613 = vrot.lane.b32.xlu1 %v612_v18, %s2121_s14  ;;  %v1898_v13 = vld [vmem:[%s4078_s0 + $0x292] ss:$40 sm:$0xf0]   ;;  %1630 = vst.msk [vmem:[%s4079_s1 - $0xf] ss:$8 sm:$0x3c] %vm3_vm1, %v1628_v32  }
  0x39   :  { %v820_v15 = vsel %vm315_vm0, %v1898_v13, %v1897_v12  ;;  %v1906_v16 = vld [vmem:[%s4078_s0 + $0x3da] ss:$40 sm:$0xf]   ;;  %1637 = vst.msk [vmem:[%s4079_s1 + $0x22] ss:$8 sm:$0x30] %vm3_vm1, %v1635_v33  }
  0x3a   :  { %602 = vrot.lane.b32.xlu0 %v601_v19, %s2121_s14  ;;  %v1907_v17 = vld [vmem:[%s4078_s0 + $0x3da] ss:$40 sm:$0xf0]   ;;  %1638 = vst.msk [vmem:[%s4079_s1 - $0x2d] ss:$8 sm:$0xc0] %vm3_vm1, %v1635_v33  }
  0x3b   :  { %v1903_v18 = vld [vmem:[%s4078_s0 + $0x3ca] ss:$40 sm:$0xf]   ;;  %v853_v20 = vsel %vm315_vm0, %v1907_v17, %v1906_v16  ;;  %1641 = vst.msk [vmem:[%s4079_s1 + $0x13] ss:$8 sm:$0xf0] %vm3_vm1, %v1639_v34  }
  0x3c   :  { %635 = vrot.lane.b32.xlu1 %v634_v24, %s2121_s14  ;;  %v1904_v19 = vld [vmem:[%s4078_s0 + $0x3ca] ss:$40 sm:$0xf0]   ;;  %v1909_v24 = vld [vmem:[%s4078_s0 + $0x6] ss:$40 sm:$0xf]  }
  0x3d   :  { %v842_v21 = vsel %vm315_vm0, %v1904_v19, %v1903_v18  ;;  %1653 = vst.msk [vmem:[%s4079_s1 + $0x26] ss:$8 sm:$0xf] %vm3_vm1, %v1652_v38   ;;  %v1656_v39 = vld [vmem:[%s4078_s0 + $0x120] ss:$4 sm:$0xff]  }
  0x3e   :  { %624 = vrot.lane.b32.xlu0 %v623_v25, %s2121_s14  ;;  %v1910_v25 = vld [vmem:[%s4078_s0 + $0x6] ss:$40 sm:$0xf0]   ;;  %1654 = vst.msk [vmem:[%s4079_s1 + $0x26] ss:$8 sm:$0x30] %vm3_vm1, %v1652_v38  }
  0x3f   :  { %v864_v35 = vsel %vm315_vm0, %v1910_v25, %v1909_v24  ;;  %1655 = vst.msk [vmem:[%s4079_s1 - $0x29] ss:$8 sm:$0xc0] %vm3_vm1, %v1652_v38   ;;  %v1632_v40 = vld [vmem:[%s4078_s0 + $0x40] ss:$4 sm:$0xff]  }
  0x40   :  { %657 = vrot.lane.b32.xlu1 %v656_v30, %s2121_s14  ;;  %v1915_v30 = vld [vmem:[%s4078_s0 + $0x26] ss:$40 sm:$0xf]   ;;  %v1649_v41 = vld [vmem:[%s4078_s0 + $0xe0] ss:$4 sm:$0xff]  }
  0x41   :  { %1657 = vst.msk [vmem:[%s4079_s1 + $0x17] ss:$8 sm:$0xf] %vm3_vm1, %v1656_v39   ;;  %1658 = vst.msk [vmem:[%s4079_s1 + $0x17] ss:$8 sm:$0xf0] %vm3_vm1, %v1656_v39  }
  0x42   :  { %646 = vrot.lane.b32.xlu0 %v645_v31, %s2121_s14  ;;  %v1916_v31 = vld [vmem:[%s4078_s0 + $0x26] ss:$40 sm:$0xf0]   ;;  %1634 = vst.msk [vmem:[%s4079_s1 - $0x1e] ss:$8 sm:$0xf0] %vm3_vm1, %v1632_v40  }
  0x43   :  { %1651 = vst.msk [vmem:[%s4079_s1 - $0x1a] ss:$8 sm:$0xf0] %vm3_vm1, %v1649_v41   ;;  %1633 = vst.msk [vmem:[%s4079_s1 + $0x31] ss:$8 sm:$0xf] %vm3_vm1, %v1632_v40   ;;  %v886_v47 = vsel %vm315_vm0, %v1916_v31, %v1915_v30 }
  0x44   :  { %679 = vrot.lane.b32.xlu1 %v678_v36, %s2121_s14  ;;  %v1642_v36 = vld [vmem:[%s4078_s0 + $0xa0] ss:$4 sm:$0xff]   ;;  %1650 = vst.msk [vmem:[%s4079_s1 + $0x35] ss:$8 sm:$0xf] %vm3_vm1, %v1649_v41  }
  0x45   :  { %1644 = vst.msk [vmem:[%s4079_s1 + $0x4] ss:$8 sm:$0xf0] %vm3_vm1, %v1642_v36   ;;  %1643 = vst.msk [vmem:[%s4079_s1 + $0x4] ss:$8 sm:$0xf] %vm3_vm1, %v1642_v36  }
  0x46   :  { %668 = vrot.lane.b32.xlu0 %v667_v37, %s2121_s14  ;;  %v1645_v37 = vld [vmem:[%s4078_s0 + $0xc0] ss:$4 sm:$0xff]   ;;  %v1921_v45 = vld [vmem:[%s4078_s0 + $0x15e] ss:$40 sm:$0xf]  }
  0x47   :  { %1648 = vst.msk [vmem:[%s4079_s1 - $0xb] ss:$8 sm:$0xc0] %vm3_vm1, %v1645_v37   ;;  %1646 = vst.msk [vmem:[%s4079_s1 + $0x44] ss:$8 sm:$0x3] %vm3_vm1, %v1645_v37  }
  0x48   :  { %701 = vrot.lane.b32.xlu1 %v700_v42, %s2121_s14  ;;  %1647 = vst.msk [vmem:[%s4079_s1 - $0xb] ss:$8 sm:$0x3c] %vm3_vm1, %v1645_v37   ;;  %v1924_v42 = vld [vmem:[%s4078_s0 + $0x286] ss:$40 sm:$0xf]  }
  0x49   :  { %v1922_v46 = vld [vmem:[%s4078_s0 + $0x15e] ss:$40 sm:$0xf0]   ;;  %v1666_v50 = vld [vmem:[%s4078_s0 + $0x180] ss:$4 sm:$0xff]  }
  0x4a   :  { %690 = vrot.lane.b32.xlu0 %v689_v43, %s2121_s14  ;;  %v1925_v43 = vld [vmem:[%s4078_s0 + $0x286] ss:$40 sm:$0xf0]   ;;  %1668 = vst.msk [vmem:[%s4079_s1 + $0x32] ss:$8 sm:$0xf0] %vm3_vm1, %v1666_v50  }
  0x4b   :  { %v1673_v51 = vld [vmem:[%s4078_s0 + $0x1c0] ss:$4 sm:$0xff]   ;;  %1667 = vst.msk [vmem:[%s4079_s1 + $0x81] ss:$8 sm:$0xf] %vm3_vm1, %v1666_v50   ;;  %v919_v57 = vsel %vm315_vm0, %v1925_v43, %v1924_v42 }
  0x4c   :  { %723 = vrot.lane.b32.xlu1 %v722_v48, %s2121_s14  ;;  %v1659_v48 = vld [vmem:[%s4078_s0 + $0x140] ss:$4 sm:$0xff]   ;;  %1674 = vst.msk [vmem:[%s4079_s1 + $0x63] ss:$8 sm:$0xf] %vm3_vm1, %v1673_v51  }
  0x4d   :  { %1660 = vst.msk [vmem:[%s4079_s1 + $0x50] ss:$8 sm:$0xf] %vm3_vm1, %v1659_v48   ;;  %v1676_v52 = vld [vmem:[%s4078_s0 + $0x1e0] ss:$4 sm:$0xff]  }
  0x4e   :  { %712 = vrot.lane.b32.xlu0 %v711_v49, %s2121_s14  ;;  %v1662_v49 = vld [vmem:[%s4078_s0 + $0x160] ss:$4 sm:$0xff]   ;;  %1661 = vst.msk [vmem:[%s4079_s1 + $0x50] ss:$8 sm:$0xf0] %vm3_vm1, %v1659_v48  }
  0x4f   :  { %1664 = vst.msk [vmem:[%s4079_s1 + $0x41] ss:$8 sm:$0x3c] %vm3_vm1, %v1662_v49   ;;  %v1679_v53 = vld [vmem:[%s4078_s0 + $0x200] ss:$4 sm:$0xff]  }
  0x50   :  { %745 = vrot.lane.b32.xlu1 %v744_v54, %s2121_s14  ;;  %1663 = vst.msk [vmem:[%s4079_s1 + $0x90] ss:$8 sm:$0x3] %vm3_vm1, %v1662_v49   ;;  %1665 = vst.msk [vmem:[%s4079_s1 + $0x41] ss:$8 sm:$0xc0] %vm3_vm1, %v1662_v49  }
  0x51   :  { %1677 = vst.msk [vmem:[%s4079_s1 + $0x54] ss:$8 sm:$0xf] %vm3_vm1, %v1676_v52   ;;  %1681 = vst.msk [vmem:[%s4079_s1 + $0x45] ss:$8 sm:$0x3c] %vm3_vm1, %v1679_v53  }
  0x52   :  { %734 = vrot.lane.b32.xlu0 %v733_v55, %s2121_s14  ;;  %v1683_v54 = vld [vmem:[%s4078_s0 + $0x220] ss:$4 sm:$0xff]   ;;  %1675 = vst.msk [vmem:[%s4079_s1 + $0x63] ss:$8 sm:$0xf0] %vm3_vm1, %v1673_v51  }
  0x53   :  { %v1690_v55 = vld [vmem:[%s4078_s0 + $0x260] ss:$4 sm:$0xff]   ;;  %1678 = vst.msk [vmem:[%s4079_s1 + $0x54] ss:$8 sm:$0xf0] %vm3_vm1, %v1676_v52  }
  0x54   :  { %766 = vrot.lane.b32.xlu1 %v765_v60, %s2122_s13  ;;  %1680 = vst.msk [vmem:[%s4079_s1 + $0x94] ss:$8 sm:$0x3] %vm3_vm1, %v1679_v53   ;;  %1682 = vst.msk [vmem:[%s4079_s1 + $0x45] ss:$8 sm:$0xc0] %vm3_vm1, %v1679_v53   ;;  %v908_v60 = vsel %vm315_vm0, %v1922_v46, %v1921_v45 }
  0x55   :  { %v1693_v56 = vld [vmem:[%s4078_s0 + $0x280] ss:$4 sm:$0xff]   ;;  %v1930_v58 = vld [vmem:[%s4078_s0 + $0x2a6] ss:$40 sm:$0xf]  }
  0x56   :  { %756 = vrot.lane.b32.xlu0 %v755_v61, %s2122_s13  ;;  %v1931_v59 = vld [vmem:[%s4078_s0 + $0x2a6] ss:$40 sm:$0xf0]   ;;  %1685 = vst.msk [vmem:[%s4079_s1 + $0x36] ss:$8 sm:$0xf0] %vm3_vm1, %v1683_v54  }
  0x57   :  { %1691 = vst.msk [vmem:[%s4079_s1 + $0x67] ss:$8 sm:$0xf] %vm3_vm1, %v1690_v55   ;;  %1684 = vst.msk [vmem:[%s4079_s1 + $0x85] ss:$8 sm:$0xf] %vm3_vm1, %v1683_v54   ;;  %v941_v5 = vsel %vm315_vm0, %v1931_v59, %v1930_v58 }
  0x58   :  { %788 = vrot.lane.b32.xlu1 %v787_v2, %s2122_s13  ;;  %1692 = vst.msk [vmem:[%s4079_s1 + $0x67] ss:$8 sm:$0xf0] %vm3_vm1, %v1690_v55   ;;  %1694 = vst.msk [vmem:[%s4079_s1 + $0xa0] ss:$8 sm:$0xf] %vm3_vm1, %v1693_v56  }
  0x59   :  { %1695 = vst.msk [vmem:[%s4079_s1 + $0xa0] ss:$8 sm:$0xf0] %vm3_vm1, %v1693_v56   ;;  %v1927_v61 = vld [vmem:[%s4078_s0 + $0x296] ss:$40 sm:$0xf]  }
  0x5a   :  { %777 = vrot.lane.b32.xlu0 %v776_v3, %s2122_s13  ;;  %v1928_v62 = vld [vmem:[%s4078_s0 + $0x296] ss:$40 sm:$0xf0]   ;;  %v1696_v63 = vld [vmem:[%s4078_s0 + $0x2a0] ss:$4 sm:$0xff]  }
  0x5b   :  { %v1700_v0 = vld [vmem:[%s4078_s0 + $0x2c0] ss:$4 sm:$0xff]   ;;  %1698 = vst.msk [vmem:[%s4079_s1 + $0x91] ss:$8 sm:$0x3c] %vm3_vm1, %v1696_v63  }
  0x5c   :  { %810 = vrot.lane.b32.xlu1 %v809_v8, %s2122_s13  ;;  %v1703_v1 = vld [vmem:[%s4078_s0 + $0x2e0] ss:$4 sm:$0xff]   ;;  %1702 = vst.msk [vmem:[%s4079_s1 + $0x82] ss:$8 sm:$0xf0] %vm3_vm1, %v1700_v0  }
  0x5d   :  { %1706 = vst.msk [vmem:[%s4079_s1 + $0x73] ss:$8 sm:$0xc0] %vm3_vm1, %v1703_v1   ;;  %v1710_v2 = vld [vmem:[%s4078_s0 + $0x320] ss:$4 sm:$0xff]  }
  0x5e   :  { %799 = vrot.lane.b32.xlu0 %v798_v9, %s2122_s13  ;;  %v1713_v3 = vld [vmem:[%s4078_s0 + $0x340] ss:$4 sm:$0xff]   ;;  %1697 = vst.msk [vmem:[%s4079_s1 + $0xe0] ss:$8 sm:$0x3] %vm3_vm1, %v1696_v63   ;;  %v930_v9 = vsel %vm315_vm0, %v1928_v62, %v1927_v61 }
  0x5f   :  { %v1717_v4 = vld [vmem:[%s4078_s0 + $0x360] ss:$4 sm:$0xff]   ;;  %1699 = vst.msk [vmem:[%s4079_s1 + $0x91] ss:$8 sm:$0xc0] %vm3_vm1, %v1696_v63  }
  0x60   :  { %832 = vrot.lane.b32.xlu1 %v831_v14, %s2122_s13  ;;  %1701 = vst.msk [vmem:[%s4079_s1 + $0xd1] ss:$8 sm:$0xf] %vm3_vm1, %v1700_v0   ;;  %1704 = vst.msk [vmem:[%s4079_s1 + $0xc2] ss:$8 sm:$0xf] %vm3_vm1, %v1703_v1  }
  0x61   :  { %1705 = vst.msk [vmem:[%s4079_s1 + $0xc2] ss:$8 sm:$0x30] %vm3_vm1, %v1703_v1   ;;  %1711 = vst.msk [vmem:[%s4079_s1 + $0xa4] ss:$8 sm:$0xf] %vm3_vm1, %v1710_v2  }
  0x62   :  { %821 = vrot.lane.b32.xlu0 %v820_v15, %s2122_s13  ;;  %1715 = vst.msk [vmem:[%s4079_s1 + $0x95] ss:$8 sm:$0x3c] %vm3_vm1, %v1713_v3   ;;  %1719 = vst.msk [vmem:[%s4079_s1 + $0x86] ss:$8 sm:$0xf0] %vm3_vm1, %v1717_v4  }
  0x63   :  { %v1720_v6 = vld [vmem:[%s4078_s0 + $0x380] ss:$4 sm:$0xff]   ;;  %1712 = vst.msk [vmem:[%s4079_s1 + $0xa4] ss:$8 sm:$0xf0] %vm3_vm1, %v1710_v2  }
  0x64   :  { %854 = vrot.lane.b32.xlu1 %v853_v20, %s2122_s13  ;;  %1714 = vst.msk [vmem:[%s4079_s1 + $0xe4] ss:$8 sm:$0x3] %vm3_vm1, %v1713_v3   ;;  %1716 = vst.msk [vmem:[%s4079_s1 + $0x95] ss:$8 sm:$0xc0] %vm3_vm1, %v1713_v3  }
  0x65   :  { %1718 = vst.msk [vmem:[%s4079_s1 + $0xd5] ss:$8 sm:$0xf] %vm3_vm1, %v1717_v4   ;;  %v1669_v7 = vld [vmem:[%s4078_s0 + $0x1a0] ss:$4 sm:$0xff]  }
  0x66   :  { %843 = vrot.lane.b32.xlu0 %v842_v21, %s2122_s13  ;;  %v1686_v8 = vld [vmem:[%s4078_s0 + $0x240] ss:$4 sm:$0xff]   ;;  %v1936_v10 = vld [vmem:[%s4078_s0 + $0x3de] ss:$40 sm:$0xf]  }
  0x67   :  { %v1937_v11 = vld [vmem:[%s4078_s0 + $0x3de] ss:$40 sm:$0xf0]   ;;  %1723 = vst.msk [vmem:[%s4079_s1 + $0x77] ss:$8 sm:$0xc0] %vm3_vm1, %v1720_v6  }
  0x68   :  { %876 = vrot.lane.b32.xlu1 %v875_v29, %s2122_s13  ;;  %1721 = vst.msk [vmem:[%s4079_s1 + $0xc6] ss:$8 sm:$0xf] %vm3_vm1, %v1720_v6   ;;  %1722 = vst.msk [vmem:[%s4079_s1 + $0xc6] ss:$8 sm:$0x30] %vm3_vm1, %v1720_v6   ;;  %v963_v17 = vsel %vm315_vm0, %v1937_v11, %v1936_v10 }
  0x69   :  { %1670 = vst.msk [vmem:[%s4079_s1 + $0x72] ss:$8 sm:$0xf] %vm3_vm1, %v1669_v7   ;;  %1687 = vst.msk [vmem:[%s4079_s1 + $0x76] ss:$8 sm:$0xf] %vm3_vm1, %v1686_v8  }
  0x6a   :  { %865 = vrot.lane.b32.xlu0 %v864_v35, %s2122_s13  ;;  %1671 = vst.msk [vmem:[%s4079_s1 + $0x72] ss:$8 sm:$0x30] %vm3_vm1, %v1669_v7   ;;  %1672 = vst.msk [vmem:[%s4079_s1 + $0x23] ss:$8 sm:$0xc0] %vm3_vm1, %v1669_v7  }
  0x6b   :  { %1688 = vst.msk [vmem:[%s4079_s1 + $0x76] ss:$8 sm:$0x30] %vm3_vm1, %v1686_v8   ;;  %1689 = vst.msk [vmem:[%s4079_s1 + $0x27] ss:$8 sm:$0xc0] %vm3_vm1, %v1686_v8  }
  0x6c   :  { %898 = vrot.lane.b32.xlu1 %v897_v44, %s2122_s13  ;;  %v1933_v12 = vld [vmem:[%s4078_s0 + $0x3ce] ss:$40 sm:$0xf]   ;;  %v1707_v14 = vld [vmem:[%s4078_s0 + $0x300] ss:$4 sm:$0xff]  }
  0x6d   :  { %v1934_v13 = vld [vmem:[%s4078_s0 + $0x3ce] ss:$40 sm:$0xf0]   ;;  %v1724_v15 = vld [vmem:[%s4078_s0 + $0x3a0] ss:$4 sm:$0xff]  }
  0x6e   :  { %887 = vrot.lane.b32.xlu0 %v886_v47, %s2122_s13  ;;  %v1727_v16 = vld [vmem:[%s4078_s0 + $0x3c0] ss:$4 sm:$0xff]   ;;  %v1942_v18 = vld [vmem:[%s4078_s0 + $0x1a] ss:$40 sm:$0xf]   ;;  %v952_v21 = vsel %vm315_vm0, %v1934_v13, %v1933_v12 }
  0x6f   :  { %v1943_v19 = vld [vmem:[%s4078_s0 + $0x1a] ss:$40 sm:$0xf0]   ;;  %1709 = vst.msk [vmem:[%s4079_s1 + $0xb3] ss:$8 sm:$0xf0] %vm3_vm1, %v1707_v14  }
  0x70   :  { %920 = vrot.lane.b32.xlu1 %v919_v57, %s2122_s13  ;;  %1726 = vst.msk [vmem:[%s4079_s1 + $0xb7] ss:$8 sm:$0xf0] %vm3_vm1, %v1724_v15   ;;  %1708 = vst.msk [vmem:[%s4079_s1 + $0xb3] ss:$8 sm:$0xf] %vm3_vm1, %v1707_v14   ;;  %v985_v31 = vsel %vm315_vm0, %v1943_v19, %v1942_v18 }
  0x71   :  { %1725 = vst.msk [vmem:[%s4079_s1 + $0xb7] ss:$8 sm:$0xf] %vm3_vm1, %v1724_v15   ;;  %1729 = vst.msk [vmem:[%s4079_s1 + $0xf0] ss:$8 sm:$0xf0] %vm3_vm1, %v1727_v16  }
  0x72   :  { %909 = vrot.lane.b32.xlu0 %v908_v60, %s2122_s13  ;;  %1728 = vst.msk [vmem:[%s4079_s1 + $0xf0] ss:$8 sm:$0xf] %vm3_vm1, %v1727_v16   ;;  %v1939_v22 = vld [vmem:[%s4078_s0 + $0xa] ss:$40 sm:$0xf]  }
  0x73   :  { %v1940_v23 = vld [vmem:[%s4078_s0 + $0xa] ss:$40 sm:$0xf0]   ;;  %v1734_v25 = vld [vmem:[%s4078_s0 + $0x400] ss:$4 sm:$0xff]  }
  0x74   :  { %942 = vrot.lane.b32.xlu1 %v941_v5, %s2122_s13  ;;  %v1737_v26 = vld [vmem:[%s4078_s0 + $0x420] ss:$4 sm:$0xff]   ;;  %1735 = vst.msk [vmem:[%s4079_s1 + $0x121] ss:$8 sm:$0xf] %vm3_vm1, %v1734_v25   ;;  %v974_v36 = vsel %vm315_vm0, %v1940_v23, %v1939_v22 }
  0x75   :  { %v1741_v27 = vld [vmem:[%s4078_s0 + $0x440] ss:$4 sm:$0xff]   ;;  %1738 = vst.msk [vmem:[%s4079_s1 + $0x112] ss:$8 sm:$0xf] %vm3_vm1, %v1737_v26  }
  0x76   :  { %931 = vrot.lane.b32.xlu0 %v930_v9, %s2122_s13  ;;  %v339_v20 = vpop.permute.xlu1 %338   ;;  %1743 = vst.msk [vmem:[%s4079_s1 + $0x103] ss:$8 sm:$0xf0] %vm3_vm1, %v1741_v27   ;;  %v1744_v28 = vld [vmem:[%s4078_s0 + $0x460] ss:$4 sm:$0xff]  }
  0x77   :  { %1768 = vst.msk [vmem:[%s4079_s1 + $0x40] sm:$0xff] %vm319_vm2, %v339_v20   ;;  %v1751_v29 = vld [vmem:[%s4078_s0 + $0x4a0] ss:$4 sm:$0xff]   ;;  %v1948_v37 = vld [vmem:[%s4078_s0 + $0x152] ss:$40 sm:$0xf]  }
  0x78   :  { %v318_v24 = vpop.permute.xlu0 %317   ;;  %964 = vrot.lane.b32.xlu1 %v963_v17, %s2122_s13  ;;  %v1754_v30 = vld [vmem:[%s4078_s0 + $0x4c0] ss:$4 sm:$0xff]   ;;  %1736 = vst.msk [vmem:[%s4079_s1 + $0xd2] ss:$8 sm:$0xf0] %vm3_vm1, %v1734_v25  }
  0x79   :  { %320 = vst.msk [vmem:[%s4079_s1] sm:$0xff] %vm319_vm2, %v318_v24   ;;  %v1758_v32 = vld [vmem:[%s4078_s0 + $0x4e0] ss:$4 sm:$0xff]   ;;  %v1949_v38 = vld [vmem:[%s4078_s0 + $0x152] ss:$40 sm:$0xf0]  }
  0x7a   :  { %1739 = vst.msk [vmem:[%s4079_s1 + $0x112] ss:$8 sm:$0x30] %vm3_vm1, %v1737_v26   ;;  %1740 = vst.msk [vmem:[%s4079_s1 + $0xc3] ss:$8 sm:$0xc0] %vm3_vm1, %v1737_v26   ;;  %953 = vrot.lane.b32.xlu0 %v952_v21, %s2122_s13  ;;  %v350_v35 = vpop.permute.xlu1 %349   ;;  %v1007_v42 = vsel %vm315_vm0, %v1949_v38, %v1948_v37 }
  0x7b   :  { %1742 = vst.msk [vmem:[%s4079_s1 + $0x103] ss:$8 sm:$0xf] %vm3_vm1, %v1741_v27   ;;  %1746 = vst.msk [vmem:[%s4079_s1 + $0xf4] ss:$8 sm:$0xf0] %vm3_vm1, %v1744_v28  }
  0x7c   :  { %1752 = vst.msk [vmem:[%s4079_s1 + $0x125] ss:$8 sm:$0xf] %vm3_vm1, %v1751_v29   ;;  %1755 = vst.msk [vmem:[%s4079_s1 + $0x116] ss:$8 sm:$0xf] %vm3_vm1, %v1754_v30   ;;  %v328_v39 = vpop.permute.xlu0 %327   ;;  %986 = vrot.lane.b32.xlu1 %v985_v31, %s2122_s13 }
  0x7d   :  { %1745 = vst.msk [vmem:[%s4079_s1 + $0xf4] ss:$8 sm:$0xf] %vm3_vm1, %v1744_v28   ;;  %1753 = vst.msk [vmem:[%s4079_s1 + $0xd6] ss:$8 sm:$0xf0] %vm3_vm1, %v1751_v29  }
  0x7e   :  { %1756 = vst.msk [vmem:[%s4079_s1 + $0x116] ss:$8 sm:$0x30] %vm3_vm1, %v1754_v30   ;;  %1757 = vst.msk [vmem:[%s4079_s1 + $0xc7] ss:$8 sm:$0xc0] %vm3_vm1, %v1754_v30   ;;  %975 = vrot.lane.b32.xlu0 %v974_v36, %s2122_s13  ;;  %v372_v43 = vpop.permute.xlu1 %371  }
  0x7f   :  { %v1730_v33 = vld [vmem:[%s4078_s0 + $0x3e0] ss:$4 sm:$0xff]   ;;  %1760 = vst.msk [vmem:[%s4079_s1 + $0x107] ss:$8 sm:$0xf0] %vm3_vm1, %v1758_v32  }
  0x80   :  { %v1747_v34 = vld [vmem:[%s4078_s0 + $0x480] ss:$4 sm:$0xff]   ;;  %1759 = vst.msk [vmem:[%s4079_s1 + $0x107] ss:$8 sm:$0xf] %vm3_vm1, %v1758_v32   ;;  %v361_v47 = vpop.permute.xlu0 %360   ;;  %1008 = vrot.lane.b32.xlu1 %v1007_v42, %s2122_s13 }
  0x81   :  { %1732 = vst.msk [vmem:[%s4079_s1 + $0xe1] ss:$8 sm:$0x3c] %vm3_vm1, %v1730_v33   ;;  %1749 = vst.msk [vmem:[%s4079_s1 + $0xe5] ss:$8 sm:$0x3c] %vm3_vm1, %v1747_v34  }
  0x82   :  { %1731 = vst.msk [vmem:[%s4079_s1 + $0x130] ss:$8 sm:$0x3] %vm3_vm1, %v1730_v33   ;;  %1733 = vst.msk [vmem:[%s4079_s1 + $0xe1] ss:$8 sm:$0xc0] %vm3_vm1, %v1730_v33   ;;  %v394_v51 = vpop.permute.xlu1 %393  }
  0x83   :  { %1748 = vst.msk [vmem:[%s4079_s1 + $0x134] ss:$8 sm:$0x3] %vm3_vm1, %v1747_v34   ;;  %1750 = vst.msk [vmem:[%s4079_s1 + $0xe5] ss:$8 sm:$0xc0] %vm3_vm1, %v1747_v34  }
  0x84   :  { %v1945_v40 = vld [vmem:[%s4078_s0 + $0x142] ss:$40 sm:$0xf]   ;;  %1771 = vst.msk [vmem:[%s4079_s1 + $0x60] sm:$0xff] %vm319_vm2, %v350_v35   ;;  %1765 = vst.msk [vmem:[%s4079_s1 + $0x20] sm:$0xff] %vm319_vm2, %v328_v39   ;;  %v383_v55 = vpop.permute.xlu0 %382  }
  0x85   :  { %v1946_v41 = vld [vmem:[%s4078_s0 + $0x142] ss:$40 sm:$0xf0]   ;;  %1777 = vst.msk [vmem:[%s4079_s1 + $0xa0] sm:$0xff] %vm319_vm2, %v372_v43   ;;  %1774 = vst.msk [vmem:[%s4079_s1 + $0x80] sm:$0xff] %vm319_vm2, %v361_v47  }
  0x86   :  { %v996_v44 = vsel %vm315_vm0, %v1946_v41, %v1945_v40  ;;  %v1954_v45 = vld [vmem:[%s4078_s0 + $0x28a] ss:$40 sm:$0xf]   ;;  %1783 = vst.msk [vmem:[%s4079_s1 + $0xe0] sm:$0xff] %vm319_vm2, %v394_v51   ;;  %1780 = vst.msk [vmem:[%s4079_s1 + $0xc0] sm:$0xff] %vm319_vm2, %v383_v55   ;;  %v416_v59 = vpop.permute.xlu1 %415  }
  0x87   :  { %v1955_v46 = vld [vmem:[%s4078_s0 + $0x28a] ss:$40 sm:$0xf0]   ;;  %997 = vrot.lane.b32.xlu0 %v996_v44, %s2122_s13  ;;  %1789 = vst.msk [vmem:[%s4079_s1 + $0x120] sm:$0xff] %vm319_vm2, %v416_v59  }
  0x88   :  { %v1951_v48 = vld [vmem:[%s4078_s0 + $0x162] ss:$40 sm:$0xf]   ;;  %v1029_v50 = vsel %vm315_vm0, %v1955_v46, %v1954_v45  ;;  %v405_v63 = vpop.permute.xlu0 %404   ;;  %v1972_v5 = vld [vmem:[%s4078_s0 + $0x1e] ss:$40 sm:$0xf]  }
  0x89   :  { %v1952_v49 = vld [vmem:[%s4078_s0 + $0x162] ss:$40 sm:$0xf0]   ;;  %1030 = vrot.lane.b32.xlu1 %v1029_v50, %s2122_s13  ;;  %1786 = vst.msk [vmem:[%s4079_s1 + $0x100] sm:$0xff] %vm319_vm2, %v405_v63  }
  0x8a   :  { %v1018_v52 = vsel %vm315_vm0, %v1952_v49, %v1951_v48  ;;  %v1960_v53 = vld [vmem:[%s4078_s0 + $0x3c2] ss:$40 sm:$0xf]   ;;  %v438_v3 = vpop.permute.xlu1 %437   ;;  %v1973_v6 = vld [vmem:[%s4078_s0 + $0x1e] ss:$40 sm:$0xf0]  }
  0x8b   :  { %v1961_v54 = vld [vmem:[%s4078_s0 + $0x3c2] ss:$40 sm:$0xf0]   ;;  %1019 = vrot.lane.b32.xlu0 %v1018_v52, %s2122_s13  ;;  %v1969_v8 = vld [vmem:[%s4078_s0 + $0xe] ss:$40 sm:$0xf]   ;;  %v1095_v10 = vsel %vm315_vm0, %v1973_v6, %v1972_v5 }
  0x8c   :  { %v1957_v56 = vld [vmem:[%s4078_s0 + $0x29a] ss:$40 sm:$0xf]   ;;  %v1051_v58 = vsel %vm315_vm0, %v1961_v54, %v1960_v53  ;;  %v427_v7 = vpop.permute.xlu0 %426   ;;  %v1970_v9 = vld [vmem:[%s4078_s0 + $0xe] ss:$40 sm:$0xf0]  }
  0x8d   :  { %v1958_v57 = vld [vmem:[%s4078_s0 + $0x29a] ss:$40 sm:$0xf0]   ;;  %1052 = vrot.lane.b32.xlu1 %v1051_v58, %s2122_s13  ;;  %1795 = vst.msk [vmem:[%s4079_s1 + $0x28] sm:$0xff] %vm319_vm2, %v438_v3   ;;  %1792 = vst.msk [vmem:[%s4079_s1 + $0x8] sm:$0xff] %vm319_vm2, %v427_v7   ;;  %v1084_v12 = vsel %vm315_vm0, %v1970_v9, %v1969_v8 }
  0x8e   :  { %v1040_v60 = vsel %vm315_vm0, %v1958_v57, %v1957_v56  ;;  %v1966_v61 = vld [vmem:[%s4078_s0 + $0x3e2] ss:$40 sm:$0xf]   ;;  %v460_v11 = vpop.permute.xlu1 %459   ;;  %v1978_v13 = vld [vmem:[%s4078_s0 + $0x156] ss:$40 sm:$0xf]  }
  0x8f   :  { %v1967_v62 = vld [vmem:[%s4078_s0 + $0x3e2] ss:$40 sm:$0xf0]   ;;  %1041 = vrot.lane.b32.xlu0 %v1040_v60, %s2122_s13  ;;  %v1979_v14 = vld [vmem:[%s4078_s0 + $0x156] ss:$40 sm:$0xf0]  }
  0x90   :  { %v1963_v0 = vld [vmem:[%s4078_s0 + $0x3d2] ss:$40 sm:$0xf]   ;;  %v1073_v2 = vsel %vm315_vm0, %v1967_v62, %v1966_v61  ;;  %v449_v15 = vpop.permute.xlu0 %448   ;;  %v1975_v16 = vld [vmem:[%s4078_s0 + $0x146] ss:$40 sm:$0xf]   ;;  %v1117_v18 = vsel %vm315_vm0, %v1979_v14, %v1978_v13 }
  0x91   :  { %v1964_v1 = vld [vmem:[%s4078_s0 + $0x3d2] ss:$40 sm:$0xf0]   ;;  %1074 = vrot.lane.b32.xlu1 %v1073_v2, %s2122_s13  ;;  %v1976_v17 = vld [vmem:[%s4078_s0 + $0x146] ss:$40 sm:$0xf0]  }
  0x92   :  { %v1062_v4 = vsel %vm315_vm0, %v1964_v1, %v1963_v0  ;;  %1801 = vst.msk [vmem:[%s4079_s1 + $0x68] sm:$0xff] %vm319_vm2, %v460_v11   ;;  %1798 = vst.msk [vmem:[%s4079_s1 + $0x48] sm:$0xff] %vm319_vm2, %v449_v15   ;;  %v482_v19 = vpop.permute.xlu1 %481   ;;  %v1106_v20 = vsel %vm315_vm0, %v1976_v17, %v1975_v16  ;;  %v1984_v21 = vld [vmem:[%s4078_s0 + $0x28e] ss:$40 sm:$0xf]  }
  0x93   :  { %1063 = vrot.lane.b32.xlu0 %v1062_v4, %s2122_s13  ;;  %v1985_v22 = vld [vmem:[%s4078_s0 + $0x28e] ss:$40 sm:$0xf0]   ;;  %1807 = vst.msk [vmem:[%s4079_s1 + $0xa8] sm:$0xff] %vm319_vm2, %v482_v19  }
  0x94   :  { %v471_v23 = vpop.permute.xlu0 %470   ;;  %v1981_v24 = vld [vmem:[%s4078_s0 + $0x166] ss:$40 sm:$0xf]   ;;  %v1139_v26 = vsel %vm315_vm0, %v1985_v22, %v1984_v21  ;;  %v2001_v45 = vld [vmem:[%s4078_s0 + $0x11] ss:$40 sm:$0xf]  }
  0x95   :  { %1096 = vrot.lane.b32.xlu1 %v1095_v10, %s2122_s13  ;;  %v1982_v25 = vld [vmem:[%s4078_s0 + $0x166] ss:$40 sm:$0xf0]   ;;  %1804 = vst.msk [vmem:[%s4079_s1 + $0x88] sm:$0xff] %vm319_vm2, %v471_v23  }
  0x96   :  { %v504_v27 = vpop.permute.xlu1 %503   ;;  %v1128_v28 = vsel %vm315_vm0, %v1982_v25, %v1981_v24  ;;  %v1990_v29 = vld [vmem:[%s4078_s0 + $0x3c6] ss:$40 sm:$0xf]   ;;  %v2002_v46 = vld [vmem:[%s4078_s0 + $0x11] ss:$40 sm:$0xf0]  }
  0x97   :  { %1085 = vrot.lane.b32.xlu0 %v1084_v12, %s2122_s13  ;;  %v1991_v30 = vld [vmem:[%s4078_s0 + $0x3c6] ss:$40 sm:$0xf0]   ;;  %1813 = vst.msk [vmem:[%s4079_s1 + $0xe8] sm:$0xff] %vm319_vm2, %v504_v27   ;;  %v1204_v50 = vsel %vm315_vm0, %v2002_v46, %v2001_v45 }
  0x98   :  { %v493_v31 = vpop.permute.xlu0 %492   ;;  %v1987_v32 = vld [vmem:[%s4078_s0 + $0x29e] ss:$40 sm:$0xf]   ;;  %v1161_v34 = vsel %vm315_vm0, %v1991_v30, %v1990_v29  ;;  %v1999_v48 = vld [vmem:[%s4078_s0 + $0x1] ss:$40 sm:$0xf]  }
  0x99   :  { %1118 = vrot.lane.b32.xlu1 %v1117_v18, %s2122_s13  ;;  %v1988_v33 = vld [vmem:[%s4078_s0 + $0x29e] ss:$40 sm:$0xf0]   ;;  %1810 = vst.msk [vmem:[%s4079_s1 + $0xc8] sm:$0xff] %vm319_vm2, %v493_v31  }
  0x9a   :  { %v526_v35 = vpop.permute.xlu1 %525   ;;  %v1150_v36 = vsel %vm315_vm0, %v1988_v33, %v1987_v32  ;;  %v1996_v37 = vld [vmem:[%s4078_s0 + $0x3e6] ss:$40 sm:$0xf]   ;;  %v2000_v49 = vld [vmem:[%s4078_s0 + $0x1] ss:$40 sm:$0xf0]  }
  0x9b   :  { %1107 = vrot.lane.b32.xlu0 %v1106_v20, %s2122_s13  ;;  %v1997_v38 = vld [vmem:[%s4078_s0 + $0x3e6] ss:$40 sm:$0xf0]   ;;  %1819 = vst.msk [vmem:[%s4079_s1 + $0x128] sm:$0xff] %vm319_vm2, %v526_v35   ;;  %v1194_v52 = vsel %vm315_vm0, %v2000_v49, %v1999_v48 }
  0x9c   :  { %v515_v39 = vpop.permute.xlu0 %514   ;;  %v1993_v40 = vld [vmem:[%s4078_s0 + $0x3d6] ss:$40 sm:$0xf]   ;;  %v1183_v42 = vsel %vm315_vm0, %v1997_v38, %v1996_v37  ;;  %v2007_v53 = vld [vmem:[%s4078_s0 + $0x149] ss:$40 sm:$0xf]  }
  0x9d   :  { %1140 = vrot.lane.b32.xlu1 %v1139_v26, %s2122_s13  ;;  %v1994_v41 = vld [vmem:[%s4078_s0 + $0x3d6] ss:$40 sm:$0xf0]   ;;  %1816 = vst.msk [vmem:[%s4079_s1 + $0x108] sm:$0xff] %vm319_vm2, %v515_v39  }
  0x9e   :  { %v548_v43 = vpop.permute.xlu1 %547   ;;  %v1172_v44 = vsel %vm315_vm0, %v1994_v41, %v1993_v40  ;;  %v2008_v54 = vld [vmem:[%s4078_s0 + $0x149] ss:$40 sm:$0xf0]   ;;  %v2031_v21 = vld [vmem:[%s4078_s0 + $0x15] ss:$40 sm:$0xf]  }
  0x9f   :  { %1129 = vrot.lane.b32.xlu0 %v1128_v28, %s2122_s13  ;;  %1825 = vst.msk [vmem:[%s4079_s1 + $0x30] sm:$0xff] %vm319_vm2, %v548_v43   ;;  %v2004_v56 = vld [vmem:[%s4078_s0 + $0x21] ss:$40 sm:$0xf]   ;;  %v1226_v58 = vsel %vm315_vm0, %v2008_v54, %v2007_v53 }
  0xa0   :  { %v537_v47 = vpop.permute.xlu0 %536   ;;  %v2005_v57 = vld [vmem:[%s4078_s0 + $0x21] ss:$40 sm:$0xf0]   ;;  %v2032_v22 = vld [vmem:[%s4078_s0 + $0x15] ss:$40 sm:$0xf0]  }
  0xa1   :  { %1162 = vrot.lane.b32.xlu1 %v1161_v34, %s2122_s13  ;;  %1822 = vst.msk [vmem:[%s4079_s1 + $0x10] sm:$0xff] %vm319_vm2, %v537_v47   ;;  %v1215_v60 = vsel %vm315_vm0, %v2005_v57, %v2004_v56  ;;  %v2013_v61 = vld [vmem:[%s4078_s0 + $0x281] ss:$40 sm:$0xf]   ;;  %v1314_v26 = vsel %vm315_vm0, %v2032_v22, %v2031_v21 }
  0xa2   :  { %v570_v51 = vpop.permute.xlu1 %569   ;;  %v2014_v62 = vld [vmem:[%s4078_s0 + $0x281] ss:$40 sm:$0xf0]   ;;  %v2028_v24 = vld [vmem:[%s4078_s0 + $0x5] ss:$40 sm:$0xf]  }
  0xa3   :  { %1151 = vrot.lane.b32.xlu0 %v1150_v36, %s2122_s13  ;;  %1831 = vst.msk [vmem:[%s4079_s1 + $0x70] sm:$0xff] %vm319_vm2, %v570_v51   ;;  %v2010_v0 = vld [vmem:[%s4078_s0 + $0x159] ss:$40 sm:$0xf]   ;;  %v1248_v2 = vsel %vm315_vm0, %v2014_v62, %v2013_v61 }
  0xa4   :  { %v559_v55 = vpop.permute.xlu0 %558   ;;  %v2011_v1 = vld [vmem:[%s4078_s0 + $0x159] ss:$40 sm:$0xf0]   ;;  %v2029_v25 = vld [vmem:[%s4078_s0 + $0x5] ss:$40 sm:$0xf0]  }
  0xa5   :  { %1184 = vrot.lane.b32.xlu1 %v1183_v42, %s2122_s13  ;;  %1828 = vst.msk [vmem:[%s4079_s1 + $0x50] sm:$0xff] %vm319_vm2, %v559_v55   ;;  %v1237_v4 = vsel %vm315_vm0, %v2011_v1, %v2010_v0  ;;  %v2019_v5 = vld [vmem:[%s4078_s0 + $0x2a1] ss:$40 sm:$0xf]   ;;  %v1303_v28 = vsel %vm315_vm0, %v2029_v25, %v2028_v24 }
  0xa6   :  { %v592_v59 = vpop.permute.xlu1 %591   ;;  %v2020_v6 = vld [vmem:[%s4078_s0 + $0x2a1] ss:$40 sm:$0xf0]   ;;  %v2037_v29 = vld [vmem:[%s4078_s0 + $0x14d] ss:$40 sm:$0xf]  }
  0xa7   :  { %1173 = vrot.lane.b32.xlu0 %v1172_v44, %s2122_s13  ;;  %1837 = vst.msk [vmem:[%s4079_s1 + $0xb0] sm:$0xff] %vm319_vm2, %v592_v59   ;;  %v2016_v8 = vld [vmem:[%s4078_s0 + $0x291] ss:$40 sm:$0xf]   ;;  %v1270_v10 = vsel %vm315_vm0, %v2020_v6, %v2019_v5 }
  0xa8   :  { %v581_v63 = vpop.permute.xlu0 %580   ;;  %v2017_v9 = vld [vmem:[%s4078_s0 + $0x291] ss:$40 sm:$0xf0]   ;;  %v2038_v30 = vld [vmem:[%s4078_s0 + $0x14d] ss:$40 sm:$0xf0]  }
  0xa9   :  { %1205 = vrot.lane.b32.xlu1 %v1204_v50, %s2123_s16  ;;  %1834 = vst.msk [vmem:[%s4079_s1 + $0x90] sm:$0xff] %vm319_vm2, %v581_v63   ;;  %v1259_v12 = vsel %vm315_vm0, %v2017_v9, %v2016_v8  ;;  %v2025_v13 = vld [vmem:[%s4078_s0 + $0x3d9] ss:$40 sm:$0xf]   ;;  %v1336_v34 = vsel %vm315_vm0, %v2038_v30, %v2037_v29 }
  0xaa   :  { %v614_v3 = vpop.permute.xlu1 %613   ;;  %v2026_v14 = vld [vmem:[%s4078_s0 + $0x3d9] ss:$40 sm:$0xf0]   ;;  %v2034_v32 = vld [vmem:[%s4078_s0 + $0x25] ss:$40 sm:$0xf]  }
  0xab   :  { %1195 = vrot.lane.b32.xlu0 %v1194_v52, %s2123_s16  ;;  %1843 = vst.msk [vmem:[%s4079_s1 + $0xf0] sm:$0xff] %vm319_vm2, %v614_v3   ;;  %v2022_v16 = vld [vmem:[%s4078_s0 + $0x3c9] ss:$40 sm:$0xf]   ;;  %v1292_v18 = vsel %vm315_vm0, %v2026_v14, %v2025_v13 }
  0xac   :  { %v603_v7 = vpop.permute.xlu0 %602   ;;  %v2023_v17 = vld [vmem:[%s4078_s0 + $0x3c9] ss:$40 sm:$0xf0]   ;;  %v2035_v33 = vld [vmem:[%s4078_s0 + $0x25] ss:$40 sm:$0xf0]  }
  0xad   :  { %1227 = vrot.lane.b32.xlu1 %v1226_v58, %s2123_s16  ;;  %1840 = vst.msk [vmem:[%s4079_s1 + $0xd0] sm:$0xff] %vm319_vm2, %v603_v7   ;;  %v1281_v20 = vsel %vm315_vm0, %v2023_v17, %v2022_v16  ;;  %v1325_v36 = vsel %vm315_vm0, %v2035_v33, %v2034_v32  ;;  %v2043_v37 = vld [vmem:[%s4078_s0 + $0x285] ss:$40 sm:$0xf]  }
  0xae   :  { %v636_v11 = vpop.permute.xlu1 %635   ;;  %v2044_v38 = vld [vmem:[%s4078_s0 + $0x285] ss:$40 sm:$0xf0]   ;;  %v2061_v61 = vld [vmem:[%s4078_s0 + $0x19] ss:$40 sm:$0xf]  }
  0xaf   :  { %1216 = vrot.lane.b32.xlu0 %v1215_v60, %s2123_s16  ;;  %1849 = vst.msk [vmem:[%s4079_s1 + $0x130] sm:$0xff] %vm319_vm2, %v636_v11   ;;  %v2040_v40 = vld [vmem:[%s4078_s0 + $0x15d] ss:$40 sm:$0xf]   ;;  %v1358_v42 = vsel %vm315_vm0, %v2044_v38, %v2043_v37 }
  0xb0   :  { %v625_v15 = vpop.permute.xlu0 %624   ;;  %v2041_v41 = vld [vmem:[%s4078_s0 + $0x15d] ss:$40 sm:$0xf0]   ;;  %v2062_v62 = vld [vmem:[%s4078_s0 + $0x19] ss:$40 sm:$0xf0]  }
  0xb1   :  { %1249 = vrot.lane.b32.xlu1 %v1248_v2, %s2123_s16  ;;  %1846 = vst.msk [vmem:[%s4079_s1 + $0x110] sm:$0xff] %vm319_vm2, %v625_v15   ;;  %v1347_v44 = vsel %vm315_vm0, %v2041_v41, %v2040_v40  ;;  %v2049_v45 = vld [vmem:[%s4078_s0 + $0x2a5] ss:$40 sm:$0xf]   ;;  %v1424_v2 = vsel %vm315_vm0, %v2062_v62, %v2061_v61 }
  0xb2   :  { %v658_v19 = vpop.permute.xlu1 %657   ;;  %v2050_v46 = vld [vmem:[%s4078_s0 + $0x2a5] ss:$40 sm:$0xf0]   ;;  %v2058_v0 = vld [vmem:[%s4078_s0 + $0x9] ss:$40 sm:$0xf]  }
  0xb3   :  { %1238 = vrot.lane.b32.xlu0 %v1237_v4, %s2123_s16  ;;  %1855 = vst.msk [vmem:[%s4079_s1 + $0x38] sm:$0xff] %vm319_vm2, %v658_v19   ;;  %v2046_v48 = vld [vmem:[%s4078_s0 + $0x295] ss:$40 sm:$0xf]   ;;  %v1380_v50 = vsel %vm315_vm0, %v2050_v46, %v2049_v45 }
  0xb4   :  { %v647_v23 = vpop.permute.xlu0 %646   ;;  %v2047_v49 = vld [vmem:[%s4078_s0 + $0x295] ss:$40 sm:$0xf0]   ;;  %v2059_v1 = vld [vmem:[%s4078_s0 + $0x9] ss:$40 sm:$0xf0]  }
  0xb5   :  { %1271 = vrot.lane.b32.xlu1 %v1270_v10, %s2123_s16  ;;  %1852 = vst.msk [vmem:[%s4079_s1 + $0x18] sm:$0xff] %vm319_vm2, %v647_v23   ;;  %v1369_v52 = vsel %vm315_vm0, %v2047_v49, %v2046_v48  ;;  %v2055_v53 = vld [vmem:[%s4078_s0 + $0x3dd] ss:$40 sm:$0xf]   ;;  %v1413_v4 = vsel %vm315_vm0, %v2059_v1, %v2058_v0 }
  0xb6   :  { %v680_v27 = vpop.permute.xlu1 %679   ;;  %v2056_v54 = vld [vmem:[%s4078_s0 + $0x3dd] ss:$40 sm:$0xf0]   ;;  %v2067_v5 = vld [vmem:[%s4078_s0 + $0x151] ss:$40 sm:$0xf]  }
  0xb7   :  { %1260 = vrot.lane.b32.xlu0 %v1259_v12, %s2123_s16  ;;  %1861 = vst.msk [vmem:[%s4079_s1 + $0x78] sm:$0xff] %vm319_vm2, %v680_v27   ;;  %v2052_v56 = vld [vmem:[%s4078_s0 + $0x3cd] ss:$40 sm:$0xf]   ;;  %v1402_v58 = vsel %vm315_vm0, %v2056_v54, %v2055_v53 }
  0xb8   :  { %v669_v31 = vpop.permute.xlu0 %668   ;;  %v2053_v57 = vld [vmem:[%s4078_s0 + $0x3cd] ss:$40 sm:$0xf0]   ;;  %v2068_v6 = vld [vmem:[%s4078_s0 + $0x151] ss:$40 sm:$0xf0]  }
  0xb9   :  { %1293 = vrot.lane.b32.xlu1 %v1292_v18, %s2123_s16  ;;  %1858 = vst.msk [vmem:[%s4079_s1 + $0x58] sm:$0xff] %vm319_vm2, %v669_v31   ;;  %v1391_v60 = vsel %vm315_vm0, %v2053_v57, %v2052_v56  ;;  %v2064_v8 = vld [vmem:[%s4078_s0 + $0x141] ss:$40 sm:$0xf]   ;;  %v1446_v10 = vsel %vm315_vm0, %v2068_v6, %v2067_v5 }
  0xba   :  { %v702_v35 = vpop.permute.xlu1 %701   ;;  %v2065_v9 = vld [vmem:[%s4078_s0 + $0x141] ss:$40 sm:$0xf0]   ;;  %v2091_v37 = vld [vmem:[%s4078_s0 + $0x1d] ss:$40 sm:$0xf]  }
  0xbb   :  { %1282 = vrot.lane.b32.xlu0 %v1281_v20, %s2123_s16  ;;  %1867 = vst.msk [vmem:[%s4079_s1 + $0xb8] sm:$0xff] %vm319_vm2, %v702_v35   ;;  %v1435_v12 = vsel %vm315_vm0, %v2065_v9, %v2064_v8  ;;  %v2073_v13 = vld [vmem:[%s4078_s0 + $0x289] ss:$40 sm:$0xf]  }
  0xbc   :  { %v691_v39 = vpop.permute.xlu0 %690   ;;  %v2074_v14 = vld [vmem:[%s4078_s0 + $0x289] ss:$40 sm:$0xf0]   ;;  %v2092_v38 = vld [vmem:[%s4078_s0 + $0x1d] ss:$40 sm:$0xf0]  }
  0xbd   :  { %1315 = vrot.lane.b32.xlu1 %v1314_v26, %s2123_s16  ;;  %1864 = vst.msk [vmem:[%s4079_s1 + $0x98] sm:$0xff] %vm319_vm2, %v691_v39   ;;  %v2070_v16 = vld [vmem:[%s4078_s0 + $0x161] ss:$40 sm:$0xf]   ;;  %v1468_v18 = vsel %vm315_vm0, %v2074_v14, %v2073_v13 }
  0xbe   :  { %v724_v43 = vpop.permute.xlu1 %723   ;;  %v2071_v17 = vld [vmem:[%s4078_s0 + $0x161] ss:$40 sm:$0xf0]   ;;  %v2088_v40 = vld [vmem:[%s4078_s0 + $0xd] ss:$40 sm:$0xf]  }
  0xbf   :  { %1304 = vrot.lane.b32.xlu0 %v1303_v28, %s2123_s16  ;;  %1873 = vst.msk [vmem:[%s4079_s1 + $0xf8] sm:$0xff] %vm319_vm2, %v724_v43   ;;  %v1457_v20 = vsel %vm315_vm0, %v2071_v17, %v2070_v16  ;;  %v2079_v21 = vld [vmem:[%s4078_s0 + $0x3c1] ss:$40 sm:$0xf]  }
  0xc0   :  { %v713_v47 = vpop.permute.xlu0 %712   ;;  %v2080_v22 = vld [vmem:[%s4078_s0 + $0x3c1] ss:$40 sm:$0xf0]   ;;  %v2089_v41 = vld [vmem:[%s4078_s0 + $0xd] ss:$40 sm:$0xf0]  }
  0xc1   :  { %1337 = vrot.lane.b32.xlu1 %v1336_v34, %s2123_s16  ;;  %1870 = vst.msk [vmem:[%s4079_s1 + $0xd8] sm:$0xff] %vm319_vm2, %v713_v47   ;;  %v2076_v24 = vld [vmem:[%s4078_s0 + $0x299] ss:$40 sm:$0xf]   ;;  %v1490_v26 = vsel %vm315_vm0, %v2080_v22, %v2079_v21 }
  0xc2   :  { %v746_v51 = vpop.permute.xlu1 %745   ;;  %v2077_v25 = vld [vmem:[%s4078_s0 + $0x299] ss:$40 sm:$0xf0]   ;;  %v2097_v45 = vld [vmem:[%s4078_s0 + $0x155] ss:$40 sm:$0xf]  }
  0xc3   :  { %1326 = vrot.lane.b32.xlu0 %v1325_v36, %s2123_s16  ;;  %1879 = vst.msk [vmem:[%s4079_s1 + $0x138] sm:$0xff] %vm319_vm2, %v746_v51   ;;  %v1479_v28 = vsel %vm315_vm0, %v2077_v25, %v2076_v24  ;;  %v2085_v29 = vld [vmem:[%s4078_s0 + $0x3e1] ss:$40 sm:$0xf]  }
  0xc4   :  { %v735_v55 = vpop.permute.xlu0 %734   ;;  %v2086_v30 = vld [vmem:[%s4078_s0 + $0x3e1] ss:$40 sm:$0xf0]   ;;  %v2098_v46 = vld [vmem:[%s4078_s0 + $0x155] ss:$40 sm:$0xf0]  }
  0xc5   :  { %1359 = vrot.lane.b32.xlu1 %v1358_v42, %s2123_s16  ;;  %1876 = vst.msk [vmem:[%s4079_s1 + $0x118] sm:$0xff] %vm319_vm2, %v735_v55   ;;  %v2082_v32 = vld [vmem:[%s4078_s0 + $0x3d1] ss:$40 sm:$0xf]   ;;  %v1512_v34 = vsel %vm315_vm0, %v2086_v30, %v2085_v29  ;;  %v1534_v42 = vsel %vm315_vm0, %v2092_v38, %v2091_v37 }
  0xc6   :  { %v767_v59 = vpop.permute.xlu1 %766   ;;  %v2083_v33 = vld [vmem:[%s4078_s0 + $0x3d1] ss:$40 sm:$0xf0]   ;;  %v2094_v48 = vld [vmem:[%s4078_s0 + $0x145] ss:$40 sm:$0xf]  }
  0xc7   :  { %1348 = vrot.lane.b32.xlu0 %v1347_v44, %s2123_s16  ;;  %1884 = vst.msk [vmem:[%s4079_s1 + $0x20] sm:$0xff] %vm758_vm3, %v767_v59   ;;  %v1501_v36 = vsel %vm315_vm0, %v2083_v33, %v2082_v32  ;;  %v1523_v44 = vsel %vm315_vm0, %v2089_v41, %v2088_v40  ;;  %v2095_v49 = vld [vmem:[%s4078_s0 + $0x145] ss:$40 sm:$0xf0]  }
  0xc8   :  { %v757_v63 = vpop.permute.xlu0 %756   ;;  %v2103_v53 = vld [vmem:[%s4078_s0 + $0x28d] ss:$40 sm:$0xf]  }
  0xc9   :  { %1381 = vrot.lane.b32.xlu1 %v1380_v50, %s2123_s16  ;;  %759 = vst.msk [vmem:[%s4079_s1] sm:$0xff] %vm758_vm3, %v757_v63   ;;  %v1556_v50 = vsel %vm315_vm0, %v2098_v46, %v2097_v45  ;;  %v2104_v54 = vld [vmem:[%s4078_s0 + $0x28d] ss:$40 sm:$0xf0]  }
  0xca   :  { %v789_v3 = vpop.permute.xlu1 %788   ;;  %v2100_v56 = vld [vmem:[%s4078_s0 + $0x165] ss:$40 sm:$0xf]  }
  0xcb   :  { %1370 = vrot.lane.b32.xlu0 %v1369_v52, %s2123_s16  ;;  %1890 = vst.msk [vmem:[%s4079_s1 + $0x60] sm:$0xff] %vm758_vm3, %v789_v3   ;;  %v1545_v52 = vsel %vm315_vm0, %v2095_v49, %v2094_v48  ;;  %v2101_v57 = vld [vmem:[%s4078_s0 + $0x165] ss:$40 sm:$0xf0]  }
  0xcc   :  { %v778_v7 = vpop.permute.xlu0 %777   ;;  %v2109_v61 = vld [vmem:[%s4078_s0 + $0x3c5] ss:$40 sm:$0xf]  }
  0xcd   :  { %1403 = vrot.lane.b32.xlu1 %v1402_v58, %s2123_s16  ;;  %1887 = vst.msk [vmem:[%s4079_s1 + $0x40] sm:$0xff] %vm758_vm3, %v778_v7   ;;  %v1578_v58 = vsel %vm315_vm0, %v2104_v54, %v2103_v53  ;;  %v2110_v62 = vld [vmem:[%s4078_s0 + $0x3c5] ss:$40 sm:$0xf0]  }
  0xce   :  { %v811_v11 = vpop.permute.xlu1 %810   ;;  %v2106_v0 = vld [vmem:[%s4078_s0 + $0x29d] ss:$40 sm:$0xf]  }
  0xcf   :  { %1392 = vrot.lane.b32.xlu0 %v1391_v60, %s2123_s16  ;;  %1896 = vst.msk [vmem:[%s4079_s1 + $0xa0] sm:$0xff] %vm758_vm3, %v811_v11   ;;  %v1567_v60 = vsel %vm315_vm0, %v2101_v57, %v2100_v56  ;;  %v2107_v1 = vld [vmem:[%s4078_s0 + $0x29d] ss:$40 sm:$0xf0]  }
  0xd0   :  { %v800_v15 = vpop.permute.xlu0 %799   ;;  %v2115_v5 = vld [vmem:[%s4078_s0 + $0x3e5] ss:$40 sm:$0xf]  }
  0xd1   :  { %1425 = vrot.lane.b32.xlu1 %v1424_v2, %s2123_s16  ;;  %1893 = vst.msk [vmem:[%s4079_s1 + $0x80] sm:$0xff] %vm758_vm3, %v800_v15   ;;  %v1600_v2 = vsel %vm315_vm0, %v2110_v62, %v2109_v61  ;;  %v2116_v6 = vld [vmem:[%s4078_s0 + $0x3e5] ss:$40 sm:$0xf0]  }
  0xd2   :  { %v833_v19 = vpop.permute.xlu1 %832   ;;  %v2112_v8 = vld [vmem:[%s4078_s0 + $0x3d5] ss:$40 sm:$0xf]  }
  0xd3   :  { %1414 = vrot.lane.b32.xlu0 %v1413_v4, %s2123_s16  ;;  %1902 = vst.msk [vmem:[%s4079_s1 + $0xe0] sm:$0xff] %vm758_vm3, %v833_v19   ;;  %v1589_v4 = vsel %vm315_vm0, %v2107_v1, %v2106_v0  ;;  %v2113_v9 = vld [vmem:[%s4078_s0 + $0x3d5] ss:$40 sm:$0xf0]  }
  0xd4   :  { %v822_v23 = vpop.permute.xlu0 %821  }
  0xd5   :  { %1447 = vrot.lane.b32.xlu1 %v1446_v10, %s2123_s16  ;;  %1899 = vst.msk [vmem:[%s4079_s1 + $0xc0] sm:$0xff] %vm758_vm3, %v822_v23   ;;  %v1622_v10 = vsel %vm315_vm0, %v2116_v6, %v2115_v5 }
  0xd6   :  { %v855_v27 = vpop.permute.xlu1 %854  }
  0xd7   :  { %1436 = vrot.lane.b32.xlu0 %v1435_v12, %s2123_s16  ;;  %1908 = vst.msk [vmem:[%s4079_s1 + $0x120] sm:$0xff] %vm758_vm3, %v855_v27   ;;  %v1611_v12 = vsel %vm315_vm0, %v2113_v9, %v2112_v8 }
  0xd8   :  { %v844_v31 = vpop.permute.xlu0 %843  }
  0xd9   :  { %1469 = vrot.lane.b32.xlu1 %v1468_v18, %s2123_s16  ;;  %1905 = vst.msk [vmem:[%s4079_s1 + $0x100] sm:$0xff] %vm758_vm3, %v844_v31  }
  0xda   :  { %v877_v35 = vpop.permute.xlu1 %876  }
  0xdb   :  { %1458 = vrot.lane.b32.xlu0 %v1457_v20, %s2123_s16  ;;  %1914 = vst.msk [vmem:[%s4079_s1 + $0x28] sm:$0xff] %vm758_vm3, %v877_v35  }
  0xdc   :  { %v866_v39 = vpop.permute.xlu0 %865  }
  0xdd   :  { %1491 = vrot.lane.b32.xlu1 %v1490_v26, %s2123_s16  ;;  %1911 = vst.msk [vmem:[%s4079_s1 + $0x8] sm:$0xff] %vm758_vm3, %v866_v39  }
  0xde   :  { %v899_v43 = vpop.permute.xlu1 %898  }
  0xdf   :  { %1480 = vrot.lane.b32.xlu0 %v1479_v28, %s2123_s16  ;;  %1920 = vst.msk [vmem:[%s4079_s1 + $0x68] sm:$0xff] %vm758_vm3, %v899_v43  }
  0xe0   :  { %v888_v47 = vpop.permute.xlu0 %887  }
  0xe1   :  { %1513 = vrot.lane.b32.xlu1 %v1512_v34, %s2123_s16  ;;  %1917 = vst.msk [vmem:[%s4079_s1 + $0x48] sm:$0xff] %vm758_vm3, %v888_v47  }
  0xe2   :  { %v921_v51 = vpop.permute.xlu1 %920  }
  0xe3   :  { %1502 = vrot.lane.b32.xlu0 %v1501_v36, %s2123_s16  ;;  %1926 = vst.msk [vmem:[%s4079_s1 + $0xa8] sm:$0xff] %vm758_vm3, %v921_v51  }
  0xe4   :  { %v910_v55 = vpop.permute.xlu0 %909  }
  0xe5   :  { %1535 = vrot.lane.b32.xlu1 %v1534_v42, %s2123_s16  ;;  %1923 = vst.msk [vmem:[%s4079_s1 + $0x88] sm:$0xff] %vm758_vm3, %v910_v55  }
  0xe6   :  { %v943_v59 = vpop.permute.xlu1 %942  }
  0xe7   :  { %1524 = vrot.lane.b32.xlu0 %v1523_v44, %s2123_s16  ;;  %1932 = vst.msk [vmem:[%s4079_s1 + $0xe8] sm:$0xff] %vm758_vm3, %v943_v59  }
  0xe8   :  { %v932_v63 = vpop.permute.xlu0 %931  }
  0xe9   :  { %1557 = vrot.lane.b32.xlu1 %v1556_v50, %s2123_s16  ;;  %1929 = vst.msk [vmem:[%s4079_s1 + $0xc8] sm:$0xff] %vm758_vm3, %v932_v63  }
  0xea   :  { %v965_v3 = vpop.permute.xlu1 %964  }
  0xeb   :  { %1546 = vrot.lane.b32.xlu0 %v1545_v52, %s2123_s16  ;;  %1938 = vst.msk [vmem:[%s4079_s1 + $0x128] sm:$0xff] %vm758_vm3, %v965_v3  }
  0xec   :  { %v954_v7 = vpop.permute.xlu0 %953  }
  0xed   :  { %1579 = vrot.lane.b32.xlu1 %v1578_v58, %s2123_s16  ;;  %1935 = vst.msk [vmem:[%s4079_s1 + $0x108] sm:$0xff] %vm758_vm3, %v954_v7  }
  0xee   :  { %v987_v11 = vpop.permute.xlu1 %986  }
  0xef   :  { %1568 = vrot.lane.b32.xlu0 %v1567_v60, %s2123_s16  ;;  %1944 = vst.msk [vmem:[%s4079_s1 + $0x30] sm:$0xff] %vm758_vm3, %v987_v11  }
  0xf0   :  { %v976_v13 = vpop.permute.xlu0 %975  }
  0xf1   :  { %1601 = vrot.lane.b32.xlu1 %v1600_v2, %s2123_s16  ;;  %1941 = vst.msk [vmem:[%s4079_s1 + $0x10] sm:$0xff] %vm758_vm3, %v976_v13  }
  0xf2   :  { %v1009_v14 = vpop.permute.xlu1 %1008  }
  0xf3   :  { %1590 = vrot.lane.b32.xlu0 %v1589_v4, %s2123_s16  ;;  %1950 = vst.msk [vmem:[%s4079_s1 + $0x70] sm:$0xff] %vm758_vm3, %v1009_v14  }
  0xf5   :  { %1623 = vrot.lane.b32.xlu1 %v1622_v10, %s2123_s16 }
  0xf7   :  { %1612 = vrot.lane.b32.xlu0 %v1611_v12, %s2123_s16 }
  0xf9   :  { %v998_v15 = vpop.permute.xlu0 %997  }
  0xfa   :  { %1947 = vst.msk [vmem:[%s4079_s1 + $0x50] sm:$0xff] %vm758_vm3, %v998_v15  }
  0xfb   :  { %v1031_v16 = vpop.permute.xlu1 %1030  }
  0xfc   :  { %1956 = vst.msk [vmem:[%s4079_s1 + $0xb0] sm:$0xff] %vm758_vm3, %v1031_v16  }
  0xfd   :  { %v1020_v17 = vpop.permute.xlu0 %1019  }
  0xfe   :  { %1953 = vst.msk [vmem:[%s4079_s1 + $0x90] sm:$0xff] %vm758_vm3, %v1020_v17  }
  0xff   :  { %v1053_v18 = vpop.permute.xlu1 %1052  }
 0x100   :  { %1962 = vst.msk [vmem:[%s4079_s1 + $0xf0] sm:$0xff] %vm758_vm3, %v1053_v18  }
 0x101   :  { %v1042_v19 = vpop.permute.xlu0 %1041  }
 0x102   :  { %1959 = vst.msk [vmem:[%s4079_s1 + $0xd0] sm:$0xff] %vm758_vm3, %v1042_v19  }
 0x103   :  { %v1075_v20 = vpop.permute.xlu1 %1074  }
 0x104   :  { %1968 = vst.msk [vmem:[%s4079_s1 + $0x130] sm:$0xff] %vm758_vm3, %v1075_v20  }
 0x105   :  { %v1064_v21 = vpop.permute.xlu0 %1063  }
 0x106   :  { %1965 = vst.msk [vmem:[%s4079_s1 + $0x110] sm:$0xff] %vm758_vm3, %v1064_v21  }
 0x107   :  { %v1097_v22 = vpop.permute.xlu1 %1096  }
 0x108   :  { %1974 = vst.msk [vmem:[%s4079_s1 + $0x38] sm:$0xff] %vm758_vm3, %v1097_v22  }
 0x109   :  { %v1086_v23 = vpop.permute.xlu0 %1085  }
 0x10a   :  { %1971 = vst.msk [vmem:[%s4079_s1 + $0x18] sm:$0xff] %vm758_vm3, %v1086_v23  }
 0x10b   :  { %v1119_v24 = vpop.permute.xlu1 %1118  }
 0x10c   :  { %1980 = vst.msk [vmem:[%s4079_s1 + $0x78] sm:$0xff] %vm758_vm3, %v1119_v24  }
 0x10d   :  { %v1108_v25 = vpop.permute.xlu0 %1107  }
 0x10e   :  { %1977 = vst.msk [vmem:[%s4079_s1 + $0x58] sm:$0xff] %vm758_vm3, %v1108_v25  }
 0x10f   :  { %v1141_v26 = vpop.permute.xlu1 %1140  }
 0x110   :  { %1986 = vst.msk [vmem:[%s4079_s1 + $0xb8] sm:$0xff] %vm758_vm3, %v1141_v26  }
 0x111   :  { %v1130_v27 = vpop.permute.xlu0 %1129  }
 0x112   :  { %1983 = vst.msk [vmem:[%s4079_s1 + $0x98] sm:$0xff] %vm758_vm3, %v1130_v27  }
 0x113   :  { %v1163_v28 = vpop.permute.xlu1 %1162  }
 0x114   :  { %1992 = vst.msk [vmem:[%s4079_s1 + $0xf8] sm:$0xff] %vm758_vm3, %v1163_v28  }
 0x115   :  { %v1152_v29 = vpop.permute.xlu0 %1151  }
 0x116   :  { %1989 = vst.msk [vmem:[%s4079_s1 + $0xd8] sm:$0xff] %vm758_vm3, %v1152_v29  }
 0x117   :  { %v1185_v30 = vpop.permute.xlu1 %1184  }
 0x118   :  { %1998 = vst.msk [vmem:[%s4079_s1 + $0x138] sm:$0xff] %vm758_vm3, %v1185_v30  }
 0x119   :  { %v1174_v31 = vpop.permute.xlu0 %1173  }
 0x11a   :  { %1995 = vst.msk [vmem:[%s4079_s1 + $0x118] sm:$0xff] %vm758_vm3, %v1174_v31  }
 0x11b   :  { %v1206_v32 = vpop.permute.xlu1 %1205  }
 0x11c   :  { %2003 = vst.msk [vmem:[%s4079_s1 + $0x20] sm:$0xff] %vm1197_vm4, %v1206_v32  }
 0x11d   :  { %v1196_v33 = vpop.permute.xlu0 %1195  }
 0x11e   :  { %1198 = vst.msk [vmem:[%s4079_s1] sm:$0xff] %vm1197_vm4, %v1196_v33  }
 0x11f   :  { %v1228_v34 = vpop.permute.xlu1 %1227  }
 0x120   :  { %2009 = vst.msk [vmem:[%s4079_s1 + $0x60] sm:$0xff] %vm1197_vm4, %v1228_v34  }
 0x121   :  { %v1217_v35 = vpop.permute.xlu0 %1216  }
 0x122   :  { %2006 = vst.msk [vmem:[%s4079_s1 + $0x40] sm:$0xff] %vm1197_vm4, %v1217_v35  }
 0x123   :  { %v1250_v36 = vpop.permute.xlu1 %1249  }
 0x124   :  { %2015 = vst.msk [vmem:[%s4079_s1 + $0xa0] sm:$0xff] %vm1197_vm4, %v1250_v36  }
 0x125   :  { %v1239_v37 = vpop.permute.xlu0 %1238  }
 0x126   :  { %2012 = vst.msk [vmem:[%s4079_s1 + $0x80] sm:$0xff] %vm1197_vm4, %v1239_v37  }
 0x127   :  { %v1272_v38 = vpop.permute.xlu1 %1271  }
 0x128   :  { %2021 = vst.msk [vmem:[%s4079_s1 + $0xe0] sm:$0xff] %vm1197_vm4, %v1272_v38  }
 0x129   :  { %v1261_v39 = vpop.permute.xlu0 %1260  }
 0x12a   :  { %2018 = vst.msk [vmem:[%s4079_s1 + $0xc0] sm:$0xff] %vm1197_vm4, %v1261_v39  }
 0x12b   :  { %v1294_v40 = vpop.permute.xlu1 %1293  }
 0x12c   :  { %2027 = vst.msk [vmem:[%s4079_s1 + $0x120] sm:$0xff] %vm1197_vm4, %v1294_v40  }
 0x12d   :  { %v1283_v41 = vpop.permute.xlu0 %1282  }
 0x12e   :  { %2024 = vst.msk [vmem:[%s4079_s1 + $0x100] sm:$0xff] %vm1197_vm4, %v1283_v41  }
 0x12f   :  { %v1316_v42 = vpop.permute.xlu1 %1315  }
 0x130   :  { %2033 = vst.msk [vmem:[%s4079_s1 + $0x28] sm:$0xff] %vm1197_vm4, %v1316_v42  }
 0x131   :  { %v1305_v43 = vpop.permute.xlu0 %1304  }
 0x132   :  { %2030 = vst.msk [vmem:[%s4079_s1 + $0x8] sm:$0xff] %vm1197_vm4, %v1305_v43  }
 0x133   :  { %v1338_v44 = vpop.permute.xlu1 %1337  }
 0x134   :  { %2039 = vst.msk [vmem:[%s4079_s1 + $0x68] sm:$0xff] %vm1197_vm4, %v1338_v44  }
 0x135   :  { %v1327_v45 = vpop.permute.xlu0 %1326  }
 0x136   :  { %2036 = vst.msk [vmem:[%s4079_s1 + $0x48] sm:$0xff] %vm1197_vm4, %v1327_v45  }
 0x137   :  { %v1360_v46 = vpop.permute.xlu1 %1359  }
 0x138   :  { %2045 = vst.msk [vmem:[%s4079_s1 + $0xa8] sm:$0xff] %vm1197_vm4, %v1360_v46  }
 0x139   :  { %v1349_v47 = vpop.permute.xlu0 %1348  }
 0x13a   :  { %2042 = vst.msk [vmem:[%s4079_s1 + $0x88] sm:$0xff] %vm1197_vm4, %v1349_v47  }
 0x13b   :  { %v1382_v48 = vpop.permute.xlu1 %1381  }
 0x13c   :  { %2051 = vst.msk [vmem:[%s4079_s1 + $0xe8] sm:$0xff] %vm1197_vm4, %v1382_v48  }
 0x13d   :  { %v1371_v49 = vpop.permute.xlu0 %1370  }
 0x13e   :  { %2048 = vst.msk [vmem:[%s4079_s1 + $0xc8] sm:$0xff] %vm1197_vm4, %v1371_v49  }
 0x13f   :  { %v1404_v50 = vpop.permute.xlu1 %1403  }
 0x140   :  { %2057 = vst.msk [vmem:[%s4079_s1 + $0x128] sm:$0xff] %vm1197_vm4, %v1404_v50  }
 0x141   :  { %v1393_v51 = vpop.permute.xlu0 %1392  }
 0x142   :  { %2054 = vst.msk [vmem:[%s4079_s1 + $0x108] sm:$0xff] %vm1197_vm4, %v1393_v51  }
 0x143   :  { %v1426_v52 = vpop.permute.xlu1 %1425  }
 0x144   :  { %2063 = vst.msk [vmem:[%s4079_s1 + $0x30] sm:$0xff] %vm1197_vm4, %v1426_v52  }
 0x145   :  { %v1415_v53 = vpop.permute.xlu0 %1414  }
 0x146   :  { %2060 = vst.msk [vmem:[%s4079_s1 + $0x10] sm:$0xff] %vm1197_vm4, %v1415_v53  }
 0x147   :  { %v1448_v54 = vpop.permute.xlu1 %1447  }
 0x148   :  { %2069 = vst.msk [vmem:[%s4079_s1 + $0x70] sm:$0xff] %vm1197_vm4, %v1448_v54  }
 0x149   :  { %v1437_v55 = vpop.permute.xlu0 %1436  }
 0x14a   :  { %2066 = vst.msk [vmem:[%s4079_s1 + $0x50] sm:$0xff] %vm1197_vm4, %v1437_v55  }
 0x14b   :  { %v1470_v56 = vpop.permute.xlu1 %1469  }
 0x14c   :  { %2075 = vst.msk [vmem:[%s4079_s1 + $0xb0] sm:$0xff] %vm1197_vm4, %v1470_v56  }
 0x14d   :  { %v1459_v57 = vpop.permute.xlu0 %1458  }
 0x14e   :  { %2072 = vst.msk [vmem:[%s4079_s1 + $0x90] sm:$0xff] %vm1197_vm4, %v1459_v57  }
 0x14f   :  { %v1492_v58 = vpop.permute.xlu1 %1491  }
 0x150   :  { %2081 = vst.msk [vmem:[%s4079_s1 + $0xf0] sm:$0xff] %vm1197_vm4, %v1492_v58  }
 0x151   :  { %v1481_v59 = vpop.permute.xlu0 %1480  }
 0x152   :  { %2078 = vst.msk [vmem:[%s4079_s1 + $0xd0] sm:$0xff] %vm1197_vm4, %v1481_v59  }
 0x153   :  { %v1514_v60 = vpop.permute.xlu1 %1513  }
 0x154   :  { %2087 = vst.msk [vmem:[%s4079_s1 + $0x130] sm:$0xff] %vm1197_vm4, %v1514_v60  }
 0x155   :  { %v1503_v61 = vpop.permute.xlu0 %1502  }
 0x156   :  { %2084 = vst.msk [vmem:[%s4079_s1 + $0x110] sm:$0xff] %vm1197_vm4, %v1503_v61  }
 0x157   :  { %v1536_v62 = vpop.permute.xlu1 %1535  }
 0x158   :  { %2093 = vst.msk [vmem:[%s4079_s1 + $0x38] sm:$0xff] %vm1197_vm4, %v1536_v62  }
 0x159   :  { %v1525_v63 = vpop.permute.xlu0 %1524  }
 0x15a   :  { %2090 = vst.msk [vmem:[%s4079_s1 + $0x18] sm:$0xff] %vm1197_vm4, %v1525_v63  }
 0x15b   :  { %v1558_v0 = vpop.permute.xlu1 %1557  }
 0x15c   :  { %2099 = vst.msk [vmem:[%s4079_s1 + $0x78] sm:$0xff] %vm1197_vm4, %v1558_v0  }
 0x15d   :  { %v1547_v1 = vpop.permute.xlu0 %1546  }
 0x15e   :  { %2096 = vst.msk [vmem:[%s4079_s1 + $0x58] sm:$0xff] %vm1197_vm4, %v1547_v1  }
 0x15f   :  { %v1580_v2 = vpop.permute.xlu1 %1579  }
 0x160   :  { %2105 = vst.msk [vmem:[%s4079_s1 + $0xb8] sm:$0xff] %vm1197_vm4, %v1580_v2  }
 0x161   :  { %v1569_v3 = vpop.permute.xlu0 %1568  }
 0x162   :  { %2102 = vst.msk [vmem:[%s4079_s1 + $0x98] sm:$0xff] %vm1197_vm4, %v1569_v3  }
 0x163   :  { %v1602_v4 = vpop.permute.xlu1 %1601  }
 0x164   :  { %2111 = vst.msk [vmem:[%s4079_s1 + $0xf8] sm:$0xff] %vm1197_vm4, %v1602_v4  }
 0x165   :  { %v1591_v5 = vpop.permute.xlu0 %1590  }
 0x166   :  { %2108 = vst.msk [vmem:[%s4079_s1 + $0xd8] sm:$0xff] %vm1197_vm4, %v1591_v5  }
 0x167   :  { %v1624_v6 = vpop.permute.xlu1 %1623  }
 0x168   :  { %2117 = vst.msk [vmem:[%s4079_s1 + $0x138] sm:$0xff] %vm1197_vm4, %v1624_v6  }
 0x169   :  { %v1613_v7 = vpop.permute.xlu0 %1612  }
 0x16a   :  { %2114 = vst.msk [vmem:[%s4079_s1 + $0x118] sm:$0xff] %vm1197_vm4, %v1613_v7  }

// kernel: tile.17
= control target key start
LH: loop header
LB: loop body
LE: loop exit
PB: predicated region body
PF: predicated region fallthrough
CT: control target
= control target key end

     0   :  { %vm92_vm0 = vcmask 1047556   ;;  %s459_s14 = smov 96   ;;  %s460_s26 = smov 64   ;;  %vm3_vm1 = vcmask 261120   ;;  %vm96_vm2 = vcmask 1048320   ;;  %vm183_vm3 = vcmask 785920   ;;  %s904_s0 = inlined_call_operand.vmem [shape: f32[32,8,32], index: 0, kind: input, shape index: {}]   ;;  %s905_s1 = inlined_call_operand.vmem [shape: f32[32,256], index: 1, kind: output, shape index: {}]  }
   0x1   :  { %v392_v0 = vld [vmem:[%s904_s0 + $0x7] ss:$8 sm:$0xf]   ;;  %v387_v3 = vld [vmem:[%s904_s0 + $0x3] ss:$8 sm:$0xf]  }
   0x2   :  { %v393_v1 = vld [vmem:[%s904_s0 + $0x7] ss:$8 sm:$0xf0]   ;;  %v388_v4 = vld [vmem:[%s904_s0 + $0x3] ss:$8 sm:$0xf0]  }
   0x3   :  { %v114_v2 = vsel %vm92_vm0, %v393_v1, %v392_v0  ;;  %v93_v5 = vsel %vm92_vm0, %v388_v4, %v387_v3  ;;  %v395_v6 = vld [vmem:[%s904_s0 + $0x87] ss:$8 sm:$0xf]   ;;  %v389_v9 = vld [vmem:[%s904_s0 + $0x83] ss:$8 sm:$0xf]  }
   0x4   :  { %115 = vrot.lane.b32.xlu1 %v114_v2, %s459_s14  ;;  %v396_v7 = vld [vmem:[%s904_s0 + $0x87] ss:$8 sm:$0xf0]   ;;  %94 = vrot.lane.b32.xlu0 %v93_v5, %s459_s14  ;;  %v390_v10 = vld [vmem:[%s904_s0 + $0x83] ss:$8 sm:$0xf0]  }
   0x5   :  { %v125_v8 = vsel %vm92_vm0, %v396_v7, %v395_v6  ;;  %v103_v11 = vsel %vm92_vm0, %v390_v10, %v389_v9  ;;  %v401_v12 = vld [vmem:[%s904_s0 + $0xc3] ss:$8 sm:$0xf]   ;;  %v407_v18 = vld [vmem:[%s904_s0 + $0xc7] ss:$8 sm:$0xf]  }
   0x6   :  { %v402_v13 = vld [vmem:[%s904_s0 + $0xc3] ss:$8 sm:$0xf0]   ;;  %v408_v19 = vld [vmem:[%s904_s0 + $0xc7] ss:$8 sm:$0xf0]  }
   0x7   :  { %v398_v14 = vld [vmem:[%s904_s0 + $0x43] ss:$8 sm:$0xf]   ;;  %v147_v16 = vsel %vm92_vm0, %v402_v13, %v401_v12  ;;  %v404_v20 = vld [vmem:[%s904_s0 + $0x47] ss:$8 sm:$0xf]   ;;  %v169_v22 = vsel %vm92_vm0, %v408_v19, %v407_v18 }
   0x8   :  { %v399_v15 = vld [vmem:[%s904_s0 + $0x43] ss:$8 sm:$0xf0]   ;;  %126 = vrot.lane.b32.xlu1 %v125_v8, %s459_s14  ;;  %104 = vrot.lane.b32.xlu0 %v103_v11, %s459_s14  ;;  %v405_v21 = vld [vmem:[%s904_s0 + $0x47] ss:$8 sm:$0xf0]  }
   0x9   :  { %v136_v17 = vsel %vm92_vm0, %v399_v15, %v398_v14  ;;  %v158_v23 = vsel %vm92_vm0, %v405_v21, %v404_v20  ;;  %v412_v24 = vld [vmem:[%s904_s0 + $0x82] ss:$8 sm:$0xf]   ;;  %v418_v30 = vld [vmem:[%s904_s0 + $0x86] ss:$8 sm:$0xf]  }
   0xa   :  { %v413_v25 = vld [vmem:[%s904_s0 + $0x82] ss:$8 sm:$0xf0]   ;;  %v419_v31 = vld [vmem:[%s904_s0 + $0x86] ss:$8 sm:$0xf0]  }
   0xb   :  { %v410_v26 = vld [vmem:[%s904_s0 + $0x2] ss:$8 sm:$0xf]   ;;  %v190_v28 = vsel %vm92_vm0, %v413_v25, %v412_v24  ;;  %v415_v32 = vld [vmem:[%s904_s0 + $0x6] ss:$8 sm:$0xf]   ;;  %v212_v34 = vsel %vm92_vm0, %v419_v31, %v418_v30 }
   0xc   :  { %148 = vrot.lane.b32.xlu1 %v147_v16, %s459_s14  ;;  %137 = vrot.lane.b32.xlu0 %v136_v17, %s459_s14  ;;  %v411_v27 = vld [vmem:[%s904_s0 + $0x2] ss:$8 sm:$0xf0]   ;;  %v416_v33 = vld [vmem:[%s904_s0 + $0x6] ss:$8 sm:$0xf0]  }
   0xd   :  { %v180_v29 = vsel %vm92_vm0, %v411_v27, %v410_v26  ;;  %v201_v35 = vsel %vm92_vm0, %v416_v33, %v415_v32  ;;  %v424_v36 = vld [vmem:[%s904_s0 + $0xc2] ss:$8 sm:$0xf]   ;;  %v430_v40 = vld [vmem:[%s904_s0 + $0xc6] ss:$8 sm:$0xf]  }
   0xe   :  { %v425_v37 = vld [vmem:[%s904_s0 + $0xc2] ss:$8 sm:$0xf0]   ;;  %v431_v42 = vld [vmem:[%s904_s0 + $0xc6] ss:$8 sm:$0xf0]  }
   0xf   :  { %v421_v38 = vld [vmem:[%s904_s0 + $0x42] ss:$8 sm:$0xf]   ;;  %v234_v41 = vsel %vm92_vm0, %v425_v37, %v424_v36  ;;  %v427_v43 = vld [vmem:[%s904_s0 + $0x46] ss:$8 sm:$0xf]   ;;  %v256_v53 = vsel %vm92_vm0, %v431_v42, %v430_v40 }
  0x10   :  { %170 = vrot.lane.b32.xlu1 %v169_v22, %s459_s14  ;;  %159 = vrot.lane.b32.xlu0 %v158_v23, %s459_s14  ;;  %v422_v39 = vld [vmem:[%s904_s0 + $0x42] ss:$8 sm:$0xf0]   ;;  %v428_v45 = vld [vmem:[%s904_s0 + $0x46] ss:$8 sm:$0xf0]  }
  0x11   :  { %v223_v44 = vsel %vm92_vm0, %v422_v39, %v421_v38  ;;  %v367_v46 = vld [vmem:[%s904_s0 + $0x80] ss:$4 sm:$0xff]   ;;  %v245_v55 = vsel %vm92_vm0, %v428_v45, %v427_v43  ;;  %v435_v56 = vld [vmem:[%s904_s0 + $0x81] ss:$8 sm:$0xf]   ;;  %s461_s25 = smov 32  }
  0x12   :  { %368 = vst.msk [vmem:[%s905_s1 + $0x20] ss:$8 sm:$0x3] %vm3_vm1, %v367_v46   ;;  %369 = vst.msk [vmem:[%s905_s1 + $0x11] ss:$8 sm:$0xc] %vm3_vm1, %v367_v46  }
  0x13   :  { %370 = vst.msk [vmem:[%s905_s1 + $0x2] ss:$8 sm:$0x30] %vm3_vm1, %v367_v46   ;;  %371 = vst.msk [vmem:[%s905_s1 - $0xd] ss:$8 sm:$0xc0] %vm3_vm1, %v367_v46  }
  0x14   :  { %191 = vrot.lane.b32.xlu1 %v190_v28, %s460_s26  ;;  %181 = vrot.lane.b32.xlu0 %v180_v29, %s460_s26  ;;  %v372_v47 = vld [vmem:[%s904_s0 + $0xa0] ss:$4 sm:$0xff]   ;;  %v436_v57 = vld [vmem:[%s904_s0 + $0x81] ss:$8 sm:$0xf0]   ;;  %vm270_vm4 = vcmask 523520  }
  0x15   :  { %v2_v48 = vld [vmem:[%s904_s0] ss:$4 sm:$0xff]   ;;  %373 = vst.msk [vmem:[%s905_s1 + $0x24] ss:$8 sm:$0x3] %vm3_vm1, %v372_v47   ;;  %v277_v60 = vsel %vm92_vm0, %v436_v57, %v435_v56 }
  0x16   :  { %v352_v49 = vld [vmem:[%s904_s0 + $0x20] ss:$4 sm:$0xff]   ;;  %374 = vst.msk [vmem:[%s905_s1 + $0x15] ss:$8 sm:$0xc] %vm3_vm1, %v372_v47  }
  0x17   :  { %375 = vst.msk [vmem:[%s905_s1 + $0x6] ss:$8 sm:$0x30] %vm3_vm1, %v372_v47   ;;  %376 = vst.msk [vmem:[%s905_s1 - $0x9] ss:$8 sm:$0xc0] %vm3_vm1, %v372_v47  }
  0x18   :  { %213 = vrot.lane.b32.xlu1 %v212_v34, %s460_s26  ;;  %202 = vrot.lane.b32.xlu0 %v201_v35, %s460_s26  ;;  %4 = vst.msk [vmem:[%s905_s1] ss:$8 sm:$0x3] %vm3_vm1, %v2_v48   ;;  %349 = vst.msk [vmem:[%s905_s1 - $0xf] ss:$8 sm:$0xc] %vm3_vm1, %v2_v48  }
  0x19   :  { %350 = vst.msk [vmem:[%s905_s1 - $0x1e] ss:$8 sm:$0x30] %vm3_vm1, %v2_v48   ;;  %351 = vst.msk [vmem:[%s905_s1 - $0x2d] ss:$8 sm:$0xc0] %vm3_vm1, %v2_v48  }
  0x1a   :  { %353 = vst.msk [vmem:[%s905_s1 + $0x4] ss:$8 sm:$0x3] %vm3_vm1, %v352_v49   ;;  %354 = vst.msk [vmem:[%s905_s1 - $0xb] ss:$8 sm:$0xc] %vm3_vm1, %v352_v49  }
  0x1b   :  { %355 = vst.msk [vmem:[%s905_s1 - $0x1a] ss:$8 sm:$0x30] %vm3_vm1, %v352_v49   ;;  %356 = vst.msk [vmem:[%s905_s1 - $0x29] ss:$8 sm:$0xc0] %vm3_vm1, %v352_v49  }
  0x1c   :  { %235 = vrot.lane.b32.xlu1 %v234_v41, %s460_s26  ;;  %v377_v50 = vld [vmem:[%s904_s0 + $0xc0] ss:$4 sm:$0xff]   ;;  %224 = vrot.lane.b32.xlu0 %v223_v44, %s460_s26  ;;  %v433_v58 = vld [vmem:[%s904_s0 + $0x1] ss:$8 sm:$0xf]  }
  0x1d   :  { %v382_v51 = vld [vmem:[%s904_s0 + $0xe0] ss:$4 sm:$0xff]   ;;  %378 = vst.msk [vmem:[%s905_s1 + $0x30] ss:$8 sm:$0x3] %vm3_vm1, %v377_v50  }
  0x1e   :  { %v357_v52 = vld [vmem:[%s904_s0 + $0x40] ss:$4 sm:$0xff]   ;;  %379 = vst.msk [vmem:[%s905_s1 + $0x21] ss:$8 sm:$0xc] %vm3_vm1, %v377_v50  }
  0x1f   :  { %380 = vst.msk [vmem:[%s905_s1 + $0x12] ss:$8 sm:$0x30] %vm3_vm1, %v377_v50   ;;  %381 = vst.msk [vmem:[%s905_s1 + $0x3] ss:$8 sm:$0xc0] %vm3_vm1, %v377_v50  }
  0x20   :  { %383 = vst.msk [vmem:[%s905_s1 + $0x34] ss:$8 sm:$0x3] %vm3_vm1, %v382_v51   ;;  %384 = vst.msk [vmem:[%s905_s1 + $0x25] ss:$8 sm:$0xc] %vm3_vm1, %v382_v51   ;;  %257 = vrot.lane.b32.xlu1 %v256_v53, %s460_s26  ;;  %246 = vrot.lane.b32.xlu0 %v245_v55, %s460_s26 }
  0x21   :  { %385 = vst.msk [vmem:[%s905_s1 + $0x16] ss:$8 sm:$0x30] %vm3_vm1, %v382_v51   ;;  %386 = vst.msk [vmem:[%s905_s1 + $0x7] ss:$8 sm:$0xc0] %vm3_vm1, %v382_v51  }
  0x22   :  { %358 = vst.msk [vmem:[%s905_s1 + $0x10] ss:$8 sm:$0x3] %vm3_vm1, %v357_v52   ;;  %359 = vst.msk [vmem:[%s905_s1 + $0x1] ss:$8 sm:$0xc] %vm3_vm1, %v357_v52  }
  0x23   :  { %360 = vst.msk [vmem:[%s905_s1 - $0xe] ss:$8 sm:$0x30] %vm3_vm1, %v357_v52   ;;  %361 = vst.msk [vmem:[%s905_s1 - $0x1d] ss:$8 sm:$0xc0] %vm3_vm1, %v357_v52  }
  0x24   :  { %v362_v54 = vld [vmem:[%s904_s0 + $0x60] ss:$4 sm:$0xff]   ;;  %v434_v59 = vld [vmem:[%s904_s0 + $0x1] ss:$8 sm:$0xf0]   ;;  %278 = vrot.lane.b32.xlu1 %v277_v60, %s461_s25 }
  0x25   :  { %363 = vst.msk [vmem:[%s905_s1 + $0x14] ss:$8 sm:$0x3] %vm3_vm1, %v362_v54   ;;  %364 = vst.msk [vmem:[%s905_s1 + $0x5] ss:$8 sm:$0xc] %vm3_vm1, %v362_v54   ;;  %v267_v61 = vsel %vm92_vm0, %v434_v59, %v433_v58 }
  0x26   :  { %365 = vst.msk [vmem:[%s905_s1 - $0xa] ss:$8 sm:$0x30] %vm3_vm1, %v362_v54   ;;  %366 = vst.msk [vmem:[%s905_s1 - $0x19] ss:$8 sm:$0xc0] %vm3_vm1, %v362_v54   ;;  %268 = vrot.lane.b32.xlu0 %v267_v61, %s461_s25 }
  0x27   :  { %v441_v62 = vld [vmem:[%s904_s0 + $0x85] ss:$8 sm:$0xf]   ;;  %v447_v4 = vld [vmem:[%s904_s0 + $0xc1] ss:$8 sm:$0xf]  }
  0x28   :  { %v442_v63 = vld [vmem:[%s904_s0 + $0x85] ss:$8 sm:$0xf0]   ;;  %v448_v5 = vld [vmem:[%s904_s0 + $0xc1] ss:$8 sm:$0xf0]  }
  0x29   :  { %v438_v0 = vld [vmem:[%s904_s0 + $0x5] ss:$8 sm:$0xf]   ;;  %v299_v2 = vsel %vm92_vm0, %v442_v63, %v441_v62  ;;  %v444_v6 = vld [vmem:[%s904_s0 + $0x41] ss:$8 sm:$0xf]   ;;  %v321_v8 = vsel %vm92_vm0, %v448_v5, %v447_v4 }
  0x2a   :  { %v439_v1 = vld [vmem:[%s904_s0 + $0x5] ss:$8 sm:$0xf0]   ;;  %v445_v7 = vld [vmem:[%s904_s0 + $0x41] ss:$8 sm:$0xf0]   ;;  %300 = vrot.lane.b32.xlu1 %v299_v2, %s461_s25 }
  0x2b   :  { %v288_v3 = vsel %vm92_vm0, %v439_v1, %v438_v0  ;;  %v310_v9 = vsel %vm92_vm0, %v445_v7, %v444_v6  ;;  %v453_v10 = vld [vmem:[%s904_s0 + $0xc5] ss:$8 sm:$0xf]  }
  0x2c   :  { %289 = vrot.lane.b32.xlu0 %v288_v3, %s461_s25  ;;  %v454_v11 = vld [vmem:[%s904_s0 + $0xc5] ss:$8 sm:$0xf0]  }
  0x2d   :  { %v450_v12 = vld [vmem:[%s904_s0 + $0x45] ss:$8 sm:$0xf]   ;;  %v343_v14 = vsel %vm92_vm0, %v454_v11, %v453_v10 }
  0x2e   :  { %v451_v13 = vld [vmem:[%s904_s0 + $0x45] ss:$8 sm:$0xf0]   ;;  %322 = vrot.lane.b32.xlu1 %v321_v8, %s461_s25 }
  0x2f   :  { %v332_v15 = vsel %vm92_vm0, %v451_v13, %v450_v12 }
  0x30   :  { %311 = vrot.lane.b32.xlu0 %v310_v9, %s461_s25 }
  0x32   :  { %344 = vrot.lane.b32.xlu1 %v343_v14, %s461_s25 }
  0x34   :  { %333 = vrot.lane.b32.xlu0 %v332_v15, %s461_s25 }
  0x76   :  { %v116_v16 = vpop.permute.xlu1 %115   ;;  %v95_v17 = vpop.permute.xlu0 %94  }
  0x77   :  { %394 = vst.msk [vmem:[%s905_s1 + $0x8] sm:$0xff] %vm96_vm2, %v116_v16   ;;  %97 = vst.msk [vmem:[%s905_s1] sm:$0xff] %vm96_vm2, %v95_v17  }
  0x7a   :  { %v127_v18 = vpop.permute.xlu1 %126   ;;  %v105_v19 = vpop.permute.xlu0 %104  }
  0x7b   :  { %397 = vst.msk [vmem:[%s905_s1 + $0x28] sm:$0xff] %vm96_vm2, %v127_v18   ;;  %391 = vst.msk [vmem:[%s905_s1 + $0x20] sm:$0xff] %vm96_vm2, %v105_v19  }
  0x7e   :  { %v149_v20 = vpop.permute.xlu1 %148   ;;  %v138_v21 = vpop.permute.xlu0 %137  }
  0x7f   :  { %403 = vst.msk [vmem:[%s905_s1 + $0x30] sm:$0xff] %vm96_vm2, %v149_v20   ;;  %400 = vst.msk [vmem:[%s905_s1 + $0x10] sm:$0xff] %vm96_vm2, %v138_v21  }
  0x82   :  { %v171_v22 = vpop.permute.xlu1 %170   ;;  %v160_v23 = vpop.permute.xlu0 %159  }
  0x83   :  { %409 = vst.msk [vmem:[%s905_s1 + $0x38] sm:$0xff] %vm96_vm2, %v171_v22   ;;  %406 = vst.msk [vmem:[%s905_s1 + $0x18] sm:$0xff] %vm96_vm2, %v160_v23  }
  0x86   :  { %v192_v24 = vpop.permute.xlu1 %191   ;;  %v182_v25 = vpop.permute.xlu0 %181  }
  0x87   :  { %414 = vst.msk [vmem:[%s905_s1 + $0x20] sm:$0xff] %vm183_vm3, %v192_v24   ;;  %184 = vst.msk [vmem:[%s905_s1] sm:$0xff] %vm183_vm3, %v182_v25  }
  0x8a   :  { %v214_v26 = vpop.permute.xlu1 %213   ;;  %v203_v27 = vpop.permute.xlu0 %202  }
  0x8b   :  { %420 = vst.msk [vmem:[%s905_s1 + $0x28] sm:$0xff] %vm183_vm3, %v214_v26   ;;  %417 = vst.msk [vmem:[%s905_s1 + $0x8] sm:$0xff] %vm183_vm3, %v203_v27  }
  0x8e   :  { %v236_v28 = vpop.permute.xlu1 %235   ;;  %v225_v29 = vpop.permute.xlu0 %224  }
  0x8f   :  { %426 = vst.msk [vmem:[%s905_s1 + $0x30] sm:$0xff] %vm183_vm3, %v236_v28   ;;  %423 = vst.msk [vmem:[%s905_s1 + $0x10] sm:$0xff] %vm183_vm3, %v225_v29  }
  0x92   :  { %v258_v30 = vpop.permute.xlu1 %257   ;;  %v247_v31 = vpop.permute.xlu0 %246  }
  0x93   :  { %432 = vst.msk [vmem:[%s905_s1 + $0x38] sm:$0xff] %vm183_vm3, %v258_v30   ;;  %429 = vst.msk [vmem:[%s905_s1 + $0x18] sm:$0xff] %vm183_vm3, %v247_v31  }
  0x96   :  { %v279_v32 = vpop.permute.xlu1 %278  }
  0x97   :  { %437 = vst.msk [vmem:[%s905_s1 + $0x20] sm:$0xff] %vm270_vm4, %v279_v32  }
  0x98   :  { %v269_v33 = vpop.permute.xlu0 %268  }
  0x99   :  { %271 = vst.msk [vmem:[%s905_s1] sm:$0xff] %vm270_vm4, %v269_v33  }
  0x9c   :  { %v301_v34 = vpop.permute.xlu1 %300  }
  0x9d   :  { %443 = vst.msk [vmem:[%s905_s1 + $0x28] sm:$0xff] %vm270_vm4, %v301_v34  }
  0x9e   :  { %v290_v35 = vpop.permute.xlu0 %289  }
  0x9f   :  { %440 = vst.msk [vmem:[%s905_s1 + $0x8] sm:$0xff] %vm270_vm4, %v290_v35  }
  0xa0   :  { %v323_v36 = vpop.permute.xlu1 %322  }
  0xa1   :  { %449 = vst.msk [vmem:[%s905_s1 + $0x30] sm:$0xff] %vm270_vm4, %v323_v36  }
  0xa2   :  { %v312_v37 = vpop.permute.xlu0 %311  }
  0xa3   :  { %446 = vst.msk [vmem:[%s905_s1 + $0x10] sm:$0xff] %vm270_vm4, %v312_v37  }
  0xa4   :  { %v345_v38 = vpop.permute.xlu1 %344  }
  0xa5   :  { %455 = vst.msk [vmem:[%s905_s1 + $0x38] sm:$0xff] %vm270_vm4, %v345_v38  }
  0xa6   :  { %v334_v39 = vpop.permute.xlu0 %333  }
  0xa7   :  { %452 = vst.msk [vmem:[%s905_s1 + $0x18] sm:$0xff] %vm270_vm4, %v334_v39  }

// kernel: _forward.1
= control target key start
LH: loop header
LB: loop body
LE: loop exit
PB: predicated region body
PF: predicated region fallthrough
CT: control target
= control target key end

     0   :  { %s13933_s0 = inlined_call_operand.vmem [shape: f32[32,64], index: 0, kind: input, shape index: {}]   ;;  %s13934_s1 = inlined_call_operand.vmem [shape: f32[32,1280], index: 1, kind: input, shape index: {}]   ;;  %s13935_s2 = inlined_call_operand.vmem [shape: f32[32,256], index: 2, kind: input, shape index: {}]   ;;  %s13936_s3 = inlined_call_operand.vmem [shape: f32[8,256], index: 3, kind: input, shape index: {}]   ;;  %s13937_s4 = inlined_call_operand.vmem [shape: f32[256,8], index: 4, kind: input, shape index: {}]   ;;  %s13938_s5 = inlined_call_operand.vmem [shape: f32[64,1280], index: 5, kind: input, shape index: {}]   ;;  %s13939_s6 = inlined_call_operand.vmem [shape: f32[256,128], index: 6, kind: input, shape index: {}]   ;;  %s13940_s7 = inlined_call_operand.vmem [shape: f32[3,1,64], index: 7, kind: input, shape index: {}]   ;;  %s13941_s8 = inlined_call_operand.vmem [shape: f32[3,1,64], index: 8, kind: input, shape index: {}]   ;;  %s13942_s9 = inlined_call_operand.vmem [shape: f32[3,64,320], index: 9, kind: input, shape index: {}]   ;;  %s13943_s10 = inlined_call_operand.vmem [shape: f32[3,1,320], index: 10, kind: input, shape index: {}]   ;;  %s13944_s11 = inlined_call_operand.vmem [shape: f32[3,64,64], index: 11, kind: input, shape index: {}]   ;;  %s13945_s12 = inlined_call_operand.vmem [shape: f32[3,1,64], index: 12, kind: input, shape index: {}]   ;;  %s13946_s13 = inlined_call_operand.vmem [shape: f32[3,64,64], index: 13, kind: input, shape index: {}]   ;;  %s13947_s14 = inlined_call_operand.vmem [shape: f32[3,1,64], index: 14, kind: input, shape index: {}]   ;;  %s13948_s15 = inlined_call_operand.vmem [shape: f32[3,1,64], index: 15, kind: input, shape index: {}]   ;;  %s13949_s16 = inlined_call_operand.vmem [shape: f32[3,1,64], index: 16, kind: input, shape index: {}]   ;;  %s13950_s17 = inlined_call_operand.vmem [shape: f32[3,64,128], index: 17, kind: input, shape index: {}]   ;;  %s13951_s18 = inlined_call_operand.vmem [shape: f32[3,1,128], index: 18, kind: input, shape index: {}]   ;;  %s13952_s19 = inlined_call_operand.vmem [shape: f32[3,128,64], index: 19, kind: input, shape index: {}]   ;;  %s13953_s20 = inlined_call_operand.vmem [shape: f32[3,1,64], index: 20, kind: input, shape index: {}]   ;;  %s13954_s21 = inlined_call_operand.hbm [shape: f32[32,64], index: 21, kind: output, shape index: {0}]   ;;  %s13955_s22 = inlined_call_operand.vmem [shape: f32[3,32,256], index: 22, kind: output, shape index: {1}]  }
   0x1   :  { %14133 = sst [smem:[#allocation94_spill]] %s13933_s0 }
   0x2   :  { %14134 = sst [smem:[#allocation95_spill]] %s13934_s1 }
   0x3   :  { %14135 = sst [smem:[#allocation96_spill]] %s13935_s2 }
   0x4   :  { %14136 = sst [smem:[#allocation97_spill]] %s13936_s3 }
   0x5   :  { %14137 = sst [smem:[#allocation98_spill]] %s13937_s4 }
   0x6   :  { %14138 = sst [smem:[#allocation99_spill]] %s13938_s5 }
   0x7   :  { %14139 = sst [smem:[#allocation100_spill]] %s13939_s6 }
   0x8   :  { %14140 = sst [smem:[#allocation101_spill]] %s13954_s21 }
   0x9   :  { %s14141_s29 = sld [smem:[#allocation94_spill]]  ;;  %vm271_vm0 = vcmask 523264  }
   0xf   :  { %v71_v0 = vld [vmem:[%s14141_s29] sm:$0xff]  ;;  %v73_v1 = vld [vmem:[%s14141_s29 + $0x10] sm:$0xff]  ;;  %v72_v2 = vld [vmem:[%s14141_s29 + $0x8] sm:$0xff] }
  0x10   :  { %v272_v3 = vsel %vm271_vm0, %v71_v0, 0.0  ;;  %v278_v4 = vsel %vm271_vm0, %v73_v1, 0.0  ;;  %v74_v5 = vld [vmem:[%s14141_s29 + $0x18] sm:$0xff] }
  0x11   :  { %28 = vsyncpa [#allocation3], 0  ;;  %273 = vadd.xlane.f32.xlu0 %v272_v3  ;;  %279 = vadd.xlane.f32.xlu1 %v278_v4  ;;  %v275_v6 = vsel %vm271_vm0, %v72_v2, 0.0  ;;  %v281_v7 = vsel %vm271_vm0, %v74_v5, 0.0  ;;  %v346_v28 = vld [vmem:[%s13942_s9 + $0x8] sm:$0xff]  ;;  %v349_v29 = vld [vmem:[%s13942_s9 + $0x20] sm:$0xff] }
  0x12   :  { %v8150_v30 = vpack.c.bf16 %v349_v29, %v346_v28  ;;  %v345_v31 = vld [vmem:[%s13942_s9] sm:$0xff]  ;;  %v348_v32 = vld [vmem:[%s13942_s9 + $0x18] sm:$0xff]  ;;  %v355_v35 = vld [vmem:[%s13942_s9 + $0x50] sm:$0xff]  ;;  %v13963_v55 = vmov 0.0   ;;  %s14142_s30 = sld [smem:[#allocation99_spill]]  ;;  %s14061_s28 = smov 64  }
  0x13   :  { %v8152_v33 = vpack.c.bf16 %v348_v32, %v345_v31  ;;  %v352_v34 = vld [vmem:[%s13942_s9 + $0x38] sm:$0xff]  ;;  %v347_v36 = vld [vmem:[%s13942_s9 + $0x10] sm:$0xff]  ;;  %v350_v38 = vld [vmem:[%s13942_s9 + $0x28] sm:$0xff]  ;;  %462 = vmatprep.mubr.f32.mxu0 %v13963_v55  ;;  %s14209_s3 = sld [smem:[#allocation100_spill]]  ;;  %s14224_s5 = sld [smem:[#allocation98_spill]]  ;;  %vm1643_vm2 = vcmask 64512  }
  0x14   :  { %8151 = vmatprep.subr.bf16.mxu0 %v8150_v30  ;;  %v8154_v37 = vpack.c.bf16 %v355_v35, %v352_v34  ;;  %v351_v39 = vld [vmem:[%s13942_s9 + $0x30] sm:$0xff]  ;;  %v354_v40 = vld [vmem:[%s13942_s9 + $0x48] sm:$0xff]  ;;  %v8166_v41 = vpack.c.bf16 %v350_v38, %v347_v36  ;;  %v361_v44 = vld [vmem:[%s13942_s9 + $0x80] sm:$0xff]  ;;  %s14233_s1 = sld [smem:[#allocation95_spill]]  ;;  %s14234_s21 = sld [smem:[#allocation96_spill]] }
  0x15   :  { %276 = vadd.xlane.f32.xlu0 %v275_v6  ;;  %282 = vadd.xlane.f32.xlu1 %v281_v7  ;;  %v8156_v42 = vpack.c.bf16 %v354_v40, %v351_v39  ;;  %v358_v43 = vld [vmem:[%s13942_s9 + $0x68] sm:$0xff]  ;;  %v353_v45 = vld [vmem:[%s13942_s9 + $0x40] sm:$0xff]  ;;  %v356_v47 = vld [vmem:[%s13942_s9 + $0x58] sm:$0xff]  ;;  %s14255_s25 = smov 64   ;;  %s14272_s0 = sld [smem:[#allocation97_spill]] }
  0x16   :  { %8153 = vmatpush1.bf16.msra.mxu0 %v8152_v33  ;;  %8167 = vmatprep.subr.bf16.mxu1 %v8166_v41  ;;  %v8158_v46 = vpack.c.bf16 %v361_v44, %v358_v43  ;;  %v357_v48 = vld [vmem:[%s13942_s9 + $0x60] sm:$0xff]  ;;  %v360_v49 = vld [vmem:[%s13942_s9 + $0x78] sm:$0xff]  ;;  %v8170_v50 = vpack.c.bf16 %v356_v47, %v353_v45  ;;  %v367_v53 = vld [vmem:[%s13942_s9 + $0xb0] sm:$0xff] }
  0x17   :  { %8155 = vmatprep.subr.bf16.mxu0 %v8154_v37  ;;  %8169 = vmatpush3.bf16.msra.mxu1 %v8166_v41  ;;  %v8160_v51 = vpack.c.bf16 %v360_v49, %v357_v48  ;;  %v364_v52 = vld [vmem:[%s13942_s9 + $0x98] sm:$0xff]  ;;  %v359_v54 = vld [vmem:[%s13942_s9 + $0x70] sm:$0xff]  ;;  %v362_v57 = vld [vmem:[%s13942_s9 + $0x88] sm:$0xff] }
  0x18   :  { %v8162_v56 = vpack.c.bf16 %v367_v53, %v364_v52  ;;  %v363_v58 = vld [vmem:[%s13942_s9 + $0x90] sm:$0xff]  ;;  %v366_v59 = vld [vmem:[%s13942_s9 + $0xa8] sm:$0xff]  ;;  %8171 = vmatprep.subr.bf16.mxu1 %v8170_v50  ;;  %v8174_v60 = vpack.c.bf16 %v362_v57, %v359_v54  ;;  %v365_v62 = vld [vmem:[%s13942_s9 + $0xa0] sm:$0xff] }
  0x19   :  { %v8164_v61 = vpack.c.bf16 %v366_v59, %v363_v58  ;;  %v368_v63 = vld [vmem:[%s13942_s9 + $0xb8] sm:$0xff]  ;;  %v600_v3 = vld [vmem:[%s13944_s11] sm:$0xff]  ;;  %v167_v36 = vld [vmem:[%s14142_s30 + $0x50] sm:$0xff] }
  0x1a   :  { %8157 = vmatpush1.bf16.msra.mxu0 %v8156_v42  ;;  %v603_v28 = vld [vmem:[%s13944_s11 + $0x18] sm:$0xff]  ;;  %v157_v35 = vld [vmem:[%s14142_s30] sm:$0xff]  ;;  %v198_v49 = vld [vmem:[%s14142_s30 + $0x148] sm:$0xff] }
  0x1b   :  { %8159 = vmatprep.subr.bf16.mxu0 %v8158_v46  ;;  %8173 = vmatpush3.bf16.msra.mxu1 %v8170_v50  ;;  %v9966_v42 = vpack.c.bf16 %v167_v36, %v157_v35  ;;  %v177_v45 = vld [vmem:[%s14142_s30 + $0xa0] sm:$0xff]  ;;  %v187_v46 = vld [vmem:[%s14142_s30 + $0xf0] sm:$0xff]  ;;  %v208_v50 = vld [vmem:[%s14142_s30 + $0x198] sm:$0xff] }
  0x1c   :  { %8175 = vmatprep.subr.bf16.mxu1 %v8174_v60  ;;  %v9981_v48 = vpack.c.bf16 %v187_v46, %v177_v45  ;;  %v604_v52 = vld [vmem:[%s13944_s11 + $0x20] sm:$0xff]  ;;  %v605_v53 = vld [vmem:[%s13944_s11 + $0x28] sm:$0xff]  ;;  %v207_v57 = vld [vmem:[%s14142_s30 + $0x190] sm:$0xff] }
  0x1d   :  { %14144 = vst [vmem:[#allocation6_spill] sm:$0xff] %v9966_v42  ;;  %v197_v54 = vld [vmem:[%s14142_s30 + $0x140] sm:$0xff]  ;;  %v218_v59 = vld [vmem:[%s14142_s30 + $0x1e8] sm:$0xff]  ;;  %v191_v46 = vld [vmem:[%s14142_s30 + $0x110] sm:$0xff] }
  0x1e   :  { %8161 = vmatpush1.bf16.msra.mxu0 %v8160_v51  ;;  %14146 = vst [vmem:[#allocation8_spill] sm:$0xff] %v9981_v48  ;;  %v9996_v51 = vpack.c.bf16 %v208_v50, %v198_v49  ;;  %v10011_v58 = vpack.c.bf16 %v207_v57, %v197_v54  ;;  %v169_v35 = vld [vmem:[%s14142_s30 + $0x60] sm:$0xff]  ;;  %v212_v49 = vld [vmem:[%s14142_s30 + $0x1b8] sm:$0xff]  ;;  %vm10591_vm1 = vmpackc.low %vm271_vm0, %vm271_vm0 }
  0x1f   :  { %8163 = vmatprep.subr.bf16.mxu0 %v8162_v56  ;;  %8177 = vmatpush3.bf16.msra.mxu1 %v8174_v60  ;;  %v8190_v56 = vpack.c.bf16 %v605_v53, %v604_v52  ;;  %v228_v60 = vld [vmem:[%s14142_s30 + $0x238] sm:$0xff]  ;;  %v181_v45 = vld [vmem:[%s14142_s30 + $0xc0] sm:$0xff] }
  0x20   :  { %14147 = vst [vmem:[#allocation9_spill] sm:$0xff] %v9996_v51  ;;  %14148 = vst [vmem:[#allocation10_spill] sm:$0xff] %v10011_v58  ;;  %v189_v57 = vld [vmem:[%s14142_s30 + $0x100] sm:$0xff] }
  0x22   :  { %8165 = vmatpush1.bf16.msra.mxu0 %v8164_v61  ;;  %v10020_v61 = vpack.c.bf16 %v228_v60, %v218_v59 }
  0x24   :  { %14149 = vst [vmem:[#allocation11_spill] sm:$0xff] %v10020_v61 }
  0x9e   :  { %v274_v8 = vpop.xlane.xlu0 %273  ;;  %v280_v9 = vpop.xlane.xlu1 %279 }
  0x9f   :  { %v285_v10 = vmul.f32 0.015625, %v274_v8  ;;  %v287_v11 = vmul.f32 0.015625, %v280_v9 }
  0xa1   :  { %v9827_v12 = vsub.f32 %v71_v0, %v285_v10  ;;  %v9829_v13 = vsub.f32 %v73_v1, %v287_v11  ;;  %v8178_v0 = vpack.c.bf16 %v368_v63, %v365_v62  ;;  %v158_v1 = vld [vmem:[%s14142_s30 + $0x8] sm:$0xff]  ;;  %v606_v62 = vld [vmem:[%s13944_s11 + $0x30] sm:$0xff]  ;;  %v607_v63 = vld [vmem:[%s13944_s11 + $0x38] sm:$0xff] }
  0xa2   :  { %v277_v14 = vpop.xlane.xlu0 %276  ;;  %v283_v15 = vpop.xlane.xlu1 %282 }
  0xa3   :  { %v286_v16 = vmul.f32 0.015625, %v277_v14  ;;  %v288_v17 = vmul.f32 0.015625, %v283_v15  ;;  %v293_v18 = vmul.f32 %v9827_v12, %v9827_v12  ;;  %v295_v19 = vmul.f32 %v9829_v13, %v9829_v13  ;;  %8179 = vmatprep.subr.bf16.mxu1 %v8178_v0 }
  0xa4   :  { %8181 = vmatpush3.bf16.msra.mxu1 %v8178_v0  ;;  %v217_v0 = vld [vmem:[%s14142_s30 + $0x1e0] sm:$0xff] }
  0xa5   :  { %v9835_v20 = vsub.f32 %v72_v2, %v286_v16  ;;  %v9837_v21 = vsub.f32 %v74_v5, %v288_v17  ;;  %v297_v22 = vsel %vm271_vm0, %v293_v18, 0.0  ;;  %v303_v23 = vsel %vm271_vm0, %v295_v19, 0.0  ;;  %v168_v2 = vld [vmem:[%s14142_s30 + $0x58] sm:$0xff]  ;;  %v601_v5 = vld [vmem:[%s13944_s11 + $0x8] sm:$0xff] }
  0xa6   :  { %298 = vadd.xlane.f32.xlu0 %v297_v22  ;;  %v9929_v4 = vpack.c.bf16 %v168_v2, %v158_v1  ;;  %v8182_v6 = vpack.c.bf16 %v601_v5, %v600_v3  ;;  %v8194_v1 = vpack.c.bf16 %v607_v63, %v606_v62  ;;  %v227_v2 = vld [vmem:[%s14142_s30 + $0x230] sm:$0xff]  ;;  %v162_v5 = vld [vmem:[%s14142_s30 + $0x28] sm:$0xff]  ;;  %v10153_v63 = vpack.c.bf16 %v191_v46, %v181_v45  ;;  %v176_v45 = vld [vmem:[%s14142_s30 + $0x98] sm:$0xff] }
  0xa7   :  { %v294_v24 = vmul.f32 %v9835_v20, %v9835_v20  ;;  %v296_v25 = vmul.f32 %v9837_v21, %v9837_v21  ;;  %v10035_v3 = vpack.c.bf16 %v227_v2, %v217_v0  ;;  %v200_v0 = vld [vmem:[%s14142_s30 + $0x158] sm:$0xff] }
  0xa8   :  { %14143 = vst [vmem:[#allocation5_spill] sm:$0xff] %v9929_v4  ;;  %8199 = vmatprep.subr.bf16.mxu1 %v9929_v4  ;;  %8183 = vmatprep.subr.bf16.mxu0 %v8182_v6  ;;  %14162 = vst [vmem:[#allocation24_spill] sm:$0xff] %v10153_v63 }
  0xa9   :  { %v300_v26 = vsel %vm271_vm0, %v294_v24, 0.0  ;;  %v306_v27 = vsel %vm271_vm0, %v296_v25, 0.0  ;;  %v6746_v24 = vld [vmem:[%s13940_s7] ss:$0 sm:$0xff]  ;;  %14150 = vst [vmem:[#allocation12_spill] sm:$0xff] %v10035_v3 }
  0xaa   :  { %304 = vadd.xlane.f32.xlu0 %v303_v23  ;;  %301 = vadd.xlane.f32.xlu1 %v300_v26  ;;  %v6747_v26 = vld [vmem:[%s13941_s8] ss:$0 sm:$0xff] }
  0xae   :  { %307 = vadd.xlane.f32.xlu1 %v306_v27  ;;  %v602_v27 = vld [vmem:[%s13944_s11 + $0x10] sm:$0xff] }
  0xaf   :  { %v8186_v34 = vpack.c.bf16 %v603_v28, %v602_v27  ;;  %v161_v28 = vld [vmem:[%s14142_s30 + $0x20] sm:$0xff] }
 0x133   :  { %v299_v7 = vpop.xlane.xlu0 %298 }
 0x134   :  { %v309_v8 = vmul.f32 0.015625, %v299_v7 }
 0x136   :  { %v313_v9 = vadd.f32 1e-06, %v309_v8  ;;  %v160_v8 = vld [vmem:[%s14142_s30 + $0x18] sm:$0xff] }
 0x137   :  { %v302_v10 = vpop.xlane.xlu1 %301  ;;  %v305_v11 = vpop.xlane.xlu0 %304 }
 0x138   :  { %9307 = vrsqrt.f32 %v313_v9  ;;  %v310_v14 = vmul.f32 0.015625, %v302_v10  ;;  %v311_v15 = vmul.f32 0.015625, %v305_v11  ;;  %v170_v9 = vld [vmem:[%s14142_s30 + $0x68] sm:$0xff]  ;;  %v371_v11 = vlaneseq }
 0x139   :  { %v10052_v10 = vpack.c.bf16 %v170_v9, %v160_v8  ;;  %v201_v8 = vld [vmem:[%s14142_s30 + $0x160] sm:$0xff]  ;;  %v211_v9 = vld [vmem:[%s14142_s30 + $0x1b0] sm:$0xff] }
 0x13a   :  { %v314_v16 = vadd.f32 1e-06, %v310_v14  ;;  %v315_v17 = vadd.f32 1e-06, %v311_v15  ;;  %v372_v14 = vshrl.u32 %v371_v11, 7 }
 0x13b   :  { %v308_v18 = vpop.xlane.xlu1 %307  ;;  %14152 = vst [vmem:[#allocation14_spill] sm:$0xff] %v10052_v10 }
 0x13c   :  { %9309 = vrsqrt.f32 %v314_v16  ;;  %v312_v19 = vmul.f32 0.015625, %v308_v18  ;;  %v10056_v15 = vsub.s32 0, %v372_v14  ;;  %v369_v16 = vld [vmem:[%s13943_s10] sm:$0x7] }
 0x13d   :  { %9311 = vrsqrt.f32 %v315_v17  ;;  %v10061_v17 = vsub.s32 1, %v372_v14 }
 0x13e   :  { %v316_v22 = vadd.f32 1e-06, %v312_v19  ;;  %14153 = vst [vmem:[#allocation15_spill] sm:$0xff] %v10056_v15  ;;  %v10064_v18 = vrot.slane %v369_v16, %v10056_v15  ;;  %v238_v15 = vld [vmem:[%s14209_s3 + $0x8] sm:$0xff] }
 0x13f   :  { %14154 = vst [vmem:[#allocation16_spill] sm:$0xff] %v10061_v17  ;;  %v10067_v19 = vrot.slane %v369_v16, %v10061_v17  ;;  %v254_v17 = vld [vmem:[%s14209_s3 + $0x88] sm:$0xff] }
 0x140   :  { %9313 = vrsqrt.f32 %v316_v22  ;;  %v10069_v22 = vsub.s32 2, %v372_v14  ;;  %v222_v14 = vld [vmem:[%s14142_s30 + $0x208] sm:$0xff] }
 0x142   :  { %v9308_v23 = vpop.eup %9307  ;;  %14155 = vst [vmem:[#allocation17_spill] sm:$0xff] %v10069_v22  ;;  %v10078_v27 = vrot.slane %v369_v16, %v10069_v22  ;;  %v232_v16 = vld [vmem:[%s14142_s30 + $0x258] sm:$0xff] }
 0x143   :  { %v321_v25 = vmul.f32 %v9308_v23, %v9827_v12 }
 0x145   :  { %v331_v29 = vmul.f32 %v6746_v24, %v321_v25 }
 0x146   :  { %v9310_v30 = vpop.eup %9309 }
 0x147   :  { %v9312_v31 = vpop.eup %9311  ;;  %v341_v32 = vadd.f32 %v6747_v26, %v331_v29  ;;  %v322_v33 = vmul.f32 %v9310_v30, %v9835_v20  ;;  %v178_v20 = vld [vmem:[%s14142_s30 + $0xa8] sm:$0xff]  ;;  %v171_v29 = vld [vmem:[%s14142_s30 + $0x70] sm:$0xff] }
 0x148   :  { %v323_v12 = vmul.f32 %v9312_v31, %v9829_v13  ;;  %v188_v13 = vld [vmem:[%s14142_s30 + $0xf8] sm:$0xff]  ;;  %v182_v30 = vld [vmem:[%s14142_s30 + $0xc8] sm:$0xff] }
 0x149   :  { %6748 = vmatmul.mubr.msk.f32.vlgmr.msra.gmra.mrb[0].mxu0 %vm271_vm0, %v341_v32  ;;  %7788 = vmatprep.mubr.msk.f32.mxu1 %vm271_vm0, %v341_v32  ;;  %v332_v37 = vmul.f32 %v6746_v24, %v322_v33  ;;  %v9968_v44 = vpack.c.bf16 %v188_v13, %v178_v20  ;;  %v192_v31 = vld [vmem:[%s14142_s30 + $0x118] sm:$0xff]  ;;  %v10104_v13 = vpack.c.bf16 %v171_v29, %v161_v28  ;;  %v199_v29 = vld [vmem:[%s14142_s30 + $0x150] sm:$0xff] }
 0x14a   :  { %v9314_v38 = vpop.eup %9313  ;;  %468 = vmatprep.mubr.f32.mxu0 %v13963_v55  ;;  %v333_v39 = vmul.f32 %v6746_v24, %v323_v12  ;;  %8185 = vmatpush3.bf16.msra.mxu0 %v8182_v6  ;;  %v172_v6 = vld [vmem:[%s14142_s30 + $0x78] sm:$0xff]  ;;  %v159_v12 = vld [vmem:[%s14142_s30 + $0x10] sm:$0xff] }
 0x14b   :  { %v342_v40 = vadd.f32 %v6747_v26, %v332_v37  ;;  %v324_v41 = vmul.f32 %v9314_v38, %v9837_v21  ;;  %8187 = vmatprep.subr.bf16.mxu0 %v8186_v34  ;;  %14145 = vst [vmem:[#allocation7_spill] sm:$0xff] %v9968_v44  ;;  %v10044_v7 = vpack.c.bf16 %v172_v6, %v162_v5  ;;  %14157 = vst [vmem:[#allocation19_spill] sm:$0xff] %v10104_v13  ;;  %v180_v38 = vld [vmem:[%s14142_s30 + $0xb8] sm:$0xff] }
 0x14c   :  { %v343_v43 = vadd.f32 %v6747_v26, %v333_v39  ;;  %v190_v39 = vld [vmem:[%s14142_s30 + $0x108] sm:$0xff] }
 0x14d   :  { %6749 = vmatmul.mubr.msk.f32.gmra.mrb[2].mxu0 %vm271_vm0, %v342_v40  ;;  %7789 = vmatmul.mubr.msk.f32.vlgmr.msra.gmra.mrb[0].mxu1 %vm271_vm0, %v342_v40  ;;  %v334_v47 = vmul.f32 %v6746_v24, %v324_v41  ;;  %14151 = vst [vmem:[#allocation13_spill] sm:$0xff] %v10044_v7  ;;  %v10140_v54 = vpack.c.bf16 %v190_v39, %v180_v38  ;;  %v231_v38 = vld [vmem:[%s14142_s30 + $0x250] sm:$0xff] }
 0x14e   :  { %7791 = vmatprep.mubr.msk.f32.mxu1 %vm271_vm0, %v343_v43  ;;  %474 = vmatprep.mubr.f32.mxu0 %v13963_v55 }
 0x14f   :  { %v344_v21 = vadd.f32 %v6747_v26, %v334_v47  ;;  %8201 = vmatpush1.bf16.msra.mxu1 %v9966_v42  ;;  %8189 = vmatpush3.bf16.msra.mxu0 %v8186_v34  ;;  %v10129_v47 = vpack.c.bf16 %v169_v35, %v159_v12  ;;  %14161 = vst [vmem:[#allocation23_spill] sm:$0xff] %v10140_v54  ;;  %v230_v12 = vld [vmem:[%s14142_s30 + $0x248] sm:$0xff] }
 0x150   :  { %8203 = vmatprep.subr.bf16.mxu1 %v9968_v44  ;;  %8191 = vmatprep.subr.bf16.mxu0 %v8190_v56  ;;  %v242_v44 = vld [vmem:[%s14209_s3 + $0x28] sm:$0xff] }
 0x151   :  { %6750 = vmatmul.mubr.msk.f32.gmra.mrb[4].mxu0 %vm271_vm0, %v343_v43  ;;  %7792 = vmatmul.mubr.msk.f32.gmra.mrb[2].mxu1 %vm271_vm0, %v344_v21  ;;  %v10119_v43 = vpack.c.bf16 %v192_v31, %v182_v30  ;;  %14160 = vst [vmem:[#allocation22_spill] sm:$0xff] %v10129_v47  ;;  %v209_v30 = vld [vmem:[%s14142_s30 + $0x1a0] sm:$0xff] }
 0x152   :  { %480 = vmatprep.mubr.f32.mxu0 %v13963_v55  ;;  %856 = vmatprep.mubr.f32.mxu1 %v13963_v55  ;;  %v10230_v39 = vpack.c.bf16 %v209_v30, %v199_v29  ;;  %v194_v29 = vld [vmem:[%s14142_s30 + $0x128] sm:$0xff] }
 0x153   :  { %8205 = vmatpush1.bf16.msra.mxu1 %v9981_v48  ;;  %8193 = vmatpush3.bf16.msra.mxu0 %v8190_v56  ;;  %14159 = vst [vmem:[#allocation21_spill] sm:$0xff] %v10119_v43  ;;  %v179_v56 = vld [vmem:[%s14142_s30 + $0xb0] sm:$0xff]  ;;  %v258_v48 = vld [vmem:[%s14209_s3 + $0xa8] sm:$0xff] }
 0x154   :  { %8207 = vmatprep.subr.bf16.mxu1 %v9996_v51  ;;  %8195 = vmatprep.subr.bf16.mxu0 %v8194_v1  ;;  %v10180_v11 = vpack.c.bf16 %v189_v57, %v179_v56  ;;  %14170 = vst [vmem:[#allocation32_spill] sm:$0xff] %v10230_v39  ;;  %v164_v56 = vld [vmem:[%s14142_s30 + $0x38] sm:$0xff]  ;;  %v174_v57 = vld [vmem:[%s14142_s30 + $0x88] sm:$0xff]  ;;  %v257_v51 = vld [vmem:[%s14209_s3 + $0xa0] sm:$0xff] }
 0x155   :  { %6751 = vmatmul.mubr.msk.f32.gmra.mrb[6].mxu0 %vm271_vm0, %v344_v21  ;;  %v202_v21 = vld [vmem:[%s14142_s30 + $0x168] sm:$0xff] }
 0x156   :  { %v10169_v6 = vpack.c.bf16 %v212_v49, %v202_v21  ;;  %14165 = vst [vmem:[#allocation27_spill] sm:$0xff] %v10180_v11  ;;  %v219_v49 = vld [vmem:[%s14142_s30 + $0x1f0] sm:$0xff] }
 0x157   :  { %8209 = vmatpush1.bf16.msra.mxu1 %v10011_v58  ;;  %8197 = vmatpush3.bf16.msra.mxu0 %v8194_v1  ;;  %v210_v1 = vld [vmem:[%s14142_s30 + $0x1a8] sm:$0xff] }
 0x158   :  { %8211 = vmatprep.subr.bf16.mxu1 %v10020_v61  ;;  %8215 = vmatprep.subr.bf16.mxu0 %v10052_v10  ;;  %14164 = vst [vmem:[#allocation26_spill] sm:$0xff] %v10169_v6  ;;  %v10192_v28 = vpack.c.bf16 %v210_v1, %v200_v0  ;;  %v165_v0 = vld [vmem:[%s14142_s30 + $0x40] sm:$0xff]  ;;  %v175_v1 = vld [vmem:[%s14142_s30 + $0x90] sm:$0xff] }
 0x159   :  { %v253_v10 = vld [vmem:[%s14209_s3 + $0x80] sm:$0xff] }
 0x15a   :  { %14166 = vst [vmem:[#allocation28_spill] sm:$0xff] %v10192_v28 }
 0x15b   :  { %8213 = vmatpush1.bf16.msra.mxu1 %v10035_v3 }
 0x15c   :  { %8231 = vmatprep.subr.bf16.mxu1 %v10044_v7  ;;  %v237_v7 = vld [vmem:[%s14209_s3] sm:$0xff] }
 0x21c   :  { %v464_v23 = vpop.f32.mrb[0].mxu0 }
 0x21d   :  { %v10072_v24 = vadd.f32 %v464_v23, %v10064_v18  ;;  %v466_v25 = vpop.f32.mrb[1].mxu0 }
 0x21e   :  { %v10075_v26 = vadd.f32 %v466_v25, %v10067_v19 }
 0x21f   :  { %716 = vrot.lane.b32.xlu0 %v10072_v24, %s14061_s28 }
 0x220   :  { %14156 = vst [vmem:[#allocation18_spill] sm:$0xff] %v10075_v26  ;;  %v572_v32 = vmax.f32 %v10075_v26, 0.0  ;;  %v470_v33 = vpop.f32.mrb[2].mxu0  ;;  %v7790_v34 = vpop.f32.mrb[0].mxu1  ;;  %v245_v26 = vld [vmem:[%s14209_s3 + $0x40] sm:$0xff] }
 0x221   :  { %v10102_v36 = vadd.f32 %v470_v33, %v10064_v18  ;;  %v472_v37 = vpop.f32.mrb[3].mxu0  ;;  %v553_v20 = vpop.f32.mrb[1].mxu1  ;;  %v10162_v2 = vadd.f32 %v7790_v34, %v10078_v27  ;;  %v10205_v33 = vpack.c.bf16 %v211_v9, %v201_v8  ;;  %v220_v34 = vld [vmem:[%s14142_s30 + $0x1f8] sm:$0xff]  ;;  %v10286_v9 = vpack.c.bf16 %v174_v57, %v164_v56  ;;  %v214_v56 = vld [vmem:[%s14142_s30 + $0x1c8] sm:$0xff] }
 0x222   :  { %v10113_v40 = vadd.f32 %v472_v37, %v10067_v19  ;;  %v10116_v41 = vadd.f32 %v553_v20, %v10078_v27  ;;  %7810 = vmatprep.mubr.msk.f32.mxu0 %vm271_vm0, %v572_v32  ;;  %v10221_v37 = vpack.c.bf16 %v232_v16, %v222_v14  ;;  %v221_v20 = vld [vmem:[%s14142_s30 + $0x200] sm:$0xff]  ;;  %v10242_v21 = vpack.c.bf16 %v230_v12, %v220_v34  ;;  %v163_v14 = vld [vmem:[%s14142_s30 + $0x30] sm:$0xff] }
 0x223   :  { %718 = vrot.lane.b32.xlu1 %v10102_v36, %s14061_s28  ;;  %14167 = vst [vmem:[#allocation29_spill] sm:$0xff] %v10205_v33  ;;  %14175 = vst [vmem:[#allocation37_spill] sm:$0xff] %v10286_v9  ;;  %v173_v16 = vld [vmem:[%s14142_s30 + $0x80] sm:$0xff]  ;;  %v195_v34 = vld [vmem:[%s14142_s30 + $0x130] sm:$0xff] }
 0x224   :  { %14158 = vst [vmem:[#allocation20_spill] sm:$0xff] %v10113_v40  ;;  %v573_v50 = vmax.f32 %v10113_v40, 0.0  ;;  %v476_v52 = vpop.f32.mrb[4].mxu0  ;;  %v7793_v53 = vpop.f32.mrb[2].mxu1  ;;  %6765 = vmatmul.mubr.msk.f32.vlgmr.msra.gmra.mrb[4].mxu1 %vm271_vm0, %v10116_v41  ;;  %14169 = vst [vmem:[#allocation31_spill] sm:$0xff] %v10221_v37  ;;  %v10314_v12 = vpack.c.bf16 %v173_v16, %v163_v14  ;;  %v236_v14 = vld [vmem:[%s14142_s30 + $0x278] sm:$0xff] }
 0x225   :  { %v10149_v59 = vadd.f32 %v476_v52, %v10064_v18  ;;  %v478_v60 = vpop.f32.mrb[5].mxu0  ;;  %v563_v62 = vpop.f32.mrb[3].mxu1  ;;  %8233 = vmatpush1.bf16.msra.mxu1 %v10104_v13  ;;  %862 = vmatprep.mubr.f32.mxu1 %v13963_v55  ;;  %14171 = vst [vmem:[#allocation33_spill] sm:$0xff] %v10242_v21  ;;  %v10252_v52 = vpack.c.bf16 %v231_v38, %v221_v20  ;;  %v206_v20 = vld [vmem:[%s14142_s30 + $0x188] sm:$0xff]  ;;  %v216_v38 = vld [vmem:[%s14142_s30 + $0x1d8] sm:$0xff] }
 0x226   :  { %v10165_v5 = vadd.f32 %v478_v60, %v10067_v19  ;;  %7811 = vmatmul.mubr.msk.f32.vlgmr.msra.gmra.mrb[8].mxu0 %vm271_vm0, %v573_v50  ;;  %8235 = vmatprep.subr.bf16.mxu1 %v10119_v43  ;;  %v10214_v35 = vadd.f32 %v563_v62, %v10078_v27  ;;  %v229_v50 = vld [vmem:[%s14142_s30 + $0x240] sm:$0xff]  ;;  %v10261_v60 = vadd.f32 %v7793_v53, %v10078_v27  ;;  %v186_v27 = vld [vmem:[%s14142_s30 + $0xe8] sm:$0xff]  ;;  %v196_v53 = vld [vmem:[%s14142_s30 + $0x138] sm:$0xff] }
 0x227   :  { %8217 = vmatpush1.bf16.msra.mxu0 %v10129_v47  ;;  %720 = vrot.lane.b32.xlu0 %v10149_v59, %s14061_s28  ;;  %14172 = vst [vmem:[#allocation34_spill] sm:$0xff] %v10252_v52  ;;  %v10274_v8 = vpack.c.bf16 %v229_v50, %v219_v49  ;;  %v10305_v30 = vpack.c.bf16 %v196_v53, %v186_v27  ;;  %14178 = vst [vmem:[#allocation40_spill] sm:$0xff] %v10314_v12  ;;  %v204_v50 = vld [vmem:[%s14142_s30 + $0x178] sm:$0xff]  ;;  %v226_v53 = vld [vmem:[%s14142_s30 + $0x228] sm:$0xff] }
 0x228   :  { %14163 = vst [vmem:[#allocation25_spill] sm:$0xff] %v10165_v5  ;;  %v574_v23 = vmax.f32 %v10165_v5, 0.0  ;;  %v482_v25 = vpop.f32.mrb[6].mxu0  ;;  %6766 = vmatmul.mubr.msk.f32.gmra.mrb[6].mxu1 %vm271_vm0, %v10162_v2  ;;  %8219 = vmatprep.subr.bf16.mxu0 %v10140_v54  ;;  %v10346_v57 = vpack.c.bf16 %v216_v38, %v206_v20  ;;  %v10367_v16 = vpack.c.bf16 %v214_v56, %v204_v50  ;;  %v234_v20 = vld [vmem:[%s14142_s30 + $0x268] sm:$0xff] }
 0x229   :  { %v10201_v31 = vadd.f32 %v482_v25, %v10064_v18  ;;  %v484_v32 = vpop.f32.mrb[7].mxu0  ;;  %8237 = vmatpush1.bf16.msra.mxu1 %v10153_v63  ;;  %868 = vmatprep.mubr.f32.mxu1 %v13963_v55  ;;  %14174 = vst [vmem:[#allocation36_spill] sm:$0xff] %v10274_v8  ;;  %v184_v25 = vld [vmem:[%s14142_s30 + $0xd8] sm:$0xff]  ;;  %14177 = vst [vmem:[#allocation39_spill] sm:$0xff] %v10305_v30  ;;  %v10388_v38 = vpack.c.bf16 %v236_v14, %v226_v53 }
 0x22a   :  { %v10217_v18 = vadd.f32 %v484_v32, %v10067_v19  ;;  %7813 = vmatprep.mubr.msk.f32.mxu0 %vm271_vm0, %v574_v23  ;;  %8239 = vmatprep.subr.bf16.mxu1 %v10169_v6  ;;  %v166_v19 = vld [vmem:[%s14142_s30 + $0x48] sm:$0xff]  ;;  %v10296_v23 = vpack.c.bf16 %v175_v1, %v165_v0  ;;  %v185_v32 = vld [vmem:[%s14142_s30 + $0xe0] sm:$0xff]  ;;  %14181 = vst [vmem:[#allocation43_spill] sm:$0xff] %v10346_v57  ;;  %v215_v1 = vld [vmem:[%s14142_s30 + $0x1d0] sm:$0xff] }
 0x22b   :  { %8221 = vmatpush1.bf16.msra.mxu0 %v10180_v11  ;;  %v10265_v62 = vpack.c.bf16 %v176_v45, %v166_v19  ;;  %v10325_v19 = vpack.c.bf16 %v194_v29, %v184_v25  ;;  %v183_v45 = vld [vmem:[%s14142_s30 + $0xd0] sm:$0xff]  ;;  %v10335_v49 = vpack.c.bf16 %v195_v34, %v185_v32  ;;  %v205_v0 = vld [vmem:[%s14142_s30 + $0x180] sm:$0xff]  ;;  %14183 = vst [vmem:[#allocation45_spill] sm:$0xff] %v10367_v16  ;;  %v224_v34 = vld [vmem:[%s14142_s30 + $0x218] sm:$0xff] }
 0x22c   :  { %14168 = vst [vmem:[#allocation30_spill] sm:$0xff] %v10217_v18  ;;  %v575_v46 = vmax.f32 %v10217_v18, 0.0  ;;  %6767 = vmatmul.mubr.msk.f32.gmra.mrb[8].mxu1 %vm271_vm0, %v10214_v35  ;;  %8223 = vmatprep.subr.bf16.mxu0 %v10192_v28  ;;  %14176 = vst [vmem:[#allocation38_spill] sm:$0xff] %v10296_v23  ;;  %v203_v25 = vld [vmem:[%s14142_s30 + $0x170] sm:$0xff]  ;;  %v213_v29 = vld [vmem:[%s14142_s30 + $0x1c0] sm:$0xff]  ;;  %v10377_v32 = vpack.c.bf16 %v215_v1, %v205_v0  ;;  %v10403_v56 = vpack.c.bf16 %v234_v20, %v224_v34 }
 0x22d   :  { %8241 = vmatpush1.bf16.msra.mxu1 %v10205_v33  ;;  %874 = vmatprep.mubr.f32.mxu1 %v13963_v55  ;;  %14173 = vst [vmem:[#allocation35_spill] sm:$0xff] %v10265_v62  ;;  %14179 = vst [vmem:[#allocation41_spill] sm:$0xff] %v10325_v19  ;;  %v10398_v50 = vpack.c.bf16 %v213_v29, %v203_v25  ;;  %v223_v0 = vld [vmem:[%s14142_s30 + $0x210] sm:$0xff]  ;;  %v233_v1 = vld [vmem:[%s14142_s30 + $0x260] sm:$0xff] }
 0x22e   :  { %7814 = vmatmul.mubr.msk.f32.gmra.mrb[10].mxu0 %vm271_vm0, %v575_v46  ;;  %8243 = vmatprep.subr.bf16.mxu1 %v10221_v37  ;;  %v193_v46 = vld [vmem:[%s14142_s30 + $0x120] sm:$0xff]  ;;  %14180 = vst [vmem:[#allocation42_spill] sm:$0xff] %v10335_v49  ;;  %14184 = vst [vmem:[#allocation46_spill] sm:$0xff] %v10377_v32  ;;  %v10420_v14 = vpack.c.bf16 %v233_v1, %v223_v0 }
 0x22f   :  { %8225 = vmatpush1.bf16.msra.mxu0 %v10230_v39  ;;  %945 = vmatprep.mubr.f32.mxu0 %v13963_v55  ;;  %v10356_v27 = vpack.c.bf16 %v193_v46, %v183_v45  ;;  %14185 = vst [vmem:[#allocation47_spill] sm:$0xff] %v10388_v38  ;;  %v225_v45 = vld [vmem:[%s14142_s30 + $0x220] sm:$0xff]  ;;  %v235_v46 = vld [vmem:[%s14142_s30 + $0x270] sm:$0xff]  ;;  %14186 = vst [vmem:[#allocation48_spill] sm:$0xff] %v10398_v50 }
 0x230   :  { %6768 = vmatmul.mubr.msk.f32.gmra.mrb[10].mxu1 %vm271_vm0, %v10261_v60  ;;  %8227 = vmatprep.subr.bf16.mxu0 %v10242_v21  ;;  %14187 = vst [vmem:[#allocation49_spill] sm:$0xff] %v10403_v56  ;;  %v10413_v53 = vpack.c.bf16 %v235_v46, %v225_v45  ;;  %14189 = vst [vmem:[#allocation51_spill] sm:$0xff] %v10420_v14 }
 0x231   :  { %8245 = vmatpush1.bf16.msra.mxu1 %v10252_v52  ;;  %1034 = vmatprep.mubr.f32.mxu1 %v13963_v55  ;;  %14182 = vst [vmem:[#allocation44_spill] sm:$0xff] %v10356_v27 }
 0x232   :  { %8263 = vmatprep.subr.bf16.mxu1 %v10265_v62  ;;  %14188 = vst [vmem:[#allocation50_spill] sm:$0xff] %v10413_v53 }
 0x233   :  { %8229 = vmatpush1.bf16.msra.mxu0 %v10274_v8 }
 0x234   :  { %6773 = vmatmul.mubr.msk.f32.vlgmr.msra.gmra.mrb[12].mxu1 %vm271_vm0, %v10116_v41  ;;  %8247 = vmatprep.subr.bf16.mxu0 %v10286_v9 }
 0x235   :  { %8265 = vmatpush1.bf16.msra.mxu1 %v10296_v23  ;;  %1040 = vmatprep.mubr.f32.mxu1 %v13963_v55 }
 0x236   :  { %6769 = vmatmul.mubr.msk.f32.vlgmr.msra.gmra.mrb[12].mxu0 %vm271_vm0, %v10116_v41  ;;  %8267 = vmatprep.subr.bf16.mxu1 %v10305_v30 }
 0x237   :  { %8249 = vmatpush1.bf16.msra.mxu0 %v10314_v12  ;;  %951 = vmatprep.mubr.f32.mxu0 %v13963_v55 }
 0x238   :  { %6774 = vmatmul.mubr.msk.f32.gmra.mrb[14].mxu1 %vm271_vm0, %v10162_v2  ;;  %8251 = vmatprep.subr.bf16.mxu0 %v10325_v19 }
 0x239   :  { %8269 = vmatpush1.bf16.msra.mxu1 %v10335_v49  ;;  %1046 = vmatprep.mubr.f32.mxu1 %v13963_v55 }
 0x23a   :  { %6770 = vmatmul.mubr.msk.f32.gmra.mrb[14].mxu0 %vm271_vm0, %v10162_v2  ;;  %8271 = vmatprep.subr.bf16.mxu1 %v10346_v57 }
 0x23b   :  { %8253 = vmatpush1.bf16.msra.mxu0 %v10356_v27  ;;  %957 = vmatprep.mubr.f32.mxu0 %v13963_v55 }
 0x23c   :  { %6775 = vmatmul.mubr.msk.f32.gmra.mrb[16].mxu1 %vm271_vm0, %v10214_v35  ;;  %8255 = vmatprep.subr.bf16.mxu0 %v10367_v16 }
 0x23d   :  { %8273 = vmatpush1.bf16.msra.mxu1 %v10377_v32  ;;  %1052 = vmatprep.mubr.f32.mxu1 %v13963_v55 }
 0x23e   :  { %6771 = vmatmul.mubr.msk.f32.gmra.mrb[16].mxu0 %vm271_vm0, %v10214_v35  ;;  %8275 = vmatprep.subr.bf16.mxu1 %v10388_v38 }
 0x23f   :  { %8257 = vmatpush1.bf16.msra.mxu0 %v10398_v50  ;;  %963 = vmatprep.mubr.f32.mxu0 %v13963_v55 }
 0x240   :  { %6776 = vmatmul.mubr.msk.f32.gmra.mrb[18].mxu1 %vm271_vm0, %v10261_v60  ;;  %8259 = vmatprep.subr.bf16.mxu0 %v10403_v56 }
 0x241   :  { %8277 = vmatpush1.bf16.msra.mxu1 %v10413_v53  ;;  %1212 = vmatprep.mubr.f32.mxu1 %v13963_v55 }
 0x242   :  { %6772 = vmatmul.mubr.msk.f32.gmra.mrb[18].mxu0 %vm271_vm0, %v10261_v60 }
 0x243   :  { %8261 = vmatpush1.bf16.msra.mxu0 %v10420_v14  ;;  %1123 = vmatprep.mubr.f32.mxu0 %v13963_v55 }
 0x244   :  { %6781 = vmatmul.mubr.msk.f32.vlgmr.msra.gmra.mrb[20].mxu1 %vm271_vm0, %v10116_v41 }
 0x245   :  { %1218 = vmatprep.mubr.f32.mxu1 %v13963_v55 }
 0x246   :  { %6777 = vmatmul.mubr.msk.f32.vlgmr.msra.gmra.mrb[20].mxu0 %vm271_vm0, %v10116_v41 }
 0x247   :  { %1129 = vmatprep.mubr.f32.mxu0 %v13963_v55 }
 0x248   :  { %6782 = vmatmul.mubr.msk.f32.gmra.mrb[22].mxu1 %vm271_vm0, %v10162_v2 }
 0x249   :  { %1224 = vmatprep.mubr.f32.mxu1 %v13963_v55 }
 0x24a   :  { %6778 = vmatmul.mubr.msk.f32.gmra.mrb[22].mxu0 %vm271_vm0, %v10162_v2  ;;  %v6760_v2 = vld [vmem:[%s13945_s12] ss:$0 sm:$0xff] }
 0x24b   :  { %1135 = vmatprep.mubr.f32.mxu0 %v13963_v55 }
 0x24c   :  { %6783 = vmatmul.mubr.msk.f32.gmra.mrb[24].mxu1 %vm271_vm0, %v10214_v35 }
 0x24d   :  { %1230 = vmatprep.mubr.f32.mxu1 %v13963_v55 }
 0x24e   :  { %6779 = vmatmul.mubr.msk.f32.gmra.mrb[24].mxu0 %vm271_vm0, %v10214_v35 }
 0x24f   :  { %1141 = vmatprep.mubr.f32.mxu0 %v13963_v55 }
 0x250   :  { %6784 = vmatmul.mubr.msk.f32.gmra.mrb[26].mxu1 %vm271_vm0, %v10261_v60 }
 0x252   :  { %6780 = vmatmul.mubr.msk.f32.gmra.mrb[26].mxu0 %vm271_vm0, %v10261_v60 }
 0x253   :  { %7240 = vmatprep.mubr.msk.f32.mxu0 %vm271_vm0, %v10072_v24 }
 0x291   :  { %v717_v54 = vpop.permute.xlu0 %716 }
 0x295   :  { %v719_v28 = vpop.permute.xlu1 %718 }
 0x299   :  { %v721_v3 = vpop.permute.xlu0 %720 }
 0x2f7   :  { %v10455_v41 = vpop.f32.mrb[4].mxu1 }
 0x2f8   :  { %v10460_v25 = vpop.f32.mrb[5].mxu1 }
 0x2f9   :  { %v7812_v35 = vpop.f32.mrb[8].mxu0 }
 0x2fa   :  { %v699_v29 = vadd.f32 %v7812_v35, %v6760_v2  ;;  %v693_v34 = vpop.f32.mrb[9].mxu0 }
 0x2fb   :  { %v10462_v20 = vpop.f32.mrb[6].mxu1  ;;  %v694_v60 = vadd.f32 %v6760_v2, %v693_v34 }
 0x2fc   :  { %v10464_v45 = vpop.f32.mrb[7].mxu1  ;;  %734 = vrot.lane.b32.xlu1 %v699_v29, %s14061_s28 }
 0x2ff   :  { %v10467_v46 = vpop.f32.mrb[8].mxu1 }
 0x300   :  { %v10469_v0 = vpop.f32.mrb[9].mxu1  ;;  %732 = vrot.lane.b32.xlu1 %v694_v60, %s14061_s28 }
 0x301   :  { %v7815_v1 = vpop.f32.mrb[10].mxu0 }
 0x302   :  { %v703_v55 = vpop.f32.mrb[11].mxu0  ;;  %v709_v29 = vadd.f32 %v7815_v1, %v6760_v2 }
 0x303   :  { %v704_v53 = vadd.f32 %v6760_v2, %v703_v55  ;;  %v10472_v38 = vpop.f32.mrb[10].mxu1 }
 0x304   :  { %v10474_v35 = vpop.f32.mrb[11].mxu1  ;;  %722 = vrot.lane.b32.xlu1 %v10201_v31, %s14061_s28 }
 0x305   :  { %736 = vrot.lane.b32.xlu0 %v704_v53, %s14061_s28 }
 0x307   :  { %v10479_v34 = vpop.f32.mrb[12].mxu1 }
 0x308   :  { %v10481_v32 = vpop.f32.mrb[13].mxu1  ;;  %738 = vrot.lane.b32.xlu1 %v709_v29, %s14061_s28 }
 0x309   :  { %v10484_v60 = vpop.f32.mrb[12].mxu0 }
 0x30a   :  { %v10486_v57 = vpop.f32.mrb[13].mxu0 }
 0x30b   :  { %v10488_v55 = vpop.f32.mrb[14].mxu1 }
 0x30c   :  { %v10490_v49 = vpop.f32.mrb[15].mxu1 }
 0x30d   :  { %v10492_v30 = vpop.f32.mrb[14].mxu0 }
 0x30e   :  { %v10494_v23 = vpop.f32.mrb[15].mxu0 }
 0x30f   :  { %v10496_v53 = vpop.f32.mrb[16].mxu1 }
 0x310   :  { %v10498_v2 = vpop.f32.mrb[17].mxu1 }
 0x311   :  { %v10500_v1 = vpop.f32.mrb[16].mxu0 }
 0x312   :  { %v10502_v14 = vpop.f32.mrb[17].mxu0 }
 0x313   :  { %v10504_v29 = vpop.f32.mrb[18].mxu1 }
 0x314   :  { %v10506_v62 = vpop.f32.mrb[19].mxu1 }
 0x315   :  { %14190 = vst [vmem:[#allocation52_spill] sm:$0xff] %v10506_v62  ;;  %v10508_v56 = vpop.f32.mrb[18].mxu0 }
 0x316   :  { %14191 = vst [vmem:[#allocation53_spill] sm:$0xff] %v10508_v56  ;;  %v10510_v52 = vpop.f32.mrb[19].mxu0 }
 0x317   :  { %14192 = vst [vmem:[#allocation54_spill] sm:$0xff] %v10510_v52  ;;  %v10512_v50 = vpop.f32.mrb[20].mxu1 }
 0x318   :  { %14193 = vst [vmem:[#allocation55_spill] sm:$0xff] %v10512_v50  ;;  %v10514_v37 = vpop.f32.mrb[21].mxu1 }
 0x319   :  { %14194 = vst [vmem:[#allocation56_spill] sm:$0xff] %v10514_v37  ;;  %v10516_v16 = vpop.f32.mrb[20].mxu0 }
 0x31a   :  { %14195 = vst [vmem:[#allocation57_spill] sm:$0xff] %v10516_v16  ;;  %v10518_v33 = vpop.f32.mrb[21].mxu0  ;;  %v247_v16 = vld [vmem:[%s14209_s3 + $0x50] sm:$0xff] }
 0x31b   :  { %14196 = vst [vmem:[#allocation58_spill] sm:$0xff] %v10518_v33  ;;  %v10520_v27 = vpop.f32.mrb[22].mxu1 }
 0x31c   :  { %14197 = vst [vmem:[#allocation59_spill] sm:$0xff] %v10520_v27  ;;  %v10522_v6 = vpop.f32.mrb[23].mxu1  ;;  %v264_v27 = vld [vmem:[%s14209_s3 + $0xd8] sm:$0xff] }
 0x31d   :  { %14198 = vst [vmem:[#allocation60_spill] sm:$0xff] %v10522_v6  ;;  %v10524_v19 = vpop.f32.mrb[22].mxu0  ;;  %v249_v6 = vld [vmem:[%s14209_s3 + $0x60] sm:$0xff] }
 0x31e   :  { %14199 = vst [vmem:[#allocation61_spill] sm:$0xff] %v10524_v19  ;;  %v10526_v63 = vpop.f32.mrb[23].mxu0 }
 0x31f   :  { %14200 = vst [vmem:[#allocation62_spill] sm:$0xff] %v10526_v63  ;;  %v10528_v12 = vpop.f32.mrb[24].mxu1 }
 0x320   :  { %14201 = vst [vmem:[#allocation63_spill] sm:$0xff] %v10528_v12  ;;  %v10530_v43 = vpop.f32.mrb[25].mxu1 }
 0x321   :  { %14202 = vst [vmem:[#allocation64_spill] sm:$0xff] %v10530_v43  ;;  %v10532_v9 = vpop.f32.mrb[24].mxu0 }
 0x322   :  { %14203 = vst [vmem:[#allocation65_spill] sm:$0xff] %v10532_v9  ;;  %v10534_v13 = vpop.f32.mrb[25].mxu0 }
 0x323   :  { %14204 = vst [vmem:[#allocation66_spill] sm:$0xff] %v10534_v13  ;;  %v10536_v8 = vpop.f32.mrb[26].mxu1 }
 0x324   :  { %14205 = vst [vmem:[#allocation67_spill] sm:$0xff] %v10536_v8  ;;  %v10538_v21 = vpop.f32.mrb[27].mxu1  ;;  %v265_v8 = vld [vmem:[%s14209_s3 + $0xe0] sm:$0xff] }
 0x325   :  { %14206 = vst [vmem:[#allocation68_spill] sm:$0xff] %v10538_v21  ;;  %v10540_v39 = vpop.f32.mrb[26].mxu0 }
 0x326   :  { %14207 = vst [vmem:[#allocation69_spill] sm:$0xff] %v10540_v39  ;;  %v10542_v22 = vpop.f32.mrb[27].mxu0  ;;  %v250_v39 = vld [vmem:[%s14209_s3 + $0x68] sm:$0xff] }
 0x327   :  { %14208 = vst [vmem:[#allocation70_spill] sm:$0xff] %v10542_v22  ;;  %v266_v22 = vld [vmem:[%s14209_s3 + $0xe8] sm:$0xff] }
 0x36e   :  { %v735_v11 = vpop.permute.xlu1 %734 }
 0x36f   :  { %v745_v47 = vsel %vm271_vm0, %v719_v28, %v735_v11  ;;  %v241_v11 = vld [vmem:[%s14209_s3 + $0x20] sm:$0xff] }
 0x370   :  { %v10561_v58 = vmul.f32 %v745_v47, %v254_v17  ;;  %v10576_v5 = vmul.f32 %v745_v47, %v238_v15  ;;  %v10604_v21 = vmul.f32 %v745_v47, %v242_v44  ;;  %v239_v44 = vld [vmem:[%s14209_s3 + $0x10] sm:$0xff]  ;;  %v10621_v12 = vmul.f32 %v745_v47, %v258_v48  ;;  %v256_v48 = vld [vmem:[%s14209_s3 + $0x98] sm:$0xff] }
 0x372   :  { %v733_v28 = vpop.permute.xlu1 %732  ;;  %14210 = vst [vmem:[#allocation71_spill] sm:$0xff] %v10561_v58  ;;  %14213 = vst [vmem:[#allocation74_spill] sm:$0xff] %v10576_v5 }
 0x373   :  { %v744_v61 = vsel %vm271_vm0, %v717_v54, %v733_v28  ;;  %v261_v54 = vld [vmem:[%s14209_s3 + $0xc0] sm:$0xff]  ;;  %v262_v28 = vld [vmem:[%s14209_s3 + $0xc8] sm:$0xff]  ;;  %14218 = vst [vmem:[#allocation77_spill] sm:$0xff] %v10621_v12 }
 0x374   :  { %v10572_v42 = vmul.f32 %v744_v61, %v253_v10  ;;  %v10574_v4 = vmul.f32 %v744_v61, %v237_v7  ;;  %v10578_v17 = vmul.f32 %v744_v61, %v241_v11  ;;  %v14214_v7 = vmov 0  ;;  %v246_v10 = vld [vmem:[%s14209_s3 + $0x48] sm:$0xff] }
 0x375   :  { %v14215_v7 = vsel %vm10591_vm1, 4294967295, %v14214_v7  ;;  %v10602_v40 = vmul.f32 %v744_v61, %v257_v51  ;;  %v255_v51 = vld [vmem:[%s14209_s3 + $0x90] sm:$0xff]  ;;  %v10623_v62 = vmul.f32 %v744_v61, %v261_v54  ;;  %v10625_v13 = vmul.f32 %v745_v47, %v262_v28 }
 0x376   :  { %14211 = vst [vmem:[#allocation72_spill] sm:$0xff] %v10572_v42  ;;  %14212 = vst [vmem:[#allocation73_spill] sm:$0xff] %v10574_v4  ;;  %v723_v15 = vpop.permute.xlu1 %722  ;;  %v8278_v11 = vpack.c.bf16 %v10561_v58, %v10572_v42  ;;  %v8281_v18 = vpack.c.bf16 %v10576_v5, %v10574_v4  ;;  %v10627_v9 = vmul.f32 %v744_v61, %v245_v26  ;;  %v259_v54 = vld [vmem:[%s14209_s3 + $0xb0] sm:$0xff]  ;;  %v244_v26 = vld [vmem:[%s14209_s3 + $0x38] sm:$0xff] }
 0x377   :  { %14216 = vst [vmem:[#allocation75_spill] sm:$0xff] %v14215_v7  ;;  %14217 = vst [vmem:[#allocation76_spill] sm:$0xff] %v10602_v40  ;;  %v737_v43 = vpop.permute.xlu0 %736  ;;  %v10658_v4 = vmul.f32 %v745_v47, %v246_v10  ;;  %v10660_v28 = vmul.f32 %v744_v61, %v265_v8  ;;  %v10664_v42 = vmul.f32 %v745_v47, %v250_v39  ;;  %v248_v8 = vld [vmem:[%s14209_s3 + $0x58] sm:$0xff]  ;;  %v243_v10 = vld [vmem:[%s14209_s3 + $0x30] sm:$0xff] }
 0x378   :  { %v746_v63 = vsel %vm271_vm0, %v721_v3, %v737_v43  ;;  %8280 = vmatprep.subr.msk.bf16.mxu0 %vm10591_vm1, %v8278_v11  ;;  %v240_v43 = vld [vmem:[%s14209_s3 + $0x18] sm:$0xff]  ;;  %v10662_v3 = vmul.f32 %v745_v47, %v266_v22  ;;  %v8290_v19 = vpack.c.bf16 %v10621_v12, %v10602_v40  ;;  %v10678_v22 = vmul.f32 %v744_v61, %v249_v6  ;;  %v267_v61 = vld [vmem:[%s14209_s3 + $0xf0] sm:$0xff]  ;;  %v79_v7 = vld [vmem:[%s14233_s1 + $0x20] sm:$0xff] }
 0x379   :  { %8283 = vmatpush3.bf16.xpose.msk.msra.mxu0 %vm10591_vm1, %v8281_v18  ;;  %v260_v11 = vld [vmem:[%s14209_s3 + $0xb8] sm:$0xff]  ;;  %14219 = vst [vmem:[#allocation78_spill] sm:$0xff] %v10660_v28  ;;  %v10666_v58 = vmul.f32 %v746_v63, %v255_v51  ;;  %v10668_v5 = vmul.f32 %v746_v63, %v239_v44  ;;  %v263_v51 = vld [vmem:[%s14209_s3 + $0xd0] sm:$0xff]  ;;  %v10728_v12 = vmul.f32 %v746_v63, %v243_v10 }
 0x37a   :  { %14220 = vst [vmem:[#allocation79_spill] sm:$0xff] %v10662_v3  ;;  %v739_v18 = vpop.permute.xlu1 %738  ;;  %v252_v47 = vld [vmem:[%s14209_s3 + $0x78] sm:$0xff]  ;;  %v10732_v56 = vmul.f32 %v746_v63, %v263_v51  ;;  %v105_v10 = vld [vmem:[%s14233_s1 + $0xf0] sm:$0xff] }
 0x37b   :  { %v747_v39 = vsel %vm271_vm0, %v723_v15, %v739_v18  ;;  %v268_v44 = vld [vmem:[%s14209_s3 + $0xf8] sm:$0xff]  ;;  %v251_v15 = vld [vmem:[%s14209_s3 + $0x70] sm:$0xff] }
 0x37c   :  { %v10699_v18 = vmul.f32 %v747_v39, %v256_v48  ;;  %v10701_v37 = vmul.f32 %v747_v39, %v240_v43  ;;  %v10703_v33 = vmul.f32 %v747_v39, %v260_v11  ;;  %v10705_v50 = vmul.f32 %v747_v39, %v244_v26 }
 0x37d   :  { %v10716_v48 = vmul.f32 %v746_v63, %v259_v54  ;;  %v10718_v43 = vmul.f32 %v747_v39, %v264_v27  ;;  %v10720_v11 = vmul.f32 %v747_v39, %v248_v8  ;;  %v10722_v26 = vmul.f32 %v747_v39, %v252_v47  ;;  %v106_v47 = vld [vmem:[%s14233_s1 + $0xf8] sm:$0xff] }
 0x37e   :  { %v8284_v6 = vpack.c.bf16 %v10699_v18, %v10666_v58  ;;  %v8287_v40 = vpack.c.bf16 %v10701_v37, %v10668_v5  ;;  %v10730_v52 = vmul.f32 %v747_v39, %v268_v44  ;;  %v10734_v54 = vmul.f32 %v746_v63, %v247_v16  ;;  %v130_v44 = vld [vmem:[%s14224_s5 + $0x28] sm:$0xff]  ;;  %v132_v16 = vld [vmem:[%s14224_s5 + $0x38] sm:$0xff] }
 0x37f   :  { %v10736_v27 = vmul.f32 %v746_v63, %v267_v61  ;;  %v10738_v8 = vmul.f32 %v746_v63, %v251_v15  ;;  %v8293_v15 = vpack.c.bf16 %v10604_v21, %v10578_v17  ;;  %v8296_v51 = vpack.c.bf16 %v10703_v33, %v10716_v48  ;;  %v145_v61 = vld [vmem:[%s14224_s5 + $0xa0] sm:$0xff]  ;;  %v147_v63 = vld [vmem:[%s14224_s5 + $0xb0] sm:$0xff] }
 0x380   :  { %14221 = vst [vmem:[#allocation80_spill] sm:$0xff] %v10730_v52  ;;  %8286 = vmatprep.subr.msk.bf16.mxu0 %vm10591_vm1, %v8284_v6  ;;  %v8302_v6 = vpack.c.bf16 %v10625_v13, %v10623_v62 }
 0x381   :  { %14222 = vst [vmem:[#allocation81_spill] sm:$0xff] %v10736_v27  ;;  %14223 = vst [vmem:[#allocation82_spill] sm:$0xff] %v10738_v8  ;;  %8289 = vmatpush3.bf16.xpose.msk.msra.mxu0 %vm10591_vm1, %v8287_v40  ;;  %v8305_v40 = vpack.c.bf16 %v10658_v4, %v10627_v9 }
 0x382   :  { %8292 = vmatprep.subr.msk.bf16.mxu0 %vm10591_vm1, %v8290_v19  ;;  %v8299_v19 = vpack.c.bf16 %v10705_v50, %v10728_v12 }
 0x389   :  { %8295 = vmatpush3.bf16.xpose.msk.msra.mxu0 %vm10591_vm1, %v8293_v15  ;;  %v8308_v15 = vpack.c.bf16 %v10718_v43, %v10732_v56 }
 0x38a   :  { %8298 = vmatprep.subr.msk.bf16.mxu0 %vm10591_vm1, %v8296_v51  ;;  %v8311_v51 = vpack.c.bf16 %v10720_v11, %v10734_v54 }
 0x391   :  { %8301 = vmatpush3.bf16.xpose.msk.msra.mxu0 %vm10591_vm1, %v8299_v19  ;;  %v8314_v19 = vpack.c.bf16 %v10662_v3, %v10660_v28 }
 0x392   :  { %8304 = vmatprep.subr.msk.bf16.mxu0 %vm10591_vm1, %v8302_v6  ;;  %v8317_v6 = vpack.c.bf16 %v10664_v42, %v10678_v22 }
 0x399   :  { %8307 = vmatpush3.bf16.xpose.msk.msra.mxu0 %vm10591_vm1, %v8305_v40  ;;  %v8320_v40 = vpack.c.bf16 %v10730_v52, %v10736_v27 }
 0x39a   :  { %8310 = vmatprep.subr.msk.bf16.mxu0 %vm10591_vm1, %v8308_v15  ;;  %v8323_v15 = vpack.c.bf16 %v10722_v26, %v10738_v8 }
 0x3a1   :  { %8313 = vmatpush3.bf16.xpose.msk.msra.mxu0 %vm10591_vm1, %v8311_v51  ;;  %v125_v51 = vld [vmem:[%s14224_s5] sm:$0xff] }
 0x3a2   :  { %8316 = vmatprep.subr.msk.bf16.mxu0 %vm10591_vm1, %v8314_v19 }
 0x3a9   :  { %8319 = vmatpush3.bf16.xpose.msk.msra.mxu0 %vm10591_vm1, %v8317_v6  ;;  %v144_v6 = vld [vmem:[%s14224_s5 + $0x98] sm:$0xff] }
 0x3aa   :  { %8322 = vmatprep.subr.msk.bf16.mxu0 %vm10591_vm1, %v8320_v40 }
 0x3b1   :  { %8325 = vmatpush3.bf16.xpose.msk.msra.mxu0 %vm10591_vm1, %v8323_v15 }
 0x3b8   :  { %7241 = vmatmul.mubr.msk.f32.vlgmr.msra.gmra.mrb[28].mxu0 %vm271_vm0, %v10072_v24  ;;  %v141_v24 = vld [vmem:[%s14224_s5 + $0x80] sm:$0xff] }
 0x3b9   :  { %7242 = vmatprep.mubr.msk.f32.mxu0 %vm271_vm0, %v10102_v36 }
 0x3bc   :  { %7243 = vmatmul.mubr.msk.f32.gmra.mrb[30].mxu0 %vm271_vm0, %v10102_v36  ;;  %v142_v36 = vld [vmem:[%s14224_s5 + $0x88] sm:$0xff] }
 0x3bd   :  { %7244 = vmatprep.mubr.msk.f32.mxu0 %vm271_vm0, %v10149_v59  ;;  %v10833_v19 = vpack.c.bf16 %v142_v36, %v141_v24  ;;  %v127_v24 = vld [vmem:[%s14224_s5 + $0x10] sm:$0xff]  ;;  %v128_v36 = vld [vmem:[%s14224_s5 + $0x18] sm:$0xff] }
 0x3bf   :  { %14225 = vst [vmem:[#allocation83_spill] sm:$0xff] %v10833_v19  ;;  %8327 = vmatprep.subr.bf16.mxu1 %v10833_v19 }
 0x3c0   :  { %7245 = vmatmul.mubr.msk.f32.gmra.mrb[32].mxu0 %vm271_vm0, %v10149_v59  ;;  %v126_v59 = vld [vmem:[%s14224_s5 + $0x8] sm:$0xff] }
 0x3c1   :  { %7246 = vmatprep.mubr.msk.f32.mxu0 %vm271_vm0, %v10201_v31  ;;  %v10844_v40 = vpack.c.bf16 %v126_v59, %v125_v51  ;;  %v146_v51 = vld [vmem:[%s14224_s5 + $0xa8] sm:$0xff]  ;;  %v10862_v59 = vpack.c.bf16 %v128_v36, %v127_v24  ;;  %v148_v24 = vld [vmem:[%s14224_s5 + $0xb8] sm:$0xff] }
 0x3c2   :  { %v10883_v36 = vpack.c.bf16 %v148_v24, %v147_v63  ;;  %v75_v63 = vld [vmem:[%s14233_s1] sm:$0xff] }
 0x3c3   :  { %14226 = vst [vmem:[#allocation84_spill] sm:$0xff] %v10844_v40  ;;  %8329 = vmatpush3.bf16.msra.mxu1 %v10844_v40  ;;  %14228 = vst [vmem:[#allocation86_spill] sm:$0xff] %v10862_v59  ;;  %v95_v24 = vld [vmem:[%s14233_s1 + $0xa0] sm:$0xff]  ;;  %v116_v40 = vld [vmem:[%s14234_s21 + $0x8] sm:$0xff] }
 0x3c4   :  { %7247 = vmatmul.mubr.msk.f32.gmra.mrb[34].mxu0 %vm271_vm0, %v10201_v31  ;;  %v143_v31 = vld [vmem:[%s14224_s5 + $0x90] sm:$0xff]  ;;  %14231 = vst [vmem:[#allocation89_spill] sm:$0xff] %v10883_v36 }
 0x3c5   :  { %v10846_v15 = vpack.c.bf16 %v144_v6, %v143_v31  ;;  %v10865_v31 = vpack.c.bf16 %v146_v51, %v145_v61  ;;  %v129_v6 = vld [vmem:[%s14224_s5 + $0x20] sm:$0xff]  ;;  %v131_v51 = vld [vmem:[%s14224_s5 + $0x30] sm:$0xff] }
 0x3c6   :  { %v10880_v61 = vpack.c.bf16 %v130_v44, %v129_v6  ;;  %v10892_v39 = vpack.c.bf16 %v132_v16, %v131_v51  ;;  %v76_v44 = vld [vmem:[%s14233_s1 + $0x8] sm:$0xff]  ;;  %v85_v6 = vld [vmem:[%s14233_s1 + $0x50] sm:$0xff]  ;;  %v86_v16 = vld [vmem:[%s14233_s1 + $0x58] sm:$0xff] }
 0x3c7   :  { %14227 = vst [vmem:[#allocation85_spill] sm:$0xff] %v10846_v15  ;;  %8331 = vmatprep.subr.bf16.mxu1 %v10846_v15  ;;  %14229 = vst [vmem:[#allocation87_spill] sm:$0xff] %v10865_v31  ;;  %v96_v51 = vld [vmem:[%s14233_s1 + $0xa8] sm:$0xff]  ;;  %v78_v15 = vld [vmem:[%s14233_s1 + $0x18] sm:$0xff]  ;;  %v1247_v19 = vmul.f32 %v10462_v20, %v85_v6  ;;  %v1248_v27 = vmul.f32 %v10464_v45, %v86_v16  ;;  %v10958_v45 = vmul.f32 %v10472_v38, %v105_v10 }
 0x3c8   :  { %8333 = vmatpush3.bf16.msra.mxu1 %v10862_v59  ;;  %14230 = vst [vmem:[#allocation88_spill] sm:$0xff] %v10880_v61  ;;  %14232 = vst [vmem:[#allocation90_spill] sm:$0xff] %v10892_v39  ;;  %v77_v59 = vld [vmem:[%s14233_s1 + $0x10] sm:$0xff]  ;;  %v90_v20 = vld [vmem:[%s14233_s1 + $0x78] sm:$0xff] }
 0x3c9   :  { %8335 = vmatprep.subr.bf16.mxu1 %v10865_v31  ;;  %v1238_v31 = vmul.f32 %v10460_v25, %v76_v44  ;;  %v10946_v25 = vmul.f32 %v10469_v0, %v96_v51  ;;  %v87_v44 = vld [vmem:[%s14233_s1 + $0x60] sm:$0xff]  ;;  %v1241_v0 = vmul.f32 %v10479_v34, %v79_v7  ;;  %v88_v16 = vld [vmem:[%s14233_s1 + $0x68] sm:$0xff]  ;;  %v1240_v34 = vmul.f32 %v10486_v57, %v78_v15  ;;  %v97_v7 = vld [vmem:[%s14233_s1 + $0xb0] sm:$0xff] }
 0x3ca   :  { %v100_v51 = vld [vmem:[%s14233_s1 + $0xc8] sm:$0xff]  ;;  %v109_v57 = vld [vmem:[%s14233_s1 + $0x110] sm:$0xff] }
 0x3cc   :  { %8337 = vmatpush3.bf16.msra.mxu1 %v10880_v61  ;;  %v1237_v61 = vmul.f32 %v10455_v41, %v75_v63  ;;  %v10943_v41 = vmul.f32 %v10467_v46, %v95_v24  ;;  %v89_v63 = vld [vmem:[%s14233_s1 + $0x70] sm:$0xff]  ;;  %v10961_v46 = vmul.f32 %v10474_v35, %v106_v47  ;;  %v99_v24 = vld [vmem:[%s14233_s1 + $0xc0] sm:$0xff]  ;;  %v1239_v35 = vmul.f32 %v10484_v60, %v77_v59  ;;  %v98_v47 = vld [vmem:[%s14233_s1 + $0xb8] sm:$0xff] }
 0x3cd   :  { %8339 = vmatprep.subr.bf16.mxu1 %v10883_v36  ;;  %v115_v36 = vld [vmem:[%s14234_s21] sm:$0xff]  ;;  %v1252_v60 = vmul.f32 %v10490_v49, %v90_v20  ;;  %v1250_v59 = vmul.f32 %v10494_v23, %v88_v16  ;;  %v108_v49 = vld [vmem:[%s14233_s1 + $0x108] sm:$0xff]  ;;  %v1260_v23 = vmul.f32 %v10502_v14, %v98_v47 }
 0x3ce   :  { %v84_v14 = vld [vmem:[%s14233_s1 + $0x48] sm:$0xff] }
 0x3cf   :  { %v14236_v47 = vld [vmem:[#allocation54_spill] sm:$0xff] }
 0x3d0   :  { %8341 = vmatpush3.bf16.msra.mxu1 %v10892_v39  ;;  %v80_v39 = vld [vmem:[%s14233_s1 + $0x28] sm:$0xff] }
 0x3d1   :  { %v1242_v10 = vmul.f32 %v10481_v32, %v80_v39  ;;  %v1249_v32 = vmul.f32 %v10492_v30, %v87_v44  ;;  %v107_v39 = vld [vmem:[%s14233_s1 + $0x100] sm:$0xff]  ;;  %v11002_v30 = vmul.f32 %v10498_v2, %v100_v51  ;;  %v1259_v44 = vmul.f32 %v10500_v1, %v97_v7  ;;  %v82_v2 = vld [vmem:[%s14233_s1 + $0x38] sm:$0xff] }
 0x3d2   :  { %v11019_v51 = vmul.f32 %v10504_v29, %v109_v57  ;;  %v119_v7 = vld [vmem:[%s14234_s21 + $0x20] sm:$0xff]  ;;  %v93_v29 = vld [vmem:[%s14233_s1 + $0x90] sm:$0xff] }
 0x48b   :  { %v1447_v6 = vpop.f32.mrb[28].mxu0 }
 0x48c   :  { %v1448_v52 = vadd.f32 %v1447_v6, %v115_v36  ;;  %v1449_v38 = vpop.f32.mrb[29].mxu0  ;;  %v117_v36 = vld [vmem:[%s14234_s21 + $0x10] sm:$0xff]  ;;  %v1251_v6 = vmul.f32 %v10488_v55, %v89_v63  ;;  %v10999_v55 = vmul.f32 %v10496_v53, %v99_v24  ;;  %v83_v53 = vld [vmem:[%s14233_s1 + $0x40] sm:$0xff] }
 0x48d   :  { %v1450_v28 = vadd.f32 %v1449_v38, %v116_v40  ;;  %v118_v40 = vld [vmem:[%s14234_s21 + $0x18] sm:$0xff] }
 0x48e   :  { %v1470_v15 = vadd.f32 %v1448_v52, %v1237_v61  ;;  %v81_v52 = vld [vmem:[%s14233_s1 + $0x30] sm:$0xff] }
 0x48f   :  { %v1471_v61 = vadd.f32 %v1450_v28, %v1238_v31  ;;  %v1453_v63 = vpop.f32.mrb[30].mxu0  ;;  %v14235_v28 = vld [vmem:[#allocation53_spill] sm:$0xff] }
 0x490   :  { %v1478_v20 = vadd.f32 %v1470_v15, %v1239_v35  ;;  %v1454_v16 = vadd.f32 %v1453_v63, %v117_v36  ;;  %v1455_v24 = vpop.f32.mrb[31].mxu0  ;;  %v11022_v31 = vmul.f32 %v14235_v28, %v107_v39  ;;  %v11031_v35 = vmul.f32 %v14236_v47, %v108_v49  ;;  %v14237_v36 = vld [vmem:[#allocation57_spill] sm:$0xff]  ;;  %v14239_v63 = vld [vmem:[#allocation58_spill] sm:$0xff] }
 0x491   :  { %v1479_v1 = vadd.f32 %v1471_v61, %v1240_v34  ;;  %v1456_v38 = vadd.f32 %v1455_v24, %v118_v40  ;;  %v1243_v15 = vmul.f32 %v14237_v36, %v81_v52  ;;  %v120_v34 = vld [vmem:[%s14234_s21 + $0x28] sm:$0xff]  ;;  %v14238_v40 = vld [vmem:[#allocation55_spill] sm:$0xff]  ;;  %v1244_v24 = vmul.f32 %v14239_v63, %v82_v2  ;;  %v91_v49 = vld [vmem:[%s14233_s1 + $0x80] sm:$0xff] }
 0x492   :  { %v1486_v57 = vadd.f32 %v1478_v20, %v1241_v0  ;;  %v1472_v39 = vadd.f32 %v1454_v16, %v1247_v19  ;;  %v1245_v61 = vmul.f32 %v14238_v40, %v83_v53  ;;  %v14240_v36 = vld [vmem:[#allocation56_spill] sm:$0xff]  ;;  %v92_v19 = vld [vmem:[%s14233_s1 + $0x88] sm:$0xff]  ;;  %v14241_v53 = vld [vmem:[#allocation59_spill] sm:$0xff] }
 0x493   :  { %v1487_v28 = vadd.f32 %v1479_v1, %v1242_v10  ;;  %v1473_v52 = vadd.f32 %v1456_v38, %v1248_v27  ;;  %v1459_v47 = vpop.f32.mrb[32].mxu0  ;;  %v1246_v3 = vmul.f32 %v14240_v36, %v84_v14  ;;  %v1255_v40 = vmul.f32 %v14241_v53, %v93_v29  ;;  %v94_v2 = vld [vmem:[%s14233_s1 + $0x98] sm:$0xff]  ;;  %v121_v27 = vld [vmem:[%s14234_s21 + $0x30] sm:$0xff]  ;;  %v14242_v1 = vld [vmem:[#allocation61_spill] sm:$0xff] }
 0x494   :  { %v1480_v0 = vadd.f32 %v1472_v39, %v1249_v32  ;;  %v1460_v20 = vadd.f32 %v1459_v47, %v119_v7  ;;  %v1461_v16 = vpop.f32.mrb[33].mxu0  ;;  %v1494_v8 = vadd.f32 %v1486_v57, %v1243_v15  ;;  %v1253_v38 = vmul.f32 %v14242_v1, %v91_v49  ;;  %v122_v7 = vld [vmem:[%s14234_s21 + $0x38] sm:$0xff]  ;;  %v14243_v29 = vld [vmem:[#allocation62_spill] sm:$0xff] }
 0x495   :  { %v1481_v63 = vadd.f32 %v1473_v52, %v1250_v59  ;;  %v1462_v10 = vadd.f32 %v1461_v16, %v120_v34  ;;  %v1495_v14 = vadd.f32 %v1487_v28, %v1244_v24  ;;  %v1254_v57 = vmul.f32 %v14243_v29, %v92_v19  ;;  %v101_v59 = vld [vmem:[%s14233_s1 + $0xd0] sm:$0xff]  ;;  %v102_v28 = vld [vmem:[%s14233_s1 + $0xd8] sm:$0xff]  ;;  %v14245_v16 = vld [vmem:[#allocation65_spill] sm:$0xff] }
 0x496   :  { %v1488_v36 = vadd.f32 %v1480_v0, %v1251_v6  ;;  %v1474_v32 = vadd.f32 %v1460_v20, %v10943_v41  ;;  %v11061_v15 = vadd.f32 %v1494_v8, %v1245_v61  ;;  %v14244_v6 = vld [vmem:[#allocation60_spill] sm:$0xff]  ;;  %v1263_v53 = vmul.f32 %v14245_v16, %v101_v59 }
 0x497   :  { %v1489_v39 = vadd.f32 %v1481_v63, %v1252_v60  ;;  %v1475_v34 = vadd.f32 %v1462_v10, %v10946_v25  ;;  %v1465_v24 = vpop.f32.mrb[34].mxu0  ;;  %v11068_v49 = vadd.f32 %v1495_v14, %v1246_v3  ;;  %v1256_v41 = vmul.f32 %v14244_v6, %v94_v2  ;;  %v110_v19 = vld [vmem:[%s14233_s1 + $0x118] sm:$0xff]  ;;  %v103_v25 = vld [vmem:[%s14233_s1 + $0xe0] sm:$0xff] }
 0x498   :  { %v1482_v8 = vadd.f32 %v1474_v32, %v1259_v44  ;;  %v1466_v61 = vadd.f32 %v1465_v24, %v121_v27  ;;  %v1467_v52 = vpop.f32.mrb[35].mxu0  ;;  %v1496_v47 = vadd.f32 %v1488_v36, %v1253_v38  ;;  %v104_v44 = vld [vmem:[%s14233_s1 + $0xe8] sm:$0xff]  ;;  %v14247_v32 = vld [vmem:[#allocation52_spill] sm:$0xff]  ;;  %v14250_v6 = vld [vmem:[#allocation69_spill] sm:$0xff] }
 0x499   :  { %v1483_v3 = vadd.f32 %v1475_v34, %v1260_v23  ;;  %v1468_v60 = vadd.f32 %v1467_v52, %v122_v7  ;;  %v1510_v0 = vmax.f32 %v11061_v15, %v11068_v49  ;;  %v1497_v20 = vadd.f32 %v1489_v39, %v1254_v57  ;;  %v14246_v27 = vld [vmem:[#allocation66_spill] sm:$0xff]  ;;  %v111_v23 = vld [vmem:[%s14233_s1 + $0x120] sm:$0xff]  ;;  %v14249_v59 = vld [vmem:[#allocation64_spill] sm:$0xff] }
 0x49a   :  { %v1490_v2 = vadd.f32 %v1482_v8, %v10999_v55  ;;  %v1476_v63 = vadd.f32 %v1466_v61, %v10958_v45  ;;  %v11088_v10 = vadd.f32 %v1496_v47, %v1255_v40  ;;  %v1264_v14 = vmul.f32 %v14246_v27, %v102_v28  ;;  %v14248_v55 = vld [vmem:[#allocation63_spill] sm:$0xff]  ;;  %v112_v45 = vld [vmem:[%s14233_s1 + $0x128] sm:$0xff]  ;;  %v114_v28 = vld [vmem:[%s14233_s1 + $0x138] sm:$0xff] }
 0x49b   :  { %v1491_v1 = vadd.f32 %v1483_v3, %v11002_v30  ;;  %v1477_v38 = vadd.f32 %v1468_v60, %v10961_v46  ;;  %1511 = vmax.xlane.f32.xlu0 %v1510_v0  ;;  %v11096_v36 = vadd.f32 %v1497_v20, %v1256_v41  ;;  %v1272_v7 = vmul.f32 %v14247_v32, %v110_v19  ;;  %v113_v46 = vld [vmem:[%s14233_s1 + $0x130] sm:$0xff]  ;;  %v14251_v61 = vld [vmem:[#allocation70_spill] sm:$0xff]  ;;  %v14253_v60 = vld [vmem:[#allocation68_spill] sm:$0xff] }
 0x49c   :  { %v1265_v29 = vmul.f32 %v14248_v55, %v103_v25  ;;  %v1484_v40 = vadd.f32 %v1476_v63, %v11022_v31  ;;  %v1498_v57 = vadd.f32 %v1490_v2, %v1263_v53  ;;  %v1266_v39 = vmul.f32 %v14249_v59, %v104_v44  ;;  %v149_v2 = vld [vmem:[%s14224_s5 + $0xc0] sm:$0xff]  ;;  %v150_v63 = vld [vmem:[%s14224_s5 + $0xc8] sm:$0xff]  ;;  %v151_v55 = vld [vmem:[%s14224_s5 + $0xd0] sm:$0xff] }
 0x49d   :  { %v1485_v30 = vadd.f32 %v1477_v38, %v11031_v35  ;;  %v1513_v34 = vmax.f32 %v11088_v10, %v11096_v36  ;;  %v1499_v24 = vadd.f32 %v1491_v1, %v1264_v14  ;;  %v1273_v41 = vmul.f32 %v14250_v6, %v111_v23  ;;  %v14252_v35 = vld [vmem:[#allocation67_spill] sm:$0xff]  ;;  %v133_v27 = vld [vmem:[%s14224_s5 + $0x40] sm:$0xff]  ;;  %v134_v23 = vld [vmem:[%s14224_s5 + $0x48] sm:$0xff] }
 0x49e   :  { %v1492_v31 = vadd.f32 %v1484_v40, %v11019_v51  ;;  %v11116_v8 = vadd.f32 %v1498_v57, %v1265_v29  ;;  %v1274_v52 = vmul.f32 %v14251_v61, %v112_v45  ;;  %v1275_v25 = vmul.f32 %v14252_v35, %v113_v46  ;;  %v14256_v1 = vld [vmem:[#allocation74_spill] sm:$0xff]  ;;  %v14257_v38 = vld [vmem:[#allocation73_spill] sm:$0xff]  ;;  %v152_v29 = vld [vmem:[%s14224_s5 + $0xd8] sm:$0xff] }
 0x49f   :  { %v1493_v47 = vadd.f32 %v1485_v30, %v1272_v7  ;;  %1514 = vmax.xlane.f32.xlu1 %v1513_v34  ;;  %v11119_v19 = vadd.f32 %v1499_v24, %v1266_v39  ;;  %v1276_v0 = vmul.f32 %v14253_v60, %v114_v28  ;;  %v11140_v14 = vpack.c.bf16 %v150_v63, %v149_v2  ;;  %v135_v45 = vld [vmem:[%s14224_s5 + $0x50] sm:$0xff]  ;;  %v136_v57 = vld [vmem:[%s14224_s5 + $0x58] sm:$0xff]  ;;  %v153_v34 = vld [vmem:[%s14224_s5 + $0xe0] sm:$0xff] }
 0x4a0   :  { %v1500_v3 = vadd.f32 %v1492_v31, %v1273_v41  ;;  %v14258_v32 = vpack.i.bf16 %v14256_v1, %v14257_v38  ;;  %v11149_v7 = vpack.c.bf16 %v134_v23, %v133_v27  ;;  %v11162_v40 = vpack.c.bf16 %v152_v29, %v151_v55  ;;  %v14261_v59 = vld [vmem:[#allocation20_spill] sm:$0xff]  ;;  %v154_v24 = vld [vmem:[%s14224_s5 + $0xe8] sm:$0xff]  ;;  %v137_v6 = vld [vmem:[%s14224_s5 + $0x60] sm:$0xff] }
 0x4a1   :  { %v1516_v20 = vmax.f32 %v11116_v8, %v11119_v19  ;;  %v1501_v16 = vadd.f32 %v1493_v47, %v1274_v52  ;;  %14254 = vst [vmem:[#allocation53_spill] sm:$0xff] %v11140_v14  ;;  %8343 = vmatprep.subr.bf16.mxu1 %v11140_v14  ;;  %v6757_v39 = vmul.f32 -1.442695, %v14261_v59  ;;  %v14262_v46 = vpack.i.bf16 %v10699_v18, %v10666_v58  ;;  %v138_v18 = vld [vmem:[%s14224_s5 + $0x68] sm:$0xff]  ;;  %v155_v35 = vld [vmem:[%s14224_s5 + $0xf0] sm:$0xff]  ;;  %v14275_v63 = vld [vmem:[#allocation72_spill] sm:$0xff] }
 0x4a2   :  { %v11125_v53 = vadd.f32 %v1500_v3, %v1275_v25  ;;  %14259 = vst [vmem:[#allocation54_spill] sm:$0xff] %v11149_v7  ;;  %8345 = vmatpush3.bf16.msra.mxu1 %v11149_v7  ;;  %14260 = vst [vmem:[#allocation57_spill] sm:$0xff] %v11162_v40  ;;  %v11172_v30 = vpack.c.bf16 %v136_v57, %v135_v45  ;;  %v11185_v58 = vpack.c.bf16 %v154_v24, %v153_v34  ;;  %v14265_v41 = vld [vmem:[#allocation30_spill] sm:$0xff]  ;;  %v156_v25 = vld [vmem:[%s14224_s5 + $0xf8] sm:$0xff] }
 0x4a3   :  { %1517 = vmax.xlane.f32.xlu0 %v1516_v20  ;;  %v11127_v51 = vadd.f32 %v1501_v16, %v1276_v0  ;;  %8347 = vmatprep.subr.bf16.mxu1 %v11162_v40  ;;  %9315 = vpow2.f32 %v6757_v39  ;;  %v6759_v28 = vmul.f32 -1.442695, %v14265_v41  ;;  %v14266_v31 = vpack.i.bf16 %v10701_v37, %v10668_v5  ;;  %v14268_v52 = vld [vmem:[#allocation18_spill] sm:$0xff]  ;;  %v139_v5 = vld [vmem:[%s14224_s5 + $0x70] sm:$0xff]  ;;  %v140_v3 = vld [vmem:[%s14224_s5 + $0x78] sm:$0xff] }
 0x4a4   :  { %14263 = vst [vmem:[#allocation55_spill] sm:$0xff] %v11172_v30  ;;  %14264 = vst [vmem:[#allocation58_spill] sm:$0xff] %v11185_v58  ;;  %v11195_v61 = vpack.c.bf16 %v138_v18, %v137_v6  ;;  %v6756_v47 = vmul.f32 -1.442695, %v14268_v52  ;;  %v11209_v37 = vpack.c.bf16 %v156_v25, %v155_v35  ;;  %v14270_v60 = vpack.i.bf16 %v10604_v21, %v10578_v17  ;;  %v124_v20 = vld [vmem:[%s14272_s0 + $0x8] sm:$0xff]  ;;  %v14273_v16 = vld [vmem:[#allocation25_spill] sm:$0xff] }
 0x4a5   :  { %v1519_v44 = vmax.f32 %v11125_v53, %v11127_v51  ;;  %9317 = vpow2.f32 %v6759_v28  ;;  %v11218_v0 = vpack.c.bf16 %v140_v3, %v139_v5  ;;  %v14274_v2 = vld [vmem:[#allocation71_spill] sm:$0xff]  ;;  %v14277_v21 = vpack.i.bf16 %v10705_v50, %v10728_v12  ;;  %v14278_v17 = vld [vmem:[#allocation77_spill] sm:$0xff]  ;;  %v14279_v23 = vld [vmem:[#allocation76_spill] sm:$0xff] }
 0x4a6   :  { %8349 = vmatpush3.bf16.msra.mxu1 %v11172_v30  ;;  %14267 = vst [vmem:[#allocation56_spill] sm:$0xff] %v11195_v61  ;;  %14269 = vst [vmem:[#allocation59_spill] sm:$0xff] %v11209_v37  ;;  %9319 = vpow2.f32 %v6756_v47  ;;  %v14276_v27 = vpack.i.bf16 %v14274_v2, %v14275_v63  ;;  %v14280_v1 = vpack.i.bf16 %v14278_v17, %v14279_v23  ;;  %v14290_v39 = vld [vmem:[#allocation78_spill] sm:$0xff] }
 0x4a7   :  { %1520 = vmax.xlane.f32.xlu0 %v1519_v44  ;;  %8351 = vmatprep.subr.bf16.mxu1 %v11185_v58  ;;  %14271 = vst [vmem:[#allocation61_spill] sm:$0xff] %v11218_v0  ;;  %v6758_v44 = vmul.f32 -1.442695, %v14273_v16  ;;  %v14282_v29 = vpack.i.bf16 %v10703_v33, %v10716_v48  ;;  %v14283_v45 = vpack.i.bf16 %v10720_v11, %v10734_v54  ;;  %v14287_v54 = vld [vmem:[#allocation82_spill] sm:$0xff] }
 0x4a8   :  { %v14285_v33 = vpack.i.bf16 %v10664_v42, %v10678_v22  ;;  %v14286_v48 = vpack.i.bf16 %v10718_v43, %v10732_v56  ;;  %v14292_v22 = vld [vmem:[#allocation80_spill] sm:$0xff]  ;;  %v14293_v56 = vld [vmem:[#allocation81_spill] sm:$0xff] }
 0x4a9   :  { %9321 = vpow2.f32 %v6758_v44  ;;  %v14294_v43 = vpack.i.bf16 %v14292_v22, %v14293_v56 }
 0x4aa   :  { %8353 = vmatpush3.bf16.msra.mxu1 %v11195_v61 }
 0x4ab   :  { %8355 = vmatprep.subr.bf16.mxu1 %v11209_v37 }
 0x4ad   :  { %v9316_v38 = vpop.eup %9315 }
 0x4ae   :  { %8357 = vmatpush3.bf16.msra.mxu1 %v11218_v0  ;;  %v589_v55 = vadd.f32 1.0, %v9316_v38 }
 0x4af   :  { %1656 = vmatprep.subr.mxu1 %v124_v20  ;;  %v9318_v12 = vpop.eup %9317 }
 0x4b0   :  { %9073 = vrot.lane.b32.xlu1 %v14258_v32, %s14255_s25  ;;  %v14281_v32 = vpack.i.bf16 %v10658_v4, %v10627_v9  ;;  %v9320_v50 = vpop.eup %9319  ;;  %9323 = vrcp.f32 %v589_v55  ;;  %v591_v57 = vadd.f32 1.0, %v9318_v12  ;;  %v14284_v4 = vpack.i.bf16 %v10625_v13, %v10623_v62  ;;  %v14289_v62 = vld [vmem:[#allocation79_spill] sm:$0xff] }
 0x4b1   :  { %v588_v9 = vadd.f32 1.0, %v9320_v50  ;;  %v14288_v13 = vpack.i.bf16 %v10722_v26, %v14287_v54 }
 0x4b2   :  { %9325 = vrcp.f32 %v591_v57 }
 0x4b3   :  { %v9322_v59 = vpop.eup %9321  ;;  %9327 = vrcp.f32 %v588_v9 }
 0x4b4   :  { %9078 = vrot.lane.b32.xlu1 %v14262_v46, %s14255_s25  ;;  %v590_v11 = vadd.f32 1.0, %v9322_v59  ;;  %v14291_v46 = vpack.i.bf16 %v14289_v62, %v14290_v39 }
 0x4b6   :  { %9329 = vrcp.f32 %v590_v11 }
 0x4b8   :  { %9083 = vrot.lane.b32.xlu1 %v14266_v31, %s14255_s25 }
 0x4ba   :  { %v9324_v42 = vpop.eup %9323 }
 0x4bc   :  { %9093 = vrot.lane.b32.xlu1 %v14270_v60, %s14255_s25  ;;  %v9326_v34 = vpop.eup %9325 }
 0x4bd   :  { %9068 = vrot.lane.b32.xlu0 %v14276_v27, %s14255_s25  ;;  %v9328_v24 = vpop.eup %9327 }
 0x4c0   :  { %9103 = vrot.lane.b32.xlu1 %v14277_v21, %s14255_s25  ;;  %v9330_v26 = vpop.eup %9329 }
 0x4c1   :  { %9088 = vrot.lane.b32.xlu0 %v14280_v1, %s14255_s25 }
 0x4c4   :  { %9113 = vrot.lane.b32.xlu1 %v14281_v32, %s14255_s25 }
 0x4c5   :  { %9098 = vrot.lane.b32.xlu0 %v14282_v29, %s14255_s25  ;;  %v14295_v29 = vmov 0.0  }
 0x4c8   :  { %9123 = vrot.lane.b32.xlu1 %v14283_v45, %s14255_s25 }
 0x4c9   :  { %9108 = vrot.lane.b32.xlu0 %v14284_v4, %s14255_s25 }
 0x4cc   :  { %9133 = vrot.lane.b32.xlu1 %v14285_v33, %s14255_s25 }
 0x4cd   :  { %9118 = vrot.lane.b32.xlu0 %v14286_v48, %s14255_s25 }
 0x4d0   :  { %9143 = vrot.lane.b32.xlu1 %v14288_v13, %s14255_s25 }
 0x4d1   :  { %9128 = vrot.lane.b32.xlu0 %v14291_v46, %s14255_s25 }
 0x4d4   :  { %1948 = vrot.lane.b32.xlu1 %v9324_v42, %s14255_s25 }
 0x4d5   :  { %9138 = vrot.lane.b32.xlu0 %v14294_v43, %s14255_s25 }
 0x4d8   :  { %1952 = vrot.lane.b32.xlu1 %v9326_v34, %s14255_s25 }
 0x4d9   :  { %1946 = vrot.lane.b32.xlu0 %v9328_v24, %s14255_s25 }
 0x4dd   :  { %1950 = vrot.lane.b32.xlu0 %v9330_v26, %s14255_s25 }
 0x528   :  { %v1512_v6 = vpop.xlane.xlu0 %1511 }
 0x529   :  { %v1522_v18 = vsub.f32 %v11061_v15, %v1512_v6  ;;  %v1523_v41 = vsub.f32 %v11068_v49, %v1512_v6 }
 0x52b   :  { %v1530_v28 = vmul.f32 1.442695, %v1522_v18  ;;  %v1532_v31 = vmul.f32 1.442695, %v1523_v41 }
 0x52c   :  { %v1515_v52 = vpop.xlane.xlu1 %1514 }
 0x52d   :  { %9331 = vpow2.f32 %v1530_v28  ;;  %v1524_v47 = vsub.f32 %v11088_v10, %v1515_v52  ;;  %v1525_v35 = vsub.f32 %v11096_v36, %v1515_v52 }
 0x52e   :  { %9333 = vpow2.f32 %v1532_v31 }
 0x52f   :  { %v1534_v25 = vmul.f32 1.442695, %v1524_v47  ;;  %v1536_v5 = vmul.f32 1.442695, %v1525_v35 }
 0x530   :  { %v1518_v3 = vpop.xlane.xlu0 %1517  ;;  %v9074_v12 = vpop.permute.xlu1 %9073 }
 0x531   :  { %9335 = vpow2.f32 %v1534_v25  ;;  %v1526_v60 = vsub.f32 %v11116_v8, %v1518_v3  ;;  %v1527_v15 = vsub.f32 %v11119_v19, %v1518_v3  ;;  %v123_v8 = vld [vmem:[%s14272_s0] sm:$0xff]  ;;  %v9076_v56 = vunpack.i.h.bf16 %v9074_v12 }
 0x532   :  { %9337 = vpow2.f32 %v1536_v5  ;;  %v9075_v43 = vunpack.i.l.bf16 %v9074_v12 }
 0x533   :  { %v1538_v20 = vmul.f32 1.442695, %v1526_v60  ;;  %v1540_v49 = vmul.f32 1.442695, %v1527_v15 }
 0x534   :  { %v1521_v16 = vpop.xlane.xlu0 %1520  ;;  %v9079_v50 = vpop.permute.xlu1 %9078  ;;  %v8360_v52 = vpack.c.bf16 %v9076_v56, %v9075_v43 }
 0x535   :  { %9339 = vpow2.f32 %v1538_v20  ;;  %v1528_v44 = vsub.f32 %v11125_v53, %v1521_v16  ;;  %v1529_v10 = vsub.f32 %v11127_v51, %v1521_v16  ;;  %v9081_v26 = vunpack.i.h.bf16 %v9079_v50 }
 0x536   :  { %9341 = vpow2.f32 %v1540_v49  ;;  %v9080_v6 = vunpack.i.l.bf16 %v9079_v50 }
 0x537   :  { %v11286_v36 = vpop.eup %9331  ;;  %v1542_v2 = vmul.f32 1.442695, %v1528_v44  ;;  %v1544_v27 = vmul.f32 1.442695, %v1529_v10 }
 0x538   :  { %v11288_v63 = vpop.eup %9333  ;;  %v9069_v21 = vpop.permute.xlu0 %9068  ;;  %v8362_v15 = vpack.c.bf16 %v9081_v26, %v9080_v6 }
 0x539   :  { %9343 = vpow2.f32 %v1542_v2  ;;  %1610 = vmatprep.mubr.f32.mxu1 %v11288_v63  ;;  %v9071_v19 = vunpack.i.h.bf16 %v9069_v21  ;;  %v9070_v53 = vunpack.i.l.bf16 %v9069_v21  ;;  %v9084_v57 = vpop.permute.xlu1 %9083 }
 0x53a   :  { %9345 = vpow2.f32 %v1544_v27  ;;  %1611 = vmatmul.mubr.f32.vlgmr.msra.gmra.mrb[28].mxu1 %v11286_v36  ;;  %v9086_v47 = vunpack.i.h.bf16 %v9084_v57  ;;  %v9085_v35 = vunpack.i.l.bf16 %v9084_v57 }
 0x53b   :  { %v11295_v51 = vpop.eup %9335  ;;  %1657 = vmatpush1.msra.mxu1 %v123_v8  ;;  %v8358_v23 = vpack.c.bf16 %v9071_v19, %v9070_v53 }
 0x53c   :  { %v11297_v17 = vpop.eup %9337  ;;  %v9089_v59 = vpop.permute.xlu0 %9088  ;;  %v8364_v16 = vpack.c.bf16 %v9086_v47, %v9085_v35 }
 0x53d   :  { %1615 = vmatprep.mubr.f32.mxu1 %v11297_v17  ;;  %8359 = vmatprep.subr.bf16.mxu1 %v8358_v23  ;;  %v9094_v13 = vpop.permute.xlu1 %9093  ;;  %v9091_v3 = vunpack.i.h.bf16 %v9089_v59  ;;  %v9090_v60 = vunpack.i.l.bf16 %v9089_v59 }
 0x53e   :  { %1616 = vmatmul.mubr.f32.gmra.mrb[30].mxu1 %v11295_v51  ;;  %v9096_v44 = vunpack.i.h.bf16 %v9094_v13  ;;  %v9095_v10 = vunpack.i.l.bf16 %v9094_v13 }
 0x53f   :  { %v11301_v1 = vpop.eup %9339  ;;  %v8366_v21 = vpack.c.bf16 %v9091_v3, %v9090_v60  ;;  %v1962_v60 = vld [vmem:[%s13946_s13] sm:$0xff] }
 0x540   :  { %v11303_v38 = vpop.eup %9341  ;;  %v9099_v42 = vpop.permute.xlu0 %9098  ;;  %v8368_v53 = vpack.c.bf16 %v9096_v44, %v9095_v10 }
 0x541   :  { %1620 = vmatprep.mubr.f32.mxu1 %v11303_v38  ;;  %v9104_v18 = vpop.permute.xlu1 %9103  ;;  %v9101_v2 = vunpack.i.h.bf16 %v9099_v42  ;;  %v9100_v27 = vunpack.i.l.bf16 %v9099_v42 }
 0x542   :  { %1621 = vmatmul.mubr.f32.gmra.mrb[32].mxu1 %v11301_v1  ;;  %v9106_v23 = vunpack.i.h.bf16 %v9104_v18  ;;  %v9105_v12 = vunpack.i.l.bf16 %v9104_v18 }
 0x543   :  { %v11307_v32 = vpop.eup %9343 }
 0x544   :  { %v11309_v55 = vpop.eup %9345  ;;  %v9109_v25 = vpop.permute.xlu0 %9108  ;;  %v8372_v59 = vpack.c.bf16 %v9106_v23, %v9105_v12 }
 0x545   :  { %1625 = vmatprep.mubr.f32.mxu1 %v11309_v55  ;;  %v9114_v20 = vpop.permute.xlu1 %9113  ;;  %v9111_v50 = vunpack.i.h.bf16 %v9109_v25 }
 0x546   :  { %1626 = vmatmul.mubr.f32.gmra.mrb[34].mxu1 %v11307_v32 }
 0x547   :  { %1720 = vmatprep.mubr.f32.mxu1 %v14295_v29 }
 0x548   :  { %v9119_v8 = vpop.permute.xlu0 %9118 }
 0x549   :  { %v9124_v57 = vpop.permute.xlu1 %9123  ;;  %v9120_v13 = vunpack.i.l.bf16 %v9119_v8 }
 0x54a   :  { %v9126_v42 = vunpack.i.h.bf16 %v9124_v57 }
 0x60d   :  { %v7280_v45 = vpop.f32.mrb[28].mxu1 }
 0x60e   :  { %v7281_v4 = vpop.f32.mrb[29].mxu1 }
 0x60f   :  { %v7282_v9 = vadd.f32 %v7281_v4, %v7280_v45  ;;  %v9110_v45 = vunpack.i.l.bf16 %v9109_v25  ;;  %v8370_v4 = vpack.c.bf16 %v9101_v2, %v9100_v27 }
 0x611   :  { %v1631_v33 = vmax.f32 %v7282_v9, 1e-30  ;;  %v7283_v48 = vpop.f32.mrb[30].mxu1 }
 0x612   :  { %v7284_v11 = vpop.f32.mrb[31].mxu1 }
 0x613   :  { %9347 = vrcp.f32 %v1631_v33  ;;  %v7285_v54 = vadd.f32 %v7284_v11, %v7283_v48  ;;  %v9116_v33 = vunpack.i.h.bf16 %v9114_v20  ;;  %v9115_v48 = vunpack.i.l.bf16 %v9114_v20  ;;  %v9129_v11 = vpop.permute.xlu0 %9128  ;;  %v1964_v20 = vld [vmem:[%s13946_s13 + $0x10] sm:$0xff] }
 0x614   :  { %v9131_v56 = vunpack.i.h.bf16 %v9129_v11  ;;  %v9130_v43 = vunpack.i.l.bf16 %v9129_v11 }
 0x615   :  { %v1632_v62 = vmax.f32 %v7285_v54, 1e-30  ;;  %v7286_v39 = vpop.f32.mrb[32].mxu1  ;;  %v9121_v54 = vunpack.i.h.bf16 %v9119_v8 }
 0x616   :  { %v7287_v46 = vpop.f32.mrb[33].mxu1 }
 0x617   :  { %9349 = vrcp.f32 %v1632_v62  ;;  %v7288_v22 = vadd.f32 %v7287_v46, %v7286_v39  ;;  %v8374_v62 = vpack.c.bf16 %v9111_v50, %v9110_v45  ;;  %v9134_v39 = vpop.permute.xlu1 %9133  ;;  %v8376_v46 = vpack.c.bf16 %v9116_v33, %v9115_v48 }
 0x618   :  { %v9136_v6 = vunpack.i.h.bf16 %v9134_v39  ;;  %v9135_v18 = vunpack.i.l.bf16 %v9134_v39 }
 0x619   :  { %v1633_v34 = vmax.f32 %v7288_v22, 1e-30  ;;  %v7289_v24 = vpop.f32.mrb[34].mxu1  ;;  %v9125_v22 = vunpack.i.l.bf16 %v9124_v57 }
 0x61a   :  { %v7290_v41 = vpop.f32.mrb[35].mxu1  ;;  %v8384_v47 = vpack.c.bf16 %v9136_v6, %v9135_v18 }
 0x61b   :  { %9351 = vrcp.f32 %v1633_v34  ;;  %v7291_v28 = vadd.f32 %v7290_v41, %v7289_v24  ;;  %v8378_v34 = vpack.c.bf16 %v9121_v54, %v9120_v13  ;;  %v9139_v24 = vpop.permute.xlu0 %9138  ;;  %v8380_v26 = vpack.c.bf16 %v9126_v42, %v9125_v22  ;;  %v9144_v41 = vpop.permute.xlu1 %9143 }
 0x61c   :  { %v9146_v35 = vunpack.i.h.bf16 %v9144_v41  ;;  %v9145_v25 = vunpack.i.l.bf16 %v9144_v41 }
 0x61d   :  { %v9348_v31 = vpop.eup %9347  ;;  %v1634_v5 = vmax.f32 %v7291_v28, 1e-30  ;;  %v9141_v28 = vunpack.i.h.bf16 %v9139_v24 }
 0x61e   :  { %6821 = vmatmul.mubr.msk.f32.vlgmr.msra.gmra.mrb[36].mxu1 %vm1643_vm2, %v9348_v31  ;;  %v9140_v31 = vunpack.i.l.bf16 %v9139_v24  ;;  %v8388_v3 = vpack.c.bf16 %v9146_v35, %v9145_v25 }
 0x61f   :  { %9353 = vrcp.f32 %v1634_v5  ;;  %8361 = vmatpush3.bf16.msra.mxu1 %v8360_v52  ;;  %1726 = vmatprep.mubr.f32.mxu1 %v14295_v29  ;;  %v8382_v52 = vpack.c.bf16 %v9131_v56, %v9130_v43  ;;  %v1947_v11 = vpop.permute.xlu0 %1946 }
 0x620   :  { %8363 = vmatprep.subr.bf16.mxu1 %v8362_v15  ;;  %v8386_v5 = vpack.c.bf16 %v9141_v28, %v9140_v31  ;;  %v1963_v15 = vld [vmem:[%s13946_s13 + $0x8] sm:$0xff]  ;;  %v6825_v31 = vld [vmem:[%s13947_s14] ss:$0 sm:$0xff] }
 0x621   :  { %v9350_v49 = vpop.eup %9349 }
 0x622   :  { %6822 = vmatmul.mubr.msk.f32.gmra.mrb[38].mxu1 %vm1643_vm2, %v9350_v49  ;;  %v8390_v49 = vpack.c.bf16 %v1963_v15, %v1962_v60  ;;  %v11393_v60 = vld [vmem:[%s14141_s29] sm:$0xff] }
 0x623   :  { %8365 = vmatpush3.bf16.msra.mxu1 %v8364_v16  ;;  %1732 = vmatprep.mubr.f32.mxu1 %v14295_v29  ;;  %v1965_v16 = vld [vmem:[%s13946_s13 + $0x18] sm:$0xff] }
 0x624   :  { %8367 = vmatprep.subr.bf16.mxu1 %v8366_v21  ;;  %v8394_v44 = vpack.c.bf16 %v1965_v16, %v1964_v20  ;;  %8391 = vmatprep.subr.bf16.mxu0 %v8390_v49 }
 0x625   :  { %v9352_v19 = vpop.eup %9351  ;;  %8393 = vmatpush3.bf16.msra.mxu0 %v8390_v49 }
 0x626   :  { %6823 = vmatmul.mubr.msk.f32.gmra.mrb[40].mxu1 %vm1643_vm2, %v9352_v19  ;;  %8395 = vmatprep.subr.bf16.mxu0 %v8394_v44 }
 0x627   :  { %8369 = vmatpush3.bf16.msra.mxu1 %v8368_v53  ;;  %1738 = vmatprep.mubr.f32.mxu1 %v14295_v29 }
 0x628   :  { %8371 = vmatprep.subr.bf16.mxu1 %v8370_v4  ;;  %v1969_v4 = vld [vmem:[%s13946_s13 + $0x38] sm:$0xff] }
 0x629   :  { %v9354_v9 = vpop.eup %9353  ;;  %8397 = vmatpush3.bf16.msra.mxu0 %v8394_v44 }
 0x62a   :  { %6824 = vmatmul.mubr.msk.f32.gmra.mrb[42].mxu1 %vm1643_vm2, %v9354_v9 }
 0x62b   :  { %8373 = vmatpush3.bf16.msra.mxu1 %v8372_v59 }
 0x62c   :  { %8375 = vmatprep.subr.bf16.mxu1 %v8374_v62 }
 0x62f   :  { %8377 = vmatpush3.bf16.msra.mxu1 %v8376_v46  ;;  %v1949_v46 = vpop.permute.xlu1 %1948 }
 0x630   :  { %8379 = vmatprep.subr.bf16.mxu1 %v8378_v34  ;;  %v1951_v34 = vpop.permute.xlu0 %1950 }
 0x633   :  { %8381 = vmatpush3.bf16.msra.mxu1 %v8380_v26  ;;  %v1953_v41 = vpop.permute.xlu1 %1952 }
 0x634   :  { %8383 = vmatprep.subr.bf16.mxu1 %v8382_v52 }
 0x637   :  { %8385 = vmatpush3.bf16.msra.mxu1 %v8384_v47 }
 0x638   :  { %8387 = vmatprep.subr.bf16.mxu1 %v8386_v5  ;;  %v11387_v5 = vld [vmem:[%s14141_s29 + $0x8] sm:$0xff] }
 0x63b   :  { %8389 = vmatpush3.bf16.msra.mxu1 %v8388_v3 }
 0x6f1   :  { %v1722_v10 = vpop.f32.mrb[36].mxu1 }
 0x6f2   :  { %v1745_v2 = vmul.f32 %v11286_v36, %v1722_v10  ;;  %v1724_v27 = vpop.f32.mrb[37].mxu1 }
 0x6f3   :  { %v1746_v21 = vmul.f32 %v11288_v63, %v1724_v27  ;;  %v11401_v27 = vld [vmem:[%s14141_s29 + $0x10] sm:$0xff] }
 0x6f4   :  { %1753 = vst [vmem:[%s13955_s22] sm:$0xff] %v1745_v2 }
 0x6f5   :  { %1754 = vst [vmem:[%s13955_s22 + $0x8] sm:$0xff] %v1746_v21  ;;  %v1728_v8 = vpop.f32.mrb[38].mxu1  ;;  %1921 = vmatprep.mubr.f32.mxu1 %v1746_v21 }
 0x6f6   :  { %v1747_v19 = vmul.f32 %v11295_v51, %v1728_v8  ;;  %v1730_v53 = vpop.f32.mrb[39].mxu1  ;;  %1922 = vmatmul.mubr.f32.vlgmr.msra.gmra.mrb[44].mxu1 %v1745_v2 }
 0x6f7   :  { %v1748_v23 = vmul.f32 %v11297_v17, %v1730_v53 }
 0x6f8   :  { %1755 = vst [vmem:[%s13955_s22 + $0x10] sm:$0xff] %v1747_v19 }
 0x6f9   :  { %1756 = vst [vmem:[%s13955_s22 + $0x18] sm:$0xff] %v1748_v23  ;;  %v1734_v36 = vpop.f32.mrb[40].mxu1  ;;  %1926 = vmatprep.mubr.f32.mxu1 %v1748_v23 }
 0x6fa   :  { %v1749_v63 = vmul.f32 %v11301_v1, %v1734_v36  ;;  %v1736_v12 = vpop.f32.mrb[41].mxu1  ;;  %1927 = vmatmul.mubr.f32.gmra.mrb[46].mxu1 %v1747_v19  ;;  %v11408_v19 = vld [vmem:[%s14141_s29 + $0x18] sm:$0xff] }
 0x6fb   :  { %v1750_v51 = vmul.f32 %v11303_v38, %v1736_v12  ;;  %v1966_v38 = vld [vmem:[%s13946_s13 + $0x20] sm:$0xff] }
 0x6fc   :  { %1757 = vst [vmem:[%s13955_s22 + $0x20] sm:$0xff] %v1749_v63 }
 0x6fd   :  { %1758 = vst [vmem:[%s13955_s22 + $0x28] sm:$0xff] %v1750_v51  ;;  %v1740_v17 = vpop.f32.mrb[42].mxu1  ;;  %1931 = vmatprep.mubr.f32.mxu1 %v1750_v51 }
 0x6fe   :  { %v1751_v50 = vmul.f32 %v11307_v32, %v1740_v17  ;;  %v1742_v45 = vpop.f32.mrb[43].mxu1  ;;  %1932 = vmatmul.mubr.f32.gmra.mrb[48].mxu1 %v1749_v63  ;;  %v1967_v32 = vld [vmem:[%s13946_s13 + $0x28] sm:$0xff] }
 0x6ff   :  { %v1752_v1 = vmul.f32 %v11309_v55, %v1742_v45  ;;  %v8398_v57 = vpack.c.bf16 %v1967_v32, %v1966_v38  ;;  %v1968_v55 = vld [vmem:[%s13946_s13 + $0x30] sm:$0xff] }
 0x700   :  { %1759 = vst [vmem:[%s13955_s22 + $0x30] sm:$0xff] %v1751_v50  ;;  %v8402_v9 = vpack.c.bf16 %v1969_v4, %v1968_v55 }
 0x701   :  { %1760 = vst [vmem:[%s13955_s22 + $0x38] sm:$0xff] %v1752_v1  ;;  %1936 = vmatprep.mubr.f32.mxu1 %v1752_v1  ;;  %8399 = vmatprep.subr.bf16.mxu0 %v8398_v57 }
 0x702   :  { %1937 = vmatmul.mubr.f32.gmra.mrb[50].mxu1 %v1751_v50  ;;  %8401 = vmatpush3.bf16.msra.mxu0 %v8398_v57 }
 0x703   :  { %8403 = vmatprep.subr.bf16.mxu0 %v8402_v9 }
 0x706   :  { %8405 = vmatpush3.bf16.msra.mxu0 %v8402_v9 }
 0x7c9   :  { %v7324_v59 = vpop.f32.mrb[44].mxu1 }
 0x7ca   :  { %v7325_v33 = vpop.f32.mrb[45].mxu1 }
 0x7cb   :  { %v7326_v48 = vadd.f32 %v7325_v33, %v7324_v59 }
 0x7cd   :  { %v1958_v54 = vmul.f32 %v7326_v48, %v1947_v11  ;;  %v7327_v13 = vpop.f32.mrb[46].mxu1 }
 0x7ce   :  { %v7328_v62 = vpop.f32.mrb[47].mxu1 }
 0x7cf   :  { %v7329_v39 = vadd.f32 %v7328_v62, %v7327_v13  ;;  %7832 = vmatprep.mubr.msk.f32.mxu0 %vm271_vm0, %v1958_v54  ;;  %v2152_v62 = vld [vmem:[%s13950_s17] sm:$0xff] }
 0x7d1   :  { %v1959_v42 = vmul.f32 %v7329_v39, %v1949_v46  ;;  %v7330_v22 = vpop.f32.mrb[48].mxu1  ;;  %v2153_v39 = vld [vmem:[%s13950_s17 + $0x8] sm:$0xff]  ;;  %v2154_v46 = vld [vmem:[%s13950_s17 + $0x10] sm:$0xff] }
 0x7d2   :  { %v7331_v56 = vpop.f32.mrb[49].mxu1 }
 0x7d3   :  { %v7332_v43 = vadd.f32 %v7331_v56, %v7330_v22  ;;  %7833 = vmatmul.mubr.msk.f32.vlgmr.msra.gmra.mrb[36].mxu0 %vm271_vm0, %v1959_v42  ;;  %v8406_v42 = vpack.c.bf16 %v2153_v39, %v2152_v62  ;;  %v2155_v22 = vld [vmem:[%s13950_s17 + $0x18] sm:$0xff] }
 0x7d4   :  { %v8410_v56 = vpack.c.bf16 %v2155_v22, %v2154_v46  ;;  %v2307_v39 = vld [vmem:[%s13952_s19 + $0x38] sm:$0xff]  ;;  %v2309_v22 = vld [vmem:[%s13952_s19 + $0x48] sm:$0xff] }
 0x7d5   :  { %v1960_v24 = vmul.f32 %v7332_v43, %v1951_v34  ;;  %v7333_v26 = vpop.f32.mrb[50].mxu1  ;;  %v2156_v43 = vld [vmem:[%s13950_s17 + $0x20] sm:$0xff]  ;;  %v2157_v34 = vld [vmem:[%s13950_s17 + $0x28] sm:$0xff]  ;;  %8407 = vmatprep.subr.bf16.mxu0 %v8406_v42 }
 0x7d6   :  { %v7334_v6 = vpop.f32.mrb[51].mxu1  ;;  %8409 = vmatpush3.bf16.msra.mxu0 %v8406_v42  ;;  %v2308_v42 = vld [vmem:[%s13952_s19 + $0x40] sm:$0xff] }
 0x7d7   :  { %v7335_v18 = vadd.f32 %v7334_v6, %v7333_v26  ;;  %7835 = vmatprep.mubr.msk.f32.mxu0 %vm271_vm0, %v1960_v24  ;;  %8411 = vmatprep.subr.bf16.mxu0 %v8410_v56  ;;  %v8414_v24 = vpack.c.bf16 %v2157_v34, %v2156_v43  ;;  %v2158_v26 = vld [vmem:[%s13950_s17 + $0x30] sm:$0xff]  ;;  %v2159_v6 = vld [vmem:[%s13950_s17 + $0x38] sm:$0xff] }
 0x7d8   :  { %v2310_v43 = vld [vmem:[%s13952_s19 + $0x50] sm:$0xff]  ;;  %v2311_v34 = vld [vmem:[%s13952_s19 + $0x58] sm:$0xff] }
 0x7d9   :  { %v1961_v28 = vmul.f32 %v7335_v18, %v1953_v41  ;;  %v8418_v18 = vpack.c.bf16 %v2159_v6, %v2158_v26  ;;  %v2300_v41 = vld [vmem:[%s13952_s19] sm:$0xff]  ;;  %v2313_v6 = vld [vmem:[%s13952_s19 + $0x68] sm:$0xff] }
 0x7da   :  { %8413 = vmatpush3.bf16.msra.mxu0 %v8410_v56  ;;  %v8438_v56 = vpack.c.bf16 %v2309_v22, %v2308_v42  ;;  %v2312_v26 = vld [vmem:[%s13952_s19 + $0x60] sm:$0xff] }
 0x7db   :  { %7836 = vmatmul.mubr.msk.f32.gmra.mrb[38].mxu0 %vm271_vm0, %v1961_v28  ;;  %8415 = vmatprep.subr.bf16.mxu0 %v8414_v24  ;;  %v2301_v28 = vld [vmem:[%s13952_s19 + $0x8] sm:$0xff] }
 0x7de   :  { %8417 = vmatpush3.bf16.msra.mxu0 %v8414_v24  ;;  %v8442_v24 = vpack.c.bf16 %v2311_v34, %v2310_v43 }
 0x7df   :  { %8419 = vmatprep.subr.bf16.mxu0 %v8418_v18 }
 0x7e2   :  { %8421 = vmatpush3.bf16.msra.mxu0 %v8418_v18  ;;  %v8446_v18 = vpack.c.bf16 %v2313_v6, %v2312_v26  ;;  %v6837_v26 = vld [vmem:[%s13953_s20] ss:$0 sm:$0xff] }
 0x8a6   :  { %v7834_v52 = vpop.f32.mrb[36].mxu0 }
 0x8a7   :  { %v2061_v47 = vadd.f32 %v7834_v52, %v6825_v31  ;;  %v2055_v35 = vpop.f32.mrb[37].mxu0 }
 0x8a8   :  { %v2056_v25 = vadd.f32 %v6825_v31, %v2055_v35 }
 0x8a9   :  { %v2075_v3 = vadd.f32 %v11387_v5, %v2061_v47 }
 0x8aa   :  { %v2074_v15 = vadd.f32 %v11393_v60, %v2056_v25 }
 0x8ab   :  { %v2083_v20 = vsel %vm271_vm0, %v2075_v3, 0.0 }
 0x8ac   :  { %2084 = vadd.xlane.f32.xlu1 %v2083_v20  ;;  %v2080_v49 = vsel %vm271_vm0, %v2074_v15, 0.0 }
 0x8ad   :  { %2081 = vadd.xlane.f32.xlu0 %v2080_v49 }
 0x8ae   :  { %v7837_v16 = vpop.f32.mrb[38].mxu0 }
 0x8af   :  { %v2065_v44 = vpop.f32.mrb[39].mxu0  ;;  %v2071_v10 = vadd.f32 %v7837_v16, %v6825_v31 }
 0x8b0   :  { %v2066_v2 = vadd.f32 %v6825_v31, %v2065_v44  ;;  %v8422_v31 = vpack.c.bf16 %v2301_v28, %v2300_v41  ;;  %v2314_v41 = vld [vmem:[%s13952_s19 + $0x70] sm:$0xff]  ;;  %v2315_v28 = vld [vmem:[%s13952_s19 + $0x78] sm:$0xff] }
 0x8b1   :  { %v2077_v53 = vadd.f32 %v11408_v19, %v2071_v10 }
 0x8b2   :  { %v2076_v21 = vadd.f32 %v11401_v27, %v2066_v2  ;;  %8423 = vmatprep.subr.bf16.mxu1 %v8422_v31 }
 0x8b3   :  { %v2089_v23 = vsel %vm271_vm0, %v2077_v53, 0.0  ;;  %8425 = vmatpush3.bf16.msra.mxu1 %v8422_v31  ;;  %v8450_v31 = vpack.c.bf16 %v2315_v28, %v2314_v41 }
 0x8b4   :  { %v2086_v8 = vsel %vm271_vm0, %v2076_v21, 0.0 }
 0x8b5   :  { %2087 = vadd.xlane.f32.xlu0 %v2086_v8 }
 0x8b9   :  { %2090 = vadd.xlane.f32.xlu0 %v2089_v23 }
 0x939   :  { %v2085_v36 = vpop.xlane.xlu1 %2084 }
 0x93a   :  { %v2093_v63 = vmul.f32 0.015625, %v2085_v36  ;;  %v2082_v12 = vpop.xlane.xlu0 %2081 }
 0x93b   :  { %v2092_v51 = vmul.f32 0.015625, %v2082_v12 }
 0x93c   :  { %v2097_v17 = vsub.f32 %v2075_v3, %v2093_v63  ;;  %v6831_v63 = vld [vmem:[%s13949_s16] ss:$0 sm:$0xff] }
 0x93d   :  { %v11412_v50 = vsub.f32 %v2074_v15, %v2092_v51 }
 0x93e   :  { %v2101_v45 = vmul.f32 %v2097_v17, %v2097_v17 }
 0x93f   :  { %v2100_v1 = vmul.f32 %v11412_v50, %v11412_v50 }
 0x940   :  { %v2107_v38 = vsel %vm271_vm0, %v2101_v45, 0.0 }
 0x941   :  { %2108 = vadd.xlane.f32.xlu1 %v2107_v38  ;;  %v2104_v32 = vsel %vm271_vm0, %v2100_v1, 0.0 }
 0x942   :  { %2105 = vadd.xlane.f32.xlu0 %v2104_v32  ;;  %v2088_v57 = vpop.xlane.xlu0 %2087 }
 0x943   :  { %v2094_v55 = vmul.f32 0.015625, %v2088_v57 }
 0x945   :  { %v11418_v4 = vsub.f32 %v2076_v21, %v2094_v55  ;;  %v6830_v21 = vld [vmem:[%s13948_s15] ss:$0 sm:$0xff] }
 0x946   :  { %v2091_v9 = vpop.xlane.xlu0 %2090 }
 0x947   :  { %v2095_v59 = vmul.f32 0.015625, %v2091_v9  ;;  %v2102_v33 = vmul.f32 %v11418_v4, %v11418_v4 }
 0x949   :  { %v11422_v48 = vsub.f32 %v2077_v53, %v2095_v59  ;;  %v2110_v11 = vsel %vm271_vm0, %v2102_v33, 0.0  ;;  %v2302_v33 = vld [vmem:[%s13952_s19 + $0x10] sm:$0xff] }
 0x94a   :  { %2111 = vadd.xlane.f32.xlu0 %v2110_v11 }
 0x94b   :  { %v2103_v54 = vmul.f32 %v11422_v48, %v11422_v48 }
 0x94d   :  { %v2113_v13 = vsel %vm271_vm0, %v2103_v54, 0.0  ;;  %v2305_v54 = vld [vmem:[%s13952_s19 + $0x28] sm:$0xff] }
 0x94e   :  { %2114 = vadd.xlane.f32.xlu1 %v2113_v13  ;;  %v2306_v13 = vld [vmem:[%s13952_s19 + $0x30] sm:$0xff] }
 0x94f   :  { %v8434_v46 = vpack.c.bf16 %v2307_v39, %v2306_v13 }
 0x9ce   :  { %v2109_v52 = vpop.xlane.xlu1 %2108 }
 0x9cf   :  { %v2117_v47 = vmul.f32 0.015625, %v2109_v52  ;;  %v2106_v35 = vpop.xlane.xlu0 %2105  ;;  %v6832_v52 = vld [vmem:[%s13951_s18] ss:$0 sm:$0xff] }
 0x9d0   :  { %v2116_v25 = vmul.f32 0.015625, %v2106_v35 }
 0x9d1   :  { %v2121_v3 = vadd.f32 1e-06, %v2117_v47 }
 0x9d2   :  { %v2120_v15 = vadd.f32 1e-06, %v2116_v25 }
 0x9d3   :  { %9355 = vrsqrt.f32 %v2121_v3 }
 0x9d4   :  { %9357 = vrsqrt.f32 %v2120_v15 }
 0x9d7   :  { %v2112_v20 = vpop.xlane.xlu0 %2111 }
 0x9d8   :  { %v2118_v49 = vmul.f32 0.015625, %v2112_v20 }
 0x9da   :  { %v2122_v16 = vadd.f32 1e-06, %v2118_v49 }
 0x9db   :  { %v2115_v44 = vpop.xlane.xlu1 %2114 }
 0x9dc   :  { %9359 = vrsqrt.f32 %v2122_v16  ;;  %v2119_v10 = vmul.f32 0.015625, %v2115_v44 }
 0x9dd   :  { %v9356_v2 = vpop.eup %9355 }
 0x9de   :  { %v9358_v8 = vpop.eup %9357  ;;  %v2129_v53 = vmul.f32 %v9356_v2, %v2097_v17  ;;  %v2123_v23 = vadd.f32 1e-06, %v2119_v10 }
 0x9df   :  { %v2128_v36 = vmul.f32 %v9358_v8, %v11412_v50 }
 0x9e0   :  { %9361 = vrsqrt.f32 %v2123_v23  ;;  %v2139_v12 = vmul.f32 %v6830_v21, %v2129_v53 }
 0x9e1   :  { %v2138_v51 = vmul.f32 %v6830_v21, %v2128_v36 }
 0x9e2   :  { %v2149_v1 = vadd.f32 %v6831_v63, %v2139_v12 }
 0x9e3   :  { %v2148_v45 = vadd.f32 %v6831_v63, %v2138_v51 }
 0x9e5   :  { %7854 = vmatprep.mubr.msk.f32.mxu0 %vm271_vm0, %v2148_v45 }
 0x9e6   :  { %v9360_v38 = vpop.eup %9359  ;;  %7855 = vmatmul.mubr.msk.f32.vlgmr.msra.gmra.mrb[40].mxu0 %vm271_vm0, %v2149_v1 }
 0x9e7   :  { %v2130_v32 = vmul.f32 %v9360_v38, %v11418_v4  ;;  %v2303_v4 = vld [vmem:[%s13952_s19 + $0x18] sm:$0xff] }
 0x9e8   :  { %v8426_v11 = vpack.c.bf16 %v2303_v4, %v2302_v33 }
 0x9e9   :  { %v2140_v17 = vmul.f32 %v6830_v21, %v2130_v32 }
 0x9ea   :  { %v9362_v57 = vpop.eup %9361  ;;  %8427 = vmatprep.subr.bf16.mxu1 %v8426_v11 }
 0x9eb   :  { %v2150_v55 = vadd.f32 %v6831_v63, %v2140_v17  ;;  %v2131_v50 = vmul.f32 %v9362_v57, %v11422_v48  ;;  %v2304_v48 = vld [vmem:[%s13952_s19 + $0x20] sm:$0xff]  ;;  %8429 = vmatpush3.bf16.msra.mxu1 %v8426_v11 }
 0x9ec   :  { %v8430_v62 = vpack.c.bf16 %v2305_v54, %v2304_v48 }
 0x9ed   :  { %7857 = vmatprep.mubr.msk.f32.mxu0 %vm271_vm0, %v2150_v55  ;;  %v2141_v9 = vmul.f32 %v6830_v21, %v2131_v50 }
 0x9ee   :  { %8431 = vmatprep.subr.bf16.mxu1 %v8430_v62 }
 0x9ef   :  { %v2151_v59 = vadd.f32 %v6831_v63, %v2141_v9  ;;  %8433 = vmatpush3.bf16.msra.mxu1 %v8430_v62 }
 0x9f0   :  { %8435 = vmatprep.subr.bf16.mxu1 %v8434_v46 }
 0x9f1   :  { %7858 = vmatmul.mubr.msk.f32.gmra.mrb[42].mxu0 %vm271_vm0, %v2151_v59 }
 0x9f2   :  { %2607 = vmatprep.mubr.f32.mxu0 %v14295_v29 }
 0x9f3   :  { %8437 = vmatpush3.bf16.msra.mxu1 %v8434_v46 }
 0x9f4   :  { %8439 = vmatprep.subr.bf16.mxu1 %v8438_v56 }
 0x9f7   :  { %8441 = vmatpush3.bf16.msra.mxu1 %v8438_v56 }
 0x9f8   :  { %8443 = vmatprep.subr.bf16.mxu1 %v8442_v24 }
 0x9fb   :  { %8445 = vmatpush3.bf16.msra.mxu1 %v8442_v24 }
 0x9fc   :  { %8447 = vmatprep.subr.bf16.mxu1 %v8446_v18 }
 0x9ff   :  { %8449 = vmatpush3.bf16.msra.mxu1 %v8446_v18 }
 0xa00   :  { %8451 = vmatprep.subr.bf16.mxu1 %v8450_v31 }
 0xa03   :  { %8453 = vmatpush3.bf16.msra.mxu1 %v8450_v31 }
 0xab9   :  { %v7856_v47 = vpop.f32.mrb[40].mxu0 }
 0xaba   :  { %v2251_v35 = vadd.f32 %v7856_v47, %v6832_v52  ;;  %v2245_v25 = vpop.f32.mrb[41].mxu0 }
 0xabb   :  { %v2246_v3 = vadd.f32 %v6832_v52, %v2245_v25 }
 0xabc   :  { %v2269_v15 = vmul.f32 0.044715, %v2251_v35  ;;  %v2265_v54 = vmul.f32 0.5, %v2251_v35 }
 0xabd   :  { %v2268_v20 = vmul.f32 0.044715, %v2246_v3  ;;  %v2264_v11 = vmul.f32 0.5, %v2246_v3 }
 0xabe   :  { %v2273_v49 = vmul.f32 %v2269_v15, %v2251_v35 }
 0xabf   :  { %v2272_v16 = vmul.f32 %v2268_v20, %v2246_v3 }
 0xac0   :  { %v2277_v44 = vmul.f32 %v2273_v49, %v2251_v35 }
 0xac1   :  { %v2276_v10 = vmul.f32 %v2272_v16, %v2246_v3 }
 0xac2   :  { %v2281_v2 = vadd.f32 %v2277_v44, %v2251_v35 }
 0xac3   :  { %v2280_v21 = vadd.f32 %v2276_v10, %v2246_v3 }
 0xac4   :  { %v2285_v8 = vmul.f32 0.7978846, %v2281_v2  ;;  %v7859_v53 = vpop.f32.mrb[42].mxu0 }
 0xac5   :  { %v2261_v23 = vadd.f32 %v7859_v53, %v6832_v52  ;;  %v2255_v36 = vpop.f32.mrb[43].mxu0  ;;  %v2284_v63 = vmul.f32 0.7978846, %v2280_v21 }
 0xac6   :  { %9363 = vtanh.f32 %v2285_v8  ;;  %v2256_v12 = vadd.f32 %v6832_v52, %v2255_v36 }
 0xac7   :  { %v2271_v51 = vmul.f32 0.044715, %v2261_v23  ;;  %9365 = vtanh.f32 %v2284_v63  ;;  %v2267_v43 = vmul.f32 0.5, %v2261_v23 }
 0xac8   :  { %v2270_v45 = vmul.f32 0.044715, %v2256_v12  ;;  %v2266_v22 = vmul.f32 0.5, %v2256_v12 }
 0xac9   :  { %v2275_v1 = vmul.f32 %v2271_v51, %v2261_v23 }
 0xaca   :  { %v2274_v38 = vmul.f32 %v2270_v45, %v2256_v12 }
 0xacb   :  { %v2279_v32 = vmul.f32 %v2275_v1, %v2261_v23 }
 0xacc   :  { %v2278_v17 = vmul.f32 %v2274_v38, %v2256_v12 }
 0xacd   :  { %v2283_v57 = vadd.f32 %v2279_v32, %v2261_v23 }
 0xace   :  { %v2282_v55 = vadd.f32 %v2278_v17, %v2256_v12 }
 0xacf   :  { %v2287_v50 = vmul.f32 0.7978846, %v2283_v57 }
 0xad0   :  { %v9364_v9 = vpop.eup %9363  ;;  %v2286_v59 = vmul.f32 0.7978846, %v2282_v55 }
 0xad1   :  { %v9366_v33 = vpop.eup %9365  ;;  %v2293_v4 = vadd.f32 1.0, %v9364_v9  ;;  %9367 = vtanh.f32 %v2287_v50  ;;  %v6843_v50 = vld [vmem:[%s13942_s9 + $0xc8] sm:$0xff]  ;;  %v6846_v9 = vld [vmem:[%s13942_s9 + $0xe0] sm:$0xff] }
 0xad2   :  { %v2292_v48 = vadd.f32 1.0, %v9366_v33  ;;  %9369 = vtanh.f32 %v2286_v59  ;;  %v8454_v59 = vpack.c.bf16 %v6846_v9, %v6843_v50  ;;  %v6842_v33 = vld [vmem:[%s13942_s9 + $0xc0] sm:$0xff] }
 0xad3   :  { %v2297_v62 = vmul.f32 %v2293_v4, %v2265_v54  ;;  %v6845_v4 = vld [vmem:[%s13942_s9 + $0xd8] sm:$0xff]  ;;  %v6852_v54 = vld [vmem:[%s13942_s9 + $0x110] sm:$0xff]  ;;  %v6840_v50 = vld [vmem:[%s13940_s7 + $0x1] ss:$0 sm:$0xff] }
 0xad4   :  { %v2296_v13 = vmul.f32 %v2292_v48, %v2264_v11  ;;  %v8456_v11 = vpack.c.bf16 %v6845_v4, %v6842_v33  ;;  %8455 = vmatprep.subr.bf16.mxu0 %v8454_v59  ;;  %v6849_v48 = vld [vmem:[%s13942_s9 + $0xf8] sm:$0xff]  ;;  %v6841_v33 = vld [vmem:[%s13941_s8 + $0x1] ss:$0 sm:$0xff] }
 0xad5   :  { %v6850_v4 = vld [vmem:[%s13942_s9 + $0x100] sm:$0xff] }
 0xad6   :  { %7892 = vmatprep.mubr.f32.mxu1 %v2296_v13  ;;  %8457 = vmatpush1.bf16.msra.mxu0 %v8456_v11  ;;  %v8458_v13 = vpack.c.bf16 %v6852_v54, %v6849_v48  ;;  %v6853_v11 = vld [vmem:[%s13942_s9 + $0x118] sm:$0xff] }
 0xad7   :  { %7893 = vmatmul.mubr.f32.vlgmr.msra.gmra.mrb[52].mxu1 %v2297_v62  ;;  %v6848_v62 = vld [vmem:[%s13942_s9 + $0xf0] sm:$0xff] }
 0xad8   :  { %8459 = vmatprep.subr.bf16.mxu0 %v8458_v13 }
 0xadb   :  { %v9368_v39 = vpop.eup %9367 }
 0xadc   :  { %v9370_v46 = vpop.eup %9369  ;;  %v2295_v42 = vadd.f32 1.0, %v9368_v39  ;;  %v6851_v39 = vld [vmem:[%s13942_s9 + $0x108] sm:$0xff] }
 0xadd   :  { %v2294_v56 = vadd.f32 1.0, %v9370_v46  ;;  %v8460_v46 = vpack.c.bf16 %v6851_v39, %v6848_v62  ;;  %v8474_v62 = vpack.c.bf16 %v6853_v11, %v6850_v4  ;;  %v14314_v11 = vld [vmem:[#allocation22_spill] sm:$0xff] }
 0xade   :  { %v2299_v24 = vmul.f32 %v2295_v42, %v2267_v43  ;;  %v6855_v42 = vld [vmem:[%s13942_s9 + $0x128] sm:$0xff] }
 0xadf   :  { %v2298_v34 = vmul.f32 %v2294_v56, %v2266_v22  ;;  %v6858_v22 = vld [vmem:[%s13942_s9 + $0x140] sm:$0xff]  ;;  %8461 = vmatpush1.bf16.msra.mxu0 %v8460_v46 }
 0xae0   :  { %v6854_v56 = vld [vmem:[%s13942_s9 + $0x120] sm:$0xff]  ;;  %v8462_v43 = vpack.c.bf16 %v6858_v22, %v6855_v42 }
 0xae1   :  { %7895 = vmatprep.mubr.f32.mxu1 %v2298_v34  ;;  %v6857_v34 = vld [vmem:[%s13942_s9 + $0x138] sm:$0xff]  ;;  %v6862_v22 = vld [vmem:[%s13942_s9 + $0x160] sm:$0xff] }
 0xae2   :  { %7896 = vmatmul.mubr.f32.gmra.mrb[54].mxu1 %v2299_v24  ;;  %v6861_v24 = vld [vmem:[%s13942_s9 + $0x158] sm:$0xff]  ;;  %8463 = vmatprep.subr.bf16.mxu0 %v8462_v43 }
 0xbaa   :  { %v7894_v6 = vpop.f32.mrb[52].mxu1 }
 0xbab   :  { %v2395_v18 = vadd.f32 %v7894_v6, %v6837_v26  ;;  %v2389_v41 = vpop.f32.mrb[53].mxu1  ;;  %v8464_v6 = vpack.c.bf16 %v6857_v34, %v6854_v56  ;;  %v6865_v56 = vld [vmem:[%s13942_s9 + $0x178] sm:$0xff] }
 0xbac   :  { %v2390_v28 = vadd.f32 %v6837_v26, %v2389_v41  ;;  %v6860_v41 = vld [vmem:[%s13942_s9 + $0x150] sm:$0xff] }
 0xbad   :  { %v11521_v31 = vadd.f32 %v11387_v5, %v2395_v18  ;;  %8465 = vmatpush1.bf16.msra.mxu0 %v8464_v6 }
 0xbae   :  { %v11524_v52 = vadd.f32 %v11393_v60, %v2390_v28  ;;  %v6863_v28 = vld [vmem:[%s13942_s9 + $0x168] sm:$0xff] }
 0xbaf   :  { %14296 = vst [vmem:[#allocation62_spill] sm:$0xff] %v11521_v31  ;;  %v2419_v47 = vsel %vm271_vm0, %v11521_v31, 0.0 }
 0xbb0   :  { %14297 = vst [vmem:[#allocation60_spill] sm:$0xff] %v11524_v52  ;;  %2420 = vadd.xlane.f32.xlu1 %v2419_v47  ;;  %v2416_v35 = vsel %vm271_vm0, %v11524_v52, 0.0  ;;  %v6844_v47 = vld [vmem:[%s13942_s9 + $0xd0] sm:$0xff] }
 0xbb1   :  { %2417 = vadd.xlane.f32.xlu0 %v2416_v35  ;;  %v6847_v35 = vld [vmem:[%s13942_s9 + $0xe8] sm:$0xff] }
 0xbb5   :  { %v7897_v25 = vpop.f32.mrb[54].mxu1 }
 0xbb6   :  { %v2405_v3 = vadd.f32 %v7897_v25, %v6837_v26  ;;  %v2399_v15 = vpop.f32.mrb[55].mxu1  ;;  %v8468_v25 = vpack.c.bf16 %v6863_v28, %v6860_v41 }
 0xbb7   :  { %v2400_v20 = vadd.f32 %v6837_v26, %v2399_v15  ;;  %v6864_v26 = vld [vmem:[%s13942_s9 + $0x170] sm:$0xff]  ;;  %v6879_v15 = vld [vmem:[%s13944_s11 + $0x40] sm:$0xff] }
 0xbb8   :  { %v11531_v49 = vadd.f32 %v11408_v19, %v2405_v3  ;;  %v8466_v18 = vpack.c.bf16 %v6864_v26, %v6861_v24  ;;  %v8470_v3 = vpack.c.bf16 %v6847_v35, %v6844_v47  ;;  %v8482_v26 = vpack.c.bf16 %v6865_v56, %v6862_v22  ;;  %v14300_v47 = vld [vmem:[#allocation5_spill] sm:$0xff]  ;;  %v14303_v35 = vld [vmem:[#allocation8_spill] sm:$0xff] }
 0xbb9   :  { %v11534_v5 = vadd.f32 %v11401_v27, %v2400_v20  ;;  %v6880_v20 = vld [vmem:[%s13944_s11 + $0x48] sm:$0xff]  ;;  %v14318_v56 = vld [vmem:[#allocation28_spill] sm:$0xff] }
 0xbba   :  { %14298 = vst [vmem:[#allocation65_spill] sm:$0xff] %v11531_v49  ;;  %v2425_v60 = vsel %vm271_vm0, %v11531_v49, 0.0  ;;  %8467 = vmatprep.subr.bf16.mxu0 %v8466_v18 }
 0xbbb   :  { %14299 = vst [vmem:[#allocation66_spill] sm:$0xff] %v11534_v5  ;;  %2426 = vadd.xlane.f32.xlu1 %v2425_v60  ;;  %v2422_v16 = vsel %vm271_vm0, %v11534_v5, 0.0  ;;  %8469 = vmatpush1.bf16.msra.mxu0 %v8468_v25  ;;  %v6881_v60 = vld [vmem:[%s13944_s11 + $0x50] sm:$0xff]  ;;  %v14304_v25 = vld [vmem:[#allocation9_spill] sm:$0xff] }
 0xbbc   :  { %2423 = vadd.xlane.f32.xlu0 %v2422_v16  ;;  %8471 = vmatprep.subr.bf16.mxu0 %v8470_v3  ;;  %v8486_v16 = vpack.c.bf16 %v6880_v20, %v6879_v15  ;;  %v14306_v15 = vld [vmem:[#allocation11_spill] sm:$0xff]  ;;  %v14307_v20 = vld [vmem:[#allocation12_spill] sm:$0xff] }
 0xbbe   :  { %8487 = vmatprep.subr.bf16.mxu1 %v8486_v16 }
 0xbbf   :  { %8489 = vmatpush3.bf16.msra.mxu1 %v8486_v16  ;;  %v6883_v16 = vld [vmem:[%s13944_s11 + $0x60] sm:$0xff] }
 0xc3d   :  { %v2421_v44 = vpop.xlane.xlu1 %2420 }
 0xc3e   :  { %v2429_v10 = vmul.f32 0.015625, %v2421_v44  ;;  %v2418_v2 = vpop.xlane.xlu0 %2417  ;;  %v6882_v44 = vld [vmem:[%s13944_s11 + $0x58] sm:$0xff] }
 0xc3f   :  { %v2428_v21 = vmul.f32 0.015625, %v2418_v2 }
 0xc40   :  { %v11541_v8 = vsub.f32 %v11521_v31, %v2429_v10  ;;  %v8490_v10 = vpack.c.bf16 %v6882_v44, %v6881_v60  ;;  %v14308_v60 = vld [vmem:[#allocation13_spill] sm:$0xff]  ;;  %v6884_v44 = vld [vmem:[%s13944_s11 + $0x68] sm:$0xff] }
 0xc41   :  { %v11544_v19 = vsub.f32 %v11524_v52, %v2428_v21 }
 0xc42   :  { %v2437_v27 = vmul.f32 %v11541_v8, %v11541_v8  ;;  %8491 = vmatprep.subr.bf16.mxu1 %v8490_v10 }
 0xc43   :  { %v2436_v53 = vmul.f32 %v11544_v19, %v11544_v19  ;;  %8493 = vmatpush3.bf16.msra.mxu1 %v8490_v10  ;;  %v8494_v10 = vpack.c.bf16 %v6884_v44, %v6883_v16  ;;  %v14323_v44 = vld [vmem:[#allocation36_spill] sm:$0xff] }
 0xc44   :  { %v2443_v23 = vsel %vm271_vm0, %v2437_v27, 0.0 }
 0xc45   :  { %2444 = vadd.xlane.f32.xlu1 %v2443_v23  ;;  %v2440_v36 = vsel %vm271_vm0, %v2436_v53, 0.0  ;;  %8495 = vmatprep.subr.bf16.mxu1 %v8494_v10 }
 0xc46   :  { %2441 = vadd.xlane.f32.xlu0 %v2440_v36 }
 0xc47   :  { %8497 = vmatpush3.bf16.msra.mxu1 %v8494_v10 }
 0xc48   :  { %v2427_v63 = vpop.xlane.xlu1 %2426 }
 0xc49   :  { %v2431_v12 = vmul.f32 0.015625, %v2427_v63  ;;  %v2424_v51 = vpop.xlane.xlu0 %2423 }
 0xc4a   :  { %v2430_v45 = vmul.f32 0.015625, %v2424_v51 }
 0xc4b   :  { %v11553_v1 = vsub.f32 %v11531_v49, %v2431_v12 }
 0xc4c   :  { %v11556_v38 = vsub.f32 %v11534_v5, %v2430_v45 }
 0xc4d   :  { %v2439_v32 = vmul.f32 %v11553_v1, %v11553_v1 }
 0xc4e   :  { %v2438_v17 = vmul.f32 %v11556_v38, %v11556_v38 }
 0xc4f   :  { %v2449_v57 = vsel %vm271_vm0, %v2439_v32, 0.0 }
 0xc50   :  { %2450 = vadd.xlane.f32.xlu1 %v2449_v57  ;;  %v2446_v55 = vsel %vm271_vm0, %v2438_v17, 0.0 }
 0xc51   :  { %2447 = vadd.xlane.f32.xlu0 %v2446_v55 }
 0xcd2   :  { %v2445_v2 = vpop.xlane.xlu1 %2444 }
 0xcd3   :  { %v2453_v21 = vmul.f32 0.015625, %v2445_v2  ;;  %v2442_v27 = vpop.xlane.xlu0 %2441  ;;  %v6885_v2 = vld [vmem:[%s13944_s11 + $0x70] sm:$0xff] }
 0xcd4   :  { %v2452_v53 = vmul.f32 0.015625, %v2442_v27 }
 0xcd5   :  { %v2457_v23 = vadd.f32 1e-06, %v2453_v21  ;;  %v6886_v21 = vld [vmem:[%s13944_s11 + $0x78] sm:$0xff] }
 0xcd6   :  { %v2456_v36 = vadd.f32 1e-06, %v2452_v53  ;;  %v8498_v27 = vpack.c.bf16 %v6886_v21, %v6885_v2  ;;  %v14309_v53 = vld [vmem:[#allocation14_spill] sm:$0xff]  ;;  %v14324_v21 = vld [vmem:[#allocation19_spill] sm:$0xff] }
 0xcd7   :  { %9371 = vrsqrt.f32 %v2457_v23  ;;  %v6866_v23 = vld [vmem:[%s13943_s10 + $0x3] sm:$0x7] }
 0xcd8   :  { %9373 = vrsqrt.f32 %v2456_v36  ;;  %8499 = vmatprep.subr.bf16.mxu1 %v8498_v27  ;;  %v14310_v36 = vld [vmem:[#allocation15_spill] sm:$0xff] }
 0xcd9   :  { %8501 = vmatpush3.bf16.msra.mxu1 %v8498_v27  ;;  %v14325_v27 = vld [vmem:[#allocation37_spill] sm:$0xff] }
 0xcda   :  { %8519 = vmatprep.subr.bf16.mxu1 %v14309_v53 }
 0xcdd   :  { %v2451_v63 = vpop.xlane.xlu1 %2450 }
 0xcde   :  { %v2455_v12 = vmul.f32 0.015625, %v2451_v63  ;;  %v2448_v51 = vpop.xlane.xlu0 %2447  ;;  %v2519_v63 = vrot.slane %v6866_v23, %v14310_v36 }
 0xcdf   :  { %v2454_v45 = vmul.f32 0.015625, %v2448_v51 }
 0xce0   :  { %v2459_v32 = vadd.f32 1e-06, %v2455_v12  ;;  %v14311_v12 = vld [vmem:[#allocation16_spill] sm:$0xff] }
 0xce1   :  { %v9372_v17 = vpop.eup %9371  ;;  %v2458_v57 = vadd.f32 1e-06, %v2454_v45  ;;  %v2523_v51 = vrot.slane %v6866_v23, %v14311_v12 }
 0xce2   :  { %v9374_v55 = vpop.eup %9373  ;;  %9375 = vrsqrt.f32 %v2459_v32  ;;  %v2465_v59 = vmul.f32 %v9372_v17, %v11541_v8  ;;  %v6856_v8 = vld [vmem:[%s13942_s9 + $0x130] sm:$0xff] }
 0xce3   :  { %v2464_v9 = vmul.f32 %v9374_v55, %v11544_v19  ;;  %9377 = vrsqrt.f32 %v2458_v57  ;;  %v6859_v19 = vld [vmem:[%s13942_s9 + $0x148] sm:$0xff] }
 0xce4   :  { %v2475_v13 = vmul.f32 %v6840_v50, %v2465_v59  ;;  %v8478_v46 = vpack.c.bf16 %v6859_v19, %v6856_v8 }
 0xce5   :  { %v2474_v48 = vmul.f32 %v6840_v50, %v2464_v9 }
 0xce6   :  { %v2485_v39 = vadd.f32 %v6841_v33, %v2475_v13 }
 0xce7   :  { %v2484_v54 = vadd.f32 %v6841_v33, %v2474_v48 }
 0xce9   :  { %6867 = vmatmul.mubr.msk.f32.vlgmr.msra.gmra.mrb[44].mxu0 %vm271_vm0, %v2484_v54 }
 0xcea   :  { %2613 = vmatprep.mubr.f32.mxu0 %v14295_v29  ;;  %8473 = vmatpush3.bf16.msra.mxu0 %v8470_v3  ;;  %v14305_v3 = vld [vmem:[#allocation10_spill] sm:$0xff] }
 0xceb   :  { %8475 = vmatprep.subr.bf16.mxu0 %v8474_v62 }
 0xcec   :  { %v9376_v42 = vpop.eup %9375 }
 0xced   :  { %v9378_v43 = vpop.eup %9377  ;;  %6868 = vmatmul.mubr.msk.f32.gmra.mrb[46].mxu0 %vm271_vm0, %v2485_v39  ;;  %v2467_v24 = vmul.f32 %v9376_v42, %v11553_v1  ;;  %v14301_v1 = vld [vmem:[#allocation6_spill] sm:$0xff] }
 0xcee   :  { %8477 = vmatpush3.bf16.msra.mxu0 %v8474_v62  ;;  %2619 = vmatprep.mubr.f32.mxu0 %v14295_v29  ;;  %v2466_v34 = vmul.f32 %v9378_v43, %v11556_v38  ;;  %v14302_v38 = vld [vmem:[#allocation7_spill] sm:$0xff] }
 0xcef   :  { %8479 = vmatprep.subr.bf16.mxu0 %v8478_v46  ;;  %v2477_v41 = vmul.f32 %v6840_v50, %v2467_v24  ;;  %v14315_v62 = vld [vmem:[#allocation23_spill] sm:$0xff] }
 0xcf0   :  { %v2476_v6 = vmul.f32 %v6840_v50, %v2466_v34  ;;  %v14320_v34 = vld [vmem:[#allocation17_spill] sm:$0xff] }
 0xcf1   :  { %v2487_v28 = vadd.f32 %v6841_v33, %v2477_v41  ;;  %v2527_v24 = vrot.slane %v6866_v23, %v14320_v34 }
 0xcf2   :  { %v2486_v18 = vadd.f32 %v6841_v33, %v2476_v6  ;;  %8481 = vmatpush3.bf16.msra.mxu0 %v8478_v46  ;;  %v14321_v6 = vld [vmem:[#allocation32_spill] sm:$0xff] }
 0xcf3   :  { %8483 = vmatprep.subr.bf16.mxu0 %v8482_v26 }
 0xcf4   :  { %6869 = vmatmul.mubr.msk.f32.gmra.mrb[48].mxu0 %vm271_vm0, %v2486_v18 }
 0xcf5   :  { %2625 = vmatprep.mubr.f32.mxu0 %v14295_v29 }
 0xcf6   :  { %8485 = vmatpush3.bf16.msra.mxu0 %v8482_v26 }
 0xcf7   :  { %8503 = vmatprep.subr.bf16.mxu0 %v14300_v47 }
 0xcf8   :  { %6870 = vmatmul.mubr.msk.f32.gmra.mrb[50].mxu0 %vm271_vm0, %v2487_v28 }
 0xcf9   :  { %7914 = vmatprep.mubr.msk.f32.mxu0 %vm271_vm0, %v2484_v54 }
 0xcfc   :  { %7915 = vmatmul.mubr.msk.f32.vlgmr.msra.gmra.mrb[52].mxu0 %vm271_vm0, %v2485_v39  ;;  %v14317_v39 = vld [vmem:[#allocation27_spill] sm:$0xff] }
 0xcfd   :  { %7917 = vmatprep.mubr.msk.f32.mxu0 %vm271_vm0, %v2486_v18  ;;  %8505 = vmatpush1.bf16.msra.mxu0 %v14301_v1 }
 0xcfe   :  { %8507 = vmatprep.subr.bf16.mxu0 %v14302_v38  ;;  %v9505_v38 = vld [vmem:[%s14209_s3 + $0x8] sm:$0xff] }
 0xd00   :  { %7918 = vmatmul.mubr.msk.f32.gmra.mrb[54].mxu0 %vm271_vm0, %v2487_v28  ;;  %v14322_v28 = vld [vmem:[#allocation33_spill] sm:$0xff] }
 0xd01   :  { %8509 = vmatpush1.bf16.msra.mxu0 %v14303_v35  ;;  %3003 = vmatprep.mubr.f32.mxu0 %v14295_v29 }
 0xd02   :  { %8511 = vmatprep.subr.bf16.mxu0 %v14304_v25  ;;  %v9504_v25 = vld [vmem:[%s14209_s3 + $0x88] sm:$0xff] }
 0xd05   :  { %8513 = vmatpush1.bf16.msra.mxu0 %v14305_v3 }
 0xd06   :  { %8515 = vmatprep.subr.bf16.mxu0 %v14306_v15 }
 0xd09   :  { %8517 = vmatpush1.bf16.msra.mxu0 %v14307_v20 }
 0xd0a   :  { %8535 = vmatprep.subr.bf16.mxu0 %v14308_v60 }
 0xdbc   :  { %v2609_v45 = vpop.f32.mrb[44].mxu0 }
 0xdbd   :  { %v11697_v32 = vadd.f32 %v2609_v45, %v2519_v63  ;;  %v2611_v17 = vpop.f32.mrb[45].mxu0  ;;  %v14328_v45 = vld [vmem:[#allocation24_spill] sm:$0xff] }
 0xdbe   :  { %v11699_v57 = vadd.f32 %v2611_v17, %v2523_v51 }
 0xdbf   :  { %2863 = vrot.lane.b32.xlu0 %v11697_v32, %s14255_s25 }
 0xdc0   :  { %14312 = vst [vmem:[#allocation52_spill] sm:$0xff] %v11699_v57  ;;  %v2717_v55 = vmax.f32 %v11699_v57, 0.0  ;;  %v2615_v50 = vpop.f32.mrb[46].mxu0 }
 0xdc1   :  { %v11704_v9 = vadd.f32 %v2615_v50, %v2519_v63  ;;  %v2617_v59 = vpop.f32.mrb[47].mxu0  ;;  %v14330_v50 = vld [vmem:[#allocation26_spill] sm:$0xff] }
 0xdc2   :  { %v11706_v33 = vadd.f32 %v2617_v59, %v2523_v51  ;;  %7936 = vmatprep.mubr.msk.f32.mxu1 %vm271_vm0, %v2717_v55  ;;  %v14329_v55 = vld [vmem:[#allocation41_spill] sm:$0xff]  ;;  %v14331_v59 = vld [vmem:[#allocation44_spill] sm:$0xff] }
 0xdc3   :  { %2865 = vrot.lane.b32.xlu1 %v11704_v9, %s14255_s25 }
 0xdc4   :  { %14313 = vst [vmem:[#allocation63_spill] sm:$0xff] %v11706_v33  ;;  %v2718_v4 = vmax.f32 %v11706_v33, 0.0  ;;  %v9515_v33 = vld [vmem:[%s14209_s3 + $0x28] sm:$0xff] }
 0xdc6   :  { %7937 = vmatmul.mubr.msk.f32.vlgmr.msra.gmra.mrb[56].mxu1 %vm271_vm0, %v2718_v4  ;;  %v14332_v4 = vld [vmem:[#allocation29_spill] sm:$0xff] }
 0xdc7   :  { %8521 = vmatpush1.bf16.msra.mxu1 %v14314_v11  ;;  %v2621_v48 = vpop.f32.mrb[48].mxu0 }
 0xdc8   :  { %v11714_v54 = vadd.f32 %v2621_v48, %v2519_v63  ;;  %v2623_v13 = vpop.f32.mrb[49].mxu0  ;;  %8523 = vmatprep.subr.bf16.mxu1 %v14315_v62 }
 0xdc9   :  { %v11717_v8 = vadd.f32 %v2623_v13, %v2523_v51  ;;  %v14333_v13 = vld [vmem:[#allocation45_spill] sm:$0xff] }
 0xdca   :  { %2867 = vrot.lane.b32.xlu0 %v11714_v54, %s14255_s25 }
 0xdcb   :  { %14316 = vst [vmem:[#allocation64_spill] sm:$0xff] %v11717_v8  ;;  %v2719_v19 = vmax.f32 %v11717_v8, 0.0  ;;  %8525 = vmatpush1.bf16.msra.mxu1 %v14317_v39  ;;  %v2627_v46 = vpop.f32.mrb[50].mxu0 }
 0xdcc   :  { %v11723_v42 = vadd.f32 %v2627_v46, %v2519_v63  ;;  %v2629_v22 = vpop.f32.mrb[51].mxu0  ;;  %8527 = vmatprep.subr.bf16.mxu1 %v14318_v56  ;;  %v14326_v63 = vld [vmem:[#allocation21_spill] sm:$0xff]  ;;  %v14335_v46 = vld [vmem:[#allocation48_spill] sm:$0xff] }
 0xdcd   :  { %v11726_v43 = vadd.f32 %v2629_v22, %v2523_v51  ;;  %7939 = vmatprep.mubr.msk.f32.mxu1 %vm271_vm0, %v2719_v19  ;;  %v14327_v51 = vld [vmem:[#allocation40_spill] sm:$0xff]  ;;  %v14334_v19 = vld [vmem:[#allocation31_spill] sm:$0xff]  ;;  %v14336_v22 = vld [vmem:[#allocation34_spill] sm:$0xff] }
 0xdcf   :  { %14319 = vst [vmem:[#allocation69_spill] sm:$0xff] %v11726_v43  ;;  %v2720_v26 = vmax.f32 %v11726_v43, 0.0  ;;  %8529 = vmatpush1.bf16.msra.mxu1 %v14321_v6  ;;  %v7916_v18 = vpop.f32.mrb[52].mxu0  ;;  %v9514_v43 = vld [vmem:[%s14209_s3 + $0xa8] sm:$0xff] }
 0xdd0   :  { %v2698_v41 = vpop.f32.mrb[53].mxu0  ;;  %8531 = vmatprep.subr.bf16.mxu1 %v14322_v28  ;;  %v2704_v23 = vadd.f32 %v7916_v18, %v2527_v24  ;;  %v14339_v18 = vld [vmem:[#allocation51_spill] sm:$0xff] }
 0xdd1   :  { %v11733_v16 = vadd.f32 %v2698_v41, %v2527_v24  ;;  %7940 = vmatmul.mubr.msk.f32.gmra.mrb[58].mxu1 %vm271_vm0, %v2720_v26  ;;  %v14337_v26 = vld [vmem:[#allocation49_spill] sm:$0xff]  ;;  %v14340_v41 = vld [vmem:[#allocation38_spill] sm:$0xff] }
 0xdd2   :  { %3092 = vmatprep.mubr.f32.mxu1 %v14295_v29 }
 0xdd3   :  { %8533 = vmatpush1.bf16.msra.mxu1 %v14323_v44  ;;  %v7919_v10 = vpop.f32.mrb[54].mxu0  ;;  %6893 = vmatmul.mubr.msk.f32.vlgmr.msra.gmra.mrb[56].mxu0 %vm271_vm0, %v11733_v16 }
 0xdd4   :  { %v2708_v2 = vpop.f32.mrb[55].mxu0  ;;  %8537 = vmatpush1.bf16.msra.mxu0 %v14324_v21  ;;  %8551 = vmatprep.subr.bf16.mxu1 %v14325_v27  ;;  %v2714_v48 = vadd.f32 %v7919_v10, %v2527_v24  ;;  %v14341_v10 = vld [vmem:[#allocation39_spill] sm:$0xff] }
 0xdd5   :  { %3009 = vmatprep.mubr.f32.mxu0 %v14295_v29  ;;  %8539 = vmatprep.subr.bf16.mxu0 %v14326_v63  ;;  %v2709_v17 = vadd.f32 %v2708_v2, %v2527_v24  ;;  %v14338_v24 = vld [vmem:[#allocation35_spill] sm:$0xff]  ;;  %v14342_v2 = vld [vmem:[#allocation42_spill] sm:$0xff] }
 0xdd6   :  { %6897 = vmatmul.mubr.msk.f32.vlgmr.msra.gmra.mrb[60].mxu1 %vm271_vm0, %v11733_v16 }
 0xdd7   :  { %8553 = vmatpush1.bf16.msra.mxu1 %v14327_v51  ;;  %6894 = vmatmul.mubr.msk.f32.gmra.mrb[58].mxu0 %vm271_vm0, %v2704_v23 }
 0xdd8   :  { %3098 = vmatprep.mubr.f32.mxu1 %v14295_v29  ;;  %8541 = vmatpush1.bf16.msra.mxu0 %v14328_v45 }
 0xdd9   :  { %8555 = vmatprep.subr.bf16.mxu1 %v14329_v55  ;;  %3015 = vmatprep.mubr.f32.mxu0 %v14295_v29 }
 0xdda   :  { %6898 = vmatmul.mubr.msk.f32.gmra.mrb[62].mxu1 %vm271_vm0, %v2704_v23  ;;  %8543 = vmatprep.subr.bf16.mxu0 %v14330_v50 }
 0xddb   :  { %8557 = vmatpush1.bf16.msra.mxu1 %v14331_v59  ;;  %6895 = vmatmul.mubr.msk.f32.gmra.mrb[60].mxu0 %vm271_vm0, %v2709_v17 }
 0xddc   :  { %3104 = vmatprep.mubr.f32.mxu1 %v14295_v29  ;;  %8545 = vmatpush1.bf16.msra.mxu0 %v14332_v4 }
 0xddd   :  { %8559 = vmatprep.subr.bf16.mxu1 %v14333_v13  ;;  %3021 = vmatprep.mubr.f32.mxu0 %v14295_v29 }
 0xdde   :  { %6899 = vmatmul.mubr.msk.f32.gmra.mrb[64].mxu1 %vm271_vm0, %v2709_v17  ;;  %8547 = vmatprep.subr.bf16.mxu0 %v14334_v19 }
 0xddf   :  { %8561 = vmatpush1.bf16.msra.mxu1 %v14335_v46  ;;  %6896 = vmatmul.mubr.msk.f32.gmra.mrb[62].mxu0 %vm271_vm0, %v2714_v48 }
 0xde0   :  { %3110 = vmatprep.mubr.f32.mxu1 %v14295_v29  ;;  %8549 = vmatpush1.bf16.msra.mxu0 %v14336_v22 }
 0xde1   :  { %8563 = vmatprep.subr.bf16.mxu1 %v14337_v26  ;;  %3181 = vmatprep.mubr.f32.mxu0 %v14295_v29 }
 0xde2   :  { %6900 = vmatmul.mubr.msk.f32.gmra.mrb[66].mxu1 %vm271_vm0, %v2714_v48  ;;  %8567 = vmatprep.subr.bf16.mxu0 %v14338_v24  ;;  %v14352_v24 = vld [vmem:[#allocation88_spill] sm:$0xff] }
 0xde3   :  { %8565 = vmatpush1.bf16.msra.mxu1 %v14339_v18  ;;  %6901 = vmatmul.mubr.msk.f32.vlgmr.msra.gmra.mrb[64].mxu0 %vm271_vm0, %v11733_v16  ;;  %v14343_v18 = vld [vmem:[#allocation43_spill] sm:$0xff] }
 0xde4   :  { %3270 = vmatprep.mubr.f32.mxu1 %v14295_v29  ;;  %8569 = vmatpush1.bf16.msra.mxu0 %v14340_v41  ;;  %v14345_v41 = vld [vmem:[#allocation47_spill] sm:$0xff] }
 0xde5   :  { %3187 = vmatprep.mubr.f32.mxu0 %v14295_v29  ;;  %8571 = vmatprep.subr.bf16.mxu0 %v14341_v10  ;;  %v14344_v10 = vld [vmem:[#allocation46_spill] sm:$0xff] }
 0xde6   :  { %6905 = vmatmul.mubr.msk.f32.vlgmr.msra.gmra.mrb[68].mxu1 %vm271_vm0, %v11733_v16 }
 0xde7   :  { %6902 = vmatmul.mubr.msk.f32.gmra.mrb[66].mxu0 %vm271_vm0, %v2704_v23  ;;  %3276 = vmatprep.mubr.f32.mxu1 %v14295_v29 }
 0xde8   :  { %8573 = vmatpush1.bf16.msra.mxu0 %v14342_v2  ;;  %3193 = vmatprep.mubr.f32.mxu0 %v14295_v29  ;;  %v14346_v2 = vld [vmem:[#allocation50_spill] sm:$0xff] }
 0xde9   :  { %8575 = vmatprep.subr.bf16.mxu0 %v14343_v18  ;;  %v14347_v18 = vld [vmem:[#allocation83_spill] sm:$0xff] }
 0xdea   :  { %6906 = vmatmul.mubr.msk.f32.gmra.mrb[70].mxu1 %vm271_vm0, %v2704_v23 }
 0xdeb   :  { %6903 = vmatmul.mubr.msk.f32.gmra.mrb[68].mxu0 %vm271_vm0, %v2709_v17  ;;  %3282 = vmatprep.mubr.f32.mxu1 %v14295_v29 }
 0xdec   :  { %8577 = vmatpush1.bf16.msra.mxu0 %v14344_v10  ;;  %3199 = vmatprep.mubr.f32.mxu0 %v14295_v29  ;;  %v14349_v10 = vld [vmem:[#allocation85_spill] sm:$0xff] }
 0xded   :  { %8579 = vmatprep.subr.bf16.mxu0 %v14345_v41  ;;  %v14348_v41 = vld [vmem:[#allocation84_spill] sm:$0xff] }
 0xdee   :  { %6907 = vmatmul.mubr.msk.f32.gmra.mrb[72].mxu1 %vm271_vm0, %v2709_v17 }
 0xdef   :  { %6904 = vmatmul.mubr.msk.f32.gmra.mrb[70].mxu0 %vm271_vm0, %v2714_v48  ;;  %3288 = vmatprep.mubr.f32.mxu1 %v14295_v29 }
 0xdf0   :  { %8581 = vmatpush1.bf16.msra.mxu0 %v14346_v2  ;;  %3359 = vmatprep.mubr.f32.mxu0 %v14295_v29  ;;  %v14350_v2 = vld [vmem:[#allocation86_spill] sm:$0xff] }
 0xdf1   :  { %8631 = vmatprep.subr.bf16.mxu0 %v14347_v18  ;;  %v14351_v18 = vld [vmem:[#allocation87_spill] sm:$0xff] }
 0xdf2   :  { %6908 = vmatmul.mubr.msk.f32.gmra.mrb[74].mxu1 %vm271_vm0, %v2714_v48 }
 0xdf3   :  { %7436 = vmatprep.mubr.msk.f32.mxu1 %vm271_vm0, %v11697_v32  ;;  %6909 = vmatmul.mubr.msk.f32.vlgmr.msra.gmra.mrb[72].mxu0 %vm271_vm0, %v11733_v16  ;;  %v14353_v16 = vld [vmem:[#allocation89_spill] sm:$0xff] }
 0xdf4   :  { %3365 = vmatprep.mubr.f32.mxu0 %v14295_v29  ;;  %8633 = vmatpush3.bf16.msra.mxu0 %v14348_v41  ;;  %v14354_v41 = vld [vmem:[#allocation90_spill] sm:$0xff] }
 0xdf5   :  { %8635 = vmatprep.subr.bf16.mxu0 %v14349_v10 }
 0xdf7   :  { %6910 = vmatmul.mubr.msk.f32.gmra.mrb[74].mxu0 %vm271_vm0, %v2704_v23  ;;  %v9503_v23 = vld [vmem:[%s14272_s0 + $0x8] sm:$0xff] }
 0xdf8   :  { %3371 = vmatprep.mubr.f32.mxu0 %v14295_v29  ;;  %8637 = vmatpush3.bf16.msra.mxu0 %v14350_v2 }
 0xdf9   :  { %8639 = vmatprep.subr.bf16.mxu0 %v14351_v18 }
 0xdfb   :  { %6911 = vmatmul.mubr.msk.f32.gmra.mrb[76].mxu0 %vm271_vm0, %v2709_v17  ;;  %v6888_v17 = vld [vmem:[%s13945_s12 + $0x1] ss:$0 sm:$0xff] }
 0xdfc   :  { %3377 = vmatprep.mubr.f32.mxu0 %v14295_v29  ;;  %8641 = vmatpush3.bf16.msra.mxu0 %v14352_v24 }
 0xdfd   :  { %8643 = vmatprep.subr.bf16.mxu0 %v14353_v16 }
 0xdff   :  { %6912 = vmatmul.mubr.msk.f32.gmra.mrb[78].mxu0 %vm271_vm0, %v2714_v48 }
 0xe00   :  { %8645 = vmatpush3.bf16.msra.mxu0 %v14354_v41 }
 0xe01   :  { %8647 = vmatprep.subr.bf16.mxu0 %v11140_v14 }
 0xe04   :  { %8649 = vmatpush3.bf16.msra.mxu0 %v11149_v7 }
 0xe05   :  { %8651 = vmatprep.subr.bf16.mxu0 %v11162_v40 }
 0xe08   :  { %8653 = vmatpush3.bf16.msra.mxu0 %v11172_v30 }
 0xe09   :  { %8655 = vmatprep.subr.bf16.mxu0 %v11185_v58 }
 0xe0c   :  { %8657 = vmatpush3.bf16.msra.mxu0 %v11195_v61 }
 0xe0d   :  { %8659 = vmatprep.subr.bf16.mxu0 %v11209_v37 }
 0xe10   :  { %8661 = vmatpush3.bf16.msra.mxu0 %v11218_v0 }
 0xe11   :  { %3802 = vmatprep.subr.mxu0 %v9503_v23 }
 0xe31   :  { %v2864_v20 = vpop.permute.xlu0 %2863 }
 0xe35   :  { %v2866_v36 = vpop.permute.xlu1 %2865 }
 0xe99   :  { %v7938_v48 = vpop.f32.mrb[56].mxu1 }
 0xe9a   :  { %v2846_v40 = vadd.f32 %v7938_v48, %v6888_v17  ;;  %v2840_v30 = vpop.f32.mrb[57].mxu1 }
 0xe9b   :  { %v2841_v58 = vadd.f32 %v6888_v17, %v2840_v30 }
 0xe9c   :  { %2881 = vrot.lane.b32.xlu1 %v2846_v40, %s14255_s25 }
 0xea0   :  { %2879 = vrot.lane.b32.xlu1 %v2841_v58, %s14255_s25 }
 0xea4   :  { %2869 = vrot.lane.b32.xlu1 %v11723_v42, %s14255_s25  ;;  %v7941_v0 = vpop.f32.mrb[58].mxu1 }
 0xea5   :  { %v2856_v37 = vadd.f32 %v7941_v0, %v6888_v17  ;;  %v2850_v61 = vpop.f32.mrb[59].mxu1 }
 0xea6   :  { %v2851_v7 = vadd.f32 %v6888_v17, %v2850_v61  ;;  %v11832_v23 = vpop.f32.mrb[56].mxu0 }
 0xea7   :  { %v11834_v14 = vpop.f32.mrb[57].mxu0 }
 0xea8   :  { %2885 = vrot.lane.b32.xlu1 %v2856_v37, %s14255_s25  ;;  %2883 = vrot.lane.b32.xlu0 %v2851_v7, %s14255_s25 }
 0xea9   :  { %v11838_v48 = vpop.f32.mrb[60].mxu1 }
 0xeaa   :  { %v11840_v40 = vpop.f32.mrb[61].mxu1  ;;  %v11842_v30 = vpop.f32.mrb[58].mxu0 }
 0xeab   :  { %v11844_v58 = vpop.f32.mrb[59].mxu0 }
 0xead   :  { %v11846_v41 = vpop.f32.mrb[62].mxu1 }
 0xeae   :  { %v11848_v0 = vpop.f32.mrb[63].mxu1  ;;  %v11850_v61 = vpop.f32.mrb[60].mxu0 }
 0xeaf   :  { %v11852_v17 = vpop.f32.mrb[61].mxu0 }
 0xeb1   :  { %v11854_v16 = vpop.f32.mrb[64].mxu1 }
 0xeb2   :  { %v11856_v37 = vpop.f32.mrb[65].mxu1  ;;  %v11858_v7 = vpop.f32.mrb[62].mxu0 }
 0xeb3   :  { %v11860_v24 = vpop.f32.mrb[63].mxu0 }
 0xeb5   :  { %v11862_v18 = vpop.f32.mrb[66].mxu1 }
 0xeb6   :  { %v11864_v2 = vpop.f32.mrb[67].mxu1  ;;  %v11866_v10 = vpop.f32.mrb[64].mxu0 }
 0xeb7   :  { %v11868_v26 = vpop.f32.mrb[65].mxu0 }
 0xeb9   :  { %v11870_v22 = vpop.f32.mrb[68].mxu1 }
 0xeba   :  { %v11872_v46 = vpop.f32.mrb[69].mxu1  ;;  %v11874_v19 = vpop.f32.mrb[66].mxu0 }
 0xebb   :  { %v11876_v13 = vpop.f32.mrb[67].mxu0 }
 0xebd   :  { %v11878_v4 = vpop.f32.mrb[70].mxu1 }
 0xebe   :  { %v11880_v59 = vpop.f32.mrb[71].mxu1  ;;  %v11882_v50 = vpop.f32.mrb[68].mxu0 }
 0xebf   :  { %v11884_v55 = vpop.f32.mrb[69].mxu0 }
 0xec0   :  { %14355 = vst [vmem:[#allocation70_spill] sm:$0xff] %v11884_v55 }
 0xec1   :  { %v11886_v45 = vpop.f32.mrb[72].mxu1 }
 0xec2   :  { %14356 = vst [vmem:[#allocation67_spill] sm:$0xff] %v11886_v45  ;;  %v11888_v51 = vpop.f32.mrb[73].mxu1  ;;  %v11890_v63 = vpop.f32.mrb[70].mxu0 }
 0xec3   :  { %14357 = vst [vmem:[#allocation68_spill] sm:$0xff] %v11888_v51  ;;  %14358 = vst [vmem:[#allocation74_spill] sm:$0xff] %v11890_v63  ;;  %v11892_v27 = vpop.f32.mrb[71].mxu0 }
 0xec4   :  { %14359 = vst [vmem:[#allocation73_spill] sm:$0xff] %v11892_v27 }
 0xec5   :  { %v11894_v21 = vpop.f32.mrb[74].mxu1 }
 0xec6   :  { %14360 = vst [vmem:[#allocation20_spill] sm:$0xff] %v11894_v21  ;;  %v11896_v44 = vpop.f32.mrb[75].mxu1  ;;  %v11898_v28 = vpop.f32.mrb[72].mxu0 }
 0xec7   :  { %14361 = vst [vmem:[#allocation30_spill] sm:$0xff] %v11896_v44  ;;  %14362 = vst [vmem:[#allocation18_spill] sm:$0xff] %v11898_v28  ;;  %v11900_v6 = vpop.f32.mrb[73].mxu0 }
 0xec8   :  { %14363 = vst [vmem:[#allocation25_spill] sm:$0xff] %v11900_v6 }
 0xeca   :  { %v11902_v34 = vpop.f32.mrb[74].mxu0 }
 0xecb   :  { %14364 = vst [vmem:[#allocation71_spill] sm:$0xff] %v11902_v34  ;;  %v11904_v56 = vpop.f32.mrb[75].mxu0 }
 0xecc   :  { %14365 = vst [vmem:[#allocation72_spill] sm:$0xff] %v11904_v56  ;;  %v9529_v56 = vld [vmem:[%s14209_s3 + $0xd8] sm:$0xff] }
 0xece   :  { %v11906_v39 = vpop.f32.mrb[76].mxu0 }
 0xecf   :  { %14366 = vst [vmem:[#allocation77_spill] sm:$0xff] %v11906_v39  ;;  %v11908_v62 = vpop.f32.mrb[77].mxu0 }
 0xed0   :  { %14367 = vst [vmem:[#allocation76_spill] sm:$0xff] %v11908_v62 }
 0xed2   :  { %v11910_v11 = vpop.f32.mrb[78].mxu0 }
 0xed3   :  { %14368 = vst [vmem:[#allocation82_spill] sm:$0xff] %v11910_v11  ;;  %v11912_v12 = vpop.f32.mrb[79].mxu0  ;;  %v9517_v11 = vld [vmem:[%s14209_s3 + $0x48] sm:$0xff] }
 0xed4   :  { %14369 = vst [vmem:[#allocation79_spill] sm:$0xff] %v11912_v12 }
 0xf0e   :  { %v2882_v53 = vpop.permute.xlu1 %2881 }
 0xf0f   :  { %v2892_v60 = vsel %vm271_vm0, %v2866_v36, %v2882_v53  ;;  %v9506_v53 = vld [vmem:[%s14209_s3 + $0x80] sm:$0xff] }
 0xf10   :  { %v11919_v35 = vmul.f32 %v9504_v25, %v2892_v60  ;;  %v11924_v1 = vmul.f32 %v9505_v38, %v2892_v60  ;;  %v9508_v25 = vld [vmem:[%s14209_s3 + $0xa0] sm:$0xff]  ;;  %v11988_v44 = vmul.f32 %v9517_v11, %v2892_v60  ;;  %v9522_v11 = vld [vmem:[%s14209_s3 + $0x10] sm:$0xff] }
 0xf11   :  { %v9509_v38 = vld [vmem:[%s14209_s3 + $0x20] sm:$0xff] }
 0xf12   :  { %v2880_v15 = vpop.permute.xlu1 %2879  ;;  %14370 = vst [vmem:[#allocation78_spill] sm:$0xff] %v11919_v35  ;;  %14371 = vst [vmem:[#allocation80_spill] sm:$0xff] %v11924_v1 }
 0xf13   :  { %v2891_v3 = vsel %vm271_vm0, %v2864_v20, %v2880_v15  ;;  %v9507_v15 = vld [vmem:[%s14209_s3] sm:$0xff] }
 0xf14   :  { %v11929_v36 = vmul.f32 %v9506_v53, %v2891_v3  ;;  %v11934_v20 = vmul.f32 %v9507_v15, %v2891_v3  ;;  %v11939_v47 = vmul.f32 %v9508_v25, %v2891_v3  ;;  %v11944_v49 = vmul.f32 %v9509_v38, %v2891_v3  ;;  %v9510_v53 = vld [vmem:[%s14209_s3 + $0xc0] sm:$0xff] }
 0xf15   :  { %v11949_v5 = vmul.f32 %v9510_v53, %v2891_v3  ;;  %v9511_v15 = vld [vmem:[%s14209_s3 + $0x40] sm:$0xff]  ;;  %v2868_v53 = vpop.permute.xlu0 %2867 }
 0xf16   :  { %14372 = vst [vmem:[#allocation81_spill] sm:$0xff] %v11929_v36  ;;  %14373 = vst [vmem:[#allocation91_spill] sm:$0xff] %v11934_v20  ;;  %v11954_v52 = vmul.f32 %v9511_v15, %v2891_v3  ;;  %v9512_v25 = vld [vmem:[%s14209_s3 + $0xe0] sm:$0xff]  ;;  %v2870_v8 = vpop.permute.xlu1 %2869  ;;  %v8582_v57 = vpack.c.bf16 %v11919_v35, %v11929_v36  ;;  %v8585_v15 = vpack.c.bf16 %v11924_v1, %v11934_v20 }
 0xf17   :  { %14374 = vst [vmem:[#allocation92_spill] sm:$0xff] %v11939_v47  ;;  %v11959_v31 = vmul.f32 %v9512_v25, %v2891_v3  ;;  %v9513_v38 = vld [vmem:[%s14209_s3 + $0x60] sm:$0xff]  ;;  %v11973_v25 = vmul.f32 %v9514_v43, %v2892_v60  ;;  %v9518_v43 = vld [vmem:[%s14209_s3 + $0xe8] sm:$0xff] }
 0xf18   :  { %v11964_v29 = vmul.f32 %v9513_v38, %v2891_v3  ;;  %v11978_v3 = vmul.f32 %v9515_v33, %v2892_v60  ;;  %v9516_v38 = vld [vmem:[%s14209_s3 + $0xc8] sm:$0xff]  ;;  %v11993_v21 = vmul.f32 %v9518_v43, %v2892_v60  ;;  %8584 = vmatprep.subr.msk.bf16.mxu1 %vm10591_vm1, %v8582_v57  ;;  %v9521_v57 = vld [vmem:[%s14209_s3 + $0x98] sm:$0xff] }
 0xf19   :  { %14375 = vst [vmem:[#allocation93_spill] sm:$0xff] %v11973_v25  ;;  %v11983_v12 = vmul.f32 %v9516_v38, %v2892_v60  ;;  %v9519_v33 = vld [vmem:[%s14209_s3 + $0x68] sm:$0xff]  ;;  %8587 = vmatpush3.bf16.xpose.msk.msra.mxu1 %vm10591_vm1, %v8585_v15  ;;  %v9520_v15 = vld [vmem:[%s14209_s3 + $0x90] sm:$0xff]  ;;  %v9618_v38 = vld [vmem:[%s14233_s1] sm:$0xff] }
 0xf1a   :  { %v11998_v62 = vmul.f32 %v9519_v33, %v2892_v60  ;;  %v2886_v39 = vpop.permute.xlu1 %2885  ;;  %v2884_v27 = vpop.permute.xlu0 %2883 }
 0xf1b   :  { %v2894_v36 = vsel %vm271_vm0, %v2870_v8, %v2886_v39  ;;  %v2893_v43 = vsel %vm271_vm0, %v2868_v53, %v2884_v27  ;;  %v9523_v8 = vld [vmem:[%s14209_s3 + $0x18] sm:$0xff]  ;;  %v9524_v27 = vld [vmem:[%s14209_s3 + $0xb0] sm:$0xff] }
 0xf1c   :  { %v12025_v60 = vmul.f32 %v9520_v15, %v2893_v43  ;;  %v12030_v33 = vmul.f32 %v9521_v57, %v2894_v36  ;;  %v12035_v35 = vmul.f32 %v9522_v11, %v2893_v43  ;;  %v12040_v39 = vmul.f32 %v9523_v8, %v2894_v36  ;;  %v9525_v57 = vld [vmem:[%s14209_s3 + $0xb8] sm:$0xff]  ;;  %v9526_v8 = vld [vmem:[%s14209_s3 + $0x30] sm:$0xff] }
 0xf1d   :  { %v12045_v53 = vmul.f32 %v9524_v27, %v2893_v43  ;;  %v12050_v15 = vmul.f32 %v9525_v57, %v2894_v36  ;;  %v12059_v1 = vmul.f32 %v9526_v8, %v2893_v43  ;;  %v9527_v27 = vld [vmem:[%s14209_s3 + $0x38] sm:$0xff]  ;;  %v9528_v57 = vld [vmem:[%s14209_s3 + $0xd0] sm:$0xff]  ;;  %v12074_v34 = vmul.f32 %v9529_v56, %v2894_v36 }
 0xf1e   :  { %v8588_v11 = vpack.c.bf16 %v12030_v33, %v12025_v60  ;;  %v8591_v20 = vpack.c.bf16 %v12040_v39, %v12035_v35  ;;  %v12064_v63 = vmul.f32 %v9527_v27, %v2894_v36  ;;  %v12069_v51 = vmul.f32 %v9528_v57, %v2893_v43  ;;  %v9530_v8 = vld [vmem:[%s14209_s3 + $0x50] sm:$0xff]  ;;  %v9531_v27 = vld [vmem:[%s14209_s3 + $0x58] sm:$0xff] }
 0xf1f   :  { %v12079_v45 = vmul.f32 %v9530_v8, %v2893_v43  ;;  %v12084_v6 = vmul.f32 %v9531_v27, %v2894_v36  ;;  %v8594_v57 = vpack.c.bf16 %v11973_v25, %v11939_v47  ;;  %v9532_v56 = vld [vmem:[%s14209_s3 + $0xf0] sm:$0xff]  ;;  %v9533_v8 = vld [vmem:[%s14209_s3 + $0xf8] sm:$0xff] }
 0xf20   :  { %8590 = vmatprep.subr.msk.bf16.mxu1 %vm10591_vm1, %v8588_v11  ;;  %v12093_v28 = vmul.f32 %v9532_v56, %v2893_v43  ;;  %v12098_v55 = vmul.f32 %v9533_v8, %v2894_v36  ;;  %v9534_v27 = vld [vmem:[%s14209_s3 + $0x70] sm:$0xff]  ;;  %v9535_v56 = vld [vmem:[%s14209_s3 + $0x78] sm:$0xff]  ;;  %v8609_v8 = vpack.c.bf16 %v11988_v44, %v11954_v52 }
 0xf21   :  { %v12103_v11 = vmul.f32 %v9534_v27, %v2893_v43  ;;  %8593 = vmatpush3.bf16.xpose.msk.msra.mxu1 %vm10591_vm1, %v8591_v20  ;;  %v12110_v47 = vmul.f32 %v9535_v56, %v2894_v36  ;;  %v8600_v43 = vpack.c.bf16 %v12050_v15, %v12045_v53  ;;  %v8603_v36 = vpack.c.bf16 %v12064_v63, %v12059_v1  ;;  %v9558_v20 = vld [vmem:[%s14234_s21 + $0x10] sm:$0xff] }
 0xf22   :  { %8596 = vmatprep.subr.msk.bf16.mxu1 %vm10591_vm1, %v8594_v57  ;;  %v8597_v57 = vpack.c.bf16 %v11978_v3, %v11944_v49  ;;  %v8606_v56 = vpack.c.bf16 %v11983_v12, %v11949_v5 }
 0xf29   :  { %8599 = vmatpush3.bf16.xpose.msk.msra.mxu1 %vm10591_vm1, %v8597_v57  ;;  %v8612_v57 = vpack.c.bf16 %v12074_v34, %v12069_v51 }
 0xf2a   :  { %8602 = vmatprep.subr.msk.bf16.mxu1 %vm10591_vm1, %v8600_v43  ;;  %v8615_v43 = vpack.c.bf16 %v12084_v6, %v12079_v45 }
 0xf31   :  { %8605 = vmatpush3.bf16.xpose.msk.msra.mxu1 %vm10591_vm1, %v8603_v36  ;;  %v8618_v36 = vpack.c.bf16 %v11993_v21, %v11959_v31 }
 0xf32   :  { %8608 = vmatprep.subr.msk.bf16.mxu1 %vm10591_vm1, %v8606_v56  ;;  %v8621_v56 = vpack.c.bf16 %v11998_v62, %v11964_v29 }
 0xf39   :  { %8611 = vmatpush3.bf16.xpose.msk.msra.mxu1 %vm10591_vm1, %v8609_v8  ;;  %v8624_v8 = vpack.c.bf16 %v12098_v55, %v12093_v28 }
 0xf3a   :  { %8614 = vmatprep.subr.msk.bf16.mxu1 %vm10591_vm1, %v8612_v57  ;;  %v8627_v57 = vpack.c.bf16 %v12110_v47, %v12103_v11 }
 0xf41   :  { %8617 = vmatpush3.bf16.xpose.msk.msra.mxu1 %vm10591_vm1, %v8615_v43 }
 0xf42   :  { %8620 = vmatprep.subr.msk.bf16.mxu1 %vm10591_vm1, %v8618_v36 }
 0xf49   :  { %8623 = vmatpush3.bf16.xpose.msk.msra.mxu1 %vm10591_vm1, %v8621_v56 }
 0xf4a   :  { %8626 = vmatprep.subr.msk.bf16.mxu1 %vm10591_vm1, %v8624_v8 }
 0xf51   :  { %8629 = vmatpush3.bf16.xpose.msk.msra.mxu1 %vm10591_vm1, %v8627_v57 }
 0xf58   :  { %7437 = vmatmul.mubr.msk.f32.vlgmr.msra.gmra.mrb[76].mxu1 %vm271_vm0, %v11697_v32  ;;  %v9536_v32 = vld [vmem:[%s14233_s1] sm:$0xff] }
 0xf59   :  { %7438 = vmatprep.mubr.msk.f32.mxu1 %vm271_vm0, %v11704_v9  ;;  %v3384_v43 = vmul.f32 %v9536_v32, %v11832_v23  ;;  %v9540_v23 = vld [vmem:[%s14233_s1 + $0x50] sm:$0xff] }
 0xf5a   :  { %v3394_v57 = vmul.f32 %v9540_v23, %v11842_v30  ;;  %v9544_v30 = vld [vmem:[%s14233_s1 + $0xa0] sm:$0xff] }
 0xf5b   :  { %v9545_v23 = vld [vmem:[%s14234_s21] sm:$0xff] }
 0xf5c   :  { %7439 = vmatmul.mubr.msk.f32.gmra.mrb[78].mxu1 %vm271_vm0, %v11704_v9  ;;  %v9537_v9 = vld [vmem:[%s14233_s1 + $0x8] sm:$0xff] }
 0xf5d   :  { %7440 = vmatprep.mubr.msk.f32.mxu1 %vm271_vm0, %v11714_v54  ;;  %v3385_v36 = vmul.f32 %v9537_v9, %v11834_v14  ;;  %v9541_v14 = vld [vmem:[%s14233_s1 + $0x58] sm:$0xff] }
 0xf5e   :  { %v3395_v32 = vmul.f32 %v9541_v14, %v11844_v58  ;;  %v12226_v58 = vmul.f32 %v9544_v30, %v11850_v61  ;;  %v9548_v30 = vld [vmem:[%s14233_s1 + $0xb8] sm:$0xff] }
 0xf60   :  { %7441 = vmatmul.mubr.msk.f32.gmra.mrb[80].mxu1 %vm271_vm0, %v11714_v54  ;;  %v9538_v54 = vld [vmem:[%s14233_s1 + $0x10] sm:$0xff] }
 0xf61   :  { %7442 = vmatprep.mubr.msk.f32.mxu1 %vm271_vm0, %v11723_v42  ;;  %v3386_v56 = vmul.f32 %v9538_v54, %v11838_v48  ;;  %v9542_v48 = vld [vmem:[%s14233_s1 + $0x60] sm:$0xff] }
 0xf62   :  { %v3396_v54 = vmul.f32 %v9542_v48, %v11846_v41  ;;  %v9546_v48 = vld [vmem:[%s14233_s1 + $0xa8] sm:$0xff] }
 0xf64   :  { %7443 = vmatmul.mubr.msk.f32.gmra.mrb[82].mxu1 %vm271_vm0, %v11723_v42  ;;  %v9539_v42 = vld [vmem:[%s14233_s1 + $0x18] sm:$0xff] }
 0xf65   :  { %v3387_v8 = vmul.f32 %v9539_v42, %v11840_v40  ;;  %v9543_v40 = vld [vmem:[%s14233_s1 + $0x68] sm:$0xff] }
 0xf66   :  { %v12220_v42 = vmul.f32 %v9543_v40, %v11848_v0  ;;  %v12235_v0 = vmul.f32 %v9546_v48, %v11852_v17  ;;  %v9547_v40 = vld [vmem:[%s14233_s1 + $0xb0] sm:$0xff] }
 0xf67   :  { %v12241_v61 = vmul.f32 %v9547_v40, %v11854_v16  ;;  %v9550_v48 = vld [vmem:[%s14233_s1 + $0xf0] sm:$0xff]  ;;  %v9551_v16 = vld [vmem:[%s14233_s1 + $0xf8] sm:$0xff] }
 0xf68   :  { %v12256_v27 = vmul.f32 %v9550_v48, %v11858_v7  ;;  %v12262_v40 = vmul.f32 %v9551_v16, %v11860_v24  ;;  %v9553_v7 = vld [vmem:[%s14233_s1 + $0x108] sm:$0xff]  ;;  %v9554_v24 = vld [vmem:[%s14233_s1 + $0x20] sm:$0xff] }
 0xf69   :  { %v3388_v48 = vmul.f32 %v9554_v24, %v11866_v10  ;;  %v9555_v16 = vld [vmem:[%s14233_s1 + $0x28] sm:$0xff] }
0x102b   :  { %v3594_v9 = vpop.f32.mrb[76].mxu1 }
0x102c   :  { %v3595_v14 = vadd.f32 %v9545_v23, %v3594_v9  ;;  %v3596_v41 = vpop.f32.mrb[77].mxu1  ;;  %v12247_v9 = vmul.f32 %v9548_v30, %v11856_v37  ;;  %v9549_v23 = vld [vmem:[%s14234_s21 + $0x8] sm:$0xff]  ;;  %v9552_v37 = vld [vmem:[%s14233_s1 + $0x100] sm:$0xff] }
0x102d   :  { %v3597_v17 = vadd.f32 %v9549_v23, %v3596_v41  ;;  %v12268_v41 = vmul.f32 %v9552_v37, %v11862_v18  ;;  %v12274_v23 = vmul.f32 %v9553_v7, %v11864_v2  ;;  %v3389_v18 = vmul.f32 %v9555_v16, %v11868_v26  ;;  %v9556_v37 = vld [vmem:[%s14233_s1 + $0x30] sm:$0xff]  ;;  %v9557_v7 = vld [vmem:[%s14233_s1 + $0x38] sm:$0xff] }
0x102e   :  { %v3617_v30 = vadd.f32 %v3595_v14, %v3384_v43  ;;  %v3390_v2 = vmul.f32 %v9556_v37, %v11870_v22  ;;  %v3391_v10 = vmul.f32 %v9557_v7, %v11872_v46  ;;  %v9560_v22 = vld [vmem:[%s14233_s1 + $0x78] sm:$0xff] }
0x102f   :  { %v3618_v43 = vadd.f32 %v3597_v17, %v3385_v36  ;;  %v3600_v14 = vpop.f32.mrb[78].mxu1  ;;  %v9559_v17 = vld [vmem:[%s14233_s1 + $0x70] sm:$0xff]  ;;  %v3399_v37 = vmul.f32 %v9560_v22, %v11876_v13  ;;  %v14377_v22 = vld [vmem:[#allocation70_spill] sm:$0xff] }
0x1030   :  { %v3625_v24 = vadd.f32 %v3617_v30, %v3386_v56  ;;  %v3601_v26 = vadd.f32 %v9558_v20, %v3600_v14  ;;  %v3602_v36 = vpop.f32.mrb[79].mxu1  ;;  %v3398_v16 = vmul.f32 %v9559_v17, %v11874_v19  ;;  %v9561_v56 = vld [vmem:[%s14234_s21 + $0x18] sm:$0xff]  ;;  %v9562_v20 = vld [vmem:[%s14233_s1 + $0x80] sm:$0xff]  ;;  %v9563_v19 = vld [vmem:[%s14233_s1 + $0x88] sm:$0xff] }
0x1031   :  { %v3626_v46 = vadd.f32 %v3618_v43, %v3387_v8  ;;  %v3603_v30 = vadd.f32 %v9561_v56, %v3602_v36  ;;  %v3400_v14 = vmul.f32 %v9562_v20, %v11878_v4  ;;  %v3401_v7 = vmul.f32 %v9563_v19, %v11880_v59  ;;  %v9564_v8 = vld [vmem:[%s14233_s1 + $0xc0] sm:$0xff]  ;;  %v9565_v36 = vld [vmem:[%s14233_s1 + $0xc8] sm:$0xff] }
0x1032   :  { %v3633_v17 = vadd.f32 %v3625_v24, %v3388_v48  ;;  %v3619_v13 = vadd.f32 %v3601_v26, %v3394_v57  ;;  %v3408_v43 = vmul.f32 %v9564_v8, %v11882_v50  ;;  %v3409_v4 = vmul.f32 %v9565_v36, %v14377_v22  ;;  %v9566_v59 = vld [vmem:[%s14233_s1 + $0x40] sm:$0xff]  ;;  %v14378_v57 = vld [vmem:[#allocation18_spill] sm:$0xff]  ;;  %v14380_v22 = vld [vmem:[#allocation67_spill] sm:$0xff] }
0x1033   :  { %v3634_v56 = vadd.f32 %v3626_v46, %v3389_v18  ;;  %v3620_v20 = vadd.f32 %v3603_v30, %v3395_v32  ;;  %v3606_v25 = vpop.f32.mrb[80].mxu1  ;;  %v3392_v48 = vmul.f32 %v9566_v59, %v14378_v57  ;;  %v9567_v50 = vld [vmem:[%s14234_s21 + $0x20] sm:$0xff]  ;;  %v9568_v18 = vld [vmem:[%s14233_s1 + $0x48] sm:$0xff] }
0x1034   :  { %v3627_v24 = vadd.f32 %v3619_v13, %v3396_v54  ;;  %v3607_v26 = vadd.f32 %v9567_v50, %v3606_v25  ;;  %v3608_v19 = vpop.f32.mrb[81].mxu1  ;;  %v3641_v8 = vadd.f32 %v3633_v17, %v3390_v2  ;;  %v14379_v32 = vld [vmem:[#allocation25_spill] sm:$0xff]  ;;  %v9569_v36 = vld [vmem:[%s14234_s21 + $0x28] sm:$0xff]  ;;  %v9570_v25 = vld [vmem:[%s14233_s1 + $0xd0] sm:$0xff] }
0x1035   :  { %v3393_v46 = vmul.f32 %v9568_v18, %v14379_v32  ;;  %v3628_v30 = vadd.f32 %v3620_v20, %v12220_v42  ;;  %v3609_v54 = vadd.f32 %v9569_v36, %v3608_v19  ;;  %v3642_v13 = vadd.f32 %v3634_v56, %v3391_v10  ;;  %v9571_v42 = vld [vmem:[%s14233_s1 + $0x90] sm:$0xff] }
0x1036   :  { %v3410_v2 = vmul.f32 %v9570_v25, %v14380_v22  ;;  %v3635_v17 = vadd.f32 %v3627_v24, %v3398_v16  ;;  %v3621_v59 = vadd.f32 %v3607_v26, %v12226_v58  ;;  %v12342_v57 = vadd.f32 %v3641_v8, %v3392_v48  ;;  %v14381_v20 = vld [vmem:[#allocation71_spill] sm:$0xff]  ;;  %v9572_v16 = vld [vmem:[%s14233_s1 + $0x98] sm:$0xff] }
0x1037   :  { %v3402_v50 = vmul.f32 %v9571_v42, %v14381_v20  ;;  %v3636_v18 = vadd.f32 %v3628_v30, %v3399_v37  ;;  %v3622_v10 = vadd.f32 %v3609_v54, %v12235_v0  ;;  %v3612_v56 = vpop.f32.mrb[82].mxu1  ;;  %v12349_v19 = vadd.f32 %v3642_v13, %v3393_v46  ;;  %v14382_v24 = vld [vmem:[#allocation72_spill] sm:$0xff]  ;;  %v9573_v26 = vld [vmem:[%s14234_s21 + $0x30] sm:$0xff] }
0x1038   :  { %v3403_v58 = vmul.f32 %v9572_v16, %v14382_v24  ;;  %v3629_v48 = vadd.f32 %v3621_v59, %v12241_v61  ;;  %v3613_v8 = vadd.f32 %v9573_v26, %v3612_v56  ;;  %v3614_v32 = vpop.f32.mrb[83].mxu1  ;;  %v3643_v37 = vadd.f32 %v3635_v17, %v3400_v14  ;;  %v9574_v46 = vld [vmem:[%s14234_s21 + $0x38] sm:$0xff]  ;;  %v14384_v59 = vld [vmem:[#allocation74_spill] sm:$0xff]  ;;  %v14386_v56 = vld [vmem:[#allocation77_spill] sm:$0xff] }
0x1039   :  { %v3630_v0 = vadd.f32 %v3622_v10, %v12247_v9  ;;  %v3615_v30 = vadd.f32 %v9574_v46, %v3614_v32  ;;  %v3657_v36 = vmax.f32 %v12342_v57, %v12349_v19  ;;  %v3644_v54 = vadd.f32 %v3636_v18, %v3401_v7  ;;  %v9575_v61 = vld [vmem:[%s14233_s1 + $0xd8] sm:$0xff]  ;;  %v9576_v9 = vld [vmem:[%s14233_s1 + $0x110] sm:$0xff]  ;;  %v14385_v10 = vld [vmem:[#allocation73_spill] sm:$0xff] }
0x103a   :  { %v14383_v13 = vld [vmem:[#allocation68_spill] sm:$0xff]  ;;  %v3637_v22 = vadd.f32 %v3629_v48, %v3408_v43  ;;  %v3623_v14 = vadd.f32 %v3613_v8, %v12256_v27  ;;  %v12370_v17 = vadd.f32 %v3643_v37, %v3402_v50  ;;  %v3418_v42 = vmul.f32 %v9576_v9, %v14384_v59  ;;  %v9578_v50 = vld [vmem:[%s14233_s1 + $0xe0] sm:$0xff]  ;;  %v14391_v59 = vld [vmem:[#allocation79_spill] sm:$0xff] }
0x103b   :  { %v3411_v25 = vmul.f32 %v9575_v61, %v14383_v13  ;;  %v3638_v20 = vadd.f32 %v3630_v0, %v3409_v4  ;;  %v3624_v7 = vadd.f32 %v3615_v30, %v12262_v40  ;;  %3658 = vmax.xlane.f32.xlu0 %v3657_v36  ;;  %v12377_v18 = vadd.f32 %v3644_v54, %v3403_v58  ;;  %v9577_v43 = vld [vmem:[%s14233_s1 + $0x118] sm:$0xff]  ;;  %v9579_v40 = vld [vmem:[%s14233_s1 + $0xe8] sm:$0xff]  ;;  %v9580_v37 = vld [vmem:[%s14233_s1 + $0x120] sm:$0xff] }
0x103c   :  { %v3419_v27 = vmul.f32 %v9577_v43, %v14385_v10  ;;  %v3412_v16 = vmul.f32 %v9578_v50, %v14386_v56  ;;  %v3631_v24 = vadd.f32 %v3623_v14, %v12268_v41  ;;  %v3645_v4 = vadd.f32 %v3637_v22, %v3410_v2  ;;  %v14387_v58 = vld [vmem:[#allocation76_spill] sm:$0xff]  ;;  %v9581_v30 = vld [vmem:[%s14233_s1 + $0x128] sm:$0xff]  ;;  %v9582_v13 = vld [vmem:[%s14233_s1 + $0x130] sm:$0xff] }
0x103d   :  { %v3413_v48 = vmul.f32 %v9579_v40, %v14387_v58  ;;  %v3632_v26 = vadd.f32 %v3624_v7, %v12274_v23  ;;  %v3660_v8 = vmax.f32 %v12370_v17, %v12377_v18  ;;  %v3646_v32 = vadd.f32 %v3638_v20, %v3411_v25  ;;  %v14388_v0 = vld [vmem:[#allocation20_spill] sm:$0xff]  ;;  %v14389_v36 = vld [vmem:[#allocation30_spill] sm:$0xff]  ;;  %v14393_v56 = vld [vmem:[#allocation91_spill] sm:$0xff] }
0x103e   :  { %v3420_v46 = vmul.f32 %v9580_v37, %v14388_v0  ;;  %v3639_v41 = vadd.f32 %v3631_v24, %v3418_v42  ;;  %v12399_v2 = vadd.f32 %v3645_v4, %v3412_v16  ;;  %v3421_v54 = vmul.f32 %v9581_v30, %v14389_v36  ;;  %v14390_v25 = vld [vmem:[#allocation82_spill] sm:$0xff]  ;;  %v9583_v9 = vld [vmem:[%s14233_s1 + $0x138] sm:$0xff]  ;;  %v14395_v24 = vld [vmem:[#allocation63_spill] sm:$0xff] }
0x103f   :  { %v3640_v23 = vadd.f32 %v3632_v26, %v3419_v27  ;;  %3661 = vmax.xlane.f32.xlu1 %v3660_v8  ;;  %v12405_v61 = vadd.f32 %v3646_v32, %v3413_v48  ;;  %v3422_v22 = vmul.f32 %v9582_v13, %v14390_v25  ;;  %v3423_v42 = vmul.f32 %v9583_v9, %v14391_v59  ;;  %v14392_v50 = vld [vmem:[#allocation80_spill] sm:$0xff]  ;;  %v14397_v58 = vld [vmem:[#allocation69_spill] sm:$0xff] }
0x1040   :  { %v3647_v14 = vadd.f32 %v3639_v41, %v3420_v46  ;;  %v14394_v16 = vpack.i.bf16 %v14392_v50, %v14393_v56  ;;  %v6876_v4 = vmul.f32 -1.442695, %v14395_v24  ;;  %v14396_v40 = vpack.i.bf16 %v12030_v33, %v12025_v60  ;;  %v14399_v8 = vld [vmem:[#allocation52_spill] sm:$0xff]  ;;  %v14402_v33 = vld [vmem:[#allocation78_spill] sm:$0xff]  ;;  %v14403_v46 = vld [vmem:[#allocation81_spill] sm:$0xff] }
0x1041   :  { %v3663_v20 = vmax.f32 %v12399_v2, %v12405_v61  ;;  %v3648_v7 = vadd.f32 %v3640_v23, %v3421_v54  ;;  %v6878_v48 = vmul.f32 -1.442695, %v14397_v58  ;;  %v14398_v26 = vpack.i.bf16 %v12040_v39, %v12035_v35  ;;  %v14401_v0 = vld [vmem:[#allocation64_spill] sm:$0xff]  ;;  %v14406_v39 = vld [vmem:[#allocation93_spill] sm:$0xff] }
0x1042   :  { %v12417_v43 = vadd.f32 %v3647_v14, %v3422_v22  ;;  %9379 = vpow2.f32 %v6876_v4  ;;  %v6875_v32 = vmul.f32 -1.442695, %v14399_v8  ;;  %v14400_v37 = vpack.i.bf16 %v11978_v3, %v11944_v49  ;;  %v14407_v30 = vld [vmem:[#allocation92_spill] sm:$0xff] }
0x1043   :  { %3664 = vmax.xlane.f32.xlu0 %v3663_v20  ;;  %v12419_v10 = vadd.f32 %v3648_v7, %v3423_v42  ;;  %9381 = vpow2.f32 %v6878_v48  ;;  %v6877_v60 = vmul.f32 -1.442695, %v14401_v0  ;;  %v14404_v41 = vpack.i.bf16 %v14402_v33, %v14403_v46 }
0x1044   :  { %9383 = vpow2.f32 %v6875_v32  ;;  %v14405_v35 = vpack.i.bf16 %v12064_v63, %v12059_v1  ;;  %v14408_v36 = vpack.i.bf16 %v14406_v39, %v14407_v30  ;;  %v14409_v3 = vpack.i.bf16 %v11988_v44, %v11954_v52 }
0x1045   :  { %v3666_v27 = vmax.f32 %v12417_v43, %v12419_v10  ;;  %9385 = vpow2.f32 %v6877_v60  ;;  %v14410_v23 = vpack.i.bf16 %v12050_v15, %v12045_v53  ;;  %v14411_v13 = vpack.i.bf16 %v12084_v6, %v12079_v45 }
0x1046   :  { %v14412_v52 = vpack.i.bf16 %v11983_v12, %v11949_v5  ;;  %v14413_v53 = vpack.i.bf16 %v11998_v62, %v11964_v29  ;;  %v14414_v6 = vpack.i.bf16 %v12074_v34, %v12069_v51  ;;  %v14415_v5 = vpack.i.bf16 %v12110_v47, %v12103_v11 }
0x1047   :  { %3667 = vmax.xlane.f32.xlu0 %v3666_v27  ;;  %v14416_v12 = vpack.i.bf16 %v11993_v21, %v11959_v31  ;;  %v14417_v62 = vpack.i.bf16 %v12098_v55, %v12093_v28  ;;  %v14418_v0 = vmov 0.0  }
0x104c   :  { %v9380_v49 = vpop.eup %9379 }
0x104d   :  { %v2734_v54 = vadd.f32 1.0, %v9380_v49  ;;  %v9382_v1 = vpop.eup %9381 }
0x104e   :  { %v9384_v63 = vpop.eup %9383  ;;  %v2736_v25 = vadd.f32 1.0, %v9382_v1 }
0x104f   :  { %9387 = vrcp.f32 %v2734_v54  ;;  %v2733_v44 = vadd.f32 1.0, %v9384_v63  ;;  %v9386_v22 = vpop.eup %9385 }
0x1050   :  { %9153 = vrot.lane.b32.xlu1 %v14394_v16, %s14255_s25  ;;  %9389 = vrcp.f32 %v2736_v25  ;;  %v2735_v45 = vadd.f32 1.0, %v9386_v22 }
0x1051   :  { %9391 = vrcp.f32 %v2733_v44 }
0x1052   :  { %9393 = vrcp.f32 %v2735_v45 }
0x1054   :  { %9158 = vrot.lane.b32.xlu1 %v14396_v40, %s14255_s25 }
0x1058   :  { %9163 = vrot.lane.b32.xlu1 %v14398_v26, %s14255_s25 }
0x1059   :  { %v9388_v29 = vpop.eup %9387 }
0x105a   :  { %v9390_v34 = vpop.eup %9389 }
0x105b   :  { %v9392_v51 = vpop.eup %9391 }
0x105c   :  { %9173 = vrot.lane.b32.xlu1 %v14400_v37, %s14255_s25  ;;  %v9394_v47 = vpop.eup %9393 }
0x105d   :  { %9148 = vrot.lane.b32.xlu0 %v14404_v41, %s14255_s25 }
0x1060   :  { %9183 = vrot.lane.b32.xlu1 %v14405_v35, %s14255_s25 }
0x1061   :  { %9168 = vrot.lane.b32.xlu0 %v14408_v36, %s14255_s25 }
0x1064   :  { %9193 = vrot.lane.b32.xlu1 %v14409_v3, %s14255_s25 }
0x1065   :  { %9178 = vrot.lane.b32.xlu0 %v14410_v23, %s14255_s25 }
0x1068   :  { %9203 = vrot.lane.b32.xlu1 %v14411_v13, %s14255_s25 }
0x1069   :  { %9188 = vrot.lane.b32.xlu0 %v14412_v52, %s14255_s25 }
0x106c   :  { %9213 = vrot.lane.b32.xlu1 %v14413_v53, %s14255_s25 }
0x106d   :  { %9198 = vrot.lane.b32.xlu0 %v14414_v6, %s14255_s25 }
0x1070   :  { %9223 = vrot.lane.b32.xlu1 %v14415_v5, %s14255_s25 }
0x1071   :  { %9208 = vrot.lane.b32.xlu0 %v14416_v12, %s14255_s25 }
0x1074   :  { %4095 = vrot.lane.b32.xlu1 %v9388_v29, %s14255_s25 }
0x1075   :  { %9218 = vrot.lane.b32.xlu0 %v14417_v62, %s14255_s25 }
0x1078   :  { %4099 = vrot.lane.b32.xlu1 %v9390_v34, %s14255_s25 }
0x1079   :  { %4093 = vrot.lane.b32.xlu0 %v9392_v51, %s14255_s25 }
0x107d   :  { %4097 = vrot.lane.b32.xlu0 %v9394_v47, %s14255_s25 }
0x10c8   :  { %v3659_v31 = vpop.xlane.xlu0 %3658 }
0x10c9   :  { %v3669_v21 = vsub.f32 %v12342_v57, %v3659_v31  ;;  %v3670_v15 = vsub.f32 %v12349_v19, %v3659_v31 }
0x10cb   :  { %v3677_v11 = vmul.f32 1.442695, %v3669_v21  ;;  %v3679_v14 = vmul.f32 1.442695, %v3670_v15 }
0x10cc   :  { %v3662_v9 = vpop.xlane.xlu1 %3661 }
0x10cd   :  { %9395 = vpow2.f32 %v3677_v11  ;;  %v3671_v28 = vsub.f32 %v12370_v17, %v3662_v9  ;;  %v3672_v55 = vsub.f32 %v12377_v18, %v3662_v9 }
0x10ce   :  { %9397 = vpow2.f32 %v3679_v14 }
0x10cf   :  { %v3681_v59 = vmul.f32 1.442695, %v3671_v28  ;;  %v3683_v42 = vmul.f32 1.442695, %v3672_v55 }
0x10d0   :  { %v3665_v20 = vpop.xlane.xlu0 %3664  ;;  %v9154_v60 = vpop.permute.xlu1 %9153 }
0x10d1   :  { %9399 = vpow2.f32 %v3681_v59  ;;  %v3673_v7 = vsub.f32 %v12399_v2, %v3665_v20  ;;  %v3674_v57 = vsub.f32 %v12405_v61, %v3665_v20  ;;  %v9156_v44 = vunpack.i.h.bf16 %v9154_v60 }
0x10d2   :  { %9401 = vpow2.f32 %v3683_v42  ;;  %v9155_v22 = vunpack.i.l.bf16 %v9154_v60 }
0x10d3   :  { %v3685_v27 = vmul.f32 1.442695, %v3673_v7  ;;  %v3687_v19 = vmul.f32 1.442695, %v3674_v57 }
0x10d4   :  { %v3668_v50 = vpop.xlane.xlu0 %3667  ;;  %v9159_v33 = vpop.permute.xlu1 %9158  ;;  %v8664_v51 = vpack.c.bf16 %v9156_v44, %v9155_v22 }
0x10d5   :  { %9403 = vpow2.f32 %v3685_v27  ;;  %v3675_v56 = vsub.f32 %v12417_v43, %v3668_v50  ;;  %v3676_v17 = vsub.f32 %v12419_v10, %v3668_v50  ;;  %v9584_v43 = vld [vmem:[%s14272_s0] sm:$0xff]  ;;  %v9161_v45 = vunpack.i.h.bf16 %v9159_v33 }
0x10d6   :  { %9405 = vpow2.f32 %v3687_v19  ;;  %v9160_v5 = vunpack.i.l.bf16 %v9159_v33 }
0x10d7   :  { %v12503_v18 = vpop.eup %9395  ;;  %v3689_v16 = vmul.f32 1.442695, %v3675_v56  ;;  %v3691_v4 = vmul.f32 1.442695, %v3676_v17 }
0x10d8   :  { %v12505_v24 = vpop.eup %9397  ;;  %v9149_v40 = vpop.permute.xlu0 %9148  ;;  %v8666_v11 = vpack.c.bf16 %v9161_v45, %v9160_v5 }
0x10d9   :  { %9407 = vpow2.f32 %v3689_v16  ;;  %3757 = vmatprep.mubr.f32.mxu0 %v12505_v24  ;;  %v9151_v2 = vunpack.i.h.bf16 %v9149_v40  ;;  %v9150_v61 = vunpack.i.l.bf16 %v9149_v40  ;;  %v9164_v41 = vpop.permute.xlu1 %9163 }
0x10da   :  { %9409 = vpow2.f32 %v3691_v4  ;;  %3758 = vmatmul.mubr.f32.vlgmr.msra.gmra.mrb[80].mxu0 %v12503_v18  ;;  %v9166_v47 = vunpack.i.h.bf16 %v9164_v41  ;;  %v9165_v31 = vunpack.i.l.bf16 %v9164_v41 }
0x10db   :  { %v12509_v58 = vpop.eup %9399  ;;  %3803 = vmatpush1.msra.mxu0 %v9584_v43  ;;  %v8662_v48 = vpack.c.bf16 %v9151_v2, %v9150_v61 }
0x10dc   :  { %v12514_v10 = vpop.eup %9401  ;;  %v9169_v30 = vpop.permute.xlu0 %9168  ;;  %v8668_v59 = vpack.c.bf16 %v9166_v47, %v9165_v31  ;;  %v6963_v47 = vld [vmem:[%s13946_s13 + $0x50] sm:$0xff] }
0x10dd   :  { %3762 = vmatprep.mubr.f32.mxu0 %v12514_v10  ;;  %8663 = vmatprep.subr.bf16.mxu0 %v8662_v48  ;;  %v9174_v23 = vpop.permute.xlu1 %9173  ;;  %v9171_v14 = vunpack.i.h.bf16 %v9169_v30  ;;  %v9170_v9 = vunpack.i.l.bf16 %v9169_v30 }
0x10de   :  { %3763 = vmatmul.mubr.f32.gmra.mrb[82].mxu0 %v12509_v58  ;;  %v9176_v42 = vunpack.i.h.bf16 %v9174_v23  ;;  %v9175_v20 = vunpack.i.l.bf16 %v9174_v23 }
0x10df   :  { %v12518_v26 = vpop.eup %9403  ;;  %v8670_v7 = vpack.c.bf16 %v9171_v14, %v9170_v9 }
0x10e0   :  { %v12520_v8 = vpop.eup %9405  ;;  %v9179_v25 = vpop.permute.xlu0 %9178  ;;  %v8672_v56 = vpack.c.bf16 %v9176_v42, %v9175_v20 }
0x10e1   :  { %3767 = vmatprep.mubr.f32.mxu0 %v12520_v8  ;;  %v9184_v12 = vpop.permute.xlu1 %9183  ;;  %v9181_v57 = vunpack.i.h.bf16 %v9179_v25  ;;  %v9180_v27 = vunpack.i.l.bf16 %v9179_v25 }
0x10e2   :  { %3768 = vmatmul.mubr.f32.gmra.mrb[84].mxu0 %v12518_v26  ;;  %v9186_v17 = vunpack.i.h.bf16 %v9184_v12  ;;  %v9185_v16 = vunpack.i.l.bf16 %v9184_v12 }
0x10e3   :  { %v12524_v32 = vpop.eup %9407  ;;  %v8674_v4 = vpack.c.bf16 %v9181_v57, %v9180_v27 }
0x10e4   :  { %v12526_v37 = vpop.eup %9409  ;;  %v9189_v21 = vpop.permute.xlu0 %9188  ;;  %v8676_v48 = vpack.c.bf16 %v9186_v17, %v9185_v16 }
0x10e5   :  { %3772 = vmatprep.mubr.f32.mxu0 %v12526_v37  ;;  %v9194_v28 = vpop.permute.xlu1 %9193  ;;  %v9191_v40 = vunpack.i.h.bf16 %v9189_v21  ;;  %v9190_v2 = vunpack.i.l.bf16 %v9189_v21  ;;  %v6964_v21 = vld [vmem:[%s13946_s13 + $0x58] sm:$0xff] }
0x10e6   :  { %3773 = vmatmul.mubr.f32.gmra.mrb[86].mxu0 %v12524_v32  ;;  %v9196_v60 = vunpack.i.h.bf16 %v9194_v28  ;;  %v9195_v33 = vunpack.i.l.bf16 %v9194_v28 }
0x10e7   :  { %3866 = vmatprep.mubr.f32.mxu0 %v14418_v0  ;;  %v8678_v41 = vpack.c.bf16 %v9191_v40, %v9190_v2 }
0x10e8   :  { %v9199_v19 = vpop.permute.xlu0 %9198 }
0x10e9   :  { %v9204_v61 = vpop.permute.xlu1 %9203 }
0x10ed   :  { %v9214_v30 = vpop.permute.xlu1 %9213 }
0x10ee   :  { %v9216_v25 = vunpack.i.h.bf16 %v9214_v30 }
0x10f1   :  { %v9224_v22 = vpop.permute.xlu1 %9223 }
0x10f2   :  { %v9226_v5 = vunpack.i.h.bf16 %v9224_v22  ;;  %v9225_v12 = vunpack.i.l.bf16 %v9224_v22 }
0x11ad   :  { %v7476_v46 = vpop.f32.mrb[80].mxu0 }
0x11ae   :  { %v7477_v35 = vpop.f32.mrb[81].mxu0 }
0x11af   :  { %v7478_v39 = vadd.f32 %v7477_v35, %v7476_v46  ;;  %v9209_v46 = vpop.permute.xlu0 %9208  ;;  %v9201_v35 = vunpack.i.h.bf16 %v9199_v19 }
0x11b0   :  { %v9211_v23 = vunpack.i.h.bf16 %v9209_v46 }
0x11b1   :  { %v3778_v36 = vmax.f32 %v7478_v39, 1e-30  ;;  %v7479_v49 = vpop.f32.mrb[82].mxu0  ;;  %v9200_v39 = vunpack.i.l.bf16 %v9199_v19 }
0x11b2   :  { %v7480_v3 = vpop.f32.mrb[83].mxu0 }
0x11b3   :  { %9411 = vrcp.f32 %v3778_v36  ;;  %v7481_v54 = vadd.f32 %v7480_v3, %v7479_v49  ;;  %v8680_v36 = vpack.c.bf16 %v9196_v60, %v9195_v33  ;;  %v9206_v49 = vunpack.i.h.bf16 %v9204_v61  ;;  %v4096_v60 = vpop.permute.xlu1 %4095 }
0x11b4   :  { %v9205_v3 = vunpack.i.l.bf16 %v9204_v61 }
0x11b5   :  { %v3779_v1 = vmax.f32 %v7481_v54, 1e-30  ;;  %v7482_v63 = vpop.f32.mrb[84].mxu0  ;;  %v8682_v54 = vpack.c.bf16 %v9201_v35, %v9200_v39 }
0x11b6   :  { %v7483_v13 = vpop.f32.mrb[85].mxu0 }
0x11b7   :  { %9413 = vrcp.f32 %v3779_v1  ;;  %v7484_v52 = vadd.f32 %v7483_v13, %v7482_v63  ;;  %v9210_v1 = vunpack.i.l.bf16 %v9209_v46  ;;  %v9219_v63 = vpop.permute.xlu0 %9218  ;;  %v8684_v13 = vpack.c.bf16 %v9206_v49, %v9205_v3 }
0x11b9   :  { %v3780_v53 = vmax.f32 %v7484_v52, 1e-30  ;;  %v7485_v6 = vpop.f32.mrb[86].mxu0  ;;  %v9215_v52 = vunpack.i.l.bf16 %v9214_v30  ;;  %v8686_v44 = vpack.c.bf16 %v9211_v23, %v9210_v1  ;;  %v6970_v1 = vld [vmem:[%s13947_s14 + $0x1] ss:$0 sm:$0xff] }
0x11ba   :  { %v7486_v29 = vpop.f32.mrb[87].mxu0 }
0x11bb   :  { %9415 = vrcp.f32 %v3780_v53  ;;  %v7487_v62 = vadd.f32 %v7486_v29, %v7485_v6  ;;  %v9221_v53 = vunpack.i.h.bf16 %v9219_v63  ;;  %v9220_v6 = vunpack.i.l.bf16 %v9219_v63  ;;  %v4094_v40 = vpop.permute.xlu0 %4093 }
0x11bc   :  { %v8688_v45 = vpack.c.bf16 %v9216_v25, %v9215_v52 }
0x11bd   :  { %v9412_v34 = vpop.eup %9411  ;;  %v3781_v15 = vmax.f32 %v7487_v62, 1e-30  ;;  %v8690_v29 = vpack.c.bf16 %v9221_v53, %v9220_v6  ;;  %v8692_v62 = vpack.c.bf16 %v9226_v5, %v9225_v12  ;;  %v14420_v53 = vld [vmem:[#allocation60_spill] sm:$0xff] }
0x11be   :  { %6949 = vmatmul.mubr.msk.f32.vlgmr.msra.gmra.mrb[88].mxu0 %vm1643_vm2, %v9412_v34  ;;  %v6961_v34 = vld [vmem:[%s13946_s13 + $0x40] sm:$0xff] }
0x11bf   :  { %9417 = vrcp.f32 %v3781_v15  ;;  %8665 = vmatpush3.bf16.msra.mxu0 %v8664_v51  ;;  %3872 = vmatprep.mubr.f32.mxu0 %v14418_v0  ;;  %v6962_v51 = vld [vmem:[%s13946_s13 + $0x48] sm:$0xff]  ;;  %v8698_v15 = vpack.c.bf16 %v6964_v21, %v6963_v47  ;;  %v4098_v39 = vpop.permute.xlu0 %4097  ;;  %v14422_v21 = vld [vmem:[#allocation65_spill] sm:$0xff] }
0x11c0   :  { %8667 = vmatprep.subr.bf16.mxu0 %v8666_v11  ;;  %v8694_v31 = vpack.c.bf16 %v6962_v51, %v6961_v34  ;;  %v14421_v51 = vld [vmem:[#allocation66_spill] sm:$0xff] }
0x11c1   :  { %v9414_v55 = vpop.eup %9413 }
0x11c2   :  { %6950 = vmatmul.mubr.msk.f32.gmra.mrb[90].mxu0 %vm1643_vm2, %v9414_v55  ;;  %8695 = vmatprep.subr.bf16.mxu1 %v8694_v31 }
0x11c3   :  { %8669 = vmatpush3.bf16.msra.mxu0 %v8668_v59  ;;  %3878 = vmatprep.mubr.f32.mxu0 %v14418_v0 }
0x11c4   :  { %8671 = vmatprep.subr.bf16.mxu0 %v8670_v7  ;;  %8697 = vmatpush3.bf16.msra.mxu1 %v8694_v31 }
0x11c5   :  { %v9416_v50 = vpop.eup %9415  ;;  %8699 = vmatprep.subr.bf16.mxu1 %v8698_v15 }
0x11c6   :  { %6951 = vmatmul.mubr.msk.f32.gmra.mrb[92].mxu0 %vm1643_vm2, %v9416_v50  ;;  %v6968_v50 = vld [vmem:[%s13946_s13 + $0x78] sm:$0xff] }
0x11c7   :  { %8673 = vmatpush3.bf16.msra.mxu0 %v8672_v56  ;;  %3884 = vmatprep.mubr.f32.mxu0 %v14418_v0 }
0x11c8   :  { %8675 = vmatprep.subr.bf16.mxu0 %v8674_v4  ;;  %8701 = vmatpush3.bf16.msra.mxu1 %v8698_v15 }
0x11c9   :  { %v9418_v43 = vpop.eup %9417 }
0x11ca   :  { %6952 = vmatmul.mubr.msk.f32.gmra.mrb[94].mxu0 %vm1643_vm2, %v9418_v43 }
0x11cb   :  { %8677 = vmatpush3.bf16.msra.mxu0 %v8676_v48 }
0x11cc   :  { %8679 = vmatprep.subr.bf16.mxu0 %v8678_v41 }
0x11cf   :  { %8681 = vmatpush3.bf16.msra.mxu0 %v8680_v36 }
0x11d0   :  { %8683 = vmatprep.subr.bf16.mxu0 %v8682_v54  ;;  %v4100_v54 = vpop.permute.xlu1 %4099 }
0x11d3   :  { %8685 = vmatpush3.bf16.msra.mxu0 %v8684_v13 }
0x11d4   :  { %8687 = vmatprep.subr.bf16.mxu0 %v8686_v44  ;;  %v14419_v44 = vld [vmem:[#allocation62_spill] sm:$0xff] }
0x11d7   :  { %8689 = vmatpush3.bf16.msra.mxu0 %v8688_v45 }
0x11d8   :  { %8691 = vmatprep.subr.bf16.mxu0 %v8690_v29 }
0x11db   :  { %8693 = vmatpush3.bf16.msra.mxu0 %v8692_v62 }
0x1291   :  { %v3868_v11 = vpop.f32.mrb[88].mxu0 }
0x1292   :  { %v3891_v14 = vmul.f32 %v12503_v18, %v3868_v11  ;;  %v3870_v9 = vpop.f32.mrb[89].mxu0 }
0x1293   :  { %v3892_v28 = vmul.f32 %v12505_v24, %v3870_v9 }
0x1294   :  { %6953 = vst [vmem:[%s13955_s22 + $0x40] sm:$0xff] %v3891_v14 }
0x1295   :  { %6954 = vst [vmem:[%s13955_s22 + $0x48] sm:$0xff] %v3892_v28  ;;  %v3874_v55 = vpop.f32.mrb[90].mxu0  ;;  %4068 = vmatprep.mubr.f32.mxu0 %v3892_v28 }
0x1296   :  { %v3893_v59 = vmul.f32 %v12509_v58, %v3874_v55  ;;  %v3876_v42 = vpop.f32.mrb[91].mxu0  ;;  %4069 = vmatmul.mubr.f32.vlgmr.msra.gmra.mrb[96].mxu0 %v3891_v14 }
0x1297   :  { %v3894_v20 = vmul.f32 %v12514_v10, %v3876_v42 }
0x1298   :  { %6955 = vst [vmem:[%s13955_s22 + $0x50] sm:$0xff] %v3893_v59 }
0x1299   :  { %6956 = vst [vmem:[%s13955_s22 + $0x58] sm:$0xff] %v3894_v20  ;;  %v3880_v18 = vpop.f32.mrb[92].mxu0  ;;  %4073 = vmatprep.mubr.f32.mxu0 %v3894_v20 }
0x129a   :  { %v3895_v24 = vmul.f32 %v12518_v26, %v3880_v18  ;;  %v3882_v7 = vpop.f32.mrb[93].mxu0  ;;  %4074 = vmatmul.mubr.f32.gmra.mrb[98].mxu0 %v3893_v59 }
0x129b   :  { %v3896_v58 = vmul.f32 %v12520_v8, %v3882_v7  ;;  %v6965_v8 = vld [vmem:[%s13946_s13 + $0x60] sm:$0xff] }
0x129c   :  { %6957 = vst [vmem:[%s13955_s22 + $0x60] sm:$0xff] %v3895_v24 }
0x129d   :  { %6958 = vst [vmem:[%s13955_s22 + $0x68] sm:$0xff] %v3896_v58  ;;  %v3886_v10 = vpop.f32.mrb[94].mxu0  ;;  %4078 = vmatprep.mubr.f32.mxu0 %v3896_v58 }
0x129e   :  { %v3897_v57 = vmul.f32 %v12524_v32, %v3886_v10  ;;  %v3888_v27 = vpop.f32.mrb[95].mxu0  ;;  %4079 = vmatmul.mubr.f32.gmra.mrb[100].mxu0 %v3895_v24  ;;  %v6966_v32 = vld [vmem:[%s13946_s13 + $0x68] sm:$0xff] }
0x129f   :  { %v3898_v26 = vmul.f32 %v12526_v37, %v3888_v27  ;;  %v8702_v19 = vpack.c.bf16 %v6966_v32, %v6965_v8  ;;  %v6967_v37 = vld [vmem:[%s13946_s13 + $0x70] sm:$0xff] }
0x12a0   :  { %6959 = vst [vmem:[%s13955_s22 + $0x70] sm:$0xff] %v3897_v57  ;;  %v8706_v56 = vpack.c.bf16 %v6968_v50, %v6967_v37 }
0x12a1   :  { %6960 = vst [vmem:[%s13955_s22 + $0x78] sm:$0xff] %v3898_v26  ;;  %4083 = vmatprep.mubr.f32.mxu0 %v3898_v26  ;;  %8703 = vmatprep.subr.bf16.mxu1 %v8702_v19 }
0x12a2   :  { %4084 = vmatmul.mubr.f32.gmra.mrb[102].mxu0 %v3897_v57  ;;  %8705 = vmatpush3.bf16.msra.mxu1 %v8702_v19 }
0x12a3   :  { %8707 = vmatprep.subr.bf16.mxu1 %v8706_v56 }
0x12a6   :  { %8709 = vmatpush3.bf16.msra.mxu1 %v8706_v56  ;;  %v6979_v56 = vld [vmem:[%s13950_s17 + $0x40] sm:$0xff] }
0x1369   :  { %v7520_v17 = vpop.f32.mrb[96].mxu0 }
0x136a   :  { %v7521_v16 = vpop.f32.mrb[97].mxu0 }
0x136b   :  { %v7522_v4 = vadd.f32 %v7521_v16, %v7520_v17  ;;  %v6980_v17 = vld [vmem:[%s13950_s17 + $0x48] sm:$0xff] }
0x136c   :  { %v8710_v16 = vpack.c.bf16 %v6980_v17, %v6979_v56  ;;  %v7004_v56 = vld [vmem:[%s13952_s19 + $0xd8] sm:$0xff] }
0x136d   :  { %v4105_v2 = vmul.f32 %v7522_v4, %v4094_v40  ;;  %v7523_v61 = vpop.f32.mrb[98].mxu0  ;;  %v6981_v4 = vld [vmem:[%s13950_s17 + $0x50] sm:$0xff]  ;;  %v6982_v40 = vld [vmem:[%s13950_s17 + $0x58] sm:$0xff] }
0x136e   :  { %v7524_v43 = vpop.f32.mrb[99].mxu0  ;;  %8711 = vmatprep.subr.bf16.mxu1 %v8710_v16 }
0x136f   :  { %v7525_v48 = vadd.f32 %v7524_v43, %v7523_v61  ;;  %7958 = vmatprep.mubr.msk.f32.mxu1 %vm271_vm0, %v4105_v2  ;;  %v8714_v2 = vpack.c.bf16 %v6982_v40, %v6981_v4  ;;  %v6983_v61 = vld [vmem:[%s13950_s17 + $0x60] sm:$0xff]  ;;  %v6984_v43 = vld [vmem:[%s13950_s17 + $0x68] sm:$0xff] }
0x1370   :  { %v7006_v4 = vld [vmem:[%s13952_s19 + $0xe8] sm:$0xff] }
0x1371   :  { %v4106_v33 = vmul.f32 %v7525_v48, %v4096_v60  ;;  %v7526_v46 = vpop.f32.mrb[100].mxu0  ;;  %v8718_v48 = vpack.c.bf16 %v6984_v43, %v6983_v61  ;;  %v6985_v60 = vld [vmem:[%s13950_s17 + $0x70] sm:$0xff]  ;;  %v7008_v61 = vld [vmem:[%s13952_s19 + $0xf8] sm:$0xff] }
0x1372   :  { %v7527_v41 = vpop.f32.mrb[101].mxu0 }
0x1373   :  { %v7528_v35 = vadd.f32 %v7527_v41, %v7526_v46  ;;  %7959 = vmatmul.mubr.msk.f32.vlgmr.msra.gmra.mrb[84].mxu1 %vm271_vm0, %v4106_v33  ;;  %v6986_v33 = vld [vmem:[%s13950_s17 + $0x78] sm:$0xff]  ;;  %v6993_v41 = vld [vmem:[%s13952_s19 + $0x80] sm:$0xff] }
0x1374   :  { %8713 = vmatpush3.bf16.msra.mxu1 %v8710_v16  ;;  %v8722_v46 = vpack.c.bf16 %v6986_v33, %v6985_v60  ;;  %v7005_v16 = vld [vmem:[%s13952_s19 + $0xe0] sm:$0xff] }
0x1375   :  { %v4107_v30 = vmul.f32 %v7528_v35, %v4098_v39  ;;  %v7529_v36 = vpop.f32.mrb[102].mxu0  ;;  %8715 = vmatprep.subr.bf16.mxu1 %v8714_v2  ;;  %v6994_v35 = vld [vmem:[%s13952_s19 + $0x88] sm:$0xff]  ;;  %v8750_v40 = vpack.c.bf16 %v7006_v4, %v7005_v16 }
0x1376   :  { %v7530_v49 = vpop.f32.mrb[103].mxu0  ;;  %v8726_v39 = vpack.c.bf16 %v6994_v35, %v6993_v41 }
0x1377   :  { %v7531_v3 = vadd.f32 %v7530_v49, %v7529_v36  ;;  %7961 = vmatprep.mubr.msk.f32.mxu1 %vm271_vm0, %v4107_v30 }
0x1378   :  { %8717 = vmatpush3.bf16.msra.mxu1 %v8714_v2  ;;  %8727 = vmatprep.subr.bf16.mxu0 %v8726_v39  ;;  %v7007_v2 = vld [vmem:[%s13952_s19 + $0xf0] sm:$0xff] }
0x1379   :  { %v4108_v23 = vmul.f32 %v7531_v3, %v4100_v54  ;;  %8719 = vmatprep.subr.bf16.mxu1 %v8718_v48  ;;  %8729 = vmatpush3.bf16.msra.mxu0 %v8726_v39  ;;  %v8754_v43 = vpack.c.bf16 %v7008_v61, %v7007_v2 }
0x137b   :  { %7962 = vmatmul.mubr.msk.f32.gmra.mrb[86].mxu1 %vm271_vm0, %v4108_v23 }
0x137c   :  { %8721 = vmatpush3.bf16.msra.mxu1 %v8718_v48  ;;  %v6988_v48 = vld [vmem:[%s13951_s18 + $0x1] ss:$0 sm:$0xff] }
0x137d   :  { %8723 = vmatprep.subr.bf16.mxu1 %v8722_v46 }
0x1380   :  { %8725 = vmatpush3.bf16.msra.mxu1 %v8722_v46 }
0x1446   :  { %v7960_v63 = vpop.f32.mrb[84].mxu1 }
0x1447   :  { %v4210_v13 = vadd.f32 %v7960_v63, %v6970_v1  ;;  %v4204_v25 = vpop.f32.mrb[85].mxu1 }
0x1448   :  { %v4205_v52 = vadd.f32 %v6970_v1, %v4204_v25 }
0x1449   :  { %v4224_v22 = vadd.f32 %v4210_v13, %v14419_v44 }
0x144a   :  { %v4223_v6 = vadd.f32 %v4205_v52, %v14420_v53 }
0x144b   :  { %v4234_v45 = vsel %vm271_vm0, %v4224_v22, 0.0 }
0x144c   :  { %4235 = vadd.xlane.f32.xlu1 %v4234_v45  ;;  %v4231_v5 = vsel %vm271_vm0, %v4223_v6, 0.0 }
0x144d   :  { %4232 = vadd.xlane.f32.xlu0 %v4231_v5 }
0x144e   :  { %v7963_v12 = vpop.f32.mrb[86].mxu1 }
0x144f   :  { %v4214_v29 = vpop.f32.mrb[87].mxu1  ;;  %v4220_v62 = vadd.f32 %v7963_v12, %v6970_v1 }
0x1450   :  { %v4215_v34 = vadd.f32 %v6970_v1, %v4214_v29 }
0x1451   :  { %v4226_v15 = vadd.f32 %v4220_v62, %v14422_v21  ;;  %v6978_v62 = vld [vmem:[%s13949_s16 + $0x1] ss:$0 sm:$0xff] }
0x1452   :  { %v4225_v47 = vadd.f32 %v4215_v34, %v14421_v51 }
0x1453   :  { %v4240_v11 = vsel %vm271_vm0, %v4226_v15, 0.0 }
0x1454   :  { %v4237_v31 = vsel %vm271_vm0, %v4225_v47, 0.0 }
0x1455   :  { %4238 = vadd.xlane.f32.xlu0 %v4237_v31 }
0x1459   :  { %4241 = vadd.xlane.f32.xlu0 %v4240_v11 }
0x14d9   :  { %v4236_v14 = vpop.xlane.xlu1 %4235 }
0x14da   :  { %v4244_v9 = vmul.f32 0.015625, %v4236_v14  ;;  %v4233_v28 = vpop.xlane.xlu0 %4232 }
0x14db   :  { %v4243_v55 = vmul.f32 0.015625, %v4233_v28 }
0x14dc   :  { %v4248_v59 = vsub.f32 %v4224_v22, %v4244_v9 }
0x14dd   :  { %v12609_v42 = vsub.f32 %v4223_v6, %v4243_v55  ;;  %v6977_v6 = vld [vmem:[%s13948_s15 + $0x1] ss:$0 sm:$0xff] }
0x14de   :  { %v4252_v20 = vmul.f32 %v4248_v59, %v4248_v59 }
0x14df   :  { %v4251_v18 = vmul.f32 %v12609_v42, %v12609_v42 }
0x14e0   :  { %v4258_v24 = vsel %vm271_vm0, %v4252_v20, 0.0 }
0x14e1   :  { %4259 = vadd.xlane.f32.xlu1 %v4258_v24  ;;  %v4255_v7 = vsel %vm271_vm0, %v4251_v18, 0.0  ;;  %v6995_v18 = vld [vmem:[%s13952_s19 + $0x90] sm:$0xff]  ;;  %v6996_v24 = vld [vmem:[%s13952_s19 + $0x98] sm:$0xff] }
0x14e2   :  { %4256 = vadd.xlane.f32.xlu0 %v4255_v7  ;;  %v4239_v58 = vpop.xlane.xlu0 %4238  ;;  %v8730_v7 = vpack.c.bf16 %v6996_v24, %v6995_v18 }
0x14e3   :  { %v4245_v10 = vmul.f32 0.015625, %v4239_v58  ;;  %v6997_v58 = vld [vmem:[%s13952_s19 + $0xa0] sm:$0xff] }
0x14e4   :  { %8731 = vmatprep.subr.bf16.mxu0 %v8730_v7 }
0x14e5   :  { %v12615_v57 = vsub.f32 %v4225_v47, %v4245_v10  ;;  %8733 = vmatpush3.bf16.msra.mxu0 %v8730_v7  ;;  %v6998_v10 = vld [vmem:[%s13952_s19 + $0xa8] sm:$0xff] }
0x14e6   :  { %v4242_v27 = vpop.xlane.xlu0 %4241 }
0x14e7   :  { %v4246_v26 = vmul.f32 0.015625, %v4242_v27  ;;  %v4253_v8 = vmul.f32 %v12615_v57, %v12615_v57  ;;  %v8734_v27 = vpack.c.bf16 %v6998_v10, %v6997_v58 }
0x14e9   :  { %v12619_v32 = vsub.f32 %v4226_v15, %v4246_v26  ;;  %v4261_v19 = vsel %vm271_vm0, %v4253_v8, 0.0  ;;  %v7000_v26 = vld [vmem:[%s13952_s19 + $0xb8] sm:$0xff]  ;;  %8735 = vmatprep.subr.bf16.mxu0 %v8734_v27 }
0x14ea   :  { %4262 = vadd.xlane.f32.xlu0 %v4261_v19  ;;  %8737 = vmatpush3.bf16.msra.mxu0 %v8734_v27  ;;  %v7002_v19 = vld [vmem:[%s13952_s19 + $0xc8] sm:$0xff] }
0x14eb   :  { %v4254_v37 = vmul.f32 %v12619_v32, %v12619_v32 }
0x14ed   :  { %v4264_v50 = vsel %vm271_vm0, %v4254_v37, 0.0 }
0x14ee   :  { %4265 = vadd.xlane.f32.xlu1 %v4264_v50  ;;  %v7003_v50 = vld [vmem:[%s13952_s19 + $0xd0] sm:$0xff] }
0x14ef   :  { %v8746_v17 = vpack.c.bf16 %v7004_v56, %v7003_v50 }
0x156e   :  { %v4260_v30 = vpop.xlane.xlu1 %4259 }
0x156f   :  { %v4268_v36 = vmul.f32 0.015625, %v4260_v30  ;;  %v4257_v49 = vpop.xlane.xlu0 %4256 }
0x1570   :  { %v4267_v3 = vmul.f32 0.015625, %v4257_v49 }
0x1571   :  { %v4272_v54 = vadd.f32 1e-06, %v4268_v36 }
0x1572   :  { %v4271_v23 = vadd.f32 1e-06, %v4267_v3 }
0x1573   :  { %9419 = vrsqrt.f32 %v4272_v54 }
0x1574   :  { %9421 = vrsqrt.f32 %v4271_v23 }
0x1577   :  { %v4263_v1 = vpop.xlane.xlu0 %4262 }
0x1578   :  { %v4269_v63 = vmul.f32 0.015625, %v4263_v1 }
0x157a   :  { %v4273_v13 = vadd.f32 1e-06, %v4269_v63 }
0x157b   :  { %v4266_v25 = vpop.xlane.xlu1 %4265 }
0x157c   :  { %9423 = vrsqrt.f32 %v4273_v13  ;;  %v4270_v52 = vmul.f32 0.015625, %v4266_v25 }
0x157d   :  { %v9420_v22 = vpop.eup %9419 }
0x157e   :  { %v9422_v45 = vpop.eup %9421  ;;  %v4280_v5 = vmul.f32 %v9420_v22, %v4248_v59  ;;  %v4274_v12 = vadd.f32 1e-06, %v4270_v52 }
0x157f   :  { %v4279_v29 = vmul.f32 %v9422_v45, %v12609_v42 }
0x1580   :  { %9425 = vrsqrt.f32 %v4274_v12  ;;  %v4290_v34 = vmul.f32 %v6977_v6, %v4280_v5 }
0x1581   :  { %v4289_v47 = vmul.f32 %v6977_v6, %v4279_v29 }
0x1582   :  { %v4300_v15 = vadd.f32 %v6978_v62, %v4290_v34 }
0x1583   :  { %v4299_v31 = vadd.f32 %v6978_v62, %v4289_v47 }
0x1585   :  { %7980 = vmatprep.mubr.msk.f32.mxu1 %vm271_vm0, %v4299_v31 }
0x1586   :  { %v9424_v11 = vpop.eup %9423  ;;  %7981 = vmatmul.mubr.msk.f32.vlgmr.msra.gmra.mrb[88].mxu1 %vm271_vm0, %v4300_v15 }
0x1587   :  { %v4281_v14 = vmul.f32 %v9424_v11, %v12615_v57  ;;  %v6999_v57 = vld [vmem:[%s13952_s19 + $0xb0] sm:$0xff] }
0x1588   :  { %v8738_v8 = vpack.c.bf16 %v7000_v26, %v6999_v57 }
0x1589   :  { %v4291_v9 = vmul.f32 %v6977_v6, %v4281_v14 }
0x158a   :  { %v9426_v28 = vpop.eup %9425  ;;  %8739 = vmatprep.subr.bf16.mxu0 %v8738_v8 }
0x158b   :  { %v4301_v55 = vadd.f32 %v6978_v62, %v4291_v9  ;;  %v4282_v59 = vmul.f32 %v9426_v28, %v12619_v32  ;;  %v7001_v32 = vld [vmem:[%s13952_s19 + $0xc0] sm:$0xff]  ;;  %8741 = vmatpush3.bf16.msra.mxu0 %v8738_v8 }
0x158c   :  { %v8742_v37 = vpack.c.bf16 %v7002_v19, %v7001_v32  ;;  %v7010_v8 = vld [vmem:[%s13953_s20 + $0x1] ss:$0 sm:$0xff] }
0x158d   :  { %7983 = vmatprep.mubr.msk.f32.mxu1 %vm271_vm0, %v4301_v55  ;;  %v4292_v42 = vmul.f32 %v6977_v6, %v4282_v59 }
0x158e   :  { %8743 = vmatprep.subr.bf16.mxu0 %v8742_v37 }
0x158f   :  { %v4302_v20 = vadd.f32 %v6978_v62, %v4292_v42  ;;  %8745 = vmatpush3.bf16.msra.mxu0 %v8742_v37 }
0x1590   :  { %8747 = vmatprep.subr.bf16.mxu0 %v8746_v17 }
0x1591   :  { %7984 = vmatmul.mubr.msk.f32.gmra.mrb[90].mxu1 %vm271_vm0, %v4302_v20 }
0x1592   :  { %4762 = vmatprep.mubr.f32.mxu1 %v14418_v0 }
0x1593   :  { %8749 = vmatpush3.bf16.msra.mxu0 %v8746_v17 }
0x1594   :  { %8751 = vmatprep.subr.bf16.mxu0 %v8750_v40 }
0x1597   :  { %8753 = vmatpush3.bf16.msra.mxu0 %v8750_v40 }
0x1598   :  { %8755 = vmatprep.subr.bf16.mxu0 %v8754_v43 }
0x159b   :  { %8757 = vmatpush3.bf16.msra.mxu0 %v8754_v43 }
0x1659   :  { %v7982_v60 = vpop.f32.mrb[88].mxu1 }
0x165a   :  { %v4404_v33 = vadd.f32 %v7982_v60, %v6988_v48  ;;  %v4398_v46 = vpop.f32.mrb[89].mxu1 }
0x165b   :  { %v4399_v41 = vadd.f32 %v6988_v48, %v4398_v46 }
0x165c   :  { %v4422_v35 = vmul.f32 0.044715, %v4404_v33  ;;  %v4418_v59 = vmul.f32 0.5, %v4404_v33 }
0x165d   :  { %v4421_v39 = vmul.f32 0.044715, %v4399_v41  ;;  %v4417_v28 = vmul.f32 0.5, %v4399_v41 }
0x165e   :  { %v4426_v30 = vmul.f32 %v4422_v35, %v4404_v33 }
0x165f   :  { %v4425_v36 = vmul.f32 %v4421_v39, %v4399_v41 }
0x1660   :  { %v4430_v49 = vmul.f32 %v4426_v30, %v4404_v33 }
0x1661   :  { %v4429_v3 = vmul.f32 %v4425_v36, %v4399_v41 }
0x1662   :  { %v4434_v54 = vadd.f32 %v4430_v49, %v4404_v33 }
0x1663   :  { %v4433_v23 = vadd.f32 %v4429_v3, %v4399_v41 }
0x1664   :  { %v4438_v1 = vmul.f32 0.7978846, %v4434_v54  ;;  %v7985_v63 = vpop.f32.mrb[90].mxu1 }
0x1665   :  { %v4414_v13 = vadd.f32 %v7985_v63, %v6988_v48  ;;  %v4408_v25 = vpop.f32.mrb[91].mxu1  ;;  %v4437_v52 = vmul.f32 0.7978846, %v4433_v23 }
0x1666   :  { %9427 = vtanh.f32 %v4438_v1  ;;  %v4409_v22 = vadd.f32 %v6988_v48, %v4408_v25 }
0x1667   :  { %v4424_v6 = vmul.f32 0.044715, %v4414_v13  ;;  %9429 = vtanh.f32 %v4437_v52  ;;  %v4420_v57 = vmul.f32 0.5, %v4414_v13 }
0x1668   :  { %v4423_v45 = vmul.f32 0.044715, %v4409_v22  ;;  %v4419_v58 = vmul.f32 0.5, %v4409_v22 }
0x1669   :  { %v4428_v5 = vmul.f32 %v4424_v6, %v4414_v13 }
0x166a   :  { %v4427_v12 = vmul.f32 %v4423_v45, %v4409_v22  ;;  %v7016_v45 = vld [vmem:[%s13942_s9 + $0x188] sm:$0xff] }
0x166b   :  { %v4432_v29 = vmul.f32 %v4428_v5, %v4414_v13  ;;  %v7019_v5 = vld [vmem:[%s13942_s9 + $0x1a0] sm:$0xff] }
0x166c   :  { %v4431_v62 = vmul.f32 %v4427_v12, %v4409_v22  ;;  %v8758_v12 = vpack.c.bf16 %v7019_v5, %v7016_v45 }
0x166d   :  { %v4436_v34 = vadd.f32 %v4432_v29, %v4414_v13  ;;  %v7015_v29 = vld [vmem:[%s13942_s9 + $0x180] sm:$0xff] }
0x166e   :  { %v4435_v47 = vadd.f32 %v4431_v62, %v4409_v22  ;;  %v7018_v62 = vld [vmem:[%s13942_s9 + $0x198] sm:$0xff]  ;;  %8759 = vmatprep.subr.bf16.mxu1 %v8758_v12 }
0x166f   :  { %v4440_v31 = vmul.f32 0.7978846, %v4436_v34  ;;  %v8760_v34 = vpack.c.bf16 %v7018_v62, %v7015_v29 }
0x1670   :  { %v9428_v15 = vpop.eup %9427  ;;  %v4439_v11 = vmul.f32 0.7978846, %v4435_v47  ;;  %v7022_v47 = vld [vmem:[%s13942_s9 + $0x1b8] sm:$0xff] }
0x1671   :  { %v9430_v14 = vpop.eup %9429  ;;  %v4446_v9 = vadd.f32 1.0, %v9428_v15  ;;  %9431 = vtanh.f32 %v4440_v31  ;;  %8761 = vmatpush1.bf16.msra.mxu1 %v8760_v34  ;;  %v7025_v31 = vld [vmem:[%s13942_s9 + $0x1d0] sm:$0xff] }
0x1672   :  { %v4445_v55 = vadd.f32 1.0, %v9430_v14  ;;  %9433 = vtanh.f32 %v4439_v11  ;;  %v8762_v15 = vpack.c.bf16 %v7025_v31, %v7022_v47  ;;  %v7021_v11 = vld [vmem:[%s13942_s9 + $0x1b0] sm:$0xff]  ;;  %v7024_v14 = vld [vmem:[%s13942_s9 + $0x1c8] sm:$0xff]  ;;  %v7035_v47 = vld [vmem:[%s13942_s9 + $0x220] sm:$0xff] }
0x1673   :  { %v4450_v20 = vmul.f32 %v4446_v9, %v4418_v59  ;;  %v8764_v9 = vpack.c.bf16 %v7024_v14, %v7021_v11  ;;  %v7027_v59 = vld [vmem:[%s13942_s9 + $0x1e0] sm:$0xff]  ;;  %v7038_v31 = vld [vmem:[%s13942_s9 + $0x238] sm:$0xff] }
0x1674   :  { %v4449_v42 = vmul.f32 %v4445_v55, %v4417_v28  ;;  %8763 = vmatprep.subr.bf16.mxu1 %v8762_v15  ;;  %v7028_v28 = vld [vmem:[%s13942_s9 + $0x1e8] sm:$0xff]  ;;  %v7031_v55 = vld [vmem:[%s13942_s9 + $0x200] sm:$0xff] }
0x1675   :  { %8765 = vmatpush1.bf16.msra.mxu1 %v8764_v9  ;;  %v8786_v9 = vpack.c.bf16 %v7038_v31, %v7035_v47 }
0x1676   :  { %8018 = vmatprep.mubr.f32.mxu0 %v4449_v42  ;;  %v8766_v42 = vpack.c.bf16 %v7031_v55, %v7028_v28 }
0x1677   :  { %8019 = vmatmul.mubr.f32.vlgmr.msra.gmra.mrb[104].mxu0 %v4450_v20  ;;  %v7030_v20 = vld [vmem:[%s13942_s9 + $0x1f8] sm:$0xff] }
0x1678   :  { %8767 = vmatprep.subr.bf16.mxu1 %v8766_v42 }
0x167b   :  { %v9432_v18 = vpop.eup %9431 }
0x167c   :  { %v9434_v24 = vpop.eup %9433  ;;  %v4448_v7 = vadd.f32 1.0, %v9432_v18  ;;  %v7034_v18 = vld [vmem:[%s13942_s9 + $0x218] sm:$0xff] }
0x167d   :  { %v4447_v10 = vadd.f32 1.0, %v9434_v24  ;;  %v7037_v24 = vld [vmem:[%s13942_s9 + $0x230] sm:$0xff] }
0x167e   :  { %v4452_v26 = vmul.f32 %v4448_v7, %v4420_v57  ;;  %v8768_v7 = vpack.c.bf16 %v7030_v20, %v7027_v59  ;;  %v7036_v57 = vld [vmem:[%s13942_s9 + $0x228] sm:$0xff]  ;;  %v14427_v20 = vld [vmem:[#allocation5_spill] sm:$0xff] }
0x167f   :  { %v4451_v27 = vmul.f32 %v4447_v10, %v4419_v58  ;;  %v8770_v58 = vpack.c.bf16 %v7037_v24, %v7034_v18  ;;  %v7033_v10 = vld [vmem:[%s13942_s9 + $0x210] sm:$0xff]  ;;  %v14430_v18 = vld [vmem:[#allocation8_spill] sm:$0xff]  ;;  %v14431_v24 = vld [vmem:[#allocation9_spill] sm:$0xff] }
0x1680   :  { %8769 = vmatpush1.bf16.msra.mxu1 %v8768_v7  ;;  %v14432_v7 = vld [vmem:[#allocation10_spill] sm:$0xff] }
0x1681   :  { %8021 = vmatprep.mubr.f32.mxu0 %v4451_v27  ;;  %v7017_v27 = vld [vmem:[%s13942_s9 + $0x190] sm:$0xff]  ;;  %8771 = vmatprep.subr.bf16.mxu1 %v8770_v58 }
0x1682   :  { %8022 = vmatmul.mubr.f32.gmra.mrb[106].mxu0 %v4452_v26  ;;  %v7020_v26 = vld [vmem:[%s13942_s9 + $0x1a8] sm:$0xff]  ;;  %v14433_v58 = vld [vmem:[#allocation11_spill] sm:$0xff] }
0x174a   :  { %v8020_v32 = vpop.f32.mrb[104].mxu0 }
0x174b   :  { %v4550_v19 = vadd.f32 %v8020_v32, %v7010_v8  ;;  %v4544_v37 = vpop.f32.mrb[105].mxu0  ;;  %v8774_v32 = vpack.c.bf16 %v7020_v26, %v7017_v27  ;;  %v7056_v27 = vld [vmem:[%s13944_s11 + $0xa0] sm:$0xff]  ;;  %v7057_v26 = vld [vmem:[%s13944_s11 + $0xa8] sm:$0xff] }
0x174c   :  { %v4545_v50 = vadd.f32 %v7010_v8, %v4544_v37  ;;  %v7053_v37 = vld [vmem:[%s13944_s11 + $0x88] sm:$0xff] }
0x174d   :  { %v12718_v56 = vadd.f32 %v4550_v19, %v14419_v44  ;;  %v7052_v19 = vld [vmem:[%s13944_s11 + $0x80] sm:$0xff] }
0x174e   :  { %v12721_v17 = vadd.f32 %v4545_v50, %v14420_v53  ;;  %v7054_v50 = vld [vmem:[%s13944_s11 + $0x90] sm:$0xff] }
0x174f   :  { %14423 = vst [vmem:[#allocation75_spill] sm:$0xff] %v12718_v56  ;;  %v4574_v16 = vsel %vm271_vm0, %v12718_v56, 0.0 }
0x1750   :  { %14424 = vst [vmem:[#allocation70_spill] sm:$0xff] %v12721_v17  ;;  %4575 = vadd.xlane.f32.xlu1 %v4574_v16  ;;  %v4571_v4 = vsel %vm271_vm0, %v12721_v17, 0.0  ;;  %v8790_v16 = vpack.c.bf16 %v7053_v37, %v7052_v19  ;;  %v7059_v19 = vld [vmem:[%s13944_s11 + $0xb8] sm:$0xff] }
0x1751   :  { %4572 = vadd.xlane.f32.xlu0 %v4571_v4  ;;  %v7055_v4 = vld [vmem:[%s13944_s11 + $0x98] sm:$0xff] }
0x1752   :  { %8791 = vmatprep.subr.bf16.mxu0 %v8790_v16 }
0x1753   :  { %8793 = vmatpush3.bf16.msra.mxu0 %v8790_v16  ;;  %v7039_v16 = vld [vmem:[%s13943_s10 + $0x6] sm:$0x7] }
0x1755   :  { %v8023_v40 = vpop.f32.mrb[106].mxu0 }
0x1756   :  { %v4560_v2 = vadd.f32 %v8023_v40, %v7010_v8  ;;  %v4554_v61 = vpop.f32.mrb[107].mxu0  ;;  %v8794_v40 = vpack.c.bf16 %v7055_v4, %v7054_v50  ;;  %v14436_v50 = vld [vmem:[#allocation14_spill] sm:$0xff]  ;;  %v14437_v4 = vld [vmem:[#allocation15_spill] sm:$0xff] }
0x1757   :  { %v4555_v43 = vadd.f32 %v7010_v8, %v4554_v61  ;;  %v8772_v8 = vpack.c.bf16 %v7036_v57, %v7033_v10  ;;  %v14434_v10 = vld [vmem:[#allocation12_spill] sm:$0xff]  ;;  %v14435_v57 = vld [vmem:[#allocation13_spill] sm:$0xff] }
0x1758   :  { %v12728_v48 = vadd.f32 %v4560_v2, %v14422_v21  ;;  %8795 = vmatprep.subr.bf16.mxu0 %v8794_v40 }
0x1759   :  { %v12731_v44 = vadd.f32 %v4555_v43, %v14421_v51  ;;  %8773 = vmatpush1.bf16.msra.mxu1 %v8772_v8  ;;  %8797 = vmatpush3.bf16.msra.mxu0 %v8794_v40  ;;  %v8798_v8 = vpack.c.bf16 %v7057_v26, %v7056_v27  ;;  %v4674_v40 = vrot.slane %v7039_v16, %v14437_v4  ;;  %v14460_v27 = vld [vmem:[#allocation45_spill] sm:$0xff]  ;;  %v14461_v26 = vld [vmem:[#allocation31_spill] sm:$0xff] }
0x175a   :  { %14425 = vst [vmem:[#allocation18_spill] sm:$0xff] %v12728_v48  ;;  %v4580_v53 = vsel %vm271_vm0, %v12728_v48, 0.0  ;;  %8775 = vmatprep.subr.bf16.mxu1 %v8774_v32  ;;  %v14468_v4 = vld [vmem:[#allocation39_spill] sm:$0xff] }
0x175b   :  { %14426 = vst [vmem:[#allocation25_spill] sm:$0xff] %v12731_v44  ;;  %4581 = vadd.xlane.f32.xlu1 %v4580_v53  ;;  %v4577_v60 = vsel %vm271_vm0, %v12731_v44, 0.0  ;;  %8799 = vmatprep.subr.bf16.mxu0 %v8798_v8 }
0x175c   :  { %4578 = vadd.xlane.f32.xlu0 %v4577_v60 }
0x175d   :  { %8801 = vmatpush3.bf16.msra.mxu0 %v8798_v8  ;;  %v14462_v8 = vld [vmem:[#allocation48_spill] sm:$0xff] }
0x17dd   :  { %v4576_v33 = vpop.xlane.xlu1 %4575 }
0x17de   :  { %v4584_v46 = vmul.f32 0.015625, %v4576_v33  ;;  %v4573_v41 = vpop.xlane.xlu0 %4572 }
0x17df   :  { %v4583_v35 = vmul.f32 0.015625, %v4573_v41 }
0x17e0   :  { %v12738_v39 = vsub.f32 %v12718_v56, %v4584_v46 }
0x17e1   :  { %v12741_v21 = vsub.f32 %v12721_v17, %v4583_v35 }
0x17e2   :  { %v4592_v51 = vmul.f32 %v12738_v39, %v12738_v39 }
0x17e3   :  { %v4591_v30 = vmul.f32 %v12741_v21, %v12741_v21 }
0x17e4   :  { %v4598_v36 = vsel %vm271_vm0, %v4592_v51, 0.0 }
0x17e5   :  { %4599 = vadd.xlane.f32.xlu1 %v4598_v36  ;;  %v4595_v49 = vsel %vm271_vm0, %v4591_v30, 0.0 }
0x17e6   :  { %4596 = vadd.xlane.f32.xlu0 %v4595_v49 }
0x17e8   :  { %v4582_v3 = vpop.xlane.xlu1 %4581 }
0x17e9   :  { %v4586_v54 = vmul.f32 0.015625, %v4582_v3  ;;  %v4579_v23 = vpop.xlane.xlu0 %4578 }
0x17ea   :  { %v4585_v1 = vmul.f32 0.015625, %v4579_v23 }
0x17eb   :  { %v12750_v63 = vsub.f32 %v12728_v48, %v4586_v54  ;;  %v7013_v54 = vld [vmem:[%s13940_s7 + $0x2] ss:$0 sm:$0xff] }
0x17ec   :  { %v12753_v13 = vsub.f32 %v12731_v44, %v4585_v1 }
0x17ed   :  { %v4594_v25 = vmul.f32 %v12750_v63, %v12750_v63 }
0x17ee   :  { %v4593_v52 = vmul.f32 %v12753_v13, %v12753_v13 }
0x17ef   :  { %v4604_v22 = vsel %vm271_vm0, %v4594_v25, 0.0  ;;  %v7014_v25 = vld [vmem:[%s13941_s8 + $0x2] ss:$0 sm:$0xff] }
0x17f0   :  { %4605 = vadd.xlane.f32.xlu1 %v4604_v22  ;;  %v4601_v6 = vsel %vm271_vm0, %v4593_v52, 0.0  ;;  %v7023_v52 = vld [vmem:[%s13942_s9 + $0x1c0] sm:$0xff]  ;;  %v7026_v22 = vld [vmem:[%s13942_s9 + $0x1d8] sm:$0xff] }
0x17f1   :  { %4602 = vadd.xlane.f32.xlu0 %v4601_v6  ;;  %v8778_v12 = vpack.c.bf16 %v7026_v22, %v7023_v52  ;;  %v14444_v22 = vld [vmem:[#allocation27_spill] sm:$0xff] }
0x1872   :  { %v4600_v2 = vpop.xlane.xlu1 %4599 }
0x1873   :  { %v4608_v61 = vmul.f32 0.015625, %v4600_v2  ;;  %v4597_v43 = vpop.xlane.xlu0 %4596  ;;  %v14438_v2 = vld [vmem:[#allocation16_spill] sm:$0xff] }
0x1874   :  { %v4607_v53 = vmul.f32 0.015625, %v4597_v43 }
0x1875   :  { %v4612_v60 = vadd.f32 1e-06, %v4608_v61  ;;  %v4678_v61 = vrot.slane %v7039_v16, %v14438_v2  ;;  %v14470_v2 = vld [vmem:[#allocation43_spill] sm:$0xff] }
0x1876   :  { %v4611_v33 = vadd.f32 1e-06, %v4607_v53 }
0x1877   :  { %9435 = vrsqrt.f32 %v4612_v60 }
0x1878   :  { %9437 = vrsqrt.f32 %v4611_v33 }
0x187d   :  { %v4606_v46 = vpop.xlane.xlu1 %4605 }
0x187e   :  { %v4610_v41 = vmul.f32 0.015625, %v4606_v46  ;;  %v4603_v35 = vpop.xlane.xlu0 %4602 }
0x187f   :  { %v4609_v51 = vmul.f32 0.015625, %v4603_v35 }
0x1880   :  { %v4614_v30 = vadd.f32 1e-06, %v4610_v41 }
0x1881   :  { %v9436_v36 = vpop.eup %9435  ;;  %v4613_v49 = vadd.f32 1e-06, %v4609_v51 }
0x1882   :  { %v9438_v3 = vpop.eup %9437  ;;  %9439 = vrsqrt.f32 %v4614_v30  ;;  %v4620_v1 = vmul.f32 %v9436_v36, %v12738_v39  ;;  %v7029_v39 = vld [vmem:[%s13942_s9 + $0x1f0] sm:$0xff] }
0x1883   :  { %v4619_v23 = vmul.f32 %v9438_v3, %v12741_v21  ;;  %9441 = vrsqrt.f32 %v4613_v49  ;;  %v7032_v21 = vld [vmem:[%s13942_s9 + $0x208] sm:$0xff] }
0x1884   :  { %v4630_v5 = vmul.f32 %v7013_v54, %v4620_v1  ;;  %v8782_v62 = vpack.c.bf16 %v7032_v21, %v7029_v39  ;;  %v14441_v49 = vld [vmem:[#allocation22_spill] sm:$0xff]  ;;  %v14442_v1 = vld [vmem:[#allocation23_spill] sm:$0xff]  ;;  %v14447_v21 = vld [vmem:[#allocation17_spill] sm:$0xff] }
0x1885   :  { %v4629_v6 = vmul.f32 %v7013_v54, %v4619_v23 }
0x1886   :  { %v4640_v29 = vadd.f32 %v7014_v25, %v4630_v5 }
0x1887   :  { %v4639_v45 = vadd.f32 %v7014_v25, %v4629_v6 }
0x1889   :  { %7040 = vmatmul.mubr.msk.f32.vlgmr.msra.gmra.mrb[92].mxu1 %vm271_vm0, %v4639_v45 }
0x188a   :  { %4768 = vmatprep.mubr.f32.mxu1 %v14418_v0  ;;  %8777 = vmatpush3.bf16.msra.mxu1 %v8774_v32  ;;  %v7058_v32 = vld [vmem:[%s13944_s11 + $0xb0] sm:$0xff] }
0x188b   :  { %8779 = vmatprep.subr.bf16.mxu1 %v8778_v12  ;;  %v8802_v37 = vpack.c.bf16 %v7059_v19, %v7058_v32  ;;  %v14463_v32 = vld [vmem:[#allocation34_spill] sm:$0xff]  ;;  %v14464_v19 = vld [vmem:[#allocation49_spill] sm:$0xff] }
0x188c   :  { %v9440_v34 = vpop.eup %9439 }
0x188d   :  { %v9442_v15 = vpop.eup %9441  ;;  %7041 = vmatmul.mubr.msk.f32.gmra.mrb[94].mxu1 %vm271_vm0, %v4640_v29  ;;  %v4622_v14 = vmul.f32 %v9440_v34, %v12750_v63  ;;  %v14428_v63 = vld [vmem:[#allocation6_spill] sm:$0xff]  ;;  %8803 = vmatprep.subr.bf16.mxu0 %v8802_v37  ;;  %v14448_v34 = vld [vmem:[#allocation32_spill] sm:$0xff] }
0x188e   :  { %8781 = vmatpush3.bf16.msra.mxu1 %v8778_v12  ;;  %4774 = vmatprep.mubr.f32.mxu1 %v14418_v0  ;;  %v4621_v11 = vmul.f32 %v9442_v15, %v12753_v13  ;;  %v14429_v13 = vld [vmem:[#allocation7_spill] sm:$0xff]  ;;  %v14445_v12 = vld [vmem:[#allocation28_spill] sm:$0xff]  ;;  %v14449_v15 = vld [vmem:[#allocation33_spill] sm:$0xff] }
0x188f   :  { %8783 = vmatprep.subr.bf16.mxu1 %v8782_v62  ;;  %v4632_v59 = vmul.f32 %v7013_v54, %v4622_v14  ;;  %8805 = vmatpush3.bf16.msra.mxu0 %v8802_v37  ;;  %v14450_v14 = vld [vmem:[#allocation36_spill] sm:$0xff]  ;;  %v14465_v37 = vld [vmem:[#allocation35_spill] sm:$0xff] }
0x1890   :  { %v4631_v28 = vmul.f32 %v7013_v54, %v4621_v11  ;;  %8823 = vmatprep.subr.bf16.mxu0 %v14436_v50  ;;  %v14466_v50 = vld [vmem:[#allocation51_spill] sm:$0xff] }
0x1891   :  { %v4642_v42 = vadd.f32 %v7014_v25, %v4632_v59  ;;  %v14452_v59 = vld [vmem:[#allocation37_spill] sm:$0xff] }
0x1892   :  { %v4641_v55 = vadd.f32 %v7014_v25, %v4631_v28  ;;  %8785 = vmatpush3.bf16.msra.mxu1 %v8782_v62 }
0x1893   :  { %8787 = vmatprep.subr.bf16.mxu1 %v8786_v9 }
0x1894   :  { %7042 = vmatmul.mubr.msk.f32.gmra.mrb[96].mxu1 %vm271_vm0, %v4641_v55 }
0x1895   :  { %4780 = vmatprep.mubr.f32.mxu1 %v14418_v0 }
0x1896   :  { %8789 = vmatpush3.bf16.msra.mxu1 %v8786_v9 }
0x1897   :  { %8807 = vmatprep.subr.bf16.mxu1 %v14427_v20  ;;  %v14453_v20 = vld [vmem:[#allocation21_spill] sm:$0xff] }
0x1898   :  { %7043 = vmatmul.mubr.msk.f32.gmra.mrb[98].mxu1 %vm271_vm0, %v4642_v42 }
0x1899   :  { %8040 = vmatprep.mubr.msk.f32.mxu1 %vm271_vm0, %v4639_v45 }
0x189c   :  { %8041 = vmatmul.mubr.msk.f32.vlgmr.msra.gmra.mrb[100].mxu1 %vm271_vm0, %v4640_v29  ;;  %v4682_v29 = vrot.slane %v7039_v16, %v14447_v21  ;;  %v14467_v16 = vld [vmem:[#allocation38_spill] sm:$0xff]  ;;  %v14487_v21 = vld [vmem:[#allocation56_spill] sm:$0xff] }
0x189d   :  { %8043 = vmatprep.mubr.msk.f32.mxu1 %vm271_vm0, %v4641_v55  ;;  %8809 = vmatpush1.bf16.msra.mxu1 %v14428_v63  ;;  %v14451_v55 = vld [vmem:[#allocation19_spill] sm:$0xff]  ;;  %v14454_v63 = vld [vmem:[#allocation40_spill] sm:$0xff] }
0x189e   :  { %8811 = vmatprep.subr.bf16.mxu1 %v14429_v13  ;;  %v14455_v13 = vld [vmem:[#allocation24_spill] sm:$0xff] }
0x18a0   :  { %8044 = vmatmul.mubr.msk.f32.gmra.mrb[102].mxu1 %vm271_vm0, %v4642_v42 }
0x18a1   :  { %8813 = vmatpush1.bf16.msra.mxu1 %v14430_v18  ;;  %5158 = vmatprep.mubr.f32.mxu1 %v14418_v0 }
0x18a2   :  { %8815 = vmatprep.subr.bf16.mxu1 %v14431_v24  ;;  %v14456_v24 = vld [vmem:[#allocation41_spill] sm:$0xff] }
0x18a5   :  { %8817 = vmatpush1.bf16.msra.mxu1 %v14432_v7  ;;  %v14457_v7 = vld [vmem:[#allocation26_spill] sm:$0xff] }
0x18a6   :  { %8819 = vmatprep.subr.bf16.mxu1 %v14433_v58  ;;  %v14458_v58 = vld [vmem:[#allocation44_spill] sm:$0xff] }
0x18a9   :  { %8821 = vmatpush1.bf16.msra.mxu1 %v14434_v10  ;;  %v14459_v10 = vld [vmem:[#allocation29_spill] sm:$0xff] }
0x18aa   :  { %8839 = vmatprep.subr.bf16.mxu1 %v14435_v57 }
0x195c   :  { %v4764_v43 = vpop.f32.mrb[92].mxu1 }
0x195d   :  { %v12894_v53 = vadd.f32 %v4764_v43, %v4674_v40  ;;  %v4766_v60 = vpop.f32.mrb[93].mxu1  ;;  %v14472_v43 = vld [vmem:[#allocation47_spill] sm:$0xff] }
0x195e   :  { %v12896_v33 = vadd.f32 %v4766_v60, %v4678_v61  ;;  %v14473_v60 = vld [vmem:[#allocation50_spill] sm:$0xff] }
0x195f   :  { %5018 = vrot.lane.b32.xlu0 %v12894_v53, %s14255_s25 }
0x1960   :  { %14439 = vst [vmem:[#allocation67_spill] sm:$0xff] %v12896_v33  ;;  %v4872_v46 = vmax.f32 %v12896_v33, 0.0  ;;  %v4770_v41 = vpop.f32.mrb[94].mxu1 }
0x1961   :  { %v12901_v35 = vadd.f32 %v4770_v41, %v4674_v40  ;;  %v4772_v51 = vpop.f32.mrb[95].mxu1  ;;  %v14475_v41 = vld [vmem:[#allocation84_spill] sm:$0xff] }
0x1962   :  { %v12903_v30 = vadd.f32 %v4772_v51, %v4678_v61  ;;  %8062 = vmatprep.mubr.msk.f32.mxu0 %vm271_vm0, %v4872_v46  ;;  %v14474_v46 = vld [vmem:[#allocation83_spill] sm:$0xff]  ;;  %v14476_v51 = vld [vmem:[#allocation85_spill] sm:$0xff] }
0x1963   :  { %5020 = vrot.lane.b32.xlu1 %v12901_v35, %s14255_s25 }
0x1964   :  { %14440 = vst [vmem:[#allocation71_spill] sm:$0xff] %v12903_v30  ;;  %v4873_v36 = vmax.f32 %v12903_v30, 0.0  ;;  %v9596_v30 = vld [vmem:[%s14209_s3 + $0xa8] sm:$0xff] }
0x1966   :  { %8063 = vmatmul.mubr.msk.f32.vlgmr.msra.gmra.mrb[108].mxu0 %vm271_vm0, %v4873_v36  ;;  %v14477_v36 = vld [vmem:[#allocation86_spill] sm:$0xff] }
0x1967   :  { %8825 = vmatpush1.bf16.msra.mxu0 %v14441_v49  ;;  %v4776_v3 = vpop.f32.mrb[96].mxu1  ;;  %v14478_v49 = vld [vmem:[#allocation87_spill] sm:$0xff] }
0x1968   :  { %v12911_v54 = vadd.f32 %v4776_v3, %v4674_v40  ;;  %v4778_v23 = vpop.f32.mrb[97].mxu1  ;;  %8827 = vmatprep.subr.bf16.mxu0 %v14442_v1  ;;  %v14479_v3 = vld [vmem:[#allocation88_spill] sm:$0xff]  ;;  %v14481_v1 = vld [vmem:[#allocation90_spill] sm:$0xff] }
0x1969   :  { %v12914_v25 = vadd.f32 %v4778_v23, %v4678_v61  ;;  %v14480_v23 = vld [vmem:[#allocation89_spill] sm:$0xff] }
0x196a   :  { %5022 = vrot.lane.b32.xlu0 %v12911_v54, %s14255_s25 }
0x196b   :  { %14443 = vst [vmem:[#allocation72_spill] sm:$0xff] %v12914_v25  ;;  %v4874_v52 = vmax.f32 %v12914_v25, 0.0  ;;  %8829 = vmatpush1.bf16.msra.mxu0 %v14444_v22  ;;  %v4782_v6 = vpop.f32.mrb[98].mxu1  ;;  %v14483_v22 = vld [vmem:[#allocation54_spill] sm:$0xff] }
0x196c   :  { %v12920_v45 = vadd.f32 %v4782_v6, %v4674_v40  ;;  %v4784_v5 = vpop.f32.mrb[99].mxu1  ;;  %8831 = vmatprep.subr.bf16.mxu0 %v14445_v12  ;;  %v14469_v40 = vld [vmem:[#allocation42_spill] sm:$0xff]  ;;  %v14484_v6 = vld [vmem:[#allocation57_spill] sm:$0xff] }
0x196d   :  { %v12923_v39 = vadd.f32 %v4784_v5, %v4678_v61  ;;  %8065 = vmatprep.mubr.msk.f32.mxu0 %vm271_vm0, %v4874_v52  ;;  %v14471_v61 = vld [vmem:[#allocation46_spill] sm:$0xff]  ;;  %v14482_v52 = vld [vmem:[#allocation53_spill] sm:$0xff]  ;;  %v14485_v5 = vld [vmem:[#allocation55_spill] sm:$0xff] }
0x196e   :  { %v14486_v12 = vld [vmem:[#allocation58_spill] sm:$0xff] }
0x196f   :  { %14446 = vst [vmem:[#allocation68_spill] sm:$0xff] %v12923_v39  ;;  %v4875_v62 = vmax.f32 %v12923_v39, 0.0  ;;  %8833 = vmatpush1.bf16.msra.mxu0 %v14448_v34  ;;  %v8042_v47 = vpop.f32.mrb[100].mxu1  ;;  %v9585_v34 = vld [vmem:[%s14272_s0 + $0x8] sm:$0xff] }
0x1970   :  { %v4853_v31 = vpop.f32.mrb[101].mxu1  ;;  %8835 = vmatprep.subr.bf16.mxu0 %v14449_v15  ;;  %v4859_v42 = vadd.f32 %v8042_v47, %v4682_v29  ;;  %v7061_v47 = vld [vmem:[%s13945_s12 + $0x2] ss:$0 sm:$0xff] }
0x1971   :  { %v12930_v11 = vadd.f32 %v4853_v31, %v4682_v29  ;;  %8066 = vmatmul.mubr.msk.f32.gmra.mrb[110].mxu0 %vm271_vm0, %v4875_v62  ;;  %v14489_v62 = vld [vmem:[#allocation61_spill] sm:$0xff] }
0x1972   :  { %5247 = vmatprep.mubr.f32.mxu0 %v14418_v0 }
0x1973   :  { %8837 = vmatpush1.bf16.msra.mxu0 %v14450_v14  ;;  %v8045_v9 = vpop.f32.mrb[102].mxu1  ;;  %7066 = vmatmul.mubr.msk.f32.vlgmr.msra.gmra.mrb[104].mxu1 %vm271_vm0, %v12930_v11 }
0x1974   :  { %v4863_v28 = vpop.f32.mrb[103].mxu1  ;;  %8841 = vmatpush1.bf16.msra.mxu1 %v14451_v55  ;;  %8855 = vmatprep.subr.bf16.mxu0 %v14452_v59  ;;  %v4869_v57 = vadd.f32 %v8045_v9, %v4682_v29 }
0x1975   :  { %5164 = vmatprep.mubr.f32.mxu1 %v14418_v0  ;;  %8843 = vmatprep.subr.bf16.mxu1 %v14453_v20  ;;  %v4864_v18 = vadd.f32 %v4863_v28, %v4682_v29  ;;  %v14488_v29 = vld [vmem:[#allocation59_spill] sm:$0xff] }
0x1976   :  { %7070 = vmatmul.mubr.msk.f32.vlgmr.msra.gmra.mrb[112].mxu0 %vm271_vm0, %v12930_v11 }
0x1977   :  { %8857 = vmatpush1.bf16.msra.mxu0 %v14454_v63  ;;  %7067 = vmatmul.mubr.msk.f32.gmra.mrb[106].mxu1 %vm271_vm0, %v4859_v42 }
0x1978   :  { %5253 = vmatprep.mubr.f32.mxu0 %v14418_v0  ;;  %8845 = vmatpush1.bf16.msra.mxu1 %v14455_v13 }
0x1979   :  { %8859 = vmatprep.subr.bf16.mxu0 %v14456_v24  ;;  %5170 = vmatprep.mubr.f32.mxu1 %v14418_v0 }
0x197a   :  { %7071 = vmatmul.mubr.msk.f32.gmra.mrb[114].mxu0 %vm271_vm0, %v4859_v42  ;;  %8847 = vmatprep.subr.bf16.mxu1 %v14457_v7 }
0x197b   :  { %8861 = vmatpush1.bf16.msra.mxu0 %v14458_v58  ;;  %7068 = vmatmul.mubr.msk.f32.gmra.mrb[108].mxu1 %vm271_vm0, %v4864_v18 }
0x197c   :  { %5259 = vmatprep.mubr.f32.mxu0 %v14418_v0  ;;  %8849 = vmatpush1.bf16.msra.mxu1 %v14459_v10 }
0x197d   :  { %8863 = vmatprep.subr.bf16.mxu0 %v14460_v27  ;;  %5176 = vmatprep.mubr.f32.mxu1 %v14418_v0 }
0x197e   :  { %7072 = vmatmul.mubr.msk.f32.gmra.mrb[116].mxu0 %vm271_vm0, %v4864_v18  ;;  %8851 = vmatprep.subr.bf16.mxu1 %v14461_v26 }
0x197f   :  { %8865 = vmatpush1.bf16.msra.mxu0 %v14462_v8  ;;  %7069 = vmatmul.mubr.msk.f32.gmra.mrb[110].mxu1 %vm271_vm0, %v4869_v57 }
0x1980   :  { %5265 = vmatprep.mubr.f32.mxu0 %v14418_v0  ;;  %8853 = vmatpush1.bf16.msra.mxu1 %v14463_v32 }
0x1981   :  { %8867 = vmatprep.subr.bf16.mxu0 %v14464_v19  ;;  %5336 = vmatprep.mubr.f32.mxu1 %v14418_v0 }
0x1982   :  { %7073 = vmatmul.mubr.msk.f32.gmra.mrb[118].mxu0 %vm271_vm0, %v4869_v57  ;;  %8871 = vmatprep.subr.bf16.mxu1 %v14465_v37 }
0x1983   :  { %8869 = vmatpush1.bf16.msra.mxu0 %v14466_v50  ;;  %7074 = vmatmul.mubr.msk.f32.vlgmr.msra.gmra.mrb[112].mxu1 %vm271_vm0, %v12930_v11 }
0x1984   :  { %5425 = vmatprep.mubr.f32.mxu0 %v14418_v0  ;;  %8873 = vmatpush1.bf16.msra.mxu1 %v14467_v16 }
0x1985   :  { %5342 = vmatprep.mubr.f32.mxu1 %v14418_v0  ;;  %8875 = vmatprep.subr.bf16.mxu1 %v14468_v4 }
0x1986   :  { %7078 = vmatmul.mubr.msk.f32.vlgmr.msra.gmra.mrb[120].mxu0 %vm271_vm0, %v12930_v11 }
0x1987   :  { %7075 = vmatmul.mubr.msk.f32.gmra.mrb[114].mxu1 %vm271_vm0, %v4859_v42  ;;  %5431 = vmatprep.mubr.f32.mxu0 %v14418_v0 }
0x1988   :  { %8877 = vmatpush1.bf16.msra.mxu1 %v14469_v40  ;;  %5348 = vmatprep.mubr.f32.mxu1 %v14418_v0 }
0x1989   :  { %8879 = vmatprep.subr.bf16.mxu1 %v14470_v2 }
0x198a   :  { %7079 = vmatmul.mubr.msk.f32.gmra.mrb[122].mxu0 %vm271_vm0, %v4859_v42 }
0x198b   :  { %7076 = vmatmul.mubr.msk.f32.gmra.mrb[116].mxu1 %vm271_vm0, %v4864_v18  ;;  %5437 = vmatprep.mubr.f32.mxu0 %v14418_v0 }
0x198c   :  { %8881 = vmatpush1.bf16.msra.mxu1 %v14471_v61  ;;  %5354 = vmatprep.mubr.f32.mxu1 %v14418_v0 }
0x198d   :  { %8883 = vmatprep.subr.bf16.mxu1 %v14472_v43 }
0x198e   :  { %7080 = vmatmul.mubr.msk.f32.gmra.mrb[124].mxu0 %vm271_vm0, %v4864_v18 }
0x198f   :  { %7077 = vmatmul.mubr.msk.f32.gmra.mrb[118].mxu1 %vm271_vm0, %v4869_v57  ;;  %5443 = vmatprep.mubr.f32.mxu0 %v14418_v0 }
0x1990   :  { %8885 = vmatpush1.bf16.msra.mxu1 %v14473_v60  ;;  %5514 = vmatprep.mubr.f32.mxu1 %v14418_v0 }
0x1991   :  { %8935 = vmatprep.subr.bf16.mxu1 %v14474_v46 }
0x1992   :  { %7081 = vmatmul.mubr.msk.f32.gmra.mrb[126].mxu0 %vm271_vm0, %v4869_v57 }
0x1993   :  { %7632 = vmatprep.mubr.msk.f32.mxu0 %vm271_vm0, %v12894_v53  ;;  %7082 = vmatmul.mubr.msk.f32.vlgmr.msra.gmra.mrb[120].mxu1 %vm271_vm0, %v12930_v11 }
0x1994   :  { %5520 = vmatprep.mubr.f32.mxu1 %v14418_v0  ;;  %8937 = vmatpush3.bf16.msra.mxu1 %v14475_v41 }
0x1995   :  { %8939 = vmatprep.subr.bf16.mxu1 %v14476_v51 }
0x1997   :  { %7083 = vmatmul.mubr.msk.f32.gmra.mrb[122].mxu1 %vm271_vm0, %v4859_v42 }
0x1998   :  { %5526 = vmatprep.mubr.f32.mxu1 %v14418_v0  ;;  %8941 = vmatpush3.bf16.msra.mxu1 %v14477_v36 }
0x1999   :  { %8943 = vmatprep.subr.bf16.mxu1 %v14478_v49 }
0x199b   :  { %7084 = vmatmul.mubr.msk.f32.gmra.mrb[124].mxu1 %vm271_vm0, %v4864_v18 }
0x199c   :  { %5532 = vmatprep.mubr.f32.mxu1 %v14418_v0  ;;  %8945 = vmatpush3.bf16.msra.mxu1 %v14479_v3 }
0x199d   :  { %8947 = vmatprep.subr.bf16.mxu1 %v14480_v23 }
0x199f   :  { %7085 = vmatmul.mubr.msk.f32.gmra.mrb[126].mxu1 %vm271_vm0, %v4869_v57 }
0x19a0   :  { %8949 = vmatpush3.bf16.msra.mxu1 %v14481_v1 }
0x19a1   :  { %8951 = vmatprep.subr.bf16.mxu1 %v14482_v52 }
0x19a4   :  { %8953 = vmatpush3.bf16.msra.mxu1 %v14483_v22 }
0x19a5   :  { %8955 = vmatprep.subr.bf16.mxu1 %v14484_v6 }
0x19a8   :  { %8957 = vmatpush3.bf16.msra.mxu1 %v14485_v5 }
0x19a9   :  { %8959 = vmatprep.subr.bf16.mxu1 %v14486_v12 }
0x19ac   :  { %8961 = vmatpush3.bf16.msra.mxu1 %v14487_v21 }
0x19ad   :  { %8963 = vmatprep.subr.bf16.mxu1 %v14488_v29 }
0x19b0   :  { %8965 = vmatpush3.bf16.msra.mxu1 %v14489_v62 }
0x19b1   :  { %5957 = vmatprep.subr.mxu1 %v9585_v34 }
0x19d5   :  { %v5021_v34 = vpop.permute.xlu1 %5020 }
0x1a39   :  { %v8064_v31 = vpop.f32.mrb[108].mxu0 }
0x1a3a   :  { %v5001_v15 = vadd.f32 %v8064_v31, %v7061_v47  ;;  %v4995_v11 = vpop.f32.mrb[109].mxu0 }
0x1a3b   :  { %v4996_v14 = vadd.f32 %v7061_v47, %v4995_v11 }
0x1a3c   :  { %5036 = vrot.lane.b32.xlu1 %v5001_v15, %s14255_s25  ;;  %v5019_v15 = vpop.permute.xlu0 %5018 }
0x1a40   :  { %5034 = vrot.lane.b32.xlu1 %v4996_v14, %s14255_s25 }
0x1a44   :  { %5024 = vrot.lane.b32.xlu1 %v12920_v45, %s14255_s25  ;;  %v8067_v9 = vpop.f32.mrb[110].mxu0 }
0x1a45   :  { %v5011_v28 = vadd.f32 %v8067_v9, %v7061_v47  ;;  %v5005_v55 = vpop.f32.mrb[111].mxu0  ;;  %v9586_v9 = vld [vmem:[%s14209_s3 + $0x88] sm:$0xff] }
0x1a46   :  { %v5006_v59 = vadd.f32 %v7061_v47, %v5005_v55  ;;  %v13029_v42 = vpop.f32.mrb[104].mxu1  ;;  %v9587_v55 = vld [vmem:[%s14209_s3 + $0x8] sm:$0xff] }
0x1a47   :  { %v13031_v20 = vpop.f32.mrb[105].mxu1 }
0x1a48   :  { %5040 = vrot.lane.b32.xlu1 %v5011_v28, %s14255_s25  ;;  %5038 = vrot.lane.b32.xlu0 %v5006_v59, %s14255_s25 }
0x1a49   :  { %v13035_v63 = vpop.f32.mrb[112].mxu0 }
0x1a4a   :  { %v13037_v13 = vpop.f32.mrb[113].mxu0  ;;  %v13039_v18 = vpop.f32.mrb[106].mxu1 }
0x1a4b   :  { %v13041_v24 = vpop.f32.mrb[107].mxu1 }
0x1a4d   :  { %v13043_v7 = vpop.f32.mrb[114].mxu0 }
0x1a4e   :  { %v13045_v58 = vpop.f32.mrb[115].mxu0  ;;  %v13047_v10 = vpop.f32.mrb[108].mxu1 }
0x1a4f   :  { %v13049_v57 = vpop.f32.mrb[109].mxu1 }
0x1a51   :  { %v13051_v27 = vpop.f32.mrb[116].mxu0 }
0x1a52   :  { %v13053_v26 = vpop.f32.mrb[117].mxu0  ;;  %v13055_v8 = vpop.f32.mrb[110].mxu1 }
0x1a53   :  { %v13057_v32 = vpop.f32.mrb[111].mxu1 }
0x1a55   :  { %v13059_v19 = vpop.f32.mrb[118].mxu0 }
0x1a56   :  { %v13061_v37 = vpop.f32.mrb[119].mxu0  ;;  %v13063_v50 = vpop.f32.mrb[112].mxu1 }
0x1a57   :  { %v13065_v16 = vpop.f32.mrb[113].mxu1 }
0x1a59   :  { %v13067_v4 = vpop.f32.mrb[120].mxu0 }
0x1a5a   :  { %v13069_v40 = vpop.f32.mrb[121].mxu0  ;;  %v13071_v2 = vpop.f32.mrb[114].mxu1 }
0x1a5b   :  { %v13073_v61 = vpop.f32.mrb[115].mxu1 }
0x1a5d   :  { %v13075_v43 = vpop.f32.mrb[122].mxu0 }
0x1a5e   :  { %v13077_v60 = vpop.f32.mrb[123].mxu0  ;;  %v13079_v46 = vpop.f32.mrb[116].mxu1 }
0x1a5f   :  { %v13081_v41 = vpop.f32.mrb[117].mxu1 }
0x1a60   :  { %14490 = vst [vmem:[#allocation74_spill] sm:$0xff] %v13081_v41 }
0x1a61   :  { %v13083_v51 = vpop.f32.mrb[124].mxu0 }
0x1a62   :  { %14491 = vst [vmem:[#allocation73_spill] sm:$0xff] %v13083_v51  ;;  %v13085_v36 = vpop.f32.mrb[125].mxu0  ;;  %v13087_v49 = vpop.f32.mrb[118].mxu1 }
0x1a63   :  { %14492 = vst [vmem:[#allocation77_spill] sm:$0xff] %v13085_v36  ;;  %14493 = vst [vmem:[#allocation76_spill] sm:$0xff] %v13087_v49  ;;  %v13089_v3 = vpop.f32.mrb[119].mxu1 }
0x1a64   :  { %14494 = vst [vmem:[#allocation20_spill] sm:$0xff] %v13089_v3 }
0x1a65   :  { %v13091_v23 = vpop.f32.mrb[126].mxu0 }
0x1a66   :  { %14495 = vst [vmem:[#allocation30_spill] sm:$0xff] %v13091_v23  ;;  %v13093_v1 = vpop.f32.mrb[127].mxu0  ;;  %v13095_v52 = vpop.f32.mrb[120].mxu1 }
0x1a67   :  { %14496 = vst [vmem:[#allocation82_spill] sm:$0xff] %v13093_v1  ;;  %14497 = vst [vmem:[#allocation79_spill] sm:$0xff] %v13095_v52  ;;  %v13097_v22 = vpop.f32.mrb[121].mxu1  ;;  %v9599_v1 = vld [vmem:[%s14209_s3 + $0x48] sm:$0xff] }
0x1a68   :  { %14498 = vst [vmem:[#allocation80_spill] sm:$0xff] %v13097_v22 }
0x1a6a   :  { %v13099_v6 = vpop.f32.mrb[122].mxu1 }
0x1a6b   :  { %14499 = vst [vmem:[#allocation91_spill] sm:$0xff] %v13099_v6  ;;  %v13101_v5 = vpop.f32.mrb[123].mxu1 }
0x1a6c   :  { %14500 = vst [vmem:[#allocation63_spill] sm:$0xff] %v13101_v5  ;;  %v9611_v5 = vld [vmem:[%s14209_s3 + $0xd8] sm:$0xff] }
0x1a6e   :  { %v13103_v12 = vpop.f32.mrb[124].mxu1 }
0x1a6f   :  { %14501 = vst [vmem:[#allocation69_spill] sm:$0xff] %v13103_v12  ;;  %v13105_v21 = vpop.f32.mrb[125].mxu1 }
0x1a70   :  { %14502 = vst [vmem:[#allocation52_spill] sm:$0xff] %v13105_v21 }
0x1a72   :  { %v13107_v29 = vpop.f32.mrb[126].mxu1 }
0x1a73   :  { %14503 = vst [vmem:[#allocation64_spill] sm:$0xff] %v13107_v29  ;;  %v13109_v62 = vpop.f32.mrb[127].mxu1 }
0x1a74   :  { %14504 = vst [vmem:[#allocation78_spill] sm:$0xff] %v13109_v62  ;;  %v9597_v62 = vld [vmem:[%s14209_s3 + $0x28] sm:$0xff] }
0x1aae   :  { %v5037_v47 = vpop.permute.xlu1 %5036 }
0x1aaf   :  { %v5047_v31 = vsel %vm271_vm0, %v5021_v34, %v5037_v47  ;;  %v9588_v34 = vld [vmem:[%s14209_s3 + $0x80] sm:$0xff] }
0x1ab0   :  { %v13116_v28 = vmul.f32 %v9586_v9, %v5047_v31  ;;  %v13121_v59 = vmul.f32 %v9587_v55, %v5047_v31  ;;  %v9590_v9 = vld [vmem:[%s14209_s3 + $0xa0] sm:$0xff]  ;;  %v13185_v23 = vmul.f32 %v9599_v1, %v5047_v31  ;;  %v9604_v1 = vld [vmem:[%s14209_s3 + $0x10] sm:$0xff] }
0x1ab1   :  { %v9591_v55 = vld [vmem:[%s14209_s3 + $0x20] sm:$0xff] }
0x1ab2   :  { %v5035_v11 = vpop.permute.xlu1 %5034  ;;  %14505 = vst [vmem:[#allocation81_spill] sm:$0xff] %v13116_v28  ;;  %14506 = vst [vmem:[#allocation93_spill] sm:$0xff] %v13121_v59 }
0x1ab3   :  { %v5046_v14 = vsel %vm271_vm0, %v5019_v15, %v5035_v11  ;;  %v9589_v15 = vld [vmem:[%s14209_s3] sm:$0xff] }
0x1ab4   :  { %v13126_v47 = vmul.f32 %v9588_v34, %v5046_v14  ;;  %v13131_v11 = vmul.f32 %v9589_v15, %v5046_v14  ;;  %v13136_v48 = vmul.f32 %v9590_v9, %v5046_v14  ;;  %v13141_v44 = vmul.f32 %v9591_v55, %v5046_v14  ;;  %v9592_v34 = vld [vmem:[%s14209_s3 + $0xc0] sm:$0xff] }
0x1ab5   :  { %v13146_v17 = vmul.f32 %v9592_v34, %v5046_v14  ;;  %v9593_v15 = vld [vmem:[%s14209_s3 + $0x40] sm:$0xff]  ;;  %v5023_v34 = vpop.permute.xlu0 %5022 }
0x1ab6   :  { %14507 = vst [vmem:[#allocation92_spill] sm:$0xff] %v13126_v47  ;;  %14508 = vst [vmem:[#allocation62_spill] sm:$0xff] %v13131_v11  ;;  %v13151_v56 = vmul.f32 %v9593_v15, %v5046_v14  ;;  %v9594_v9 = vld [vmem:[%s14209_s3 + $0xe0] sm:$0xff]  ;;  %v5025_v33 = vpop.permute.xlu1 %5024  ;;  %v8886_v39 = vpack.c.bf16 %v13116_v28, %v13126_v47  ;;  %v8889_v15 = vpack.c.bf16 %v13121_v59, %v13131_v11 }
0x1ab7   :  { %14509 = vst [vmem:[#allocation60_spill] sm:$0xff] %v13136_v48  ;;  %v13156_v0 = vmul.f32 %v9594_v9, %v5046_v14  ;;  %v9595_v55 = vld [vmem:[%s14209_s3 + $0x60] sm:$0xff]  ;;  %v13170_v9 = vmul.f32 %v9596_v30, %v5047_v31  ;;  %v9600_v30 = vld [vmem:[%s14209_s3 + $0xe8] sm:$0xff] }
0x1ab8   :  { %v13161_v25 = vmul.f32 %v9595_v55, %v5046_v14  ;;  %v13175_v14 = vmul.f32 %v9597_v62, %v5047_v31  ;;  %v9598_v55 = vld [vmem:[%s14209_s3 + $0xc8] sm:$0xff]  ;;  %v13190_v21 = vmul.f32 %v9600_v30, %v5047_v31  ;;  %8888 = vmatprep.subr.msk.bf16.mxu0 %vm10591_vm1, %v8886_v39  ;;  %v9603_v39 = vld [vmem:[%s14209_s3 + $0x98] sm:$0xff] }
0x1ab9   :  { %14510 = vst [vmem:[#allocation66_spill] sm:$0xff] %v13170_v9  ;;  %v13180_v29 = vmul.f32 %v9598_v55, %v5047_v31  ;;  %v9601_v62 = vld [vmem:[%s14209_s3 + $0x68] sm:$0xff]  ;;  %8891 = vmatpush3.bf16.xpose.msk.msra.mxu0 %vm10591_vm1, %v8889_v15  ;;  %v9602_v15 = vld [vmem:[%s14209_s3 + $0x90] sm:$0xff] }
0x1aba   :  { %v13195_v12 = vmul.f32 %v9601_v62, %v5047_v31  ;;  %v5041_v55 = vpop.permute.xlu1 %5040  ;;  %v5039_v3 = vpop.permute.xlu0 %5038 }
0x1abb   :  { %v5049_v47 = vsel %vm271_vm0, %v5025_v33, %v5041_v55  ;;  %v5048_v30 = vsel %vm271_vm0, %v5023_v34, %v5039_v3  ;;  %v9605_v33 = vld [vmem:[%s14209_s3 + $0x18] sm:$0xff]  ;;  %v9606_v34 = vld [vmem:[%s14209_s3 + $0xb0] sm:$0xff] }
0x1abc   :  { %v13222_v31 = vmul.f32 %v9602_v15, %v5048_v30  ;;  %v13227_v62 = vmul.f32 %v9603_v39, %v5049_v47  ;;  %v13232_v28 = vmul.f32 %v9604_v1, %v5048_v30  ;;  %v13237_v3 = vmul.f32 %v9605_v33, %v5049_v47  ;;  %v9607_v39 = vld [vmem:[%s14209_s3 + $0xb8] sm:$0xff]  ;;  %v9608_v33 = vld [vmem:[%s14209_s3 + $0x30] sm:$0xff] }
0x1abd   :  { %v13242_v55 = vmul.f32 %v9606_v34, %v5048_v30  ;;  %v13247_v15 = vmul.f32 %v9607_v39, %v5049_v47  ;;  %v13256_v59 = vmul.f32 %v9608_v33, %v5048_v30  ;;  %v9609_v34 = vld [vmem:[%s14209_s3 + $0x38] sm:$0xff]  ;;  %v9610_v39 = vld [vmem:[%s14209_s3 + $0xd0] sm:$0xff]  ;;  %v13271_v6 = vmul.f32 %v9611_v5, %v5049_v47 }
0x1abe   :  { %v8892_v1 = vpack.c.bf16 %v13227_v62, %v13222_v31  ;;  %v8895_v11 = vpack.c.bf16 %v13237_v3, %v13232_v28  ;;  %v13261_v49 = vmul.f32 %v9609_v34, %v5049_v47  ;;  %v13266_v36 = vmul.f32 %v9610_v39, %v5048_v30  ;;  %v9612_v33 = vld [vmem:[%s14209_s3 + $0x50] sm:$0xff]  ;;  %v9613_v34 = vld [vmem:[%s14209_s3 + $0x58] sm:$0xff] }
0x1abf   :  { %v13276_v51 = vmul.f32 %v9612_v33, %v5048_v30  ;;  %v13281_v22 = vmul.f32 %v9613_v34, %v5049_v47  ;;  %v8898_v39 = vpack.c.bf16 %v13170_v9, %v13136_v48  ;;  %v9614_v5 = vld [vmem:[%s14209_s3 + $0xf0] sm:$0xff]  ;;  %v9615_v33 = vld [vmem:[%s14209_s3 + $0xf8] sm:$0xff]  ;;  %v9237_v9 = vpack.i.bf16 %v13227_v62, %v13222_v31 }
0x1ac0   :  { %8894 = vmatprep.subr.msk.bf16.mxu0 %vm10591_vm1, %v8892_v1  ;;  %v13290_v52 = vmul.f32 %v9614_v5, %v5048_v30  ;;  %v13295_v41 = vmul.f32 %v9615_v33, %v5049_v47  ;;  %v9616_v34 = vld [vmem:[%s14209_s3 + $0x70] sm:$0xff]  ;;  %v9617_v5 = vld [vmem:[%s14209_s3 + $0x78] sm:$0xff]  ;;  %v8913_v33 = vpack.c.bf16 %v13185_v23, %v13151_v56 }
0x1ac1   :  { %v13300_v1 = vmul.f32 %v9616_v34, %v5048_v30  ;;  %8897 = vmatpush3.bf16.xpose.msk.msra.mxu0 %vm10591_vm1, %v8895_v11  ;;  %v13307_v48 = vmul.f32 %v9617_v5, %v5049_v47  ;;  %v8904_v30 = vpack.c.bf16 %v13247_v15, %v13242_v55  ;;  %v8907_v47 = vpack.c.bf16 %v13261_v49, %v13256_v59  ;;  %v9640_v34 = vld [vmem:[%s14234_s21 + $0x10] sm:$0xff]  ;;  %v14536_v62 = vld [vmem:[#allocation92_spill] sm:$0xff] }
0x1ac2   :  { %8900 = vmatprep.subr.msk.bf16.mxu0 %vm10591_vm1, %v8898_v39  ;;  %v8901_v39 = vpack.c.bf16 %v13175_v14, %v13141_v44  ;;  %v8910_v5 = vpack.c.bf16 %v13180_v29, %v13146_v17 }
0x1ac9   :  { %8903 = vmatpush3.bf16.xpose.msk.msra.mxu0 %vm10591_vm1, %v8901_v39  ;;  %v8916_v39 = vpack.c.bf16 %v13271_v6, %v13266_v36 }
0x1aca   :  { %8906 = vmatprep.subr.msk.bf16.mxu0 %vm10591_vm1, %v8904_v30  ;;  %v8919_v30 = vpack.c.bf16 %v13281_v22, %v13276_v51 }
0x1ad1   :  { %8909 = vmatpush3.bf16.xpose.msk.msra.mxu0 %vm10591_vm1, %v8907_v47  ;;  %v8922_v47 = vpack.c.bf16 %v13190_v21, %v13156_v0 }
0x1ad2   :  { %8912 = vmatprep.subr.msk.bf16.mxu0 %vm10591_vm1, %v8910_v5  ;;  %v8925_v5 = vpack.c.bf16 %v13195_v12, %v13161_v25 }
0x1ad9   :  { %8915 = vmatpush3.bf16.xpose.msk.msra.mxu0 %vm10591_vm1, %v8913_v33  ;;  %v8928_v33 = vpack.c.bf16 %v13295_v41, %v13290_v52 }
0x1ada   :  { %8918 = vmatprep.subr.msk.bf16.mxu0 %vm10591_vm1, %v8916_v39  ;;  %v8931_v39 = vpack.c.bf16 %v13307_v48, %v13300_v1 }
0x1ae1   :  { %8921 = vmatpush3.bf16.xpose.msk.msra.mxu0 %vm10591_vm1, %v8919_v30 }
0x1ae2   :  { %8924 = vmatprep.subr.msk.bf16.mxu0 %vm10591_vm1, %v8922_v47 }
0x1ae9   :  { %8927 = vmatpush3.bf16.xpose.msk.msra.mxu0 %vm10591_vm1, %v8925_v5 }
0x1aea   :  { %8930 = vmatprep.subr.msk.bf16.mxu0 %vm10591_vm1, %v8928_v33 }
0x1af1   :  { %8933 = vmatpush3.bf16.xpose.msk.msra.mxu0 %vm10591_vm1, %v8931_v39 }
0x1af8   :  { %7633 = vmatmul.mubr.msk.f32.vlgmr.msra.gmra.mrb[128].mxu0 %vm271_vm0, %v12894_v53  ;;  %v5539_v53 = vmul.f32 %v9618_v38, %v13029_v42  ;;  %v9622_v42 = vld [vmem:[%s14233_s1 + $0x50] sm:$0xff] }
0x1af9   :  { %7634 = vmatprep.mubr.msk.f32.mxu0 %vm271_vm0, %v12901_v35  ;;  %v5549_v33 = vmul.f32 %v9622_v42, %v13039_v18  ;;  %v9626_v18 = vld [vmem:[%s14233_s1 + $0xa0] sm:$0xff] }
0x1afc   :  { %7635 = vmatmul.mubr.msk.f32.gmra.mrb[130].mxu0 %vm271_vm0, %v12901_v35  ;;  %v9619_v35 = vld [vmem:[%s14233_s1 + $0x8] sm:$0xff] }
0x1afd   :  { %7636 = vmatprep.mubr.msk.f32.mxu0 %vm271_vm0, %v12911_v54  ;;  %v5540_v30 = vmul.f32 %v9619_v35, %v13031_v20  ;;  %v9623_v20 = vld [vmem:[%s14233_s1 + $0x58] sm:$0xff] }
0x1afe   :  { %v5550_v39 = vmul.f32 %v9623_v20, %v13041_v24  ;;  %v13423_v24 = vmul.f32 %v9626_v18, %v13047_v10  ;;  %v9628_v20 = vld [vmem:[%s14233_s1 + $0xa8] sm:$0xff] }
0x1aff   :  { %v9631_v18 = vld [vmem:[%s14234_s21 + $0x8] sm:$0xff] }
0x1b00   :  { %7637 = vmatmul.mubr.msk.f32.gmra.mrb[132].mxu0 %vm271_vm0, %v12911_v54  ;;  %v9620_v54 = vld [vmem:[%s14233_s1 + $0x10] sm:$0xff] }
0x1b01   :  { %7638 = vmatprep.mubr.msk.f32.mxu0 %vm271_vm0, %v12920_v45  ;;  %v5541_v47 = vmul.f32 %v9620_v54, %v13035_v63  ;;  %v9624_v63 = vld [vmem:[%s14233_s1 + $0x60] sm:$0xff] }
0x1b02   :  { %v5551_v35 = vmul.f32 %v9624_v63, %v13043_v7  ;;  %v9629_v63 = vld [vmem:[%s14233_s1 + $0xb0] sm:$0xff] }
0x1b03   :  { %v13438_v10 = vmul.f32 %v9629_v63, %v13051_v27  ;;  %v9633_v27 = vld [vmem:[%s14233_s1 + $0xf8] sm:$0xff] }
0x1b04   :  { %7639 = vmatmul.mubr.msk.f32.gmra.mrb[134].mxu0 %vm271_vm0, %v12920_v45  ;;  %v9621_v45 = vld [vmem:[%s14233_s1 + $0x18] sm:$0xff]  ;;  %v13459_v63 = vmul.f32 %v9633_v27, %v13057_v32  ;;  %v9636_v32 = vld [vmem:[%s14233_s1 + $0x20] sm:$0xff]  ;;  %v9637_v27 = vld [vmem:[%s14233_s1 + $0x28] sm:$0xff] }
0x1b05   :  { %v5542_v5 = vmul.f32 %v9621_v45, %v13037_v13  ;;  %v9625_v13 = vld [vmem:[%s14233_s1 + $0x68] sm:$0xff]  ;;  %v9627_v45 = vld [vmem:[%s14234_s21] sm:$0xff] }
0x1b06   :  { %v13417_v54 = vmul.f32 %v9625_v13, %v13045_v58  ;;  %v13432_v58 = vmul.f32 %v9628_v20, %v13049_v57  ;;  %v9630_v13 = vld [vmem:[%s14233_s1 + $0xb8] sm:$0xff] }
0x1bcb   :  { %v5749_v38 = vpop.f32.mrb[128].mxu0 }
0x1bcc   :  { %v5750_v42 = vadd.f32 %v9627_v45, %v5749_v38  ;;  %v5751_v7 = vpop.f32.mrb[129].mxu0  ;;  %v13444_v38 = vmul.f32 %v9630_v13, %v13053_v26  ;;  %v9632_v45 = vld [vmem:[%s14233_s1 + $0xf0] sm:$0xff]  ;;  %v9634_v26 = vld [vmem:[%s14233_s1 + $0x100] sm:$0xff] }
0x1bcd   :  { %v5752_v57 = vadd.f32 %v9631_v18, %v5751_v7  ;;  %v13453_v20 = vmul.f32 %v9632_v45, %v13055_v8  ;;  %v13465_v7 = vmul.f32 %v9634_v26, %v13059_v19  ;;  %v9635_v8 = vld [vmem:[%s14233_s1 + $0x108] sm:$0xff]  ;;  %v5543_v45 = vmul.f32 %v9636_v32, %v13063_v50  ;;  %v9638_v26 = vld [vmem:[%s14233_s1 + $0x30] sm:$0xff] }
0x1bce   :  { %v5772_v13 = vadd.f32 %v5750_v42, %v5539_v53  ;;  %v13471_v18 = vmul.f32 %v9635_v8, %v13061_v37  ;;  %v5544_v19 = vmul.f32 %v9637_v27, %v13065_v16  ;;  %v5545_v37 = vmul.f32 %v9638_v26, %v13067_v4  ;;  %v9639_v8 = vld [vmem:[%s14233_s1 + $0x38] sm:$0xff] }
0x1bcf   :  { %v5773_v53 = vadd.f32 %v5752_v57, %v5540_v30  ;;  %v5755_v42 = vpop.f32.mrb[130].mxu0  ;;  %v5546_v50 = vmul.f32 %v9639_v8, %v13069_v40  ;;  %v9641_v57 = vld [vmem:[%s14233_s1 + $0x70] sm:$0xff]  ;;  %v9642_v4 = vld [vmem:[%s14233_s1 + $0x78] sm:$0xff] }
0x1bd0   :  { %v5780_v32 = vadd.f32 %v5772_v13, %v5541_v47  ;;  %v5756_v16 = vadd.f32 %v9640_v34, %v5755_v42  ;;  %v5757_v30 = vpop.f32.mrb[131].mxu0  ;;  %v5553_v27 = vmul.f32 %v9641_v57, %v13071_v2  ;;  %v5554_v26 = vmul.f32 %v9642_v4, %v13073_v61  ;;  %v9643_v47 = vld [vmem:[%s14234_s21 + $0x18] sm:$0xff]  ;;  %v9644_v34 = vld [vmem:[%s14233_s1 + $0x80] sm:$0xff]  ;;  %v9645_v2 = vld [vmem:[%s14233_s1 + $0x88] sm:$0xff] }
0x1bd1   :  { %v5781_v40 = vadd.f32 %v5773_v53, %v5542_v5  ;;  %v5758_v13 = vadd.f32 %v9643_v47, %v5757_v30  ;;  %v5555_v42 = vmul.f32 %v9644_v34, %v13075_v43  ;;  %v5556_v8 = vmul.f32 %v9645_v2, %v13077_v60  ;;  %v9646_v5 = vld [vmem:[%s14233_s1 + $0xc0] sm:$0xff]  ;;  %v9647_v30 = vld [vmem:[%s14233_s1 + $0xc8] sm:$0xff] }
0x1bd2   :  { %v5788_v57 = vadd.f32 %v5780_v32, %v5543_v45  ;;  %v5774_v61 = vadd.f32 %v5756_v16, %v5549_v33  ;;  %v5563_v53 = vmul.f32 %v9646_v5, %v13079_v46  ;;  %v14511_v4 = vld [vmem:[#allocation74_spill] sm:$0xff]  ;;  %v9648_v60 = vld [vmem:[%s14233_s1 + $0x40] sm:$0xff]  ;;  %v14512_v33 = vld [vmem:[#allocation79_spill] sm:$0xff] }
0x1bd3   :  { %v5564_v43 = vmul.f32 %v9647_v30, %v14511_v4  ;;  %v5789_v47 = vadd.f32 %v5781_v40, %v5544_v19  ;;  %v5775_v34 = vadd.f32 %v5758_v13, %v5550_v39  ;;  %v5761_v11 = vpop.f32.mrb[132].mxu0  ;;  %v5547_v45 = vmul.f32 %v9648_v60, %v14512_v33  ;;  %v9649_v46 = vld [vmem:[%s14234_s21 + $0x20] sm:$0xff]  ;;  %v9650_v19 = vld [vmem:[%s14233_s1 + $0x48] sm:$0xff]  ;;  %v14513_v39 = vld [vmem:[#allocation80_spill] sm:$0xff] }
0x1bd4   :  { %v5782_v32 = vadd.f32 %v5774_v61, %v5551_v35  ;;  %v5762_v16 = vadd.f32 %v9649_v46, %v5761_v11  ;;  %v5763_v2 = vpop.f32.mrb[133].mxu0  ;;  %v5796_v5 = vadd.f32 %v5788_v57, %v5545_v37  ;;  %v5548_v40 = vmul.f32 %v9650_v19, %v14513_v39  ;;  %v9651_v30 = vld [vmem:[%s14234_s21 + $0x28] sm:$0xff]  ;;  %v9652_v11 = vld [vmem:[%s14233_s1 + $0xd0] sm:$0xff]  ;;  %v14514_v4 = vld [vmem:[#allocation73_spill] sm:$0xff] }
0x1bd5   :  { %v5783_v13 = vadd.f32 %v5775_v34, %v13417_v54  ;;  %v5764_v35 = vadd.f32 %v9651_v30, %v5763_v2  ;;  %v5797_v61 = vadd.f32 %v5789_v47, %v5546_v50  ;;  %v5565_v37 = vmul.f32 %v9652_v11, %v14514_v4  ;;  %v9653_v54 = vld [vmem:[%s14233_s1 + $0x90] sm:$0xff] }
0x1bd6   :  { %v5790_v57 = vadd.f32 %v5782_v32, %v5553_v27  ;;  %v5776_v60 = vadd.f32 %v5762_v16, %v13423_v24  ;;  %v13539_v33 = vadd.f32 %v5796_v5, %v5547_v45  ;;  %v14515_v34 = vld [vmem:[#allocation91_spill] sm:$0xff]  ;;  %v9654_v27 = vld [vmem:[%s14233_s1 + $0x98] sm:$0xff] }
0x1bd7   :  { %v5557_v46 = vmul.f32 %v9653_v54, %v14515_v34  ;;  %v5791_v19 = vadd.f32 %v5783_v13, %v5554_v26  ;;  %v5777_v50 = vadd.f32 %v5764_v35, %v13432_v58  ;;  %v5767_v47 = vpop.f32.mrb[134].mxu0  ;;  %v13546_v2 = vadd.f32 %v5797_v61, %v5548_v40  ;;  %v14516_v32 = vld [vmem:[#allocation63_spill] sm:$0xff]  ;;  %v9656_v40 = vld [vmem:[%s14234_s21 + $0x38] sm:$0xff]  ;;  %v14517_v61 = vld [vmem:[#allocation77_spill] sm:$0xff] }
0x1bd8   :  { %v5558_v24 = vmul.f32 %v9654_v27, %v14516_v32  ;;  %v5784_v45 = vadd.f32 %v5776_v60, %v13438_v10  ;;  %v9655_v16 = vld [vmem:[%s14234_s21 + $0x30] sm:$0xff]  ;;  %v5769_v39 = vpop.f32.mrb[135].mxu0  ;;  %v5798_v26 = vadd.f32 %v5790_v57, %v5555_v42  ;;  %v9657_v10 = vld [vmem:[%s14233_s1 + $0xd8] sm:$0xff] }
0x1bd9   :  { %v5768_v5 = vadd.f32 %v9655_v16, %v5767_v47  ;;  %v5785_v58 = vadd.f32 %v5777_v50, %v13444_v38  ;;  %v5770_v13 = vadd.f32 %v9656_v40, %v5769_v39  ;;  %v5812_v30 = vmax.f32 %v13539_v33, %v13546_v2  ;;  %v9658_v38 = vld [vmem:[%s14233_s1 + $0x110] sm:$0xff]  ;;  %v14518_v60 = vld [vmem:[#allocation76_spill] sm:$0xff]  ;;  %v14520_v47 = vld [vmem:[#allocation69_spill] sm:$0xff] }
0x1bda   :  { %v5799_v35 = vadd.f32 %v5791_v19, %v5556_v8  ;;  %v5566_v11 = vmul.f32 %v9657_v10, %v14517_v61  ;;  %v5792_v4 = vadd.f32 %v5784_v45, %v5563_v53  ;;  %v13567_v57 = vadd.f32 %v5798_v26, %v5557_v46  ;;  %v9659_v53 = vld [vmem:[%s14233_s1 + $0x118] sm:$0xff]  ;;  %v9660_v46 = vld [vmem:[%s14233_s1 + $0xe0] sm:$0xff]  ;;  %v9664_v61 = vld [vmem:[%s14233_s1 + $0x130] sm:$0xff] }
0x1bdb   :  { %v5778_v42 = vadd.f32 %v5768_v5, %v13453_v20  ;;  %v5573_v54 = vmul.f32 %v9658_v38, %v14518_v60  ;;  %v5793_v34 = vadd.f32 %v5785_v58, %v5564_v43  ;;  %v5779_v8 = vadd.f32 %v5770_v13, %v13459_v63  ;;  %5813 = vmax.xlane.f32.xlu0 %v5812_v30  ;;  %v14519_v50 = vld [vmem:[#allocation20_spill] sm:$0xff]  ;;  %v9661_v63 = vld [vmem:[%s14233_s1 + $0xe8] sm:$0xff]  ;;  %v9662_v26 = vld [vmem:[%s14233_s1 + $0x120] sm:$0xff] }
0x1bdc   :  { %v13574_v19 = vadd.f32 %v5799_v35, %v5558_v24  ;;  %v5574_v20 = vmul.f32 %v9659_v53, %v14519_v50  ;;  %v5567_v27 = vmul.f32 %v9660_v46, %v14520_v47  ;;  %v5800_v43 = vadd.f32 %v5792_v4, %v5565_v37  ;;  %v14521_v24 = vld [vmem:[#allocation52_spill] sm:$0xff]  ;;  %v14522_v58 = vld [vmem:[#allocation30_spill] sm:$0xff]  ;;  %v14526_v46 = vld [vmem:[#allocation93_spill] sm:$0xff] }
0x1bdd   :  { %v5786_v32 = vadd.f32 %v5778_v42, %v13465_v7  ;;  %v5568_v45 = vmul.f32 %v9661_v63, %v14521_v24  ;;  %v5787_v16 = vadd.f32 %v5779_v8, %v13471_v18  ;;  %v5801_v39 = vadd.f32 %v5793_v34, %v5566_v11  ;;  %v9663_v13 = vld [vmem:[%s14233_s1 + $0x128] sm:$0xff]  ;;  %v14524_v11 = vld [vmem:[#allocation64_spill] sm:$0xff] }
0x1bde   :  { %v5815_v5 = vmax.f32 %v13567_v57, %v13574_v19  ;;  %v5575_v40 = vmul.f32 %v9662_v26, %v14522_v58  ;;  %v13596_v37 = vadd.f32 %v5800_v43, %v5567_v27  ;;  %v14523_v30 = vld [vmem:[#allocation82_spill] sm:$0xff]  ;;  %v5577_v4 = vmul.f32 %v9664_v61, %v14524_v11  ;;  %v9665_v38 = vld [vmem:[%s14233_s1 + $0x138] sm:$0xff] }
0x1bdf   :  { %v5794_v7 = vadd.f32 %v5786_v32, %v5573_v54  ;;  %v5576_v35 = vmul.f32 %v9663_v13, %v14523_v30  ;;  %v5795_v18 = vadd.f32 %v5787_v16, %v5574_v20  ;;  %v13602_v10 = vadd.f32 %v5801_v39, %v5568_v45  ;;  %v14525_v60 = vld [vmem:[#allocation78_spill] sm:$0xff]  ;;  %v14529_v32 = vld [vmem:[#allocation71_spill] sm:$0xff]  ;;  %v14530_v63 = vld [vmem:[#allocation68_spill] sm:$0xff] }
0x1be0   :  { %5816 = vmax.xlane.f32.xlu1 %v5815_v5  ;;  %v5578_v54 = vmul.f32 %v9665_v38, %v14525_v60  ;;  %v14527_v47 = vld [vmem:[#allocation62_spill] sm:$0xff]  ;;  %v7049_v43 = vmul.f32 -1.442695, %v14529_v32  ;;  %v7051_v24 = vmul.f32 -1.442695, %v14530_v63  ;;  %v14531_v45 = vpack.i.bf16 %v13237_v3, %v13232_v28  ;;  %v14532_v16 = vld [vmem:[#allocation67_spill] sm:$0xff] }
0x1be1   :  { %v5802_v42 = vadd.f32 %v5794_v7, %v5575_v40  ;;  %v5818_v34 = vmax.f32 %v13596_v37, %v13602_v10  ;;  %v5803_v8 = vadd.f32 %v5795_v18, %v5576_v35  ;;  %v14528_v27 = vpack.i.bf16 %v14526_v46, %v14527_v47  ;;  %v14534_v26 = vld [vmem:[#allocation72_spill] sm:$0xff]  ;;  %v14539_v3 = vld [vmem:[#allocation66_spill] sm:$0xff] }
0x1be2   :  { %9443 = vpow2.f32 %v7049_v43  ;;  %v7048_v5 = vmul.f32 -1.442695, %v14532_v16  ;;  %v14533_v39 = vpack.i.bf16 %v13175_v14, %v13141_v44  ;;  %v7050_v31 = vmul.f32 -1.442695, %v14534_v26  ;;  %v14540_v40 = vld [vmem:[#allocation60_spill] sm:$0xff] }
0x1be3   :  { %v13614_v53 = vadd.f32 %v5802_v42, %v5577_v4  ;;  %5819 = vmax.xlane.f32.xlu0 %v5818_v34  ;;  %v13616_v50 = vadd.f32 %v5803_v8, %v5578_v54  ;;  %9445 = vpow2.f32 %v7051_v24  ;;  %v14538_v28 = vpack.i.bf16 %v13261_v49, %v13256_v59 }
0x1be4   :  { %9447 = vpow2.f32 %v7048_v5  ;;  %v14541_v7 = vpack.i.bf16 %v14539_v3, %v14540_v40  ;;  %v14542_v14 = vpack.i.bf16 %v13185_v23, %v13151_v56  ;;  %v14543_v30 = vpack.i.bf16 %v13247_v15, %v13242_v55 }
0x1be5   :  { %v5821_v20 = vmax.f32 %v13614_v53, %v13616_v50  ;;  %9449 = vpow2.f32 %v7050_v31  ;;  %v14544_v35 = vpack.i.bf16 %v13281_v22, %v13276_v51  ;;  %v14545_v56 = vpack.i.bf16 %v13180_v29, %v13146_v17 }
0x1be6   :  { %v14546_v55 = vpack.i.bf16 %v13195_v12, %v13161_v25  ;;  %v14547_v51 = vpack.i.bf16 %v13271_v6, %v13266_v36  ;;  %v14548_v17 = vpack.i.bf16 %v13307_v48, %v13300_v1  ;;  %v14549_v29 = vpack.i.bf16 %v13190_v21, %v13156_v0 }
0x1be7   :  { %5822 = vmax.xlane.f32.xlu0 %v5821_v20  ;;  %v14550_v36 = vpack.i.bf16 %v13295_v41, %v13290_v52 }
0x1bec   :  { %v9444_v44 = vpop.eup %9443 }
0x1bed   :  { %v4889_v13 = vadd.f32 1.0, %v9444_v44  ;;  %v9446_v49 = vpop.eup %9445 }
0x1bee   :  { %v9448_v59 = vpop.eup %9447  ;;  %v4891_v18 = vadd.f32 1.0, %v9446_v49 }
0x1bef   :  { %9451 = vrcp.f32 %v4889_v13  ;;  %v4888_v23 = vadd.f32 1.0, %v9448_v59  ;;  %v9450_v61 = vpop.eup %9449 }
0x1bf0   :  { %9453 = vrcp.f32 %v4891_v18  ;;  %v4890_v22 = vadd.f32 1.0, %v9450_v61 }
0x1bf1   :  { %9233 = vrot.lane.b32.xlu1 %v14528_v27, %s14255_s25  ;;  %9455 = vrcp.f32 %v4888_v23 }
0x1bf2   :  { %9457 = vrcp.f32 %v4890_v22 }
0x1bf5   :  { %9238 = vrot.lane.b32.xlu1 %v9237_v9, %s14255_s25  ;;  %v14535_v9 = vld [vmem:[#allocation81_spill] sm:$0xff] }
0x1bf6   :  { %v14537_v58 = vpack.i.bf16 %v14535_v9, %v14536_v62 }
0x1bf9   :  { %9243 = vrot.lane.b32.xlu1 %v14531_v45, %s14255_s25  ;;  %v9452_v25 = vpop.eup %9451 }
0x1bfa   :  { %v9454_v6 = vpop.eup %9453 }
0x1bfb   :  { %v9456_v12 = vpop.eup %9455 }
0x1bfc   :  { %v9458_v48 = vpop.eup %9457 }
0x1bfd   :  { %9253 = vrot.lane.b32.xlu1 %v14533_v39, %s14255_s25  ;;  %9228 = vrot.lane.b32.xlu0 %v14537_v58, %s14255_s25  ;;  %v14551_v39 = vmov 0.0  }
0x1c01   :  { %9263 = vrot.lane.b32.xlu1 %v14538_v28, %s14255_s25  ;;  %9248 = vrot.lane.b32.xlu0 %v14541_v7, %s14255_s25 }
0x1c05   :  { %9273 = vrot.lane.b32.xlu1 %v14542_v14, %s14255_s25  ;;  %9258 = vrot.lane.b32.xlu0 %v14543_v30, %s14255_s25 }
0x1c09   :  { %9283 = vrot.lane.b32.xlu1 %v14544_v35, %s14255_s25  ;;  %9268 = vrot.lane.b32.xlu0 %v14545_v56, %s14255_s25 }
0x1c0d   :  { %9293 = vrot.lane.b32.xlu1 %v14546_v55, %s14255_s25  ;;  %9278 = vrot.lane.b32.xlu0 %v14547_v51, %s14255_s25 }
0x1c11   :  { %9303 = vrot.lane.b32.xlu1 %v14548_v17, %s14255_s25  ;;  %9288 = vrot.lane.b32.xlu0 %v14549_v29, %s14255_s25 }
0x1c15   :  { %6250 = vrot.lane.b32.xlu1 %v9452_v25, %s14255_s25  ;;  %9298 = vrot.lane.b32.xlu0 %v14550_v36, %s14255_s25 }
0x1c19   :  { %6254 = vrot.lane.b32.xlu1 %v9454_v6, %s14255_s25  ;;  %6248 = vrot.lane.b32.xlu0 %v9456_v12, %s14255_s25 }
0x1c1d   :  { %6252 = vrot.lane.b32.xlu0 %v9458_v48, %s14255_s25 }
0x1c68   :  { %v5814_v0 = vpop.xlane.xlu0 %5813 }
0x1c69   :  { %v5824_v21 = vsub.f32 %v13539_v33, %v5814_v0  ;;  %v5825_v15 = vsub.f32 %v13546_v2, %v5814_v0 }
0x1c6b   :  { %v5832_v1 = vmul.f32 1.442695, %v5824_v21  ;;  %v5834_v11 = vmul.f32 1.442695, %v5825_v15 }
0x1c6d   :  { %v5817_v4 = vpop.xlane.xlu1 %5816  ;;  %9459 = vpow2.f32 %v5832_v1 }
0x1c6e   :  { %v5826_v41 = vsub.f32 %v13567_v57, %v5817_v4  ;;  %v5827_v52 = vsub.f32 %v13574_v19, %v5817_v4  ;;  %9461 = vpow2.f32 %v5834_v11 }
0x1c70   :  { %v5836_v42 = vmul.f32 1.442695, %v5826_v41  ;;  %v5838_v38 = vmul.f32 1.442695, %v5827_v52  ;;  %v5820_v60 = vpop.xlane.xlu0 %5819 }
0x1c71   :  { %v5828_v54 = vsub.f32 %v13596_v37, %v5820_v60  ;;  %v5829_v33 = vsub.f32 %v13602_v10, %v5820_v60  ;;  %v9234_v26 = vpop.permute.xlu1 %9233 }
0x1c72   :  { %9463 = vpow2.f32 %v5836_v42  ;;  %v9236_v56 = vunpack.i.h.bf16 %v9234_v26  ;;  %v9235_v23 = vunpack.i.l.bf16 %v9234_v26 }
0x1c73   :  { %9465 = vpow2.f32 %v5838_v38  ;;  %v5840_v34 = vmul.f32 1.442695, %v5828_v54  ;;  %v5842_v2 = vmul.f32 1.442695, %v5829_v33 }
0x1c74   :  { %v5823_v8 = vpop.xlane.xlu0 %5822  ;;  %v8968_v6 = vpack.c.bf16 %v9236_v56, %v9235_v23 }
0x1c75   :  { %9467 = vpow2.f32 %v5840_v34  ;;  %v5830_v20 = vsub.f32 %v13614_v53, %v5823_v8  ;;  %v5831_v57 = vsub.f32 %v13616_v50, %v5823_v8  ;;  %v9666_v53 = vld [vmem:[%s14272_s0] sm:$0xff]  ;;  %v9239_v31 = vpop.permute.xlu1 %9238 }
0x1c76   :  { %9469 = vpow2.f32 %v5842_v2  ;;  %v9241_v51 = vunpack.i.h.bf16 %v9239_v31  ;;  %v9240_v22 = vunpack.i.l.bf16 %v9239_v31 }
0x1c77   :  { %v13700_v19 = vpop.eup %9459  ;;  %v5844_v46 = vmul.f32 1.442695, %v5830_v20  ;;  %v5846_v27 = vmul.f32 1.442695, %v5831_v57 }
0x1c78   :  { %v13702_v47 = vpop.eup %9461  ;;  %v9229_v32 = vpop.permute.xlu0 %9228  ;;  %v8970_v15 = vpack.c.bf16 %v9241_v51, %v9240_v22 }
0x1c79   :  { %9471 = vpow2.f32 %v5844_v46  ;;  %5912 = vmatprep.mubr.f32.mxu1 %v13702_v47  ;;  %v9231_v37 = vunpack.i.h.bf16 %v9229_v32  ;;  %v9230_v10 = vunpack.i.l.bf16 %v9229_v32  ;;  %v9244_v62 = vpop.permute.xlu1 %9243 }
0x1c7a   :  { %9473 = vpow2.f32 %v5846_v27  ;;  %5913 = vmatmul.mubr.f32.vlgmr.msra.gmra.mrb[128].mxu1 %v13700_v19  ;;  %v9246_v12 = vunpack.i.h.bf16 %v9244_v62  ;;  %v9245_v48 = vunpack.i.l.bf16 %v9244_v62 }
0x1c7b   :  { %5958 = vmatpush1.msra.mxu1 %v9666_v53  ;;  %v8966_v63 = vpack.c.bf16 %v9231_v37, %v9230_v10 }
0x1c7c   :  { %v13706_v43 = vpop.eup %9463  ;;  %v9249_v3 = vpop.permute.xlu0 %9248  ;;  %v8972_v52 = vpack.c.bf16 %v9246_v12, %v9245_v48  ;;  %v7137_v12 = vld [vmem:[%s13946_s13 + $0x98] sm:$0xff] }
0x1c7d   :  { %v13711_v50 = vpop.eup %9465  ;;  %8967 = vmatprep.subr.bf16.mxu1 %v8966_v63  ;;  %v9254_v13 = vpop.permute.xlu1 %9253  ;;  %v9251_v1 = vunpack.i.h.bf16 %v9249_v3  ;;  %v9250_v11 = vunpack.i.l.bf16 %v9249_v3 }
0x1c7e   :  { %5917 = vmatprep.mubr.f32.mxu1 %v13711_v50  ;;  %v9256_v42 = vunpack.i.h.bf16 %v9254_v13  ;;  %v9255_v38 = vunpack.i.l.bf16 %v9254_v13 }
0x1c7f   :  { %5918 = vmatmul.mubr.f32.gmra.mrb[130].mxu1 %v13706_v43  ;;  %v13715_v24 = vpop.eup %9467  ;;  %v8974_v60 = vpack.c.bf16 %v9251_v1, %v9250_v11 }
0x1c80   :  { %v13717_v45 = vpop.eup %9469  ;;  %v9259_v35 = vpop.permute.xlu0 %9258  ;;  %v8976_v8 = vpack.c.bf16 %v9256_v42, %v9255_v38 }
0x1c81   :  { %5922 = vmatprep.mubr.f32.mxu1 %v13717_v45  ;;  %v9264_v17 = vpop.permute.xlu1 %9263  ;;  %v9261_v54 = vunpack.i.h.bf16 %v9259_v35  ;;  %v9260_v33 = vunpack.i.l.bf16 %v9259_v35 }
0x1c82   :  { %v9266_v20 = vunpack.i.h.bf16 %v9264_v17  ;;  %v9265_v57 = vunpack.i.l.bf16 %v9264_v17 }
0x1c83   :  { %5923 = vmatmul.mubr.f32.gmra.mrb[132].mxu1 %v13715_v24  ;;  %v13721_v16 = vpop.eup %9471  ;;  %v8978_v46 = vpack.c.bf16 %v9261_v54, %v9260_v33  ;;  %v7141_v33 = vld [vmem:[%s13946_s13 + $0xb8] sm:$0xff] }
0x1c84   :  { %v13723_v5 = vpop.eup %9473  ;;  %v9269_v0 = vpop.permute.xlu0 %9268  ;;  %v8980_v53 = vpack.c.bf16 %v9266_v20, %v9265_v57 }
0x1c85   :  { %5927 = vmatprep.mubr.f32.mxu1 %v13723_v5  ;;  %v9274_v4 = vpop.permute.xlu1 %9273  ;;  %v9271_v27 = vunpack.i.h.bf16 %v9269_v0  ;;  %v9270_v32 = vunpack.i.l.bf16 %v9269_v0 }
0x1c86   :  { %v9276_v63 = vunpack.i.h.bf16 %v9274_v4  ;;  %v9275_v26 = vunpack.i.l.bf16 %v9274_v4 }
0x1c87   :  { %5928 = vmatmul.mubr.f32.gmra.mrb[134].mxu1 %v13721_v16 }
0x1c88   :  { %6021 = vmatprep.mubr.f32.mxu1 %v14551_v39  ;;  %v9279_v34 = vpop.permute.xlu0 %9278  ;;  %v8984_v3 = vpack.c.bf16 %v9276_v63, %v9275_v26 }
0x1c89   :  { %v9284_v37 = vpop.permute.xlu1 %9283  ;;  %v9281_v62 = vunpack.i.h.bf16 %v9279_v34 }
0x1c8c   :  { %v9289_v31 = vpop.permute.xlu0 %9288 }
0x1c90   :  { %v9299_v13 = vpop.permute.xlu0 %9298 }
0x1c91   :  { %v9301_v56 = vunpack.i.h.bf16 %v9299_v13  ;;  %v9300_v23 = vunpack.i.l.bf16 %v9299_v13 }
0x1c93   :  { %v8994_v22 = vpack.c.bf16 %v9301_v56, %v9300_v23 }
0x1c94   :  { %v6249_v57 = vpop.permute.xlu0 %6248 }
0x1d4d   :  { %v7672_v9 = vpop.f32.mrb[128].mxu1 }
0x1d4e   :  { %v7673_v58 = vpop.f32.mrb[129].mxu1 }
0x1d4f   :  { %v7674_v28 = vadd.f32 %v7673_v58, %v7672_v9  ;;  %v8982_v9 = vpack.c.bf16 %v9271_v27, %v9270_v32  ;;  %v9280_v58 = vunpack.i.l.bf16 %v9279_v34 }
0x1d51   :  { %v5933_v40 = vmax.f32 %v7674_v28, 1e-30  ;;  %v9294_v28 = vpop.permute.xlu1 %9293 }
0x1d52   :  { %v7675_v7 = vpop.f32.mrb[130].mxu1 }
0x1d53   :  { %v7676_v44 = vpop.f32.mrb[131].mxu1  ;;  %9475 = vrcp.f32 %v5933_v40  ;;  %v9286_v40 = vunpack.i.h.bf16 %v9284_v37 }
0x1d54   :  { %v7677_v14 = vadd.f32 %v7676_v44, %v7675_v7  ;;  %v9285_v7 = vunpack.i.l.bf16 %v9284_v37  ;;  %v8986_v44 = vpack.c.bf16 %v9281_v62, %v9280_v58 }
0x1d56   :  { %v5934_v30 = vmax.f32 %v7677_v14, 1e-30  ;;  %v7678_v49 = vpop.f32.mrb[132].mxu1  ;;  %v9291_v14 = vunpack.i.h.bf16 %v9289_v31 }
0x1d57   :  { %v7679_v59 = vpop.f32.mrb[133].mxu1 }
0x1d58   :  { %9477 = vrcp.f32 %v5934_v30  ;;  %v7680_v18 = vadd.f32 %v7679_v59, %v7678_v49  ;;  %v8988_v30 = vpack.c.bf16 %v9286_v40, %v9285_v7  ;;  %v9296_v49 = vunpack.i.h.bf16 %v9294_v28 }
0x1d59   :  { %v9295_v59 = vunpack.i.l.bf16 %v9294_v28 }
0x1d5a   :  { %v5935_v61 = vmax.f32 %v7680_v18, 1e-30  ;;  %v7681_v55 = vpop.f32.mrb[134].mxu1  ;;  %v9304_v18 = vpop.permute.xlu1 %9303 }
0x1d5b   :  { %v7682_v29 = vpop.f32.mrb[135].mxu1  ;;  %v9305_v51 = vunpack.i.l.bf16 %v9304_v18 }
0x1d5c   :  { %9479 = vrcp.f32 %v5935_v61  ;;  %v7683_v25 = vadd.f32 %v7682_v29, %v7681_v55  ;;  %v8992_v61 = vpack.c.bf16 %v9296_v49, %v9295_v59  ;;  %v9306_v55 = vunpack.i.h.bf16 %v9304_v18  ;;  %v7134_v29 = vld [vmem:[%s13946_s13 + $0x80] sm:$0xff]  ;;  %v14552_v49 = vld [vmem:[#allocation75_spill] sm:$0xff] }
0x1d5d   :  { %v9476_v36 = vpop.eup %9475 }
0x1d5e   :  { %v5936_v21 = vmax.f32 %v7683_v25, 1e-30  ;;  %7122 = vmatmul.mubr.msk.f32.vlgmr.msra.gmra.mrb[136].mxu1 %vm1643_vm2, %v9476_v36  ;;  %v8996_v17 = vpack.c.bf16 %v9306_v55, %v9305_v51  ;;  %v7135_v25 = vld [vmem:[%s13946_s13 + $0x88] sm:$0xff]  ;;  %v7136_v36 = vld [vmem:[%s13946_s13 + $0x90] sm:$0xff] }
0x1d5f   :  { %8969 = vmatpush3.bf16.msra.mxu1 %v8968_v6  ;;  %6027 = vmatprep.mubr.f32.mxu1 %v14551_v39  ;;  %v8998_v6 = vpack.c.bf16 %v7135_v25, %v7134_v29  ;;  %v9002_v48 = vpack.c.bf16 %v7137_v12, %v7136_v36  ;;  %v14555_v25 = vld [vmem:[#allocation18_spill] sm:$0xff] }
0x1d60   :  { %9481 = vrcp.f32 %v5936_v21  ;;  %8971 = vmatprep.subr.bf16.mxu1 %v8970_v15 }
0x1d61   :  { %8999 = vmatprep.subr.bf16.mxu0 %v8998_v6 }
0x1d62   :  { %v9478_v41 = vpop.eup %9477  ;;  %9001 = vmatpush3.bf16.msra.mxu0 %v8998_v6 }
0x1d63   :  { %7123 = vmatmul.mubr.msk.f32.gmra.mrb[138].mxu1 %vm1643_vm2, %v9478_v41  ;;  %9003 = vmatprep.subr.bf16.mxu0 %v9002_v48 }
0x1d64   :  { %8973 = vmatpush3.bf16.msra.mxu1 %v8972_v52  ;;  %6033 = vmatprep.mubr.f32.mxu1 %v14551_v39 }
0x1d65   :  { %8975 = vmatprep.subr.bf16.mxu1 %v8974_v60 }
0x1d66   :  { %v9480_v2 = vpop.eup %9479  ;;  %9005 = vmatpush3.bf16.msra.mxu0 %v9002_v48 }
0x1d67   :  { %7124 = vmatmul.mubr.msk.f32.gmra.mrb[140].mxu1 %vm1643_vm2, %v9480_v2 }
0x1d68   :  { %8977 = vmatpush3.bf16.msra.mxu1 %v8976_v8  ;;  %6039 = vmatprep.mubr.f32.mxu1 %v14551_v39  ;;  %v9290_v39 = vunpack.i.l.bf16 %v9289_v31 }
0x1d69   :  { %8979 = vmatprep.subr.bf16.mxu1 %v8978_v46 }
0x1d6a   :  { %v9482_v10 = vpop.eup %9481  ;;  %v8990_v35 = vpack.c.bf16 %v9291_v14, %v9290_v39 }
0x1d6b   :  { %7125 = vmatmul.mubr.msk.f32.gmra.mrb[142].mxu1 %vm1643_vm2, %v9482_v10  ;;  %v6251_v10 = vpop.permute.xlu1 %6250 }
0x1d6c   :  { %8981 = vmatpush3.bf16.msra.mxu1 %v8980_v53 }
0x1d6d   :  { %8983 = vmatprep.subr.bf16.mxu1 %v8982_v9  ;;  %v6253_v9 = vpop.permute.xlu0 %6252 }
0x1d6f   :  { %v6255_v40 = vpop.permute.xlu1 %6254 }
0x1d70   :  { %8985 = vmatpush3.bf16.msra.mxu1 %v8984_v3 }
0x1d71   :  { %8987 = vmatprep.subr.bf16.mxu1 %v8986_v44  ;;  %v7143_v44 = vld [vmem:[%s13947_s14 + $0x2] ss:$0 sm:$0xff] }
0x1d74   :  { %8989 = vmatpush3.bf16.msra.mxu1 %v8988_v30 }
0x1d75   :  { %8991 = vmatprep.subr.bf16.mxu1 %v8990_v35  ;;  %v14553_v35 = vld [vmem:[#allocation70_spill] sm:$0xff] }
0x1d78   :  { %8993 = vmatpush3.bf16.msra.mxu1 %v8992_v61 }
0x1d79   :  { %8995 = vmatprep.subr.bf16.mxu1 %v8994_v22 }
0x1d7c   :  { %8997 = vmatpush3.bf16.msra.mxu1 %v8996_v17  ;;  %v14554_v17 = vld [vmem:[#allocation25_spill] sm:$0xff] }
0x1e31   :  { %v6023_v0 = vpop.f32.mrb[136].mxu1 }
0x1e32   :  { %v6046_v21 = vmul.f32 %v13700_v19, %v6023_v0  ;;  %v6025_v15 = vpop.f32.mrb[137].mxu1 }
0x1e33   :  { %v6047_v1 = vmul.f32 %v13702_v47, %v6025_v15 }
0x1e34   :  { %7126 = vst [vmem:[%s13955_s22 + $0x80] sm:$0xff] %v6046_v21 }
0x1e35   :  { %7127 = vst [vmem:[%s13955_s22 + $0x88] sm:$0xff] %v6047_v1  ;;  %6223 = vmatprep.mubr.f32.mxu1 %v6047_v1 }
0x1e36   :  { %v6029_v11 = vpop.f32.mrb[138].mxu1  ;;  %6224 = vmatmul.mubr.f32.vlgmr.msra.gmra.mrb[144].mxu1 %v6046_v21 }
0x1e37   :  { %v6048_v4 = vmul.f32 %v13706_v43, %v6029_v11  ;;  %v6031_v41 = vpop.f32.mrb[139].mxu1 }
0x1e38   :  { %v6049_v52 = vmul.f32 %v13711_v50, %v6031_v41 }
0x1e39   :  { %7128 = vst [vmem:[%s13955_s22 + $0x90] sm:$0xff] %v6048_v4 }
0x1e3a   :  { %7129 = vst [vmem:[%s13955_s22 + $0x98] sm:$0xff] %v6049_v52  ;;  %v6035_v19 = vpop.f32.mrb[140].mxu1  ;;  %6228 = vmatprep.mubr.f32.mxu1 %v6049_v52 }
0x1e3b   :  { %v6050_v47 = vmul.f32 %v13715_v24, %v6035_v19  ;;  %v6037_v42 = vpop.f32.mrb[141].mxu1  ;;  %6229 = vmatmul.mubr.f32.gmra.mrb[146].mxu1 %v6048_v4 }
0x1e3c   :  { %v6051_v43 = vmul.f32 %v13717_v45, %v6037_v42  ;;  %v7138_v45 = vld [vmem:[%s13946_s13 + $0xa0] sm:$0xff] }
0x1e3d   :  { %7130 = vst [vmem:[%s13955_s22 + $0xa0] sm:$0xff] %v6050_v47 }
0x1e3e   :  { %7131 = vst [vmem:[%s13955_s22 + $0xa8] sm:$0xff] %v6051_v43  ;;  %v6041_v50 = vpop.f32.mrb[142].mxu1  ;;  %6233 = vmatprep.mubr.f32.mxu1 %v6051_v43 }
0x1e3f   :  { %v6052_v38 = vmul.f32 %v13721_v16, %v6041_v50  ;;  %v6043_v60 = vpop.f32.mrb[143].mxu1  ;;  %6234 = vmatmul.mubr.f32.gmra.mrb[148].mxu1 %v6050_v47  ;;  %v7139_v16 = vld [vmem:[%s13946_s13 + $0xa8] sm:$0xff] }
0x1e40   :  { %v6053_v24 = vmul.f32 %v13723_v5, %v6043_v60  ;;  %v9006_v54 = vpack.c.bf16 %v7139_v16, %v7138_v45  ;;  %v7140_v5 = vld [vmem:[%s13946_s13 + $0xb0] sm:$0xff]  ;;  %s9693_s13 = smov [#allocation2]  }
0x1e41   :  { %7132 = vst [vmem:[%s13955_s22 + $0xb0] sm:$0xff] %v6052_v38  ;;  %v9010_v34 = vpack.c.bf16 %v7141_v33, %v7140_v5  ;;  %v7152_v5 = vld [vmem:[%s13950_s17 + $0x80] sm:$0xff]  ;;  %v7153_v33 = vld [vmem:[%s13950_s17 + $0x88] sm:$0xff] }
0x1e42   :  { %7133 = vst [vmem:[%s13955_s22 + $0xb8] sm:$0xff] %v6053_v24  ;;  %6238 = vmatprep.mubr.f32.mxu1 %v6053_v24  ;;  %9007 = vmatprep.subr.bf16.mxu0 %v9006_v54  ;;  %s6731_s22 = sshll.u32 %s9693_s13, 4  ;;  %s6732_s22 = int_to_ptr.vmem [resolvable:$true] %s6731_s22 }
0x1e43   :  { %6239 = vmatmul.mubr.f32.gmra.mrb[150].mxu1 %v6052_v38  ;;  %9009 = vmatpush3.bf16.msra.mxu0 %v9006_v54  ;;  %p9672_p1 = scmp.lt.s32.totalorder %s6732_s22, %s6732_s22 }
0x1e44   :  { %9011 = vmatprep.subr.bf16.mxu0 %v9010_v34 }
0x1e47   :  { %9013 = vmatpush3.bf16.msra.mxu0 %v9010_v34  ;;  %v9014_v34 = vpack.c.bf16 %v7153_v33, %v7152_v5  ;;  %v7178_v5 = vld [vmem:[%s13952_s19 + $0x160] sm:$0xff]  ;;  %v7179_v33 = vld [vmem:[%s13952_s19 + $0x168] sm:$0xff] }
0x1e49   :  { %9015 = vmatprep.subr.bf16.mxu0 %v9014_v34 }
0x1f09   :  { %v7716_v2 = vpop.f32.mrb[144].mxu1 }
0x1f0a   :  { %v7717_v8 = vpop.f32.mrb[145].mxu1 }
0x1f0b   :  { %v7718_v20 = vadd.f32 %v7717_v8, %v7716_v2  ;;  %v7154_v2 = vld [vmem:[%s13950_s17 + $0x90] sm:$0xff]  ;;  %v7155_v8 = vld [vmem:[%s13950_s17 + $0x98] sm:$0xff] }
0x1f0d   :  { %v6260_v46 = vmul.f32 %v7718_v20, %v6249_v57  ;;  %v9018_v20 = vpack.c.bf16 %v7155_v8, %v7154_v2  ;;  %v7156_v57 = vld [vmem:[%s13950_s17 + $0xa0] sm:$0xff]  ;;  %v7180_v2 = vld [vmem:[%s13952_s19 + $0x170] sm:$0xff]  ;;  %v7181_v8 = vld [vmem:[%s13952_s19 + $0x178] sm:$0xff] }
0x1f0e   :  { %v7719_v27 = vpop.f32.mrb[146].mxu1 }
0x1f0f   :  { %v7720_v32 = vpop.f32.mrb[147].mxu1  ;;  %8084 = vmatprep.mubr.msk.f32.mxu0 %vm271_vm0, %v6260_v46  ;;  %v7157_v46 = vld [vmem:[%s13950_s17 + $0xa8] sm:$0xff] }
0x1f10   :  { %v7721_v37 = vadd.f32 %v7720_v32, %v7719_v27  ;;  %v9022_v27 = vpack.c.bf16 %v7157_v46, %v7156_v57  ;;  %v7158_v32 = vld [vmem:[%s13950_s17 + $0xb0] sm:$0xff]  ;;  %v7161_v57 = vld [vmem:[%s13951_s18 + $0x2] ss:$0 sm:$0xff] }
0x1f12   :  { %v6261_v53 = vmul.f32 %v7721_v37, %v6251_v10  ;;  %v7722_v63 = vpop.f32.mrb[148].mxu1  ;;  %v7159_v37 = vld [vmem:[%s13950_s17 + $0xb8] sm:$0xff] }
0x1f13   :  { %v7723_v26 = vpop.f32.mrb[149].mxu1  ;;  %v9026_v10 = vpack.c.bf16 %v7159_v37, %v7158_v32 }
0x1f14   :  { %v7724_v31 = vadd.f32 %v7723_v26, %v7722_v63  ;;  %8085 = vmatmul.mubr.msk.f32.vlgmr.msra.gmra.mrb[136].mxu0 %vm271_vm0, %v6261_v53  ;;  %v7166_v53 = vld [vmem:[%s13952_s19 + $0x100] sm:$0xff]  ;;  %v7167_v63 = vld [vmem:[%s13952_s19 + $0x108] sm:$0xff] }
0x1f15   :  { %9017 = vmatpush3.bf16.msra.mxu0 %v9014_v34  ;;  %v9030_v26 = vpack.c.bf16 %v7167_v63, %v7166_v53  ;;  %v9054_v34 = vpack.c.bf16 %v7179_v33, %v7178_v5 }
0x1f16   :  { %v6262_v62 = vmul.f32 %v7724_v31, %v6253_v9  ;;  %v7725_v58 = vpop.f32.mrb[150].mxu1  ;;  %9019 = vmatprep.subr.bf16.mxu0 %v9018_v20 }
0x1f17   :  { %v7726_v28 = vpop.f32.mrb[151].mxu1  ;;  %9031 = vmatprep.subr.bf16.mxu1 %v9030_v26 }
0x1f18   :  { %v7727_v3 = vadd.f32 %v7726_v28, %v7725_v58  ;;  %8087 = vmatprep.mubr.msk.f32.mxu0 %vm271_vm0, %v6262_v62  ;;  %9033 = vmatpush3.bf16.msra.mxu1 %v9030_v26 }
0x1f19   :  { %9021 = vmatpush3.bf16.msra.mxu0 %v9018_v20  ;;  %v9058_v20 = vpack.c.bf16 %v7181_v8, %v7180_v2 }
0x1f1a   :  { %v6263_v7 = vmul.f32 %v7727_v3, %v6255_v40  ;;  %9023 = vmatprep.subr.bf16.mxu0 %v9022_v27 }
0x1f1c   :  { %8088 = vmatmul.mubr.msk.f32.gmra.mrb[138].mxu0 %vm271_vm0, %v6263_v7 }
0x1f1d   :  { %9025 = vmatpush3.bf16.msra.mxu0 %v9022_v27 }
0x1f1e   :  { %9027 = vmatprep.subr.bf16.mxu0 %v9026_v10 }
0x1f21   :  { %9029 = vmatpush3.bf16.msra.mxu0 %v9026_v10 }
0x1fe7   :  { %v8086_v14 = vpop.f32.mrb[136].mxu0 }
0x1fe8   :  { %v6365_v39 = vadd.f32 %v8086_v14, %v7143_v44  ;;  %v6359_v13 = vpop.f32.mrb[137].mxu0 }
0x1fe9   :  { %v6360_v30 = vadd.f32 %v7143_v44, %v6359_v13 }
0x1fea   :  { %v6379_v59 = vadd.f32 %v6365_v39, %v14552_v49 }
0x1feb   :  { %v6378_v18 = vadd.f32 %v6360_v30, %v14553_v35  ;;  %v7150_v30 = vld [vmem:[%s13948_s15 + $0x2] ss:$0 sm:$0xff] }
0x1fec   :  { %v6389_v56 = vsel %vm271_vm0, %v6379_v59, 0.0 }
0x1fed   :  { %6390 = vadd.xlane.f32.xlu1 %v6389_v56  ;;  %v6386_v23 = vsel %vm271_vm0, %v6378_v18, 0.0 }
0x1fee   :  { %6387 = vadd.xlane.f32.xlu0 %v6386_v23 }
0x1fef   :  { %v8089_v61 = vpop.f32.mrb[138].mxu0 }
0x1ff0   :  { %v6369_v55 = vpop.f32.mrb[139].mxu0  ;;  %v6375_v51 = vadd.f32 %v8089_v61, %v7143_v44  ;;  %v7151_v61 = vld [vmem:[%s13949_s16 + $0x2] ss:$0 sm:$0xff] }
0x1ff1   :  { %v6370_v22 = vadd.f32 %v7143_v44, %v6369_v55 }
0x1ff2   :  { %v6381_v36 = vadd.f32 %v6375_v51, %v14555_v25 }
0x1ff3   :  { %v6380_v29 = vadd.f32 %v6370_v22, %v14554_v17 }
0x1ff4   :  { %v6395_v12 = vsel %vm271_vm0, %v6381_v36, 0.0 }
0x1ff5   :  { %v6392_v6 = vsel %vm271_vm0, %v6380_v29, 0.0 }
0x1ff6   :  { %6393 = vadd.xlane.f32.xlu0 %v6392_v6 }
0x1ffa   :  { %6396 = vadd.xlane.f32.xlu0 %v6395_v12 }
0x207a   :  { %v6391_v48 = vpop.xlane.xlu1 %6390 }
0x207b   :  { %v6399_v0 = vmul.f32 0.015625, %v6391_v48  ;;  %v6388_v21 = vpop.xlane.xlu0 %6387 }
0x207c   :  { %v6398_v15 = vmul.f32 0.015625, %v6388_v21 }
0x207d   :  { %v6403_v1 = vsub.f32 %v6379_v59, %v6399_v0 }
0x207e   :  { %v13806_v11 = vsub.f32 %v6378_v18, %v6398_v15 }
0x207f   :  { %v6407_v4 = vmul.f32 %v6403_v1, %v6403_v1 }
0x2080   :  { %v6406_v41 = vmul.f32 %v13806_v11, %v13806_v11 }
0x2081   :  { %v6413_v52 = vsel %vm271_vm0, %v6407_v4, 0.0  ;;  %v7169_v4 = vld [vmem:[%s13952_s19 + $0x118] sm:$0xff] }
0x2082   :  { %6414 = vadd.xlane.f32.xlu1 %v6413_v52  ;;  %v6410_v19 = vsel %vm271_vm0, %v6406_v41, 0.0  ;;  %v7170_v52 = vld [vmem:[%s13952_s19 + $0x120] sm:$0xff] }
0x2083   :  { %6411 = vadd.xlane.f32.xlu0 %v6410_v19  ;;  %v6394_v47 = vpop.xlane.xlu0 %6393  ;;  %v7171_v19 = vld [vmem:[%s13952_s19 + $0x128] sm:$0xff] }
0x2084   :  { %v6400_v42 = vmul.f32 0.015625, %v6394_v47  ;;  %v9038_v47 = vpack.c.bf16 %v7171_v19, %v7170_v52 }
0x2086   :  { %v13812_v43 = vsub.f32 %v6380_v29, %v6400_v42  ;;  %v7172_v42 = vld [vmem:[%s13952_s19 + $0x130] sm:$0xff] }
0x2087   :  { %v6397_v50 = vpop.xlane.xlu0 %6396 }
0x2088   :  { %v6401_v38 = vmul.f32 0.015625, %v6397_v50  ;;  %v6408_v60 = vmul.f32 %v13812_v43, %v13812_v43 }
0x208a   :  { %v13816_v24 = vsub.f32 %v6381_v36, %v6401_v38  ;;  %v6416_v45 = vsel %vm271_vm0, %v6408_v60, 0.0  ;;  %v7174_v38 = vld [vmem:[%s13952_s19 + $0x140] sm:$0xff]  ;;  %v7175_v60 = vld [vmem:[%s13952_s19 + $0x148] sm:$0xff] }
0x208b   :  { %6417 = vadd.xlane.f32.xlu0 %v6416_v45  ;;  %v7176_v45 = vld [vmem:[%s13952_s19 + $0x150] sm:$0xff] }
0x208c   :  { %v6409_v16 = vmul.f32 %v13816_v24, %v13816_v24 }
0x208e   :  { %v6419_v54 = vsel %vm271_vm0, %v6409_v16, 0.0  ;;  %v7177_v16 = vld [vmem:[%s13952_s19 + $0x158] sm:$0xff] }
0x208f   :  { %6420 = vadd.xlane.f32.xlu1 %v6419_v54  ;;  %v9050_v54 = vpack.c.bf16 %v7177_v16, %v7176_v45 }
0x210f   :  { %v6415_v31 = vpop.xlane.xlu1 %6414 }
0x2110   :  { %v6423_v9 = vmul.f32 0.015625, %v6415_v31  ;;  %v6412_v62 = vpop.xlane.xlu0 %6411 }
0x2111   :  { %v6422_v58 = vmul.f32 0.015625, %v6412_v62 }
0x2112   :  { %v6427_v28 = vadd.f32 1e-06, %v6423_v9 }
0x2113   :  { %v6426_v3 = vadd.f32 1e-06, %v6422_v58 }
0x2114   :  { %9483 = vrsqrt.f32 %v6427_v28 }
0x2115   :  { %9485 = vrsqrt.f32 %v6426_v3 }
0x2118   :  { %v6418_v40 = vpop.xlane.xlu0 %6417 }
0x2119   :  { %v6424_v7 = vmul.f32 0.015625, %v6418_v40 }
0x211b   :  { %v6428_v44 = vadd.f32 1e-06, %v6424_v7 }
0x211c   :  { %v6421_v14 = vpop.xlane.xlu1 %6420 }
0x211d   :  { %9487 = vrsqrt.f32 %v6428_v44  ;;  %v6425_v39 = vmul.f32 0.015625, %v6421_v14 }
0x211e   :  { %v9484_v13 = vpop.eup %9483 }
0x211f   :  { %v9486_v59 = vpop.eup %9485  ;;  %v6435_v18 = vmul.f32 %v9484_v13, %v6403_v1  ;;  %v6429_v56 = vadd.f32 1e-06, %v6425_v39 }
0x2120   :  { %v6434_v23 = vmul.f32 %v9486_v59, %v13806_v11  ;;  %v7168_v11 = vld [vmem:[%s13952_s19 + $0x110] sm:$0xff] }
0x2121   :  { %9489 = vrsqrt.f32 %v6429_v56  ;;  %v6445_v55 = vmul.f32 %v7150_v30, %v6435_v18  ;;  %v9034_v41 = vpack.c.bf16 %v7169_v4, %v7168_v11 }
0x2122   :  { %v6444_v51 = vmul.f32 %v7150_v30, %v6434_v23 }
0x2123   :  { %v6455_v29 = vadd.f32 %v7151_v61, %v6445_v55  ;;  %9035 = vmatprep.subr.bf16.mxu1 %v9034_v41 }
0x2124   :  { %v6454_v22 = vadd.f32 %v7151_v61, %v6444_v51  ;;  %9037 = vmatpush3.bf16.msra.mxu1 %v9034_v41 }
0x2125   :  { %9039 = vmatprep.subr.bf16.mxu1 %v9038_v47 }
0x2126   :  { %8106 = vmatprep.mubr.msk.f32.mxu0 %vm271_vm0, %v6454_v22 }
0x2127   :  { %v9488_v36 = vpop.eup %9487  ;;  %8107 = vmatmul.mubr.msk.f32.vlgmr.msra.gmra.mrb[140].mxu0 %vm271_vm0, %v6455_v29 }
0x2128   :  { %v6436_v6 = vmul.f32 %v9488_v36, %v13812_v43  ;;  %v7173_v43 = vld [vmem:[%s13952_s19 + $0x138] sm:$0xff]  ;;  %9041 = vmatpush3.bf16.msra.mxu1 %v9038_v47 }
0x2129   :  { %v9042_v50 = vpack.c.bf16 %v7173_v43, %v7172_v42  ;;  %v7183_v42 = vld [vmem:[%s13953_s20 + $0x2] ss:$0 sm:$0xff]  ;;  %s9667_s20 = scalar_lea.vmem %s6732_s22, 512 }
0x212a   :  { %v6446_v12 = vmul.f32 %v7150_v30, %v6436_v6  ;;  %p9668_p0 = scmp.ne.s32.totalorder %s6732_s22, %s9667_s20  ;;  %p9673_p2 = scmp.lt.s32.totalorder %s9667_s20, %s9667_s20 }
0x212b   :  { %v9490_v48 = vpop.eup %9489  ;;  %9043 = vmatprep.subr.bf16.mxu1 %v9042_v50 }
0x212c   :  { %v6456_v0 = vadd.f32 %v7151_v61, %v6446_v12  ;;  %v6437_v21 = vmul.f32 %v9490_v48, %v13816_v24  ;;  %v9046_v24 = vpack.c.bf16 %v7175_v60, %v7174_v38  ;;  %9045 = vmatpush3.bf16.msra.mxu1 %v9042_v50  ;;  %p9674_p3 = por %p9673_p2, %p9672_p1 }
0x212e   :  { %8109 = vmatprep.mubr.msk.f32.mxu0 %vm271_vm0, %v6456_v0  ;;  %v6447_v15 = vmul.f32 %v7150_v30, %v6437_v21  ;;  %9047 = vmatprep.subr.bf16.mxu1 %v9046_v24  ;;  %p9675_p4 = pnand %p9674_p3, %p9668_p0 }
0x2130   :  { %v6457_v1 = vadd.f32 %v7151_v61, %v6447_v15  ;;  %9049 = vmatpush3.bf16.msra.mxu1 %v9046_v24 }
0x2131   :  { %9051 = vmatprep.subr.bf16.mxu1 %v9050_v54 }
0x2132   :  { %8110 = vmatmul.mubr.msk.f32.gmra.mrb[142].mxu0 %vm271_vm0, %v6457_v1 }
0x2134   :  { %9053 = vmatpush3.bf16.msra.mxu1 %v9050_v54 }
0x2135   :  { %9055 = vmatprep.subr.bf16.mxu1 %v9054_v34 }
0x2138   :  { %9057 = vmatpush3.bf16.msra.mxu1 %v9054_v34 }
0x2139   :  { %9059 = vmatprep.subr.bf16.mxu1 %v9058_v20 }
0x213c   :  { %9061 = vmatpush3.bf16.msra.mxu1 %v9058_v20 }
0x21fa   :  { %v8108_v46 = vpop.f32.mrb[140].mxu0 }
0x21fb   :  { %v6559_v27 = vadd.f32 %v8108_v46, %v7161_v57  ;;  %v6553_v32 = vpop.f32.mrb[141].mxu0 }
0x21fc   :  { %v6554_v37 = vadd.f32 %v7161_v57, %v6553_v32 }
0x21fd   :  { %v6577_v10 = vmul.f32 0.044715, %v6559_v27  ;;  %v6573_v48 = vmul.f32 0.5, %v6559_v27 }
0x21fe   :  { %v6576_v53 = vmul.f32 0.044715, %v6554_v37  ;;  %v6572_v6 = vmul.f32 0.5, %v6554_v37 }
0x21ff   :  { %v6581_v63 = vmul.f32 %v6577_v10, %v6559_v27 }
0x2200   :  { %v6580_v26 = vmul.f32 %v6576_v53, %v6554_v37 }
0x2201   :  { %v6585_v31 = vmul.f32 %v6581_v63, %v6559_v27 }
0x2202   :  { %v6584_v9 = vmul.f32 %v6580_v26, %v6554_v37 }
0x2203   :  { %v6589_v62 = vadd.f32 %v6585_v31, %v6559_v27 }
0x2204   :  { %v6588_v58 = vadd.f32 %v6584_v9, %v6554_v37 }
0x2205   :  { %v6593_v28 = vmul.f32 0.7978846, %v6589_v62  ;;  %v8111_v3 = vpop.f32.mrb[142].mxu0 }
0x2206   :  { %v6569_v40 = vadd.f32 %v8111_v3, %v7161_v57  ;;  %v6563_v7 = vpop.f32.mrb[143].mxu0  ;;  %v6592_v44 = vmul.f32 0.7978846, %v6588_v58 }
0x2207   :  { %9491 = vtanh.f32 %v6593_v28  ;;  %v6564_v14 = vadd.f32 %v7161_v57, %v6563_v7 }
0x2208   :  { %v6579_v39 = vmul.f32 0.044715, %v6569_v40  ;;  %9493 = vtanh.f32 %v6592_v44  ;;  %v6575_v52 = vmul.f32 0.5, %v6569_v40 }
0x2209   :  { %v6578_v13 = vmul.f32 0.044715, %v6564_v14  ;;  %v6574_v4 = vmul.f32 0.5, %v6564_v14 }
0x220a   :  { %v6583_v30 = vmul.f32 %v6579_v39, %v6569_v40 }
0x220b   :  { %v6582_v59 = vmul.f32 %v6578_v13, %v6564_v14 }
0x220c   :  { %v6587_v18 = vmul.f32 %v6583_v30, %v6569_v40 }
0x220d   :  { %v6586_v56 = vmul.f32 %v6582_v59, %v6564_v14 }
0x220e   :  { %v6591_v23 = vadd.f32 %v6587_v18, %v6569_v40 }
0x220f   :  { %v6590_v61 = vadd.f32 %v6586_v56, %v6564_v14 }
0x2210   :  { %v6595_v55 = vmul.f32 0.7978846, %v6591_v23 }
0x2211   :  { %v9492_v51 = vpop.eup %9491  ;;  %v6594_v22 = vmul.f32 0.7978846, %v6590_v61 }
0x2212   :  { %v9494_v29 = vpop.eup %9493  ;;  %v6601_v36 = vadd.f32 1.0, %v9492_v51  ;;  %9495 = vtanh.f32 %v6595_v55 }
0x2213   :  { %v6600_v12 = vadd.f32 1.0, %v9494_v29  ;;  %9497 = vtanh.f32 %v6594_v22 }
0x2214   :  { %v6605_v21 = vmul.f32 %v6601_v36, %v6573_v48 }
0x2215   :  { %v6604_v0 = vmul.f32 %v6600_v12, %v6572_v6 }
0x2217   :  { %8144 = vmatprep.mubr.f32.mxu1 %v6604_v0 }
0x2218   :  { %8145 = vmatmul.mubr.f32.vlgmr.msra.gmra.mrb[152].mxu1 %v6605_v21 }
0x221c   :  { %v9496_v15 = vpop.eup %9495 }
0x221d   :  { %v9498_v1 = vpop.eup %9497  ;;  %v6603_v11 = vadd.f32 1.0, %v9496_v15 }
0x221e   :  { %v6602_v41 = vadd.f32 1.0, %v9498_v1 }
0x221f   :  { %v6607_v47 = vmul.f32 %v6603_v11, %v6575_v52 }
0x2220   :  { %v6606_v19 = vmul.f32 %v6602_v41, %v6574_v4 }
0x2222   :  { %8147 = vmatprep.mubr.f32.mxu1 %v6606_v19 }
0x2223   :  { %8148 = vmatmul.mubr.f32.gmra.mrb[154].mxu1 %v6607_v47 }
0x22eb   :  { %v8146_v43 = vpop.f32.mrb[152].mxu1 }
0x22ec   :  { %v6705_v50 = vadd.f32 %v8146_v43, %v7183_v42  ;;  %v6699_v38 = vpop.f32.mrb[153].mxu1 }
0x22ed   :  { %v6700_v60 = vadd.f32 %v7183_v42, %v6699_v38 }
0x22ee   :  { %v6719_v24 = vadd.f32 %v6705_v50, %v14552_v49 }
0x22ef   :  { %v6718_v45 = vadd.f32 %v6700_v60, %v14553_v35 }
0x22f0   :  { %6723 = vst.msk [vmem:[#allocation2 + $0x8] sm:$0xff] %vm271_vm0, %v6719_v24 }
0x22f1   :  { %6722 = vst.msk [vmem:[#allocation2] sm:$0xff] %vm271_vm0, %v6718_v45 }
0x22f6   :  { %v8149_v16 = vpop.f32.mrb[154].mxu1 }
0x22f7   :  { %v6715_v54 = vadd.f32 %v8149_v16, %v7183_v42  ;;  %v6709_v5 = vpop.f32.mrb[155].mxu1 }
0x22f8   :  { %v6710_v33 = vadd.f32 %v7183_v42, %v6709_v5 }
0x22f9   :  { %v6721_v34 = vadd.f32 %v6715_v54, %v14555_v25 }
0x22fa   :  { %v6720_v2 = vadd.f32 %v6710_v33, %v14554_v17 }
0x22fb   :  { %6725 = vst.msk [vmem:[#allocation2 + $0x18] sm:$0xff] %vm271_vm0, %v6721_v34 }
0x22fc   :  { %6724 = vst.msk [vmem:[#allocation2 + $0x10] sm:$0xff] %vm271_vm0, %v6720_v2 }
0x22fd   :  { %9678 = shalt.err (!%p9675_p4)
}
0x22fe   :  { %s14556_s7 = sld [smem:[#allocation101_spill]] }
0x2304   :  { %s9679_s4 = scalar_lea.hbm %s14556_s7, 512 }
0x2305   :  { %p9680_p5 = scmp.ne.s32.totalorder %s14556_s7, %s9679_s4  ;;  %p9683_p6 = scmp.lt.u32.totalorder %s9679_s4, %s14556_s7 }
0x2307   :  { %p9685_p7 = pnand %p9683_p6, %p9680_p5 }
0x2309   :  { %9688 = shalt.err (!%p9685_p7)
}
0x230a   :  { %s9694_s11 = smov 128   ;;  %s9695_s8 = smov 8  }
0x230b   :  { %6737 = dma.vmem_to_hbm [thread:$0]  %s6732_s22, 512, %s14556_s7, [#allocation3], %s9694_s11, %s9694_s11, %s9695_s8  }
0x230c   :  { %9689 = dma.done.wait [#allocation3], 512  }
0x230d   :  { %9690 = vsyncadd [#allocation3], 4294966784 }
0x230e   :  { %6745 = vsyncpa [#allocation3], 1 }

</bundles_post_ra>
